<compile_context>
chip_gen: v7x
topology: tpu7x:2x2x1
jax: 0.10.0
libtpu: 0.0.40
codegen_flags: <defaults>
</compile_context>

<pallas_src>
import jax
import jax.numpy as jnp
from jax.experimental import pallas as pl
from jax.experimental.pallas import tpu as pltpu

IMG_SHAPE = (3, 32, 32)
Z_DIM = 128
H1, H2, H3 = 256, 512, 1024
OUT_DIM = IMG_SHAPE[0] * IMG_SHAPE[1] * IMG_SHAPE[2]  # 3072

_LAYER_DIMS = [(Z_DIM, H1), (H1, H2), (H2, H3), (H3, OUT_DIM)]
_MATMUL_MACS = sum(k * n for k, n in _LAYER_DIMS)  # per batch row


def _leaky_relu(x, slope=0.2):
    return jnp.where(x > 0, x, slope * x)


def generator_kernel(z_ref,
                     w1_ref, b1_ref,
                     w2_ref, b2_ref,
                     w3_ref, b3_ref,
                     w4_ref, b4_ref,
                     out_ref):
    """Whole 4-layer MLP for one batch tile.

    Matmuls: bf16 x bf16 on the MXU with f32 accumulation.
    Bias add + LeakyReLU: on the f32 accumulator (VPU), then cast to bf16 only
    for the next MXU input. Everything stays resident in VMEM.
    """
    x = z_ref[...].astype(jnp.bfloat16)                                   # (TB, 128)

    h = jnp.dot(x, w1_ref[...], preferred_element_type=jnp.float32) + b1_ref[...]
    h = _leaky_relu(h).astype(jnp.bfloat16)                               # (TB, 256)

    h = jnp.dot(h, w2_ref[...], preferred_element_type=jnp.float32) + b2_ref[...]
    h = _leaky_relu(h).astype(jnp.bfloat16)                               # (TB, 512)

    h = jnp.dot(h, w3_ref[...], preferred_element_type=jnp.float32) + b3_ref[...]
    h = _leaky_relu(h).astype(jnp.bfloat16)                               # (TB, 1024)

    h = jnp.dot(h, w4_ref[...], preferred_element_type=jnp.float32) + b4_ref[...]
    out_ref[...] = h.astype(out_ref.dtype)                                # (TB, 3072)


def _pick_batch_tile(B):
    """Prefer MXU-filling tiles (256 on v6e/v7x, 128 on v5e) while keeping at
    least 2 grid steps so v7x's two TensorCores both get work."""
    for t in (256, 128, 64, 32, 16, 8):
        if B % t == 0 and B // t >= 2:
            return t
    return B  # tiny batch: single grid step, block == full array (legal)


def generator_forward(z, params, *, batch_tile=None):
    """z: (B, 128) float32. Returns (B, 3, 32, 32) float32."""
    (w1, b1), (w2, b2), (w3, b3), (w4, b4) = params
    B = z.shape[0]
    if batch_tile is None:
        batch_tile = _pick_batch_tile(B)

    # Pad batch to a tile multiple if needed (sliced off at the end).
    pad = (-B) % batch_tile
    zp = jnp.pad(z, ((0, pad), (0, 0))) if pad else z
    Bp = B + pad
    grid = (Bp // batch_tile,)

    # Weights as bf16 (f32 accumulation in-kernel); biases stay f32 so the
    # bias-add happens on the f32 accumulator.
    bf16 = jnp.bfloat16
    weights = [w1.astype(bf16), w2.astype(bf16), w3.astype(bf16), w4.astype(bf16)]
    biases = [b1.astype(jnp.float32), b2.astype(jnp.float32),
              b3.astype(jnp.float32), b4.astype(jnp.float32)]

    # Weights/biases stay fully resident in VMEM (constant index_map); only
    # z / out are streamed over the batch grid.
    def full(shape):
        return pl.BlockSpec(shape, lambda i: (0,) * len(shape))

    weight_bytes = sum(int(w.size) * w.dtype.itemsize for w in weights)
    bias_bytes = sum(int(b.size) * b.dtype.itemsize for b in biases)
    cost = pl.CostEstimate(
        flops=2 * Bp * _MATMUL_MACS,
        transcendentals=0,
        bytes_accessed=weight_bytes + bias_bytes + Bp * Z_DIM * 4 + Bp * OUT_DIM * 4,
    )

    flat = pl.pallas_call(
        generator_kernel,
        out_shape=jax.ShapeDtypeStruct((Bp, OUT_DIM), jnp.float32),
        grid_spec=pltpu.PrefetchScalarGridSpec(
            num_scalar_prefetch=0,
            grid=grid,
            in_specs=[
                pl.BlockSpec((batch_tile, Z_DIM), lambda i: (i, 0)),
                full((Z_DIM, H1)), full((1, H1)),
                full((H1, H2)),    full((1, H2)),
                full((H2, H3)),    full((1, H3)),
                full((H3, OUT_DIM)), full((1, OUT_DIM)),
            ],
            out_specs=pl.BlockSpec((batch_tile, OUT_DIM), lambda i: (i, 0)),
        ),
        compiler_params=pltpu.CompilerParams(
            dimension_semantics=("parallel",),
            # Headroom under v7x's 64 MiB physical VMEM; bf16 weights
            # double-buffered (~15 MiB) + 256x3072 f32 output tiles fit easily.
            vmem_limit_bytes=48 << 20,
        ),
        cost_estimate=cost,
    )(zp, weights[0], biases[0], weights[1], biases[1],
      weights[2], biases[2], weights[3], biases[3])

    if pad:
        flat = flat[:B]
    # Equivalent of torch .view(-1, 3, 32, 32) on a row-major (B, 3072) tensor.
    return flat.reshape(B, *IMG_SHAPE)


def init_params(key):
    """Deterministic init mimicking nn.Linear's uniform(-1/sqrt(fan_in), 1/sqrt(fan_in)).
    Weights are stored as (in_features, out_features), f32 (cast to bf16 at call)."""
    params = []
    for (fan_in, fan_out) in _LAYER_DIMS:
        key, kw, kb = jax.random.split(key, 3)
        bound = 1.0 / jnp.sqrt(fan_in)
        w = jax.random.uniform(kw, (fan_in, fan_out), jnp.float32, -bound, bound)
        b = jax.random.uniform(kb, (1, fan_out), jnp.float32, -bound, bound)
        params.append((w, b))
    return params


def generator_reference(z, params):
    """Pure-JAX f32 reference for correctness checking."""
    x = z
    for i, (w, b) in enumerate(params):
        x = x @ w + b
        if i < len(params) - 1:
            x = jnp.where(x > 0, x, 0.2 * x)
    return x.reshape(-1, *IMG_SHAPE)


if __name__ == "__main__":
    key = jax.random.PRNGKey(0)
    k_params, k_z = jax.random.split(key)

    params = init_params(k_params)
    batch = 16  # small demo batch; tile auto-picks 8 -> 2 parallel grid steps
    z = jax.random.normal(k_z, (batch, Z_DIM), dtype=jnp.float32)

    out = generator_forward(z, params)
    out = jax.block_until_ready(out)

    ref = generator_reference(z, params)
    assert out.shape == (batch, 3, 32, 32), out.shape
    # bf16 weights/activations with f32 accumulation: expect ~1e-2-level deviation
    # from the pure-f32 reference, so use a relaxed (scale-aware) tolerance.
    max_err = float(jnp.max(jnp.abs(out - ref)))
    scale = float(jnp.max(jnp.abs(ref)))
    assert max_err <= 0.05 * scale + 0.05, (max_err, scale)

    print("KERNEL_OK")
</pallas_src>

<mosaic_0001>
module attributes {stable_mosaic.version = 11 : i64} {
  func.func @generator_kernel(%arg0: i32, %arg1: memref<8x128xf32, #tpu.memory_space<vmem>>, %arg2: memref<128x256xbf16, #tpu.memory_space<vmem>>, %arg3: memref<1x256xf32, #tpu.memory_space<vmem>>, %arg4: memref<256x512xbf16, #tpu.memory_space<vmem>>, %arg5: memref<1x512xf32, #tpu.memory_space<vmem>>, %arg6: memref<512x1024xbf16, #tpu.memory_space<vmem>>, %arg7: memref<1x1024xf32, #tpu.memory_space<vmem>>, %arg8: memref<1024x3072xbf16, #tpu.memory_space<vmem>>, %arg9: memref<1x3072xf32, #tpu.memory_space<vmem>>, %arg10: memref<8x3072xf32, #tpu.memory_space<vmem>>) attributes {dimension_semantics = [#tpu.dimension_semantics<parallel>], iteration_bounds = array<i64: 2>, scalar_prefetch = 0 : i64, scratch_operands = 0 : i64, tpu.core_type = #tpu.core_type<tc>, window_params = [{transform_indices = @transform_0, window_bounds = array<i64: 8, 128>}, {pipeline_mode = #tpu.pipeline_mode<synchronous>, transform_indices = @transform_1, window_bounds = array<i64: 128, 256>}, {pipeline_mode = #tpu.pipeline_mode<synchronous>, transform_indices = @transform_2, window_bounds = array<i64: 1, 256>}, {pipeline_mode = #tpu.pipeline_mode<synchronous>, transform_indices = @transform_3, window_bounds = array<i64: 256, 512>}, {pipeline_mode = #tpu.pipeline_mode<synchronous>, transform_indices = @transform_4, window_bounds = array<i64: 1, 512>}, {pipeline_mode = #tpu.pipeline_mode<synchronous>, transform_indices = @transform_5, window_bounds = array<i64: 512, 1024>}, {pipeline_mode = #tpu.pipeline_mode<synchronous>, transform_indices = @transform_6, window_bounds = array<i64: 1, 1024>}, {pipeline_mode = #tpu.pipeline_mode<synchronous>, transform_indices = @transform_7, window_bounds = array<i64: 1024, 3072>}, {pipeline_mode = #tpu.pipeline_mode<synchronous>, transform_indices = @transform_8, window_bounds = array<i64: 1, 3072>}, {transform_indices = @transform_9, window_bounds = array<i64: 8, 3072>}]} {
    %c0 = arith.constant 0 : index
    %c0_0 = arith.constant 0 : index
    %0 = vector.load %arg1[%c0, %c0_0] : memref<8x128xf32, #tpu.memory_space<vmem>>, vector<8x128xf32>
    %1 = arith.truncf %0 : vector<8x128xf32> to vector<8x128xbf16>
    %c0_1 = arith.constant 0 : index
    %c0_2 = arith.constant 0 : index
    %2 = vector.load %arg2[%c0_1, %c0_2] : memref<128x256xbf16, #tpu.memory_space<vmem>>, vector<128x256xbf16>
    %cst = arith.constant dense<0.000000e+00> : vector<8x256xf32>
    %3 = tpu.matmul %1, %2, %cst {dimension_numbers = #tpu.dot_dimension_numbers<[1], [0], [0], [1], [0, 0, 1, 1], [], []>} : vector<8x128xbf16>, vector<128x256xbf16>, vector<8x256xf32> -> vector<8x256xf32>
    %c0_3 = arith.constant 0 : index
    %c0_4 = arith.constant 0 : index
    %4 = vector.load %arg3[%c0_3, %c0_4] : memref<1x256xf32, #tpu.memory_space<vmem>>, vector<1x256xf32>
    %5 = vector.broadcast %4 : vector<1x256xf32> to vector<8x256xf32>
    %6 = arith.addf %3, %5 : vector<8x256xf32>
    %cst_5 = arith.constant 0.000000e+00 : f32
    %7 = vector.broadcast %cst_5 : f32 to vector<8x256xf32>
    %8 = arith.cmpf ogt, %6, %7 : vector<8x256xf32>
    %cst_6 = arith.constant 2.000000e-01 : f32
    %9 = vector.broadcast %cst_6 : f32 to vector<8x256xf32>
    %10 = arith.mulf %9, %6 : vector<8x256xf32>
    %11 = arith.select %8, %6, %10 : vector<8x256xi1>, vector<8x256xf32>
    %12 = arith.truncf %11 : vector<8x256xf32> to vector<8x256xbf16>
    %c0_7 = arith.constant 0 : index
    %c0_8 = arith.constant 0 : index
    %13 = vector.load %arg4[%c0_7, %c0_8] : memref<256x512xbf16, #tpu.memory_space<vmem>>, vector<256x512xbf16>
    %cst_9 = arith.constant dense<0.000000e+00> : vector<8x512xf32>
    %14 = tpu.matmul %12, %13, %cst_9 {dimension_numbers = #tpu.dot_dimension_numbers<[1], [0], [0], [1], [0, 0, 1, 1], [], []>} : vector<8x256xbf16>, vector<256x512xbf16>, vector<8x512xf32> -> vector<8x512xf32>
    %c0_10 = arith.constant 0 : index
    %c0_11 = arith.constant 0 : index
    %15 = vector.load %arg5[%c0_10, %c0_11] : memref<1x512xf32, #tpu.memory_space<vmem>>, vector<1x512xf32>
    %16 = vector.broadcast %15 : vector<1x512xf32> to vector<8x512xf32>
    %17 = arith.addf %14, %16 : vector<8x512xf32>
    %cst_12 = arith.constant 0.000000e+00 : f32
    %18 = vector.broadcast %cst_12 : f32 to vector<8x512xf32>
    %19 = arith.cmpf ogt, %17, %18 : vector<8x512xf32>
    %cst_13 = arith.constant 2.000000e-01 : f32
    %20 = vector.broadcast %cst_13 : f32 to vector<8x512xf32>
    %21 = arith.mulf %20, %17 : vector<8x512xf32>
    %22 = arith.select %19, %17, %21 : vector<8x512xi1>, vector<8x512xf32>
    %23 = arith.truncf %22 : vector<8x512xf32> to vector<8x512xbf16>
    %c0_14 = arith.constant 0 : index
    %c0_15 = arith.constant 0 : index
    %24 = vector.load %arg6[%c0_14, %c0_15] : memref<512x1024xbf16, #tpu.memory_space<vmem>>, vector<512x1024xbf16>
    %cst_16 = arith.constant dense<0.000000e+00> : vector<8x1024xf32>
    %25 = tpu.matmul %23, %24, %cst_16 {dimension_numbers = #tpu.dot_dimension_numbers<[1], [0], [0], [1], [0, 0, 1, 1], [], []>} : vector<8x512xbf16>, vector<512x1024xbf16>, vector<8x1024xf32> -> vector<8x1024xf32>
    %c0_17 = arith.constant 0 : index
    %c0_18 = arith.constant 0 : index
    %26 = vector.load %arg7[%c0_17, %c0_18] : memref<1x1024xf32, #tpu.memory_space<vmem>>, vector<1x1024xf32>
    %27 = vector.broadcast %26 : vector<1x1024xf32> to vector<8x1024xf32>
    %28 = arith.addf %25, %27 : vector<8x1024xf32>
    %cst_19 = arith.constant 0.000000e+00 : f32
    %29 = vector.broadcast %cst_19 : f32 to vector<8x1024xf32>
    %30 = arith.cmpf ogt, %28, %29 : vector<8x1024xf32>
    %cst_20 = arith.constant 2.000000e-01 : f32
    %31 = vector.broadcast %cst_20 : f32 to vector<8x1024xf32>
    %32 = arith.mulf %31, %28 : vector<8x1024xf32>
    %33 = arith.select %30, %28, %32 : vector<8x1024xi1>, vector<8x1024xf32>
    %34 = arith.truncf %33 : vector<8x1024xf32> to vector<8x1024xbf16>
    %c0_21 = arith.constant 0 : index
    %c0_22 = arith.constant 0 : index
    %35 = vector.load %arg8[%c0_21, %c0_22] : memref<1024x3072xbf16, #tpu.memory_space<vmem>>, vector<1024x3072xbf16>
    %cst_23 = arith.constant dense<0.000000e+00> : vector<8x3072xf32>
    %36 = tpu.matmul %34, %35, %cst_23 {dimension_numbers = #tpu.dot_dimension_numbers<[1], [0], [0], [1], [0, 0, 1, 1], [], []>} : vector<8x1024xbf16>, vector<1024x3072xbf16>, vector<8x3072xf32> -> vector<8x3072xf32>
    %c0_24 = arith.constant 0 : index
    %c0_25 = arith.constant 0 : index
    %37 = vector.load %arg9[%c0_24, %c0_25] : memref<1x3072xf32, #tpu.memory_space<vmem>>, vector<1x3072xf32>
    %38 = vector.broadcast %37 : vector<1x3072xf32> to vector<8x3072xf32>
    %39 = arith.addf %36, %38 : vector<8x3072xf32>
    %c0_26 = arith.constant 0 : index
    %c0_27 = arith.constant 0 : index
    %40 = vector.load %arg10[%c0_26, %c0_27] : memref<8x3072xf32, #tpu.memory_space<vmem>>, vector<8x3072xf32>
    tpu.vector_store %arg10[%c0_26, %c0_27], %39 {strides = array<i32>} : memref<8x3072xf32, #tpu.memory_space<vmem>>, vector<8x3072xf32>,
    return
  }
  func.func @transform_0(%arg0: i32) -> (i32, i32) {
    %c0_i32 = arith.constant 0 : i32
    %c0_i32_0 = arith.constant 0 : i32
    return %arg0, %c0_i32 : i32, i32
  }
  func.func @transform_1(%arg0: i32) -> (i32, i32) {
    %c0_i32 = arith.constant 0 : i32
    %c0_i32_0 = arith.constant 0 : i32
    %c0_i32_1 = arith.constant 0 : i32
    return %c0_i32, %c0_i32_0 : i32, i32
  }
  func.func @transform_2(%arg0: i32) -> (i32, i32) {
    %c0_i32 = arith.constant 0 : i32
    %c0_i32_0 = arith.constant 0 : i32
    %c0_i32_1 = arith.constant 0 : i32
    return %c0_i32, %c0_i32_0 : i32, i32
  }
  func.func @transform_3(%arg0: i32) -> (i32, i32) {
    %c0_i32 = arith.constant 0 : i32
    %c0_i32_0 = arith.constant 0 : i32
    %c0_i32_1 = arith.constant 0 : i32
    return %c0_i32, %c0_i32_0 : i32, i32
  }
  func.func @transform_4(%arg0: i32) -> (i32, i32) {
    %c0_i32 = arith.constant 0 : i32
    %c0_i32_0 = arith.constant 0 : i32
    %c0_i32_1 = arith.constant 0 : i32
    return %c0_i32, %c0_i32_0 : i32, i32
  }
  func.func @transform_5(%arg0: i32) -> (i32, i32) {
    %c0_i32 = arith.constant 0 : i32
    %c0_i32_0 = arith.constant 0 : i32
    %c0_i32_1 = arith.constant 0 : i32
    return %c0_i32, %c0_i32_0 : i32, i32
  }
  func.func @transform_6(%arg0: i32) -> (i32, i32) {
    %c0_i32 = arith.constant 0 : i32
    %c0_i32_0 = arith.constant 0 : i32
    %c0_i32_1 = arith.constant 0 : i32
    return %c0_i32, %c0_i32_0 : i32, i32
  }
  func.func @transform_7(%arg0: i32) -> (i32, i32) {
    %c0_i32 = arith.constant 0 : i32
    %c0_i32_0 = arith.constant 0 : i32
    %c0_i32_1 = arith.constant 0 : i32
    return %c0_i32, %c0_i32_0 : i32, i32
  }
  func.func @transform_8(%arg0: i32) -> (i32, i32) {
    %c0_i32 = arith.constant 0 : i32
    %c0_i32_0 = arith.constant 0 : i32
    %c0_i32_1 = arith.constant 0 : i32
    return %c0_i32, %c0_i32_0 : i32, i32
  }
  func.func @transform_9(%arg0: i32) -> (i32, i32) {
    %c0_i32 = arith.constant 0 : i32
    %c0_i32_0 = arith.constant 0 : i32
    return %arg0, %c0_i32 : i32, i32
  }
}

</mosaic_0001>

<bundles_post_ra>
// kernel: tpu_custom_call.1
= control target key start
LH: loop header
LB: loop body
LE: loop exit
PB: predicated region body
PF: predicated region fallthrough
CT: control target
= control target key end

     0   :  { %s17948_s0 = inlined_call_operand.hbm [shape: f32[16,128], index: 0, kind: input, shape index: {}]   ;;  %s17949_s1 = inlined_call_operand.hbm [shape: bf16[128,256], index: 1, kind: input, shape index: {}]   ;;  %s17950_s2 = inlined_call_operand.hbm [shape: f32[1,256], index: 2, kind: input, shape index: {}]   ;;  %s17951_s3 = inlined_call_operand.hbm [shape: bf16[256,512], index: 3, kind: input, shape index: {}]   ;;  %s17952_s4 = inlined_call_operand.hbm [shape: f32[1,512], index: 4, kind: input, shape index: {}]   ;;  %s17953_s5 = inlined_call_operand.hbm [shape: bf16[512,1024], index: 5, kind: input, shape index: {}]   ;;  %s17954_s6 = inlined_call_operand.hbm [shape: f32[1,1024], index: 6, kind: input, shape index: {}]   ;;  %s17955_s7 = inlined_call_operand.hbm [shape: bf16[1024,3072], index: 7, kind: input, shape index: {}]   ;;  %s17956_s8 = inlined_call_operand.hbm [shape: f32[1,3072], index: 8, kind: input, shape index: {}]   ;;  %s17957_s9 = inlined_call_operand.hbm [shape: f32[16,3072], index: 9, kind: output, shape index: {}]  }
   0x1   :  { %17962 = sst [smem:[#allocation24_spill]] %s17949_s1 }
   0x2   :  { %17963 = sst [smem:[#allocation25_spill]] %s17957_s9 }
   0x3   :  { %14 = vsyncpa [#allocation3], 0 }
   0x4   :  { %16 = vsyncpa [#allocation3 + $0x1], 0 }
   0x5   :  { %17 = vsyncpa [#allocation6], 0 }
   0x6   :  { %18 = vsyncpa [#allocation9], 0 }
   0x7   :  { %19 = vsyncpa [#allocation12], 0 }
   0x8   :  { %20 = vsyncpa [#allocation15], 0 }
   0x9   :  { %21 = vsyncpa [#allocation4], 0 }
   0xa   :  { %23 = vsyncpa [#allocation4 + $0x1], 0  ;;  %s17311_s30 = smov 0   ;;  %s17313_s10 = smov 0  }
   0xb   :  { %s17315_s11 = smov 0   ;;  %s17317_s12 = smov 0  }
   0xc LB: > { %s17242_s13 = smov [#allocation5]   ;;  %s17332_s15 = sadd.s32 4294967295, %s17240_s12   ;;  %s17240_s12 = sphi %s17317_s12, %s17990_s12   ;;  %s17236_s11 = sphi %s17315_s11, %s17989_s11   ;;  %s17232_s10 = sphi %s17313_s10, %s17988_s10   ;;  %s17228_s30 = sphi %s17311_s30, %s17987_s30  }
   0xd   : > { %s266_s14 = sshll.u32 %s17242_s13, 4  ;;  %p14554_p0 = scmp.ge.s32.totalorder %s17240_s12, 1  ;;  %s17337_s14 = int_to_ptr.vmem [resolvable:$true] %s266_s14 }
   0xe   : > { %p17959_p1 = scmp.eq.s32.totalorder %s17332_s15, 0  ;;  %p254_p2 = scmp.lt.s32.totalorder %s17240_s12, 3 }
   0xf   : > { %s17243_s17 = smov [#allocation8]   ;;  %s17244_s20 = smov [#allocation11]  }
  0x10   : > { %p17339_p3 = pnand %p14554_p0, %p254_p2  ;;  %s290_s18 = sshll.u32 %s17243_s17, 4  ;;  %s17352_s18 = int_to_ptr.vmem [resolvable:$true] %s290_s18 }
  0x11   : > { %s17354_s21 = sshll.u32 %s17244_s20, 4  ;;  %s17966_s1 = sld [smem:[#allocation24_spill]]  ;;  %s315_s21 = int_to_ptr.vmem [resolvable:$true] %s17354_s21 }
  0x12   : > { %s17964_s16 = scalar_select %p17339_p3, 1, 0 }
  0x13   : > { %p16681_p5 = pneg %p17339_p3 }
  0x15   : > { %p17348_p6 = pnand %p16681_p5, %p17959_p1 }
  0x17   : > { %s16904_s24 = scalar_lea.hbm %s17966_s1, 2048  ;;  %p17364_p8 = pneg %p17348_p6 }
  0x18   : > { %p16905_p7 = scmp.ne.s32.totalorder %s17966_s1, %s16904_s24  ;;  %p16911_p11 = scmp.lt.u32.totalorder %s16904_s24, %s17966_s1 }
  0x1a   : > { %p16907_p9 = pnand %p17364_p8, %p16905_p7 }
  0x1c   : > { %p16908_p10 = pneg %p16907_p9 }
  0x1e   : > { %p16913_p12 = pnand %p16911_p11, %p16908_p10 }
  0x20   : > { %16916 = shalt.err (!%p16913_p12)
}
  0x21   : > { %s16917_s13 = scalar_lea.vmem %s17337_s14, 2048  ;;  %p16925_p5 = scmp.lt.s32.totalorder %s17337_s14, %s17337_s14 }
  0x22   : > { %p16918_p13 = scmp.ne.s32.totalorder %s17337_s14, %s16917_s13  ;;  %p16926_p4 = scmp.lt.s32.totalorder %s16917_s13, %s16917_s13 }
  0x24   : > { %p16920_p0 = pnand %p16918_p13, %p17364_p8  ;;  %p16927_p7 = por %p16926_p4, %p16925_p5 }
  0x26   : > { %p16921_p2 = pneg %p16920_p0 }
  0x28   : > { %p16928_p9 = pnand %p16927_p7, %p16921_p2 }
  0x2a   : > { %16931 = shalt.err (!%p16928_p9)
}
  0x2b   : > { %s17245_s17 = smov 128   ;;  %s17246_s20 = smov 8  }
  0x2c   : > { %16684 = dma.hbm_to_vmem [thread:$0]  (!%p17348_p6), %s17966_s1, 2048, %s17337_s14, [#allocation6], %s17245_s17, %s17245_s17, %s17246_s20  }
  0x2d   : > { %s16932_s26 = scalar_lea.hbm %s17951_s3, 8192 }
  0x2e   : > { %p16933_p4 = scmp.ne.s32.totalorder %s17951_s3, %s16932_s26  ;;  %p16939_p12 = scmp.lt.u32.totalorder %s16932_s26, %s17951_s3 }
  0x30   : > { %p16935_p10 = pnand %p16933_p4, %p17364_p8 }
  0x32   : > { %p16936_p11 = pneg %p16935_p10 }
  0x34   : > { %p16941_p13 = pnand %p16939_p12, %p16936_p11 }
  0x36   : > { %16944 = shalt.err (!%p16941_p13)
}
  0x37   : > { %s16945_s14 = scalar_lea.vmem %s17352_s18, 8192  ;;  %p16953_p7 = scmp.lt.s32.totalorder %s17352_s18, %s17352_s18 }
  0x38   : > { %p16946_p0 = scmp.ne.s32.totalorder %s17352_s18, %s16945_s14  ;;  %p16954_p9 = scmp.lt.s32.totalorder %s16945_s14, %s16945_s14 }
  0x3a   : > { %p16948_p2 = pnand %p16946_p0, %p17364_p8  ;;  %p16955_p4 = por %p16954_p9, %p16953_p7 }
  0x3c   : > { %p16949_p5 = pneg %p16948_p2 }
  0x3e   : > { %p16956_p10 = pnand %p16955_p4, %p16949_p5 }
  0x40   : > { %16959 = shalt.err (!%p16956_p10)
}
  0x41   : > { %s17247_s17 = smov 256   ;;  %s17248_s9 = smov 16  }
  0x42   : > { %16690 = dma.hbm_to_vmem [thread:$0]  (!%p17348_p6), %s17951_s3, 8192, %s17352_s18, [#allocation9], %s17247_s17, %s17247_s17, %s17248_s9  }
  0x43   : > { %s16960_s25 = scalar_lea.hbm %s17953_s5, 32768 }
  0x44   : > { %p16961_p11 = scmp.ne.s32.totalorder %s17953_s5, %s16960_s25  ;;  %p16967_p0 = scmp.lt.u32.totalorder %s16960_s25, %s17953_s5 }
  0x46   : > { %p16963_p12 = pnand %p16961_p11, %p17364_p8 }
  0x48   : > { %p16964_p13 = pneg %p16963_p12 }
  0x4a   : > { %p16969_p2 = pnand %p16967_p0, %p16964_p13 }
  0x4c   : > { %16972 = shalt.err (!%p16969_p2)
}
  0x4d   : > { %s16973_s14 = scalar_lea.vmem %s315_s21, 32768  ;;  %p16981_p4 = scmp.lt.s32.totalorder %s315_s21, %s315_s21 }
  0x4e   : > { %p16974_p5 = scmp.ne.s32.totalorder %s315_s21, %s16973_s14  ;;  %p16982_p10 = scmp.lt.s32.totalorder %s16973_s14, %s16973_s14 }
  0x50   : > { %p16976_p7 = pnand %p16974_p5, %p17364_p8  ;;  %p16983_p1 = por %p16982_p10, %p16981_p4 }
  0x52   : > { %p16977_p9 = pneg %p16976_p7 }
  0x54   : > { %p16984_p3 = pnand %p16983_p1, %p16977_p9 }
  0x56   : > { %16987 = shalt.err (!%p16984_p3)
}
  0x57   : > { %s17249_s18 = smov 512   ;;  %s17250_s17 = smov 32  }
  0x58   : > { %16696 = dma.hbm_to_vmem [thread:$0]  (!%p17348_p6), %s17953_s5, 32768, %s315_s21, [#allocation12], %s17249_s18, %s17249_s18, %s17250_s17  }
  0x59   : > { %s17251_s22 = smov [#allocation14]   ;;  %s16988_s26 = scalar_lea.hbm %s17955_s7, 196608 }
  0x5a   : > { %s338_s23 = sshll.u32 %s17251_s22, 4  ;;  %p16989_p1 = scmp.ne.s32.totalorder %s17955_s7, %s16988_s26  ;;  %s339_s23 = int_to_ptr.vmem [resolvable:$true] %s338_s23 }
  0x5b   : > { %p16995_p12 = scmp.lt.u32.totalorder %s16988_s26, %s17955_s7 }
  0x5c   : > { %p16991_p3 = pnand %p16989_p1, %p17364_p8 }
  0x5e   : > { %p16992_p11 = pneg %p16991_p3 }
  0x60   : > { %p16997_p13 = pnand %p16995_p12, %p16992_p11 }
  0x62   : > { %17000 = shalt.err (!%p16997_p13)
}
  0x63   : > { %s17001_s21 = scalar_lea.vmem %s339_s23, 196608  ;;  %p17009_p7 = scmp.lt.s32.totalorder %s339_s23, %s339_s23 }
  0x64   : > { %p17002_p0 = scmp.ne.s32.totalorder %s339_s23, %s17001_s21  ;;  %p17010_p9 = scmp.lt.s32.totalorder %s17001_s21, %s17001_s21 }
  0x66   : > { %p17004_p2 = pnand %p17002_p0, %p17364_p8  ;;  %p17011_p4 = por %p17010_p9, %p17009_p7 }
  0x68   : > { %p17005_p5 = pneg %p17004_p2 }
  0x6a   : > { %p17012_p10 = pnand %p17011_p4, %p17005_p5 }
  0x6c   : > { %17015 = shalt.err (!%p17012_p10)
}
  0x6d   : > { %s17252_s18 = smov 1536   ;;  %s17253_s17 = smov 96  }
  0x6e   : > { %16702 = dma.hbm_to_vmem [thread:$0]  (!%p17348_p6), %s17955_s7, 196608, %s339_s23, [#allocation15], %s17252_s18, %s17252_s18, %s17253_s17  }
  0x6f   : > { %s17254_s22 = smov [#allocation7]   ;;  %s17255_s25 = smov [#allocation10]  }
  0x70   : > { %s280_s24 = sshll.u32 %s17254_s22, 4  ;;  %s304_s26 = sshll.u32 %s17255_s25, 4  ;;  %s281_s24 = int_to_ptr.vmem [resolvable:$true] %s280_s24  ;;  %s17445_s26 = int_to_ptr.vmem [resolvable:$true] %s304_s26 }
  0x71   : > { %s17016_s13 = scalar_lea.hbm %s17950_s2, 32 }
  0x72   : > { %p17017_p1 = scmp.ne.s32.totalorder %s17950_s2, %s17016_s13  ;;  %p17023_p12 = scmp.lt.u32.totalorder %s17016_s13, %s17950_s2 }
  0x74   : > { %p17019_p3 = pnand %p17017_p1, %p17364_p8 }
  0x76   : > { %p17020_p11 = pneg %p17019_p3 }
  0x78   : > { %p17025_p13 = pnand %p17023_p12, %p17020_p11 }
  0x7a   : > { %17028 = shalt.err (!%p17025_p13)
}
  0x7b   : > { %s17029_s18 = scalar_lea.vmem %s281_s24, 32  ;;  %p17037_p7 = scmp.lt.s32.totalorder %s281_s24, %s281_s24 }
  0x7c   : > { %p17030_p0 = scmp.ne.s32.totalorder %s281_s24, %s17029_s18  ;;  %p17038_p9 = scmp.lt.s32.totalorder %s17029_s18, %s17029_s18 }
  0x7e   : > { %p17032_p2 = pnand %p17030_p0, %p17364_p8  ;;  %p17039_p4 = por %p17038_p9, %p17037_p7 }
  0x80   : > { %p17033_p5 = pneg %p17032_p2 }
  0x82   : > { %p17040_p10 = pnand %p17039_p4, %p17033_p5 }
  0x84   : > { %17043 = shalt.err (!%p17040_p10)
}
  0x85   : > { %16687 = dma.hbm_to_vmem [thread:$0]  (!%p17348_p6), %s17950_s2, 32, %s281_s24, [#allocation6]  }
  0x86   : > { %s17044_s28 = scalar_lea.hbm %s17952_s4, 64 }
  0x87   : > { %p17045_p1 = scmp.ne.s32.totalorder %s17952_s4, %s17044_s28  ;;  %p17051_p12 = scmp.lt.u32.totalorder %s17044_s28, %s17952_s4 }
  0x89   : > { %p17047_p3 = pnand %p17045_p1, %p17364_p8 }
  0x8b   : > { %p17048_p11 = pneg %p17047_p3 }
  0x8d   : > { %p17053_p13 = pnand %p17051_p12, %p17048_p11 }
  0x8f   : > { %17056 = shalt.err (!%p17053_p13)
}
  0x90   : > { %s17057_s24 = scalar_lea.vmem %s17445_s26, 64  ;;  %p17065_p7 = scmp.lt.s32.totalorder %s17445_s26, %s17445_s26 }
  0x91   : > { %p17058_p0 = scmp.ne.s32.totalorder %s17445_s26, %s17057_s24  ;;  %p17066_p9 = scmp.lt.s32.totalorder %s17057_s24, %s17057_s24 }
  0x93   : > { %p17060_p2 = pnand %p17058_p0, %p17364_p8  ;;  %p17067_p4 = por %p17066_p9, %p17065_p7 }
  0x95   : > { %p17061_p5 = pneg %p17060_p2 }
  0x97   : > { %p17068_p10 = pnand %p17067_p4, %p17061_p5 }
  0x99   : > { %17071 = shalt.err (!%p17068_p10)
}
  0x9a   : > { %16693 = dma.hbm_to_vmem [thread:$0]  (!%p17348_p6), %s17952_s4, 64, %s17445_s26, [#allocation9]  }
  0x9b   : > { %s17256_s18 = smov [#allocation13]   ;;  %s17257_s20 = smov [#allocation16]  }
  0x9c   : > { %s328_s17 = sshll.u32 %s17256_s18, 4  ;;  %s352_s22 = sshll.u32 %s17257_s20, 4  ;;  %s329_s17 = int_to_ptr.vmem [resolvable:$true] %s328_s17  ;;  %s17488_s22 = int_to_ptr.vmem [resolvable:$true] %s352_s22 }
  0x9d   : > { %s17072_s29 = scalar_lea.hbm %s17954_s6, 128 }
  0x9e   : > { %p17073_p1 = scmp.ne.s32.totalorder %s17954_s6, %s17072_s29  ;;  %p17079_p12 = scmp.lt.u32.totalorder %s17072_s29, %s17954_s6 }
  0xa0   : > { %p17075_p3 = pnand %p17073_p1, %p17364_p8 }
  0xa2   : > { %p17076_p11 = pneg %p17075_p3 }
  0xa4   : > { %p17081_p13 = pnand %p17079_p12, %p17076_p11 }
  0xa6   : > { %17084 = shalt.err (!%p17081_p13)
}
  0xa7   : > { %s17085_s24 = scalar_lea.vmem %s329_s17, 128  ;;  %p17093_p7 = scmp.lt.s32.totalorder %s329_s17, %s329_s17 }
  0xa8   : > { %p17086_p0 = scmp.ne.s32.totalorder %s329_s17, %s17085_s24  ;;  %p17094_p9 = scmp.lt.s32.totalorder %s17085_s24, %s17085_s24 }
  0xaa   : > { %p17088_p2 = pnand %p17086_p0, %p17364_p8  ;;  %p17095_p4 = por %p17094_p9, %p17093_p7 }
  0xac   : > { %p17089_p5 = pneg %p17088_p2 }
  0xae   : > { %p17096_p10 = pnand %p17095_p4, %p17089_p5 }
  0xb0   : > { %17099 = shalt.err (!%p17096_p10)
}
  0xb1   : > { %16699 = dma.hbm_to_vmem [thread:$0]  (!%p17348_p6), %s17954_s6, 128, %s329_s17, [#allocation12]  }
  0xb2   : > { %s17100_s25 = scalar_lea.hbm %s17956_s8, 384 }
  0xb3   : > { %p17101_p1 = scmp.ne.s32.totalorder %s17956_s8, %s17100_s25  ;;  %p17107_p12 = scmp.lt.u32.totalorder %s17100_s25, %s17956_s8 }
  0xb5   : > { %p17103_p3 = pnand %p17101_p1, %p17364_p8 }
  0xb7   : > { %p17104_p11 = pneg %p17103_p3 }
  0xb9   : > { %p17109_p13 = pnand %p17107_p12, %p17104_p11 }
  0xbb   : > { %17112 = shalt.err (!%p17109_p13)
}
  0xbc   : > { %s17113_s17 = scalar_lea.vmem %s17488_s22, 384  ;;  %p17121_p7 = scmp.lt.s32.totalorder %s17488_s22, %s17488_s22 }
  0xbd   : > { %p17114_p0 = scmp.ne.s32.totalorder %s17488_s22, %s17113_s17  ;;  %p17122_p9 = scmp.lt.s32.totalorder %s17113_s17, %s17113_s17 }
  0xbf   : > { %p17116_p2 = pnand %p17114_p0, %p17364_p8  ;;  %p17123_p4 = por %p17122_p9, %p17121_p7 }
  0xc1   : > { %p17117_p5 = pneg %p17116_p2 }
  0xc3   : > { %p17124_p10 = pnand %p17123_p4, %p17117_p5 }
  0xc5   : > { %17127 = shalt.err (!%p17124_p10)
}
  0xc6   : > { %16705 = dma.hbm_to_vmem [thread:$0]  (!%p17348_p6), %s17956_s8, 384, %s17488_s22, [#allocation15]  }
  0xc7   : > { %s14553_s19 = sadd.s32 4294967294, %s17240_s12   ;;  %s17533_s27 = sadd.s32 1, %s17240_s12  }
  0xc8   : > { %s33_s24 = ssub.s32 %s17240_s12, %s17533_s27  ;;  %s36_s9 = sadd.s32 1, %s17236_s11 }
  0xc9   : > { %p34_p8 = scmp.eq.s32.totalorder %s33_s24, 0  ;;  %p43_p1 = scmp.ne.s32.totalorder %s17236_s11, %s17232_s10 }
  0xca   : > { %p44_p3 = scmp.eq.s32.totalorder %s17240_s12, 0  ;;  %p49_p11 = scmp.ne.s32.totalorder %s17232_s10, %s17228_s30 }
  0xcb   : > { %s17544_s23 = scalar_select %p34_p8, %s17236_s11, %s36_s9  }
  0xcc   : > { %p17546_p12 = por %p44_p3, %p43_p1  ;;  %p17969_p13 = scmp.eq.s32.totalorder %s17332_s15, 0 }
  0xcd   : > { %p241_p0 = scmp.eq.s32.totalorder %s17332_s15, 1  ;;  %p247_p2 = scmp.eq.s32.totalorder %s14553_s19, 1 }
  0xce   : > { %p17552_p6 = por %p17969_p13, %p49_p11  ;;  %p16722_p5 = scmp.lt.s32.totalorder %s17240_s12, 2 }
  0xcf   : > { %s363_s20 = sand.u32 1, %s17236_s11   ;;  %p17559_p7 = por %p241_p0, %p43_p1 }
  0xd0   : > { %p17563_p9 = por %p247_p2, %p49_p11  ;;  %s14564_s29 = sshll.u32 %s363_s20, 3 }
  0xd1   : > { %s17971_s25 = scalar_select %p17559_p7, 1, 0 }
  0xd2   : > { %s17972_s28 = scalar_select %p17563_p9, 1, 0 }
  0xd3   : > { %s14565_s13 = sshll.u32 %s17240_s12, 7  ;;  %s367_s26 = scalar_lea.vmem [#allocation2], %s14564_s29 }
  0xd4   : > { %s17571_s21 = scalar_lea.hbm %s17948_s0, %s14565_s13  ;;  %s374_s19 = sshll.u32 %s367_s26, 4  ;;  %s17573_s19 = int_to_ptr.vmem [resolvable:$true] %s374_s19 }
  0xd5   : > { %p17577_p4 = pnand %p16722_p5, %p17546_p12  ;;  %s364_s9 = scalar_lea.sflag [#allocation3], %s363_s20 }
  0xd6   : > { %s17128_s1 = scalar_lea.hbm %s17571_s21, 128  ;;  %s17133_s14 = scalar_lea.hbm %s17948_s0, 256 }
  0xd7   : > { %p17129_p10 = scmp.ne.s32.totalorder %s17571_s21, %s17128_s1  ;;  %p17130_p8 = pneg %p17577_p4 }
  0xd8   : > { %p17134_p11 = scmp.lt.u32.totalorder %s17571_s21, %s17948_s0  ;;  %p17135_p12 = scmp.lt.u32.totalorder %s17133_s14, %s17128_s1 }
  0xd9   : > { %p17131_p1 = pnand %p17130_p8, %p17129_p10  ;;  %p17137_p0 = scmp.lt.u32.totalorder %s17128_s1, %s17571_s21 }
  0xda   : > { %p17136_p13 = por %p17135_p12, %p17134_p11 }
  0xdb   : > { %p17132_p3 = pneg %p17131_p1 }
  0xdc   : > { %p17138_p2 = por %p17137_p0, %p17136_p13 }
  0xde   : > { %p17139_p5 = pnand %p17138_p2, %p17132_p3 }
  0xe0   : > { %17142 = shalt.err (!%p17139_p5)
}
  0xe1   : > { %s17143_s20 = scalar_lea.vmem %s17573_s19, 128  ;;  %s17258_s26 = smov [#allocation2]  }
  0xe2   : > { %p17144_p10 = scmp.ne.s32.totalorder %s17573_s19, %s17143_s20  ;;  %s17148_s29 = sshll.u32 %s17258_s26, 4  ;;  %s17149_s29 = int_to_ptr.vmem [resolvable:$false] %s17148_s29 }
  0xe3   : > { %s17150_s13 = scalar_lea.vmem %s17149_s29, 256  ;;  %p17151_p7 = scmp.lt.s32.totalorder %s17573_s19, %s17149_s29 }
  0xe4   : > { %p17146_p1 = pnand %p17144_p10, %p17130_p8  ;;  %p17152_p11 = scmp.lt.s32.totalorder %s17150_s13, %s17143_s20 }
  0xe6   : > { %p17147_p9 = pneg %p17146_p1  ;;  %p17153_p12 = por %p17152_p11, %p17151_p7 }
  0xe8   : > { %p17154_p13 = pnand %p17153_p12, %p17147_p9 }
  0xea   : > { %17157 = shalt.err (!%p17154_p13)
}
  0xeb   : > { %16709 = dma.hbm_to_vmem [thread:$0]  (!%p17577_p4), %s17571_s21, 128, %s17573_s19, %s364_s9  }
  0xec   : > { %p17974_p3 = scmp.ne.s32.totalorder %s17964_s16, 0 }
  0xed   : > { %s17609_s1 = sand.u32 (!%p17974_p3), 1, %s17232_s10  }
  0xee   : > { %383 = sbr.rel (%p17974_p3) target bundleno = 2720 (0xaa0), region = 56  ;;  %s14567_s14 = sshll.u32 (!%p17974_p3), %s17609_s1, 3 }
  0xef   : > { %s386_s18 = scalar_lea.sflag (!%p17974_p3), [#allocation3], %s17609_s1  ;;  %s17613_s17 = scalar_lea.vmem (!%p17974_p3), [#allocation2], %s14567_s14 }
  0xf5   : > { %17203 = dma.done.wait (%p17552_p6), %s386_s18, 128  }
  0xf6   : > { %17205 = vsyncadd (%p17552_p6), %s386_s18, 4294967168  ;;  %p17975_p7 = scmp.eq.s32.totalorder %s17332_s15, 0 }
  0xf8   : > { %17207 = dma.done.wait (%p17975_p7), [#allocation6], 2080   ;;  %p17976_p9 = pmov %p17975_p7 }
  0xf9   : > { %p17977_p4 = pmov %p17975_p7 }
  0xfa   : > { %17209 = vsyncadd (%p17976_p9), [#allocation6], 4294965216 }
  0xfb   : > { %17211 = dma.done.wait (%p17977_p4), [#allocation9], 8256   ;;  %p17978_p8 = pmov %p17977_p4 }
  0xfc   : > { %p17979_p0 = pmov %p17977_p4 }
  0xfd   : > { %17213 = vsyncadd (%p17978_p8), [#allocation9], 4294959040 }
  0xfe   : > { %17215 = dma.done.wait (%p17979_p0), [#allocation12], 32896   ;;  %p17980_p2 = pmov %p17979_p0 }
  0xff   : > { %p17981_p6 = pmov %p17979_p0 }
 0x100   : > { %17217 = vsyncadd (%p17980_p2), [#allocation12], 4294934400 }
 0x101   : > { %17219 = dma.done.wait (%p17981_p6), [#allocation15], 196992   ;;  %p17982_p5 = pmov %p17979_p0 }
 0x102   : > { %v17259_v0 = vmov 0   ;;  %v16781_v1 = vld [vmem:[#allocation5 + $0x4] ss:$8 sps:$4 sm:$0xff]   ;;  %v16783_v2 = vld [vmem:[#allocation5] ss:$8 sps:$4 sm:$0xff]   ;;  %v457_v26 = vld [vmem:[%s17613_s17] sm:$0xff] }
 0x103   : > { %17221 = vsyncadd (%p17982_p5), [#allocation15], 4294770304  ;;  %599 = vmatprep.mubr.bf16.mxu0 %v17259_v0  ;;  %567 = vmatprep.subr.bf16.mxu0 %v16781_v1  ;;  %v16784_v3 = vld [vmem:[#allocation5 + $0x14] ss:$8 sps:$4 sm:$0xff]   ;;  %v16786_v4 = vld [vmem:[#allocation5 + $0x10] ss:$8 sps:$4 sm:$0xff]   ;;  %v458_v30 = vpack.c.bf16 %v457_v26, %v457_v26 }
 0x104   : > { %568 = vmatpush1.bf16.msra.mxu0 %v16783_v2  ;;  %v16787_v5 = vld [vmem:[#allocation5 + $0x24] ss:$8 sps:$4 sm:$0xff]   ;;  %v16789_v6 = vld [vmem:[#allocation5 + $0x20] ss:$8 sps:$4 sm:$0xff]   ;;  %v16790_v7 = vld [vmem:[#allocation5 + $0x34] ss:$8 sps:$4 sm:$0xff]  }
 0x105   : > { %569 = vmatprep.subr.bf16.mxu0 %v16784_v3  ;;  %v16792_v8 = vld [vmem:[#allocation5 + $0x30] ss:$8 sps:$4 sm:$0xff]   ;;  %v16793_v10 = vld [vmem:[#allocation5 + $0x44] ss:$8 sps:$4 sm:$0xff]   ;;  %v16795_v13 = vld [vmem:[#allocation5 + $0x40] ss:$8 sps:$4 sm:$0xff]  }
 0x106   : > { %v16805_v9 = vld [vmem:[#allocation8 + $0x4] ss:$16 sps:$4 sm:$0xff]   ;;  %v16810_v11 = vld [vmem:[#allocation8] ss:$16 sps:$4 sm:$0xff]   ;;  %v16809_v27 = vld [vmem:[#allocation8 + $0xc] ss:$16 sps:$4 sm:$0xff]  }
 0x107   : > { %1022 = vmatprep.subr.bf16.mxu1 %v16805_v9  ;;  %v16811_v12 = vld [vmem:[#allocation8 + $0x24] ss:$16 sps:$4 sm:$0xff]   ;;  %v16816_v15 = vld [vmem:[#allocation8 + $0x20] ss:$16 sps:$4 sm:$0xff]   ;;  %v16807_v31 = vld [vmem:[#allocation8 + $0x8] ss:$16 sps:$4 sm:$0xff]  }
 0x108   : > { %570 = vmatpush1.bf16.msra.mxu0 %v16786_v4  ;;  %v16796_v14 = vld [vmem:[#allocation5 + $0x54] ss:$8 sps:$4 sm:$0xff]   ;;  %1023 = vmatpush1.bf16.msra.mxu1 %v16810_v11  ;;  %v16798_v17 = vld [vmem:[#allocation5 + $0x50] ss:$8 sps:$4 sm:$0xff]   ;;  %v16799_v18 = vld [vmem:[#allocation5 + $0x64] ss:$8 sps:$4 sm:$0xff]  }
 0x109   : > { %571 = vmatprep.subr.bf16.mxu0 %v16787_v5  ;;  %1024 = vmatprep.subr.bf16.mxu1 %v16811_v12  ;;  %v16817_v16 = vld [vmem:[#allocation8 + $0x44] ss:$16 sps:$4 sm:$0xff]   ;;  %v16822_v19 = vld [vmem:[#allocation8 + $0x40] ss:$16 sps:$4 sm:$0xff]   ;;  %v16815_v32 = vld [vmem:[#allocation8 + $0x2c] ss:$16 sps:$4 sm:$0xff]  }
 0x10a   : > { %v16823_v20 = vld [vmem:[#allocation8 + $0x64] ss:$16 sps:$4 sm:$0xff]   ;;  %v16828_v23 = vld [vmem:[#allocation8 + $0x60] ss:$16 sps:$4 sm:$0xff]   ;;  %v16813_v35 = vld [vmem:[#allocation8 + $0x28] ss:$16 sps:$4 sm:$0xff]  }
 0x10b   : > { %v16801_v21 = vld [vmem:[#allocation5 + $0x60] ss:$8 sps:$4 sm:$0xff]   ;;  %v16802_v22 = vld [vmem:[#allocation5 + $0x74] ss:$8 sps:$4 sm:$0xff]   ;;  %v16804_v25 = vld [vmem:[#allocation5 + $0x70] ss:$8 sps:$4 sm:$0xff]  }
 0x10c   : > { %572 = vmatpush1.bf16.msra.mxu0 %v16789_v6  ;;  %1025 = vmatpush1.bf16.msra.mxu1 %v16816_v15  ;;  %v16829_v24 = vld [vmem:[#allocation8 + $0x84] ss:$16 sps:$4 sm:$0xff]   ;;  %v16834_v28 = vld [vmem:[#allocation8 + $0x80] ss:$16 sps:$4 sm:$0xff]   ;;  %v16821_v36 = vld [vmem:[#allocation8 + $0x4c] ss:$16 sps:$4 sm:$0xff]  }
 0x10d   : > { %573 = vmatprep.subr.bf16.mxu0 %v16790_v7  ;;  %1026 = vmatprep.subr.bf16.mxu1 %v16817_v16  ;;  %v16835_v29 = vld [vmem:[#allocation8 + $0xa4] ss:$16 sps:$4 sm:$0xff]   ;;  %v16840_v33 = vld [vmem:[#allocation8 + $0xa0] ss:$16 sps:$4 sm:$0xff]   ;;  %v16819_v39 = vld [vmem:[#allocation8 + $0x48] ss:$16 sps:$4 sm:$0xff]  }
 0x10e   : > { %v16841_v34 = vld [vmem:[#allocation8 + $0xc4] ss:$16 sps:$4 sm:$0xff]   ;;  %v16846_v37 = vld [vmem:[#allocation8 + $0xc0] ss:$16 sps:$4 sm:$0xff]   ;;  %v16827_v40 = vld [vmem:[#allocation8 + $0x6c] ss:$16 sps:$4 sm:$0xff]  }
 0x10f   : > { %v16847_v38 = vld [vmem:[#allocation8 + $0xe4] ss:$16 sps:$4 sm:$0xff]   ;;  %v16852_v41 = vld [vmem:[#allocation8 + $0xe0] ss:$16 sps:$4 sm:$0xff]   ;;  %v16825_v43 = vld [vmem:[#allocation8 + $0x68] ss:$16 sps:$4 sm:$0xff]  }
 0x110   : > { %574 = vmatpush1.bf16.msra.mxu0 %v16792_v8  ;;  %1027 = vmatpush1.bf16.msra.mxu1 %v16822_v19  ;;  %v16853_v42 = vld [vmem:[#allocation8 + $0x104] ss:$16 sps:$4 sm:$0xff]   ;;  %v16833_v44 = vld [vmem:[#allocation8 + $0x8c] ss:$16 sps:$4 sm:$0xff]   ;;  %v16858_v45 = vld [vmem:[#allocation8 + $0x100] ss:$16 sps:$4 sm:$0xff]  }
 0x111   : > { %575 = vmatprep.subr.bf16.mxu0 %v16793_v10  ;;  %1028 = vmatprep.subr.bf16.mxu1 %v16823_v20  ;;  %v16859_v46 = vld [vmem:[#allocation8 + $0x124] ss:$16 sps:$4 sm:$0xff]   ;;  %v16831_v47 = vld [vmem:[#allocation8 + $0x88] ss:$16 sps:$4 sm:$0xff]   ;;  %v16864_v48 = vld [vmem:[#allocation8 + $0x120] ss:$16 sps:$4 sm:$0xff]  }
 0x112   : > { %v16839_v49 = vld [vmem:[#allocation8 + $0xac] ss:$16 sps:$4 sm:$0xff]   ;;  %v16865_v50 = vld [vmem:[#allocation8 + $0x144] ss:$16 sps:$4 sm:$0xff]   ;;  %v16837_v51 = vld [vmem:[#allocation8 + $0xa8] ss:$16 sps:$4 sm:$0xff]  }
 0x113   : > { %v16870_v52 = vld [vmem:[#allocation8 + $0x140] ss:$16 sps:$4 sm:$0xff]   ;;  %v16845_v53 = vld [vmem:[#allocation8 + $0xcc] ss:$16 sps:$4 sm:$0xff]   ;;  %v16871_v54 = vld [vmem:[#allocation8 + $0x164] ss:$16 sps:$4 sm:$0xff]  }
 0x114   : > { %576 = vmatpush1.bf16.msra.mxu0 %v16795_v13  ;;  %1029 = vmatpush1.bf16.msra.mxu1 %v16828_v23  ;;  %v16843_v55 = vld [vmem:[#allocation8 + $0xc8] ss:$16 sps:$4 sm:$0xff]   ;;  %v16876_v56 = vld [vmem:[#allocation8 + $0x160] ss:$16 sps:$4 sm:$0xff]   ;;  %v16851_v57 = vld [vmem:[#allocation8 + $0xec] ss:$16 sps:$4 sm:$0xff]  }
 0x115   : > { %577 = vmatprep.subr.bf16.mxu0 %v16796_v14  ;;  %1030 = vmatprep.subr.bf16.mxu1 %v16829_v24  ;;  %v16877_v58 = vld [vmem:[#allocation8 + $0x184] ss:$16 sps:$4 sm:$0xff]   ;;  %v16849_v59 = vld [vmem:[#allocation8 + $0xe8] ss:$16 sps:$4 sm:$0xff]   ;;  %v16882_v60 = vld [vmem:[#allocation8 + $0x180] ss:$16 sps:$4 sm:$0xff]  }
 0x116   : > { %v16857_v61 = vld [vmem:[#allocation8 + $0x10c] ss:$16 sps:$4 sm:$0xff]   ;;  %v16883_v62 = vld [vmem:[#allocation8 + $0x1a4] ss:$16 sps:$4 sm:$0xff]   ;;  %v16855_v63 = vld [vmem:[#allocation8 + $0x108] ss:$16 sps:$4 sm:$0xff]  }
 0x117   : > { %v16888_v0 = vld [vmem:[#allocation8 + $0x1a0] ss:$16 sps:$4 sm:$0xff]   ;;  %v16863_v1 = vld [vmem:[#allocation8 + $0x12c] ss:$16 sps:$4 sm:$0xff]   ;;  %v16861_v2 = vld [vmem:[#allocation8 + $0x128] ss:$16 sps:$4 sm:$0xff]  }
 0x118   : > { %578 = vmatpush1.bf16.msra.mxu0 %v16798_v17  ;;  %1031 = vmatpush1.bf16.msra.mxu1 %v16834_v28  ;;  %v16869_v3 = vld [vmem:[#allocation8 + $0x14c] ss:$16 sps:$4 sm:$0xff]   ;;  %v16867_v4 = vld [vmem:[#allocation8 + $0x148] ss:$16 sps:$4 sm:$0xff]   ;;  %v16889_v11 = vld [vmem:[#allocation8 + $0x1c4] ss:$16 sps:$4 sm:$0xff]  }
 0x119   : > { %579 = vmatprep.subr.bf16.mxu0 %v16799_v18  ;;  %1032 = vmatprep.subr.bf16.mxu1 %v16835_v29  ;;  %v16875_v5 = vld [vmem:[#allocation8 + $0x16c] ss:$16 sps:$4 sm:$0xff]   ;;  %v16873_v6 = vld [vmem:[#allocation8 + $0x168] ss:$16 sps:$4 sm:$0xff]   ;;  %v16894_v14 = vld [vmem:[#allocation8 + $0x1c0] ss:$16 sps:$4 sm:$0xff]  }
 0x11a   : > { %v16881_v7 = vld [vmem:[#allocation8 + $0x18c] ss:$16 sps:$4 sm:$0xff]   ;;  %v16879_v8 = vld [vmem:[#allocation8 + $0x188] ss:$16 sps:$4 sm:$0xff]   ;;  %v16895_v15 = vld [vmem:[#allocation8 + $0x1e4] ss:$16 sps:$4 sm:$0xff]  }
 0x11b   : > { %v16887_v9 = vld [vmem:[#allocation8 + $0x1ac] ss:$16 sps:$4 sm:$0xff]   ;;  %v16885_v10 = vld [vmem:[#allocation8 + $0x1a8] ss:$16 sps:$4 sm:$0xff]   ;;  %v16900_v18 = vld [vmem:[#allocation8 + $0x1e0] ss:$16 sps:$4 sm:$0xff]  }
 0x11c   : > { %580 = vmatpush1.bf16.msra.mxu0 %v16801_v21  ;;  %1033 = vmatpush1.bf16.msra.mxu1 %v16840_v33  ;;  %v16893_v12 = vld [vmem:[#allocation8 + $0x1cc] ss:$16 sps:$4 sm:$0xff]   ;;  %v16891_v13 = vld [vmem:[#allocation8 + $0x1c8] ss:$16 sps:$4 sm:$0xff]   ;;  %s16643_s16 = smul.u32 192, %s17609_s1  ;;  %s17983_s9 = sld [smem:[#allocation25_spill]] }
 0x11d   : > { %581 = vmatprep.subr.bf16.mxu0 %v16802_v22  ;;  %1034 = vmatprep.subr.bf16.mxu1 %v16841_v34  ;;  %v16897_v16 = vld [vmem:[#allocation8 + $0x1e8] ss:$16 sps:$4 sm:$0xff]   ;;  %v16899_v17 = vld [vmem:[#allocation8 + $0x1ec] ss:$16 sps:$4 sm:$0xff]   ;;  %s16644_s21 = smul.u32 3072, %s17332_s15  ;;  %s14393_s26 = scalar_lea.sflag [#allocation4], %s17609_s1 }
 0x11e   : > { %v1120_v19 = vld [vmem:[#allocation11] sm:$0xff]  ;;  %v1121_v21 = vld [vmem:[#allocation11 + $0x8] sm:$0xff]  ;;  %s17777_s22 = scalar_lea.vmem [#allocation17], %s16643_s16  ;;  %p17984_p1 = scmp.ne.s32.totalorder %s17971_s25, 0 }
 0x11f   : > { %v1124_v20 = vld [vmem:[#allocation11 + $0x20] sm:$0xff]  ;;  %v1125_v24 = vld [vmem:[#allocation11 + $0x28] sm:$0xff]  ;;  %s14407_s19 = sshll.u32 %s17777_s22, 4  ;;  %s17260_s13 = smov [#allocation17]   ;;  %s17903_s19 = int_to_ptr.vmem [resolvable:$true] %s14407_s19 }
 0x120   : > { %582 = vmatpush1.bf16.msra.mxu0 %v16804_v25  ;;  %1035 = vmatpush1.bf16.msra.mxu1 %v16846_v37  ;;  %v14656_v22 = vcombine.low %v1120_v19, %v1124_v20  ;;  %v14657_v23 = vcombine.high %v1120_v19, %v1124_v20  ;;  %v14658_v25 = vcombine.low %v1121_v21, %v1125_v24  ;;  %v1168_v20 = vld [vmem:[#allocation11 + $0x180] sm:$0xff]  ;;  %s17158_s29 = scalar_lea.vmem %s17903_s19, 3072  ;;  %s17162_s14 = sshll.u32 %s17260_s13, 4  ;;  %s17163_s14 = int_to_ptr.vmem [resolvable:$false] %s17162_s14 }
 0x121   : > { %1063 = vmatprep.subr.bf16.mxu0 %v16809_v27  ;;  %1036 = vmatprep.subr.bf16.mxu1 %v16847_v38  ;;  %v14659_v26 = vcombine.high %v1121_v21, %v1125_v24  ;;  %v477_v27 = vlaneseq  ;;  %v1172_v21 = vld [vmem:[#allocation11 + $0x1a0] sm:$0xff]  ;;  %p17159_p10 = scmp.ne.s32.totalorder %s17903_s19, %s17158_s29  ;;  %s17164_s18 = scalar_lea.vmem %s17163_s14, 6144 }
 0x122   : > { %s17901_s20 = scalar_lea.hbm %s17983_s9, %s16644_s21  ;;  %p17165_p13 = scmp.lt.s32.totalorder %s17903_s19, %s17163_s14 }
 0x123   : > { %600 = vmatmul.mubr.bf16.vlgmr.msra.gmra.mrb[0].mxu0 %v458_v30  ;;  %v17636_v28 = vshrl.u32 %v477_v27, 7  ;;  %v475_v30 = vld [vmem:[#allocation7] sm:$0x3]  ;;  %p17160_p11 = pnand %p17159_p10, %p17984_p1  ;;  %p17166_p3 = scmp.lt.s32.totalorder %s17164_s18, %s17158_s29 }
 0x124   : > { %1064 = vmatpush1.bf16.msra.mxu0 %v16807_v31  ;;  %1037 = vmatpush1.bf16.msra.mxu1 %v16852_v41 }
 0x125   : > { %1065 = vmatprep.subr.bf16.mxu0 %v16815_v32  ;;  %1038 = vmatprep.subr.bf16.mxu1 %v16853_v42  ;;  %v17639_v29 = vsub.s32 0, %v17636_v28  ;;  %v17642_v31 = vsub.s32 1, %v17636_v28  ;;  %v1128_v42 = vld [vmem:[#allocation11 + $0x40] sm:$0xff]  ;;  %p17161_p12 = pneg %p17160_p11  ;;  %p17167_p7 = por %p17166_p3, %p17165_p13 }
 0x127   : > { %v480_v32 = vrot.slane %v475_v30, %v17639_v29  ;;  %v484_v33 = vrot.slane %v475_v30, %v17642_v31  ;;  %v1176_v30 = vld [vmem:[#allocation11 + $0x1c0] sm:$0xff]  ;;  %p17168_p9 = pnand %p17167_p7, %p17161_p12 }
 0x128   : > { %1066 = vmatpush1.bf16.msra.mxu0 %v16813_v35  ;;  %1039 = vmatpush1.bf16.msra.mxu1 %v16858_v45  ;;  %v1129_v45 = vld [vmem:[#allocation11 + $0x48] sm:$0xff] }
 0x129   : > { %1067 = vmatprep.subr.bf16.mxu0 %v16821_v36  ;;  %1040 = vmatprep.subr.bf16.mxu1 %v16859_v46  ;;  %v1133_v46 = vld [vmem:[#allocation11 + $0x68] sm:$0xff] }
 0x12c   : > { %1068 = vmatpush1.bf16.msra.mxu0 %v16819_v39  ;;  %1041 = vmatpush1.bf16.msra.mxu1 %v16864_v48 }
 0x12d   : > { %1069 = vmatprep.subr.bf16.mxu0 %v16827_v40  ;;  %1042 = vmatprep.subr.bf16.mxu1 %v16865_v50 }
 0x130   : > { %1070 = vmatpush1.bf16.msra.mxu0 %v16825_v43  ;;  %1043 = vmatpush1.bf16.msra.mxu1 %v16870_v52  ;;  %v1136_v52 = vld [vmem:[#allocation11 + $0x80] sm:$0xff] }
 0x131   : > { %1071 = vmatprep.subr.bf16.mxu0 %v16833_v44  ;;  %1044 = vmatprep.subr.bf16.mxu1 %v16871_v54  ;;  %v1132_v44 = vld [vmem:[#allocation11 + $0x60] sm:$0xff]  ;;  %v1137_v54 = vld [vmem:[#allocation11 + $0x88] sm:$0xff] }
 0x132   : > { %v14665_v50 = vcombine.high %v1128_v42, %v1132_v44 }
 0x134   : > { %1072 = vmatpush1.bf16.msra.mxu0 %v16831_v47  ;;  %1045 = vmatpush1.bf16.msra.mxu1 %v16876_v56  ;;  %v14664_v56 = vcombine.low %v1128_v42, %v1132_v44  ;;  %v1189_v42 = vld [vmem:[#allocation11 + $0x228] sm:$0xff] }
 0x135   : > { %1073 = vmatprep.subr.bf16.mxu0 %v16839_v49  ;;  %1046 = vmatprep.subr.bf16.mxu1 %v16877_v58 }
 0x138   : > { %1074 = vmatpush1.bf16.msra.mxu0 %v16837_v51  ;;  %1047 = vmatpush1.bf16.msra.mxu1 %v16882_v60  ;;  %v14667_v51 = vcombine.high %v1129_v45, %v1133_v46  ;;  %v1144_v60 = vld [vmem:[#allocation11 + $0xc0] sm:$0xff] }
 0x139   : > { %1075 = vmatprep.subr.bf16.mxu0 %v16845_v53  ;;  %1048 = vmatprep.subr.bf16.mxu1 %v16883_v62  ;;  %v1140_v53 = vld [vmem:[#allocation11 + $0xa0] sm:$0xff]  ;;  %v1145_v62 = vld [vmem:[#allocation11 + $0xc8] sm:$0xff] }
 0x13a   : > { %v14673_v58 = vcombine.high %v1136_v52, %v1140_v53 }
 0x13c   : > { %1076 = vmatpush1.bf16.msra.mxu0 %v16843_v55  ;;  %1049 = vmatpush1.bf16.msra.mxu1 %v16888_v0  ;;  %v1141_v55 = vld [vmem:[#allocation11 + $0xa8] sm:$0xff]  ;;  %v14672_v0 = vcombine.low %v1136_v52, %v1140_v53 }
 0x13d   : > { %1077 = vmatprep.subr.bf16.mxu0 %v16851_v57  ;;  %1050 = vmatprep.subr.bf16.mxu1 %v16889_v11  ;;  %v14666_v57 = vcombine.low %v1129_v45, %v1133_v46 }
 0x140   : > { %1078 = vmatpush1.bf16.msra.mxu0 %v16849_v59  ;;  %1051 = vmatpush1.bf16.msra.mxu1 %v16894_v14  ;;  %v14675_v59 = vcombine.high %v1137_v54, %v1141_v55  ;;  %v1161_v14 = vld [vmem:[#allocation11 + $0x148] sm:$0xff] }
 0x141   : > { %1079 = vmatprep.subr.bf16.mxu0 %v16857_v61  ;;  %1052 = vmatprep.subr.bf16.mxu1 %v16895_v15  ;;  %v1148_v61 = vld [vmem:[#allocation11 + $0xe0] sm:$0xff]  ;;  %v1165_v15 = vld [vmem:[#allocation11 + $0x168] sm:$0xff] }
 0x142   : > { %v14699_v19 = vcombine.high %v1161_v14, %v1165_v15 }
 0x144   : > { %1080 = vmatpush1.bf16.msra.mxu0 %v16855_v63  ;;  %1053 = vmatpush1.bf16.msra.mxu1 %v16900_v18  ;;  %v1149_v63 = vld [vmem:[#allocation11 + $0xe8] sm:$0xff] }
 0x145   : > { %1081 = vmatprep.subr.bf16.mxu0 %v16863_v1  ;;  %2698 = vmatprep.subr.bf16.mxu1 %v14657_v23  ;;  %v14674_v1 = vcombine.low %v1137_v54, %v1141_v55  ;;  %v1173_v23 = vld [vmem:[#allocation11 + $0x1a8] sm:$0xff]  ;;  %v1200_v55 = vld [vmem:[#allocation11 + $0x280] sm:$0xff] }
 0x148   : > { %1082 = vmatpush1.bf16.msra.mxu0 %v16861_v2  ;;  %v14681_v2 = vcombine.high %v1144_v60, %v1148_v61 }
 0x149   : > { %1083 = vmatprep.subr.bf16.mxu0 %v16869_v3  ;;  %v14683_v3 = vcombine.high %v1145_v62, %v1149_v63 }
 0x14c   : > { %1084 = vmatpush1.bf16.msra.mxu0 %v16867_v4  ;;  %v1152_v4 = vld [vmem:[#allocation11 + $0x100] sm:$0xff] }
 0x14d   : > { %1085 = vmatprep.subr.bf16.mxu0 %v16875_v5  ;;  %v1156_v5 = vld [vmem:[#allocation11 + $0x120] sm:$0xff] }
 0x150   : > { %1086 = vmatpush1.bf16.msra.mxu0 %v16873_v6  ;;  %v1153_v6 = vld [vmem:[#allocation11 + $0x108] sm:$0xff] }
 0x151   : > { %1087 = vmatprep.subr.bf16.mxu0 %v16881_v7  ;;  %v1157_v7 = vld [vmem:[#allocation11 + $0x128] sm:$0xff] }
 0x152   : > { %v14691_v11 = vcombine.high %v1153_v6, %v1157_v7 }
 0x154   : > { %1088 = vmatpush1.bf16.msra.mxu0 %v16879_v8  ;;  %v14680_v8 = vcombine.low %v1144_v60, %v1148_v61 }
 0x155   : > { %1089 = vmatprep.subr.bf16.mxu0 %v16887_v9  ;;  %v14682_v9 = vcombine.low %v1145_v62, %v1149_v63  ;;  %v1208_v63 = vld [vmem:[#allocation11 + $0x2c0] sm:$0xff] }
 0x158   : > { %1090 = vmatpush1.bf16.msra.mxu0 %v16885_v10  ;;  %v14689_v10 = vcombine.high %v1152_v4, %v1156_v5 }
 0x159   : > { %1091 = vmatprep.subr.bf16.mxu0 %v16893_v12  ;;  %v1160_v12 = vld [vmem:[#allocation11 + $0x140] sm:$0xff] }
 0x15c   : > { %1092 = vmatpush1.bf16.msra.mxu0 %v16891_v13  ;;  %v1164_v13 = vld [vmem:[#allocation11 + $0x160] sm:$0xff] }
 0x15d   : > { %1093 = vmatprep.subr.bf16.mxu0 %v16899_v17  ;;  %v14690_v17 = vcombine.low %v1153_v6, %v1157_v7  ;;  %v14697_v18 = vcombine.high %v1160_v12, %v1164_v13  ;;  %v14696_v24 = vcombine.low %v1160_v12, %v1164_v13  ;;  %v1216_v7 = vld [vmem:[#allocation11 + $0x300] sm:$0xff] }
 0x160   : > { %1094 = vmatpush1.bf16.msra.mxu0 %v16897_v16  ;;  %v14688_v16 = vcombine.low %v1152_v4, %v1156_v5 }
 0x161   : > { %2780 = vmatprep.subr.bf16.mxu0 %v14659_v26  ;;  %v14705_v26 = vcombine.high %v1168_v20, %v1172_v21 }
 0x1f6   : > { %v601_v34 = vpop.f32.mrb[0].mxu0 }
 0x1f7   : > { %v602_v35 = vadd.f32 %v601_v34, %v480_v32  ;;  %v603_v36 = vpop.f32.mrb[1].mxu0  ;;  %v1180_v32 = vld [vmem:[#allocation11 + $0x1e0] sm:$0xff]  ;;  %v1181_v34 = vld [vmem:[#allocation11 + $0x1e8] sm:$0xff] }
 0x1f8   : > { %v604_v37 = vadd.f32 %v603_v36, %v484_v33  ;;  %v605_v38 = vpop.f32.mrb[2].mxu0  ;;  %v1177_v33 = vld [vmem:[#allocation11 + $0x1c8] sm:$0xff] }
 0x1f9   : > { %vm608_vm0 = vcmp.gt.f32.partialorder %v602_v35, 0.0  ;;  %v610_v39 = vmul.f32 0.2, %v602_v35  ;;  %v606_v40 = vpop.f32.mrb[3].mxu0  ;;  %v14715_v38 = vcombine.high %v1177_v33, %v1181_v34  ;;  %v14714_v44 = vcombine.low %v1177_v33, %v1181_v34 }
 0x1fa   : > { %v611_v41 = vmul.f32 0.2, %v604_v37  ;;  %vm609_vm1 = vcmp.gt.f32.partialorder %v604_v37, 0.0  ;;  %v1188_v40 = vld [vmem:[#allocation11 + $0x220] sm:$0xff] }
 0x1fb   : > { %v612_v43 = vsel %vm608_vm0, %v602_v35, %v610_v39  ;;  %v14704_v35 = vcombine.low %v1168_v20, %v1172_v21  ;;  %v1184_v39 = vld [vmem:[#allocation11 + $0x200] sm:$0xff] }
 0x1fc   : > { %v613_v47 = vsel %vm609_vm1, %v604_v37, %v611_v41  ;;  %v614_v49 = vpack.c.bf16 %v612_v43, %v612_v43  ;;  %v14713_v37 = vcombine.high %v1176_v30, %v1180_v32  ;;  %v1185_v41 = vld [vmem:[#allocation11 + $0x208] sm:$0xff]  ;;  %v14712_v43 = vcombine.low %v1176_v30, %v1180_v32 }
 0x1fd   : > { %v615_v48 = vpack.c.bf16 %v613_v47, %v613_v47  ;;  %v14721_v45 = vcombine.high %v1184_v39, %v1188_v40  ;;  %v14723_v46 = vcombine.high %v1185_v41, %v1189_v42  ;;  %v1192_v47 = vld [vmem:[#allocation11 + $0x240] sm:$0xff]  ;;  %v14722_v52 = vcombine.low %v1185_v41, %v1189_v42  ;;  %v1237_v32 = vld [vmem:[#allocation11 + $0x3a8] sm:$0xff] }
 0x1ff   : > { %1054 = vmatprep.mubr.bf16.mxu1 %v615_v48  ;;  %1095 = vmatprep.mubr.bf16.mxu0 %v615_v48  ;;  %v1196_v48 = vld [vmem:[#allocation11 + $0x260] sm:$0xff] }
 0x200   : > { %1055 = vmatmul.mubr.bf16.vlgmr.msra.gmra.mrb[0].mxu1 %v614_v49  ;;  %1096 = vmatmul.mubr.bf16.vlgmr.msra.gmra.mrb[4].mxu0 %v614_v49  ;;  %v1193_v49 = vld [vmem:[#allocation11 + $0x248] sm:$0xff]  ;;  %v14729_v53 = vcombine.high %v1192_v47, %v1196_v48 }
 0x201   : > { %2699 = vmatpush1.bf16.msra.mxu1 %v14656_v22  ;;  %2781 = vmatpush1.bf16.msra.mxu0 %v14658_v25  ;;  %v1169_v22 = vld [vmem:[#allocation11 + $0x188] sm:$0xff]  ;;  %v14698_v25 = vcombine.low %v1161_v14, %v1165_v15  ;;  %v1224_v15 = vld [vmem:[#allocation11 + $0x340] sm:$0xff] }
 0x202   : > { %2700 = vmatprep.subr.bf16.mxu1 %v14665_v50  ;;  %2782 = vmatprep.subr.bf16.mxu0 %v14667_v51  ;;  %v14707_v27 = vcombine.high %v1169_v22, %v1173_v23  ;;  %v14706_v36 = vcombine.low %v1169_v22, %v1173_v23  ;;  %v1197_v50 = vld [vmem:[#allocation11 + $0x268] sm:$0xff]  ;;  %v14720_v51 = vcombine.low %v1184_v39, %v1188_v40 }
 0x203   : > { %v14731_v54 = vcombine.high %v1193_v49, %v1197_v50  ;;  %v14730_v60 = vcombine.low %v1193_v49, %v1197_v50  ;;  %v1245_v40 = vld [vmem:[#allocation11 + $0x3e8] sm:$0xff] }
 0x204   : > { %v1253_v49 = vld [vmem:[#allocation11 + $0x428] sm:$0xff] }
 0x205   : > { %2701 = vmatpush1.bf16.msra.mxu1 %v14664_v56  ;;  %2783 = vmatpush1.bf16.msra.mxu0 %v14666_v57  ;;  %v1204_v56 = vld [vmem:[#allocation11 + $0x2a0] sm:$0xff]  ;;  %v1201_v57 = vld [vmem:[#allocation11 + $0x288] sm:$0xff] }
 0x206   : > { %2702 = vmatprep.subr.bf16.mxu1 %v14673_v58  ;;  %2784 = vmatprep.subr.bf16.mxu0 %v14675_v59  ;;  %v1205_v58 = vld [vmem:[#allocation11 + $0x2a8] sm:$0xff]  ;;  %v14728_v59 = vcombine.low %v1192_v47, %v1196_v48  ;;  %v14737_v61 = vcombine.high %v1200_v55, %v1204_v56 }
 0x207   : > { %v14739_v62 = vcombine.high %v1201_v57, %v1205_v58  ;;  %v14738_v4 = vcombine.low %v1201_v57, %v1205_v58 }
 0x209   : > { %2703 = vmatpush1.bf16.msra.mxu1 %v14672_v0  ;;  %2785 = vmatpush1.bf16.msra.mxu0 %v14674_v1  ;;  %v1212_v0 = vld [vmem:[#allocation11 + $0x2e0] sm:$0xff]  ;;  %v1209_v1 = vld [vmem:[#allocation11 + $0x2c8] sm:$0xff] }
 0x20a   : > { %2704 = vmatprep.subr.bf16.mxu1 %v14681_v2  ;;  %2786 = vmatprep.subr.bf16.mxu0 %v14683_v3  ;;  %v1213_v2 = vld [vmem:[#allocation11 + $0x2e8] sm:$0xff]  ;;  %v14736_v3 = vcombine.low %v1200_v55, %v1204_v56  ;;  %v14745_v5 = vcombine.high %v1208_v63, %v1212_v0 }
 0x20b   : > { %v14747_v6 = vcombine.high %v1209_v1, %v1213_v2  ;;  %v14746_v12 = vcombine.low %v1209_v1, %v1213_v2 }
 0x20d   : > { %2705 = vmatpush1.bf16.msra.mxu1 %v14680_v8  ;;  %2787 = vmatpush1.bf16.msra.mxu0 %v14682_v9  ;;  %v1220_v8 = vld [vmem:[#allocation11 + $0x320] sm:$0xff]  ;;  %v1217_v9 = vld [vmem:[#allocation11 + $0x308] sm:$0xff] }
 0x20e   : > { %2706 = vmatprep.subr.bf16.mxu1 %v14689_v10  ;;  %2788 = vmatprep.subr.bf16.mxu0 %v14691_v11  ;;  %v1221_v10 = vld [vmem:[#allocation11 + $0x328] sm:$0xff]  ;;  %v14744_v11 = vcombine.low %v1208_v63, %v1212_v0  ;;  %v14753_v13 = vcombine.high %v1216_v7, %v1220_v8 }
 0x20f   : > { %v14755_v14 = vcombine.high %v1217_v9, %v1221_v10  ;;  %v14754_v20 = vcombine.low %v1217_v9, %v1221_v10  ;;  %v1260_v10 = vld [vmem:[#allocation11 + $0x460] sm:$0xff] }
 0x211   : > { %2707 = vmatpush1.bf16.msra.mxu1 %v14688_v16  ;;  %2789 = vmatpush1.bf16.msra.mxu0 %v14690_v17  ;;  %v1228_v16 = vld [vmem:[#allocation11 + $0x360] sm:$0xff]  ;;  %v1225_v17 = vld [vmem:[#allocation11 + $0x348] sm:$0xff] }
 0x212   : > { %2708 = vmatprep.subr.bf16.mxu1 %v14697_v18  ;;  %2790 = vmatprep.subr.bf16.mxu0 %v14699_v19  ;;  %v1229_v18 = vld [vmem:[#allocation11 + $0x368] sm:$0xff]  ;;  %v14752_v19 = vcombine.low %v1216_v7, %v1220_v8  ;;  %v14761_v21 = vcombine.high %v1224_v15, %v1228_v16  ;;  %v14760_v23 = vcombine.low %v1224_v15, %v1228_v16  ;;  %v1256_v8 = vld [vmem:[#allocation11 + $0x440] sm:$0xff] }
 0x213   : > { %v14763_v22 = vcombine.high %v1225_v17, %v1229_v18  ;;  %v1264_v16 = vld [vmem:[#allocation11 + $0x480] sm:$0xff] }
 0x215   : > { %2709 = vmatpush1.bf16.msra.mxu1 %v14696_v24  ;;  %2791 = vmatpush1.bf16.msra.mxu0 %v14698_v25  ;;  %v14762_v24 = vcombine.low %v1225_v17, %v1229_v18  ;;  %v1232_v25 = vld [vmem:[#allocation11 + $0x380] sm:$0xff]  ;;  %v14793_v17 = vcombine.high %v1256_v8, %v1260_v10 }
 0x216   : > { %2710 = vmatprep.subr.bf16.mxu1 %v14705_v26  ;;  %2792 = vmatprep.subr.bf16.mxu0 %v14707_v27  ;;  %v1236_v26 = vld [vmem:[#allocation11 + $0x3a0] sm:$0xff]  ;;  %v1233_v27 = vld [vmem:[#allocation11 + $0x388] sm:$0xff] }
 0x217   : > { %v14769_v30 = vcombine.high %v1232_v25, %v1236_v26  ;;  %v14768_v33 = vcombine.low %v1232_v25, %v1236_v26  ;;  %v14770_v34 = vcombine.low %v1233_v27, %v1237_v32 }
 0x219   : > { %2711 = vmatpush1.bf16.msra.mxu1 %v14704_v35  ;;  %2793 = vmatpush1.bf16.msra.mxu0 %v14706_v36  ;;  %v14771_v35 = vcombine.high %v1233_v27, %v1237_v32  ;;  %v1240_v36 = vld [vmem:[#allocation11 + $0x3c0] sm:$0xff]  ;;  %v1273_v32 = vld [vmem:[#allocation11 + $0x4c8] sm:$0xff] }
 0x21a   : > { %2712 = vmatprep.subr.bf16.mxu1 %v14713_v37  ;;  %2794 = vmatprep.subr.bf16.mxu0 %v14715_v38  ;;  %v1244_v37 = vld [vmem:[#allocation11 + $0x3e0] sm:$0xff]  ;;  %v1241_v38 = vld [vmem:[#allocation11 + $0x3c8] sm:$0xff] }
 0x21b   : > { %v14777_v39 = vcombine.high %v1240_v36, %v1244_v37  ;;  %v14776_v41 = vcombine.low %v1240_v36, %v1244_v37  ;;  %v14778_v42 = vcombine.low %v1241_v38, %v1245_v40  ;;  %v1272_v27 = vld [vmem:[#allocation11 + $0x4c0] sm:$0xff] }
 0x21d   : > { %2713 = vmatpush1.bf16.msra.mxu1 %v14712_v43  ;;  %2795 = vmatpush1.bf16.msra.mxu0 %v14714_v44  ;;  %v14779_v43 = vcombine.high %v1241_v38, %v1245_v40  ;;  %v1248_v44 = vld [vmem:[#allocation11 + $0x400] sm:$0xff]  ;;  %v1281_v40 = vld [vmem:[#allocation11 + $0x508] sm:$0xff] }
 0x21e   : > { %2714 = vmatprep.subr.bf16.mxu1 %v14721_v45  ;;  %2796 = vmatprep.subr.bf16.mxu0 %v14723_v46  ;;  %v1252_v45 = vld [vmem:[#allocation11 + $0x420] sm:$0xff]  ;;  %v1249_v46 = vld [vmem:[#allocation11 + $0x408] sm:$0xff] }
 0x21f   : > { %v14784_v47 = vcombine.low %v1248_v44, %v1252_v45  ;;  %v14785_v48 = vcombine.high %v1248_v44, %v1252_v45  ;;  %v14786_v50 = vcombine.low %v1249_v46, %v1253_v49  ;;  %v1280_v38 = vld [vmem:[#allocation11 + $0x500] sm:$0xff] }
 0x221   : > { %2715 = vmatpush1.bf16.msra.mxu1 %v14720_v51  ;;  %2797 = vmatpush1.bf16.msra.mxu0 %v14722_v52  ;;  %v14787_v51 = vcombine.high %v1249_v46, %v1253_v49  ;;  %v17646_v52 = vld [vmem:[#allocation10] sm:$0xf]  ;;  %v1288_v46 = vld [vmem:[#allocation11 + $0x540] sm:$0xff]  ;;  %v1293_v49 = vld [vmem:[#allocation11 + $0x568] sm:$0xff] }
 0x222   : > { %2716 = vmatprep.subr.bf16.mxu1 %v14729_v53  ;;  %2798 = vmatprep.subr.bf16.mxu0 %v14731_v54  ;;  %v17649_v53 = vsub.s32 3, %v17636_v28  ;;  %v685_v54 = vrot.slane %v17646_v52, %v17639_v29  ;;  %v689_v55 = vrot.slane %v17646_v52, %v17642_v31 }
 0x224   : > { %v697_v56 = vrot.slane %v17646_v52, %v17649_v53 }
 0x225   : > { %2717 = vmatpush1.bf16.msra.mxu1 %v14728_v59  ;;  %2799 = vmatpush1.bf16.msra.mxu0 %v14730_v60 }
 0x226   : > { %2718 = vmatprep.subr.bf16.mxu1 %v14737_v61  ;;  %2800 = vmatprep.subr.bf16.mxu0 %v14739_v62 }
 0x229   : > { %2719 = vmatpush1.bf16.msra.mxu1 %v14736_v3  ;;  %2801 = vmatpush1.bf16.msra.mxu0 %v14738_v4 }
 0x22a   : > { %2720 = vmatprep.subr.bf16.mxu1 %v14745_v5  ;;  %2802 = vmatprep.subr.bf16.mxu0 %v14747_v6 }
 0x22d   : > { %2721 = vmatpush1.bf16.msra.mxu1 %v14744_v11  ;;  %2803 = vmatpush1.bf16.msra.mxu0 %v14746_v12  ;;  %v1257_v11 = vld [vmem:[#allocation11 + $0x448] sm:$0xff] }
 0x22e   : > { %2722 = vmatprep.subr.bf16.mxu1 %v14753_v13  ;;  %2804 = vmatprep.subr.bf16.mxu0 %v14755_v14  ;;  %v1261_v12 = vld [vmem:[#allocation11 + $0x468] sm:$0xff] }
 0x22f   : > { %v14795_v18 = vcombine.high %v1257_v11, %v1261_v12 }
 0x231   : > { %2723 = vmatpush1.bf16.msra.mxu1 %v14752_v19  ;;  %2805 = vmatpush1.bf16.msra.mxu0 %v14754_v20  ;;  %v1268_v19 = vld [vmem:[#allocation11 + $0x4a0] sm:$0xff]  ;;  %v1265_v20 = vld [vmem:[#allocation11 + $0x488] sm:$0xff] }
 0x232   : > { %2724 = vmatprep.subr.bf16.mxu1 %v14761_v21  ;;  %2806 = vmatprep.subr.bf16.mxu0 %v14763_v22  ;;  %v1269_v21 = vld [vmem:[#allocation11 + $0x4a8] sm:$0xff]  ;;  %v14801_v25 = vcombine.high %v1264_v16, %v1268_v19 }
 0x233   : > { %v14803_v26 = vcombine.high %v1265_v20, %v1269_v21 }
 0x235   : > { %2725 = vmatpush1.bf16.msra.mxu1 %v14760_v23  ;;  %2807 = vmatpush1.bf16.msra.mxu0 %v14762_v24  ;;  %v14792_v23 = vcombine.low %v1256_v8, %v1260_v10  ;;  %v14794_v24 = vcombine.low %v1257_v11, %v1261_v12  ;;  %v1316_v10 = vld [vmem:[#allocation11 + $0x620] sm:$0xff]  ;;  %v1313_v11 = vld [vmem:[#allocation11 + $0x608] sm:$0xff] }
 0x236   : > { %2726 = vmatprep.subr.bf16.mxu1 %v14769_v30  ;;  %2808 = vmatprep.subr.bf16.mxu0 %v14771_v35  ;;  %v1276_v30 = vld [vmem:[#allocation11 + $0x4e0] sm:$0xff]  ;;  %v14802_v35 = vcombine.low %v1265_v20, %v1269_v21  ;;  %v1317_v12 = vld [vmem:[#allocation11 + $0x628] sm:$0xff] }
 0x237   : > { %v14809_v36 = vcombine.high %v1272_v27, %v1276_v30  ;;  %v1324_v20 = vld [vmem:[#allocation11 + $0x660] sm:$0xff]  ;;  %v1321_v21 = vld [vmem:[#allocation11 + $0x648] sm:$0xff] }
 0x239   : > { %2727 = vmatpush1.bf16.msra.mxu1 %v14768_v33  ;;  %2809 = vmatpush1.bf16.msra.mxu0 %v14770_v34  ;;  %v1277_v33 = vld [vmem:[#allocation11 + $0x4e8] sm:$0xff]  ;;  %v14800_v34 = vcombine.low %v1264_v16, %v1268_v19  ;;  %v1320_v19 = vld [vmem:[#allocation11 + $0x640] sm:$0xff] }
 0x23a   : > { %2728 = vmatprep.subr.bf16.mxu1 %v14777_v39  ;;  %2810 = vmatprep.subr.bf16.mxu0 %v14779_v43  ;;  %v14811_v37 = vcombine.high %v1273_v32, %v1277_v33  ;;  %v1284_v39 = vld [vmem:[#allocation11 + $0x520] sm:$0xff]  ;;  %v14810_v43 = vcombine.low %v1273_v32, %v1277_v33  ;;  %v1329_v33 = vld [vmem:[#allocation11 + $0x688] sm:$0xff] }
 0x23b   : > { %v14817_v44 = vcombine.high %v1280_v38, %v1284_v39  ;;  %v1332_v32 = vld [vmem:[#allocation11 + $0x6a0] sm:$0xff] }
 0x23d   : > { %2729 = vmatpush1.bf16.msra.mxu1 %v14776_v41  ;;  %2811 = vmatpush1.bf16.msra.mxu0 %v14778_v42  ;;  %v1285_v41 = vld [vmem:[#allocation11 + $0x528] sm:$0xff]  ;;  %v14808_v42 = vcombine.low %v1272_v27, %v1276_v30  ;;  %v1328_v30 = vld [vmem:[#allocation11 + $0x680] sm:$0xff] }
 0x23e   : > { %2739 = vmatprep.subr.bf16.mxu1 %v14785_v48  ;;  %2821 = vmatprep.subr.bf16.mxu0 %v14787_v51  ;;  %v14819_v45 = vcombine.high %v1281_v40, %v1285_v41  ;;  %v1289_v48 = vld [vmem:[#allocation11 + $0x548] sm:$0xff]  ;;  %v14818_v51 = vcombine.low %v1281_v40, %v1285_v41  ;;  %v1340_v40 = vld [vmem:[#allocation11 + $0x6e0] sm:$0xff] }
 0x23f   : > { %v1337_v41 = vld [vmem:[#allocation11 + $0x6c8] sm:$0xff] }
 0x2d3   : > { %v1056_v57 = vpop.f32.mrb[0].mxu1  ;;  %v17657_v58 = vpop.f32.mrb[4].mxu0 }
 0x2d4   : > { %v1057_v59 = vadd.f32 %v1056_v57, %v685_v54  ;;  %v1058_v60 = vpop.f32.mrb[1].mxu1  ;;  %v1099_v61 = vpop.f32.mrb[5].mxu0  ;;  %v1300_v57 = vld [vmem:[#allocation11 + $0x5a0] sm:$0xff] }
 0x2d5   : > { %v1059_v62 = vadd.f32 %v1058_v60, %v689_v55  ;;  %v1100_v63 = vadd.f32 %v1099_v61, %v697_v56  ;;  %v1060_v0 = vpop.f32.mrb[2].mxu1  ;;  %v1101_v1 = vpop.f32.mrb[6].mxu0  ;;  %v14827_v55 = vcombine.high %v1289_v48, %v1293_v49  ;;  %v1296_v56 = vld [vmem:[#allocation11 + $0x580] sm:$0xff]  ;;  %v1301_v60 = vld [vmem:[#allocation11 + $0x5a8] sm:$0xff] }
 0x2d6   : > { %vm1104_vm2 = vcmp.gt.f32.partialorder %v1057_v59, 0.0  ;;  %v1108_v2 = vmul.f32 0.2, %v1057_v59  ;;  %v1061_v6 = vpop.f32.mrb[3].mxu1  ;;  %v1102_v7 = vpop.f32.mrb[7].mxu0  ;;  %v1304_v1 = vld [vmem:[#allocation11 + $0x5c0] sm:$0xff] }
 0x2d7   : > { %vm1105_vm3 = vcmp.gt.f32.partialorder %v1059_v62, 0.0  ;;  %v1109_v3 = vmul.f32 0.2, %v1059_v62  ;;  %vm1107_vm4 = vcmp.gt.f32.partialorder %v1100_v63, 0.0  ;;  %v1111_v4 = vmul.f32 0.2, %v1100_v63 }
 0x2d8   : > { %v1112_v5 = vsel %vm1104_vm2, %v1057_v59, %v1108_v2  ;;  %v1297_v59 = vld [vmem:[#allocation11 + $0x588] sm:$0xff]  ;;  %v1308_v2 = vld [vmem:[#allocation11 + $0x5e0] sm:$0xff] }
 0x2d9   : > { %v1113_v9 = vsel %vm1105_vm3, %v1059_v62, %v1109_v3  ;;  %v1115_v14 = vsel %vm1107_vm4, %v1100_v63, %v1111_v4  ;;  %v17661_v15 = vpack.c.bf16 %v1112_v5, %v1112_v5  ;;  %v14826_v62 = vcombine.low %v1289_v48, %v1293_v49  ;;  %v1305_v3 = vld [vmem:[#allocation11 + $0x5c8] sm:$0xff]  ;;  %v1348_v48 = vld [vmem:[#allocation11 + $0x720] sm:$0xff] }
 0x2da   : > { %v17659_v13 = vpack.c.bf16 %v1113_v9, %v1113_v9  ;;  %v17665_v22 = vpack.c.bf16 %v1115_v14, %v1115_v14  ;;  %v14833_v63 = vcombine.high %v1296_v56, %v1300_v57  ;;  %v14835_v0 = vcombine.high %v1297_v59, %v1301_v60  ;;  %v1309_v4 = vld [vmem:[#allocation11 + $0x5e8] sm:$0xff]  ;;  %v1312_v9 = vld [vmem:[#allocation11 + $0x600] sm:$0xff] }
 0x2db   : > { %v14832_v5 = vcombine.low %v1296_v56, %v1300_v57  ;;  %v14834_v6 = vcombine.low %v1297_v59, %v1301_v60  ;;  %v14841_v7 = vcombine.high %v1304_v1, %v1308_v2  ;;  %v14843_v8 = vcombine.high %v1305_v3, %v1309_v4  ;;  %v1345_v49 = vld [vmem:[#allocation11 + $0x708] sm:$0xff]  ;;  %v1352_v57 = vld [vmem:[#allocation11 + $0x740] sm:$0xff] }
 0x2dc   : > { %2730 = vmatprep.mubr.bf16.mxu1 %v17659_v13  ;;  %2812 = vmatprep.mubr.bf16.mxu0 %v17659_v13  ;;  %v14840_v14 = vcombine.low %v1304_v1, %v1308_v2  ;;  %v14842_v16 = vcombine.low %v1305_v3, %v1309_v4  ;;  %v17672_v59 = vsub.s32 2, %v17636_v28  ;;  %v1356_v60 = vld [vmem:[#allocation11 + $0x760] sm:$0xff] }
 0x2dd   : > { %2731 = vmatmul.mubr.bf16.vlgmr.msra.gmra.mrb[4].mxu1 %v17661_v15  ;;  %2813 = vmatmul.mubr.bf16.vlgmr.msra.gmra.mrb[8].mxu0 %v17661_v15  ;;  %v14889_v1 = vcombine.high %v1352_v57, %v1356_v60  ;;  %v1360_v3 = vld [vmem:[#allocation11 + $0x780] sm:$0xff] }
 0x2de   : > { %2740 = vmatpush1.bf16.msra.mxu1 %v14784_v47  ;;  %2822 = vmatpush1.bf16.msra.mxu0 %v14786_v50  ;;  %v1292_v47 = vld [vmem:[#allocation11 + $0x560] sm:$0xff]  ;;  %v14816_v50 = vcombine.low %v1280_v38, %v1284_v39  ;;  %v693_v4 = vrot.slane %v17646_v52, %v17672_v59 }
 0x2df   : > { %2771 = vmatprep.mubr.bf16.mxu1 %v17665_v22  ;;  %2853 = vmatprep.mubr.bf16.mxu0 %v17665_v22  ;;  %v14825_v54 = vcombine.high %v1288_v46, %v1292_v47  ;;  %v14824_v61 = vcombine.low %v1288_v46, %v1292_v47  ;;  %v1336_v39 = vld [vmem:[#allocation11 + $0x6c0] sm:$0xff] }
 0x2e0   : > { %2741 = vmatprep.subr.bf16.mxu1 %v14793_v17  ;;  %2823 = vmatprep.subr.bf16.mxu0 %v14795_v18  ;;  %v14849_v17 = vcombine.high %v1312_v9, %v1316_v10  ;;  %v14851_v18 = vcombine.high %v1313_v11, %v1317_v12  ;;  %v1344_v47 = vld [vmem:[#allocation11 + $0x700] sm:$0xff] }
 0x2e2   : > { %2742 = vmatpush1.bf16.msra.mxu1 %v14792_v23  ;;  %2824 = vmatpush1.bf16.msra.mxu0 %v14794_v24  ;;  %v1325_v23 = vld [vmem:[#allocation11 + $0x668] sm:$0xff]  ;;  %v14848_v24 = vcombine.low %v1312_v9, %v1316_v10 }
 0x2e3   : > { %2743 = vmatprep.subr.bf16.mxu1 %v14801_v25  ;;  %2825 = vmatprep.subr.bf16.mxu0 %v14803_v26  ;;  %v14850_v25 = vcombine.low %v1313_v11, %v1317_v12  ;;  %v14857_v26 = vcombine.high %v1320_v19, %v1324_v20  ;;  %v14859_v27 = vcombine.high %v1321_v21, %v1325_v23  ;;  %v1368_v12 = vld [vmem:[#allocation11 + $0x7c0] sm:$0xff] }
 0x2e6   : > { %2744 = vmatpush1.bf16.msra.mxu1 %v14800_v34  ;;  %2826 = vmatpush1.bf16.msra.mxu0 %v14802_v35  ;;  %v1333_v34 = vld [vmem:[#allocation11 + $0x6a8] sm:$0xff]  ;;  %v14856_v35 = vcombine.low %v1320_v19, %v1324_v20 }
 0x2e7   : > { %2745 = vmatprep.subr.bf16.mxu1 %v14809_v36  ;;  %2827 = vmatprep.subr.bf16.mxu0 %v14811_v37  ;;  %v14858_v36 = vcombine.low %v1321_v21, %v1325_v23  ;;  %v14865_v37 = vcombine.high %v1328_v30, %v1332_v32  ;;  %v14867_v38 = vcombine.high %v1329_v33, %v1333_v34  ;;  %v1122_v23 = vld [vmem:[#allocation11 + $0x10] sm:$0xff] }
 0x2ea   : > { %2746 = vmatpush1.bf16.msra.mxu1 %v14808_v42  ;;  %2828 = vmatpush1.bf16.msra.mxu0 %v14810_v43  ;;  %v1341_v42 = vld [vmem:[#allocation11 + $0x6e8] sm:$0xff]  ;;  %v14864_v43 = vcombine.low %v1328_v30, %v1332_v32 }
 0x2eb   : > { %2747 = vmatprep.subr.bf16.mxu1 %v14817_v44  ;;  %2829 = vmatprep.subr.bf16.mxu0 %v14819_v45  ;;  %v14866_v44 = vcombine.low %v1329_v33, %v1333_v34  ;;  %v14873_v45 = vcombine.high %v1336_v39, %v1340_v40  ;;  %v14875_v46 = vcombine.high %v1337_v41, %v1341_v42 }
 0x2ee   : > { %2748 = vmatpush1.bf16.msra.mxu1 %v14816_v50  ;;  %2830 = vmatpush1.bf16.msra.mxu0 %v14818_v51  ;;  %v1349_v50 = vld [vmem:[#allocation11 + $0x728] sm:$0xff]  ;;  %v14872_v51 = vcombine.low %v1336_v39, %v1340_v40 }
 0x2ef   : > { %2749 = vmatprep.subr.bf16.mxu1 %v14825_v54  ;;  %2831 = vmatprep.subr.bf16.mxu0 %v14827_v55  ;;  %v14874_v54 = vcombine.low %v1337_v41, %v1341_v42  ;;  %v14881_v55 = vcombine.high %v1344_v47, %v1348_v48  ;;  %v14883_v56 = vcombine.high %v1345_v49, %v1349_v50 }
 0x2f2   : > { %2750 = vmatpush1.bf16.msra.mxu1 %v14824_v61  ;;  %2832 = vmatpush1.bf16.msra.mxu0 %v14826_v62  ;;  %v1353_v61 = vld [vmem:[#allocation11 + $0x748] sm:$0xff] }
 0x2f3   : > { %2751 = vmatprep.subr.bf16.mxu1 %v14833_v63  ;;  %2833 = vmatprep.subr.bf16.mxu0 %v14835_v0  ;;  %v1357_v62 = vld [vmem:[#allocation11 + $0x768] sm:$0xff]  ;;  %v14880_v63 = vcombine.low %v1344_v47, %v1348_v48  ;;  %v14882_v0 = vcombine.low %v1345_v49, %v1349_v50  ;;  %v1143_v47 = vld [vmem:[#allocation11 + $0xb8] sm:$0xff] }
 0x2f4   : > { %v14891_v2 = vcombine.high %v1353_v61, %v1357_v62  ;;  %v14890_v9 = vcombine.low %v1353_v61, %v1357_v62 }
 0x2f6   : > { %2752 = vmatpush1.bf16.msra.mxu1 %v14832_v5  ;;  %2834 = vmatpush1.bf16.msra.mxu0 %v14834_v6  ;;  %v1364_v5 = vld [vmem:[#allocation11 + $0x7a0] sm:$0xff]  ;;  %v1361_v6 = vld [vmem:[#allocation11 + $0x788] sm:$0xff] }
 0x2f7   : > { %2753 = vmatprep.subr.bf16.mxu1 %v14841_v7  ;;  %2835 = vmatprep.subr.bf16.mxu0 %v14843_v8  ;;  %v1365_v7 = vld [vmem:[#allocation11 + $0x7a8] sm:$0xff]  ;;  %v14888_v8 = vcombine.low %v1352_v57, %v1356_v60  ;;  %v14897_v10 = vcombine.high %v1360_v3, %v1364_v5  ;;  %v14896_v52 = vcombine.low %v1360_v3, %v1364_v5  ;;  %v1151_v57 = vld [vmem:[#allocation11 + $0xf8] sm:$0xff] }
 0x2f8   : > { %v14899_v11 = vcombine.high %v1361_v6, %v1365_v7  ;;  %v14898_v19 = vcombine.low %v1361_v6, %v1365_v7  ;;  %v1162_v7 = vld [vmem:[#allocation11 + $0x150] sm:$0xff] }
 0x2fa   : > { %2754 = vmatpush1.bf16.msra.mxu1 %v14840_v14  ;;  %2836 = vmatpush1.bf16.msra.mxu0 %v14842_v16  ;;  %v1098_v14 = vadd.f32 %v17657_v58, %v693_v4  ;;  %v1372_v16 = vld [vmem:[#allocation11 + $0x7e0] sm:$0xff] }
 0x2fb   : > { %2755 = vmatprep.subr.bf16.mxu1 %v14849_v17  ;;  %2837 = vmatprep.subr.bf16.mxu0 %v14851_v18  ;;  %v1369_v17 = vld [vmem:[#allocation11 + $0x7c8] sm:$0xff]  ;;  %v14905_v20 = vcombine.high %v1368_v12, %v1372_v16  ;;  %v14904_v58 = vcombine.low %v1368_v12, %v1372_v16 }
 0x2fc   : > { %v1373_v18 = vld [vmem:[#allocation11 + $0x7e8] sm:$0xff]  ;;  %vm1106_vm5 = vcmp.gt.f32.partialorder %v1098_v14, 0.0 }
 0x2fd   : > { %v14907_v21 = vcombine.high %v1369_v17, %v1373_v18  ;;  %v14906_v30 = vcombine.low %v1369_v17, %v1373_v18  ;;  %v1170_v17 = vld [vmem:[#allocation11 + $0x190] sm:$0xff] }
 0x2fe   : > { %2756 = vmatpush1.bf16.msra.mxu1 %v14848_v24  ;;  %2838 = vmatpush1.bf16.msra.mxu0 %v14850_v25  ;;  %v1110_v24 = vmul.f32 0.2, %v1098_v14  ;;  %v1126_v25 = vld [vmem:[#allocation11 + $0x30] sm:$0xff] }
 0x2ff   : > { %2757 = vmatprep.subr.bf16.mxu1 %v14857_v26  ;;  %2839 = vmatprep.subr.bf16.mxu0 %v14859_v27  ;;  %v1123_v26 = vld [vmem:[#allocation11 + $0x18] sm:$0xff]  ;;  %v14661_v32 = vcombine.high %v1122_v23, %v1126_v25  ;;  %v14660_v39 = vcombine.low %v1122_v23, %v1126_v25  ;;  %v1174_v18 = vld [vmem:[#allocation11 + $0x1b0] sm:$0xff] }
 0x300   : > { %v1127_v27 = vld [vmem:[#allocation11 + $0x38] sm:$0xff]  ;;  %v1114_v34 = vsel %vm1106_vm5, %v1098_v14, %v1110_v24  ;;  %v14709_v23 = vcombine.high %v1170_v17, %v1174_v18  ;;  %v1178_v25 = vld [vmem:[#allocation11 + $0x1d0] sm:$0xff] }
 0x301   : > { %v14663_v33 = vcombine.high %v1123_v26, %v1127_v27  ;;  %v17677_v40 = vpack.c.bf16 %v1114_v34, %v1114_v34  ;;  %v14662_v41 = vcombine.low %v1123_v26, %v1127_v27  ;;  %v1182_v26 = vld [vmem:[#allocation11 + $0x1f0] sm:$0xff]  ;;  %v1179_v27 = vld [vmem:[#allocation11 + $0x1d8] sm:$0xff] }
 0x302   : > { %2758 = vmatpush1.bf16.msra.mxu1 %v14856_v35  ;;  %2840 = vmatpush1.bf16.msra.mxu0 %v14858_v36  ;;  %v1130_v35 = vld [vmem:[#allocation11 + $0x50] sm:$0xff] }
 0x303   : > { %2759 = vmatprep.subr.bf16.mxu1 %v14865_v37  ;;  %2841 = vmatprep.subr.bf16.mxu0 %v14867_v38  ;;  %v1134_v36 = vld [vmem:[#allocation11 + $0x70] sm:$0xff]  ;;  %v1131_v37 = vld [vmem:[#allocation11 + $0x58] sm:$0xff] }
 0x304   : > { %v1135_v38 = vld [vmem:[#allocation11 + $0x78] sm:$0xff]  ;;  %v14669_v42 = vcombine.high %v1130_v35, %v1134_v36  ;;  %v14668_v48 = vcombine.low %v1130_v35, %v1134_v36  ;;  %v1186_v35 = vld [vmem:[#allocation11 + $0x210] sm:$0xff] }
 0x305   : > { %v14670_v49 = vcombine.low %v1131_v37, %v1135_v38  ;;  %v1190_v36 = vld [vmem:[#allocation11 + $0x230] sm:$0xff] }
 0x306   : > { %2760 = vmatpush1.bf16.msra.mxu1 %v14864_v43  ;;  %2842 = vmatpush1.bf16.msra.mxu0 %v14866_v44  ;;  %v14671_v43 = vcombine.high %v1131_v37, %v1135_v38  ;;  %v1138_v44 = vld [vmem:[#allocation11 + $0x90] sm:$0xff]  ;;  %v1187_v37 = vld [vmem:[#allocation11 + $0x218] sm:$0xff] }
 0x307   : > { %2761 = vmatprep.subr.bf16.mxu1 %v14873_v45  ;;  %2843 = vmatprep.subr.bf16.mxu0 %v14875_v46  ;;  %v1142_v45 = vld [vmem:[#allocation11 + $0xb0] sm:$0xff]  ;;  %v1139_v46 = vld [vmem:[#allocation11 + $0x98] sm:$0xff] }
 0x308   : > { %v14677_v50 = vcombine.high %v1138_v44, %v1142_v45  ;;  %v14676_v60 = vcombine.low %v1138_v44, %v1142_v45  ;;  %v14678_v61 = vcombine.low %v1139_v46, %v1143_v47  ;;  %v1191_v38 = vld [vmem:[#allocation11 + $0x238] sm:$0xff]  ;;  %v1194_v44 = vld [vmem:[#allocation11 + $0x250] sm:$0xff] }
 0x309   : > { %v1198_v45 = vld [vmem:[#allocation11 + $0x270] sm:$0xff] }
 0x30a   : > { %2762 = vmatpush1.bf16.msra.mxu1 %v14872_v51  ;;  %2844 = vmatpush1.bf16.msra.mxu0 %v14874_v54  ;;  %v14679_v51 = vcombine.high %v1139_v46, %v1143_v47  ;;  %v1146_v54 = vld [vmem:[#allocation11 + $0xd0] sm:$0xff]  ;;  %v1195_v46 = vld [vmem:[#allocation11 + $0x258] sm:$0xff] }
 0x30b   : > { %2763 = vmatprep.subr.bf16.mxu1 %v14881_v55  ;;  %2845 = vmatprep.subr.bf16.mxu0 %v14883_v56  ;;  %v1150_v55 = vld [vmem:[#allocation11 + $0xf0] sm:$0xff]  ;;  %v1147_v56 = vld [vmem:[#allocation11 + $0xd8] sm:$0xff] }
 0x30c   : > { %v14685_v62 = vcombine.high %v1146_v54, %v1150_v55  ;;  %v14684_v3 = vcombine.low %v1146_v54, %v1150_v55  ;;  %v14686_v4 = vcombine.low %v1147_v56, %v1151_v57  ;;  %v1199_v47 = vld [vmem:[#allocation11 + $0x278] sm:$0xff]  ;;  %v1202_v54 = vld [vmem:[#allocation11 + $0x290] sm:$0xff] }
 0x30d   : > { %v1206_v55 = vld [vmem:[#allocation11 + $0x2b0] sm:$0xff] }
 0x30e   : > { %2764 = vmatpush1.bf16.msra.mxu1 %v14880_v63  ;;  %2846 = vmatpush1.bf16.msra.mxu0 %v14882_v0  ;;  %v14687_v63 = vcombine.high %v1147_v56, %v1151_v57  ;;  %v1154_v0 = vld [vmem:[#allocation11 + $0x110] sm:$0xff]  ;;  %v1203_v56 = vld [vmem:[#allocation11 + $0x298] sm:$0xff] }
 0x30f   : > { %2765 = vmatprep.subr.bf16.mxu1 %v14889_v1  ;;  %2847 = vmatprep.subr.bf16.mxu0 %v14891_v2  ;;  %v1158_v1 = vld [vmem:[#allocation11 + $0x130] sm:$0xff]  ;;  %v1159_v2 = vld [vmem:[#allocation11 + $0x138] sm:$0xff] }
 0x310   : > { %v14693_v5 = vcombine.high %v1154_v0, %v1158_v1  ;;  %v1207_v57 = vld [vmem:[#allocation11 + $0x2b8] sm:$0xff] }
 0x312   : > { %2766 = vmatpush1.bf16.msra.mxu1 %v14888_v8  ;;  %2848 = vmatpush1.bf16.msra.mxu0 %v14890_v9  ;;  %v1166_v8 = vld [vmem:[#allocation11 + $0x170] sm:$0xff]  ;;  %v1163_v9 = vld [vmem:[#allocation11 + $0x158] sm:$0xff] }
 0x313   : > { %2767 = vmatprep.subr.bf16.mxu1 %v14897_v10  ;;  %2849 = vmatprep.subr.bf16.mxu0 %v14899_v11  ;;  %v1167_v10 = vld [vmem:[#allocation11 + $0x178] sm:$0xff]  ;;  %v14692_v11 = vcombine.low %v1154_v0, %v1158_v1  ;;  %v14701_v14 = vcombine.high %v1162_v7, %v1166_v8  ;;  %v1210_v0 = vld [vmem:[#allocation11 + $0x2d0] sm:$0xff] }
 0x314   : > { %v14703_v16 = vcombine.high %v1163_v9, %v1167_v10  ;;  %v1214_v1 = vld [vmem:[#allocation11 + $0x2f0] sm:$0xff] }
 0x316   : > { %2768 = vmatpush1.bf16.msra.mxu1 %v14896_v52  ;;  %2850 = vmatpush1.bf16.msra.mxu0 %v14898_v19  ;;  %v1171_v52 = vld [vmem:[#allocation11 + $0x198] sm:$0xff] }
 0x317   : > { %2769 = vmatprep.subr.bf16.mxu1 %v14905_v20  ;;  %2851 = vmatprep.subr.bf16.mxu0 %v14907_v21  ;;  %v1175_v19 = vld [vmem:[#allocation11 + $0x1b8] sm:$0xff]  ;;  %v14700_v20 = vcombine.low %v1162_v7, %v1166_v8  ;;  %v14702_v21 = vcombine.low %v1163_v9, %v1167_v10  ;;  %v1218_v7 = vld [vmem:[#allocation11 + $0x310] sm:$0xff] }
 0x318   : > { %v14711_v24 = vcombine.high %v1171_v52, %v1175_v19  ;;  %v1222_v8 = vld [vmem:[#allocation11 + $0x330] sm:$0xff]  ;;  %v1219_v9 = vld [vmem:[#allocation11 + $0x318] sm:$0xff] }
 0x319   : > { %v1223_v10 = vld [vmem:[#allocation11 + $0x338] sm:$0xff] }
 0x31a   : > { %2770 = vmatpush1.bf16.msra.mxu1 %v14904_v58  ;;  %2852 = vmatpush1.bf16.msra.mxu0 %v14906_v30  ;;  %v1183_v58 = vld [vmem:[#allocation11 + $0x1f8] sm:$0xff]  ;;  %v14708_v30 = vcombine.low %v1170_v17, %v1174_v18  ;;  %v1226_v17 = vld [vmem:[#allocation11 + $0x350] sm:$0xff] }
 0x31b   : > { %2862 = vmatprep.subr.bf16.mxu1 %v14661_v32  ;;  %2944 = vmatprep.subr.bf16.mxu0 %v14663_v33  ;;  %v14710_v32 = vcombine.low %v1171_v52, %v1175_v19  ;;  %v14717_v33 = vcombine.high %v1178_v25, %v1182_v26  ;;  %v14719_v34 = vcombine.high %v1179_v27, %v1183_v58  ;;  %v1230_v18 = vld [vmem:[#allocation11 + $0x370] sm:$0xff]  ;;  %v1227_v52 = vld [vmem:[#allocation11 + $0x358] sm:$0xff] }
 0x31c   : > { %v1231_v19 = vld [vmem:[#allocation11 + $0x378] sm:$0xff] }
 0x31d   : > { %2772 = vmatmul.mubr.bf16.vlgmr.msra.gmra.mrb[4].mxu1 %v17677_v40  ;;  %2854 = vmatmul.mubr.bf16.vlgmr.msra.gmra.mrb[8].mxu0 %v17677_v40 }
 0x31e   : > { %2863 = vmatpush1.bf16.msra.mxu1 %v14660_v39  ;;  %2894 = vmatprep.mubr.bf16.mxu1 %v17659_v13  ;;  %v14716_v39 = vcombine.low %v1178_v25, %v1182_v26  ;;  %v1234_v25 = vld [vmem:[#allocation11 + $0x390] sm:$0xff] }
 0x31f   : > { %2945 = vmatpush1.bf16.msra.mxu0 %v14662_v41  ;;  %2976 = vmatprep.mubr.bf16.mxu0 %v17659_v13  ;;  %v1155_v13 = vld [vmem:[#allocation11 + $0x118] sm:$0xff]  ;;  %v14718_v41 = vcombine.low %v1179_v27, %v1183_v58  ;;  %v1238_v26 = vld [vmem:[#allocation11 + $0x3b0] sm:$0xff] }
 0x320   : > { %2864 = vmatprep.subr.bf16.mxu1 %v14669_v42  ;;  %2946 = vmatprep.subr.bf16.mxu0 %v14671_v43  ;;  %v14695_v6 = vcombine.high %v1155_v13, %v1159_v2  ;;  %v14694_v12 = vcombine.low %v1155_v13, %v1159_v2  ;;  %v14725_v42 = vcombine.high %v1186_v35, %v1190_v36  ;;  %v1211_v13 = vld [vmem:[#allocation11 + $0x2d8] sm:$0xff] }
 0x321   : > { %v14727_v43 = vcombine.high %v1187_v37, %v1191_v38  ;;  %v1215_v2 = vld [vmem:[#allocation11 + $0x2f8] sm:$0xff] }
 0x322   : > { %2865 = vmatpush1.bf16.msra.mxu1 %v14668_v48  ;;  %v14724_v48 = vcombine.low %v1186_v35, %v1190_v36  ;;  %v1235_v27 = vld [vmem:[#allocation11 + $0x398] sm:$0xff]  ;;  %v1242_v35 = vld [vmem:[#allocation11 + $0x3d0] sm:$0xff] }
 0x323   : > { %2947 = vmatpush1.bf16.msra.mxu0 %v14670_v49  ;;  %2866 = vmatprep.subr.bf16.mxu1 %v14677_v50  ;;  %v14726_v49 = vcombine.low %v1187_v37, %v1191_v38  ;;  %v14733_v50 = vcombine.high %v1194_v44, %v1198_v45  ;;  %v1239_v58 = vld [vmem:[#allocation11 + $0x3b8] sm:$0xff]  ;;  %v1246_v36 = vld [vmem:[#allocation11 + $0x3f0] sm:$0xff] }
 0x324   : > { %2948 = vmatprep.subr.bf16.mxu0 %v14679_v51  ;;  %v14735_v51 = vcombine.high %v1195_v46, %v1199_v47  ;;  %v1243_v37 = vld [vmem:[#allocation11 + $0x3d8] sm:$0xff] }
 0x325   : > { %v1247_v38 = vld [vmem:[#allocation11 + $0x3f8] sm:$0xff] }
 0x326   : > { %2867 = vmatpush1.bf16.msra.mxu1 %v14676_v60  ;;  %v14732_v60 = vcombine.low %v1194_v44, %v1198_v45  ;;  %v1250_v44 = vld [vmem:[#allocation11 + $0x410] sm:$0xff] }
 0x327   : > { %2949 = vmatpush1.bf16.msra.mxu0 %v14678_v61  ;;  %2868 = vmatprep.subr.bf16.mxu1 %v14685_v62  ;;  %v14734_v61 = vcombine.low %v1195_v46, %v1199_v47  ;;  %v14741_v62 = vcombine.high %v1202_v54, %v1206_v55  ;;  %v1254_v45 = vld [vmem:[#allocation11 + $0x430] sm:$0xff]  ;;  %v1251_v46 = vld [vmem:[#allocation11 + $0x418] sm:$0xff] }
 0x328   : > { %2950 = vmatprep.subr.bf16.mxu0 %v14687_v63  ;;  %v14743_v63 = vcombine.high %v1203_v56, %v1207_v57  ;;  %v1255_v47 = vld [vmem:[#allocation11 + $0x438] sm:$0xff] }
 0x32a   : > { %2869 = vmatpush1.bf16.msra.mxu1 %v14684_v3  ;;  %v14740_v3 = vcombine.low %v1202_v54, %v1206_v55  ;;  %v1258_v54 = vld [vmem:[#allocation11 + $0x450] sm:$0xff] }
 0x32b   : > { %2951 = vmatpush1.bf16.msra.mxu0 %v14686_v4  ;;  %2870 = vmatprep.subr.bf16.mxu1 %v14693_v5  ;;  %v14742_v4 = vcombine.low %v1203_v56, %v1207_v57  ;;  %v14749_v5 = vcombine.high %v1210_v0, %v1214_v1  ;;  %v1262_v55 = vld [vmem:[#allocation11 + $0x470] sm:$0xff]  ;;  %v14788_v56 = vcombine.low %v1250_v44, %v1254_v45  ;;  %v1259_v57 = vld [vmem:[#allocation11 + $0x458] sm:$0xff] }
 0x32c   : > { %2952 = vmatprep.subr.bf16.mxu0 %v14695_v6  ;;  %v14751_v6 = vcombine.high %v1211_v13, %v1215_v2 }
 0x32e   : > { %2871 = vmatpush1.bf16.msra.mxu1 %v14692_v11  ;;  %v14748_v11 = vcombine.low %v1210_v0, %v1214_v1  ;;  %v1270_v0 = vld [vmem:[#allocation11 + $0x4b0] sm:$0xff] }
 0x32f   : > { %2953 = vmatpush1.bf16.msra.mxu0 %v14694_v12  ;;  %2872 = vmatprep.subr.bf16.mxu1 %v14701_v14  ;;  %v14750_v12 = vcombine.low %v1211_v13, %v1215_v2  ;;  %v14757_v14 = vcombine.high %v1218_v7, %v1222_v8  ;;  %v1267_v13 = vld [vmem:[#allocation11 + $0x498] sm:$0xff] }
 0x330   : > { %2954 = vmatprep.subr.bf16.mxu0 %v14703_v16  ;;  %v14759_v16 = vcombine.high %v1219_v9, %v1223_v10  ;;  %v1271_v2 = vld [vmem:[#allocation11 + $0x4b8] sm:$0xff] }
 0x332   : > { %2873 = vmatpush1.bf16.msra.mxu1 %v14700_v20  ;;  %v14756_v20 = vcombine.low %v1218_v7, %v1222_v8  ;;  %v1274_v7 = vld [vmem:[#allocation11 + $0x4d0] sm:$0xff] }
 0x333   : > { %2955 = vmatpush1.bf16.msra.mxu0 %v14702_v21  ;;  %2874 = vmatprep.subr.bf16.mxu1 %v14709_v23  ;;  %v14758_v21 = vcombine.low %v1219_v9, %v1223_v10  ;;  %v14765_v23 = vcombine.high %v1226_v17, %v1230_v18  ;;  %v1278_v8 = vld [vmem:[#allocation11 + $0x4f0] sm:$0xff]  ;;  %v1275_v9 = vld [vmem:[#allocation11 + $0x4d8] sm:$0xff] }
 0x334   : > { %2956 = vmatprep.subr.bf16.mxu0 %v14711_v24  ;;  %v14767_v24 = vcombine.high %v1227_v52, %v1231_v19  ;;  %v1279_v10 = vld [vmem:[#allocation11 + $0x4f8] sm:$0xff] }
 0x336   : > { %2875 = vmatpush1.bf16.msra.mxu1 %v14708_v30  ;;  %v14764_v30 = vcombine.low %v1226_v17, %v1230_v18  ;;  %v1286_v17 = vld [vmem:[#allocation11 + $0x530] sm:$0xff]  ;;  %v1283_v18 = vld [vmem:[#allocation11 + $0x518] sm:$0xff] }
 0x337   : > { %2957 = vmatpush1.bf16.msra.mxu0 %v14710_v32  ;;  %2876 = vmatprep.subr.bf16.mxu1 %v14717_v33  ;;  %v14766_v32 = vcombine.low %v1227_v52, %v1231_v19  ;;  %v14773_v33 = vcombine.high %v1234_v25, %v1238_v26  ;;  %v1287_v52 = vld [vmem:[#allocation11 + $0x538] sm:$0xff]  ;;  %v14814_v19 = vcombine.low %v1275_v9, %v1279_v10 }
 0x338   : > { %2958 = vmatprep.subr.bf16.mxu0 %v14719_v34  ;;  %v14775_v34 = vcombine.high %v1235_v27, %v1239_v58 }
 0x33a   : > { %2877 = vmatpush1.bf16.msra.mxu1 %v14716_v39  ;;  %v14772_v39 = vcombine.low %v1234_v25, %v1238_v26  ;;  %v1291_v25 = vld [vmem:[#allocation11 + $0x558] sm:$0xff] }
 0x33b   : > { %2959 = vmatpush1.bf16.msra.mxu0 %v14718_v41  ;;  %2878 = vmatprep.subr.bf16.mxu1 %v14725_v42  ;;  %v14774_v41 = vcombine.low %v1235_v27, %v1239_v58  ;;  %v14781_v42 = vcombine.high %v1242_v35, %v1246_v36  ;;  %v1295_v26 = vld [vmem:[#allocation11 + $0x578] sm:$0xff]  ;;  %v14822_v58 = vcombine.low %v1283_v18, %v1287_v52 }
 0x33c   : > { %2960 = vmatprep.subr.bf16.mxu0 %v14727_v43  ;;  %v14783_v43 = vcombine.high %v1243_v37, %v1247_v38 }
 0x33e   : > { %2879 = vmatpush1.bf16.msra.mxu1 %v14724_v48  ;;  %v14780_v48 = vcombine.low %v1242_v35, %v1246_v36  ;;  %v1299_v35 = vld [vmem:[#allocation11 + $0x598] sm:$0xff] }
 0x33f   : > { %2961 = vmatpush1.bf16.msra.mxu0 %v14726_v49  ;;  %2880 = vmatprep.subr.bf16.mxu1 %v14733_v50  ;;  %v14782_v49 = vcombine.low %v1243_v37, %v1247_v38  ;;  %v14789_v50 = vcombine.high %v1250_v44, %v1254_v45  ;;  %v1303_v36 = vld [vmem:[#allocation11 + $0x5b8] sm:$0xff]  ;;  %v14830_v38 = vcombine.low %v1291_v25, %v1295_v26 }
 0x340   : > { %2962 = vmatprep.subr.bf16.mxu0 %v14735_v51  ;;  %v14791_v51 = vcombine.high %v1251_v46, %v1255_v47  ;;  %v1307_v44 = vld [vmem:[#allocation11 + $0x5d8] sm:$0xff] }
 0x341   : > { %v1311_v45 = vld [vmem:[#allocation11 + $0x5f8] sm:$0xff] }
 0x342   : > { %2881 = vmatpush1.bf16.msra.mxu1 %v14732_v60  ;;  %v1263_v60 = vld [vmem:[#allocation11 + $0x478] sm:$0xff] }
 0x343   : > { %2963 = vmatpush1.bf16.msra.mxu0 %v14734_v61  ;;  %2882 = vmatprep.subr.bf16.mxu1 %v14741_v62  ;;  %v14790_v61 = vcombine.low %v1251_v46, %v1255_v47  ;;  %v14797_v62 = vcombine.high %v1258_v54, %v1262_v55  ;;  %v14799_v1 = vcombine.high %v1259_v57, %v1263_v60 }
 0x344   : > { %2964 = vmatprep.subr.bf16.mxu0 %v14743_v63  ;;  %v1266_v63 = vld [vmem:[#allocation11 + $0x490] sm:$0xff]  ;;  %v14838_v47 = vcombine.low %v1299_v35, %v1303_v36 }
 0x346   : > { %2883 = vmatpush1.bf16.msra.mxu1 %v14740_v3  ;;  %v14796_v3 = vcombine.low %v1258_v54, %v1262_v55  ;;  %v1315_v54 = vld [vmem:[#allocation11 + $0x618] sm:$0xff] }
 0x347   : > { %2965 = vmatpush1.bf16.msra.mxu0 %v14742_v4  ;;  %2884 = vmatprep.subr.bf16.mxu1 %v14749_v5  ;;  %v14798_v4 = vcombine.low %v1259_v57, %v1263_v60  ;;  %v14805_v5 = vcombine.high %v1266_v63, %v1270_v0  ;;  %v1319_v55 = vld [vmem:[#allocation11 + $0x638] sm:$0xff]  ;;  %v14846_v57 = vcombine.low %v1307_v44, %v1311_v45 }
 0x348   : > { %2966 = vmatprep.subr.bf16.mxu0 %v14751_v6  ;;  %v14807_v6 = vcombine.high %v1267_v13, %v1271_v2 }
 0x34a   : > { %2885 = vmatpush1.bf16.msra.mxu1 %v14748_v11  ;;  %v14804_v11 = vcombine.low %v1266_v63, %v1270_v0  ;;  %v1326_v63 = vld [vmem:[#allocation11 + $0x670] sm:$0xff]  ;;  %v1323_v0 = vld [vmem:[#allocation11 + $0x658] sm:$0xff] }
 0x34b   : > { %2967 = vmatpush1.bf16.msra.mxu0 %v14750_v12  ;;  %2886 = vmatprep.subr.bf16.mxu1 %v14757_v14  ;;  %v14813_v12 = vcombine.high %v1274_v7, %v1278_v8  ;;  %v14815_v14 = vcombine.high %v1275_v9, %v1279_v10 }
 0x34c   : > { %2968 = vmatprep.subr.bf16.mxu0 %v14759_v16  ;;  %v1282_v16 = vld [vmem:[#allocation11 + $0x510] sm:$0xff] }
 0x34d   : > { %v14820_v27 = vcombine.low %v1282_v16, %v1286_v17 }
 0x34e   : > { %2887 = vmatpush1.bf16.msra.mxu1 %v14756_v20  ;;  %v14821_v20 = vcombine.high %v1282_v16, %v1286_v17  ;;  %v1339_v16 = vld [vmem:[#allocation11 + $0x6d8] sm:$0xff] }
 0x34f   : > { %2969 = vmatpush1.bf16.msra.mxu0 %v14758_v21  ;;  %2888 = vmatprep.subr.bf16.mxu1 %v14765_v23  ;;  %v14823_v21 = vcombine.high %v1283_v18, %v1287_v52  ;;  %v1290_v23 = vld [vmem:[#allocation11 + $0x550] sm:$0xff]  ;;  %v1343_v17 = vld [vmem:[#allocation11 + $0x6f8] sm:$0xff] }
 0x350   : > { %2970 = vmatprep.subr.bf16.mxu0 %v14767_v24  ;;  %v1294_v24 = vld [vmem:[#allocation11 + $0x570] sm:$0xff] }
 0x351   : > { %v14828_v37 = vcombine.low %v1290_v23, %v1294_v24 }
 0x352   : > { %2889 = vmatpush1.bf16.msra.mxu1 %v14764_v30  ;;  %v14829_v30 = vcombine.high %v1290_v23, %v1294_v24  ;;  %v1347_v23 = vld [vmem:[#allocation11 + $0x718] sm:$0xff] }
 0x353   : > { %2971 = vmatpush1.bf16.msra.mxu0 %v14766_v32  ;;  %2890 = vmatprep.subr.bf16.mxu1 %v14773_v33  ;;  %v14831_v32 = vcombine.high %v1291_v25, %v1295_v26  ;;  %v1298_v33 = vld [vmem:[#allocation11 + $0x590] sm:$0xff]  ;;  %v1351_v24 = vld [vmem:[#allocation11 + $0x738] sm:$0xff]  ;;  %v14878_v26 = vcombine.low %v1339_v16, %v1343_v17 }
 0x354   : > { %2972 = vmatprep.subr.bf16.mxu0 %v14775_v34  ;;  %v1302_v34 = vld [vmem:[#allocation11 + $0x5b0] sm:$0xff] }
 0x355   : > { %v14836_v46 = vcombine.low %v1298_v33, %v1302_v34 }
 0x356   : > { %2891 = vmatpush1.bf16.msra.mxu1 %v14772_v39  ;;  %v14837_v39 = vcombine.high %v1298_v33, %v1302_v34  ;;  %v1355_v33 = vld [vmem:[#allocation11 + $0x758] sm:$0xff] }
 0x357   : > { %2973 = vmatpush1.bf16.msra.mxu0 %v14774_v41  ;;  %2892 = vmatprep.subr.bf16.mxu1 %v14781_v42  ;;  %v14839_v41 = vcombine.high %v1299_v35, %v1303_v36  ;;  %v1306_v42 = vld [vmem:[#allocation11 + $0x5d0] sm:$0xff]  ;;  %v1359_v34 = vld [vmem:[#allocation11 + $0x778] sm:$0xff]  ;;  %v14886_v36 = vcombine.low %v1347_v23, %v1351_v24 }
 0x358   : > { %2974 = vmatprep.subr.bf16.mxu0 %v14783_v43  ;;  %v1310_v43 = vld [vmem:[#allocation11 + $0x5f0] sm:$0xff] }
 0x35a   : > { %2893 = vmatpush1.bf16.msra.mxu1 %v14780_v48  ;;  %v14845_v48 = vcombine.high %v1306_v42, %v1310_v43 }
 0x35b   : > { %2975 = vmatpush1.bf16.msra.mxu0 %v14782_v49  ;;  %2903 = vmatprep.subr.bf16.mxu1 %v14789_v50  ;;  %v14847_v49 = vcombine.high %v1307_v44, %v1311_v45  ;;  %v1314_v50 = vld [vmem:[#allocation11 + $0x610] sm:$0xff]  ;;  %v14894_v45 = vcombine.low %v1355_v33, %v1359_v34 }
 0x35c   : > { %2985 = vmatprep.subr.bf16.mxu0 %v14791_v51  ;;  %v1318_v51 = vld [vmem:[#allocation11 + $0x630] sm:$0xff] }
 0x35d   : > { %2895 = vmatmul.mubr.bf16.vlgmr.msra.gmra.mrb[8].mxu1 %v17661_v15  ;;  %v14853_v60 = vcombine.high %v1314_v50, %v1318_v51 }
 0x35e   : > { %2977 = vmatmul.mubr.bf16.vlgmr.msra.gmra.mrb[12].mxu0 %v17661_v15  ;;  %2904 = vmatpush1.bf16.msra.mxu1 %v14788_v56  ;;  %v14806_v15 = vcombine.low %v1267_v13, %v1271_v2  ;;  %v14844_v56 = vcombine.low %v1306_v42, %v1310_v43  ;;  %v14852_v13 = vcombine.low %v1314_v50, %v1318_v51  ;;  %v1363_v42 = vld [vmem:[#allocation11 + $0x798] sm:$0xff] }
 0x35f   : > { %2935 = vmatprep.mubr.bf16.mxu1 %v17665_v22  ;;  %2986 = vmatpush1.bf16.msra.mxu0 %v14790_v61  ;;  %v14855_v61 = vcombine.high %v1315_v54, %v1319_v55  ;;  %v14854_v2 = vcombine.low %v1315_v54, %v1319_v55  ;;  %v1367_v43 = vld [vmem:[#allocation11 + $0x7b8] sm:$0xff] }
 0x360   : > { %3017 = vmatprep.mubr.bf16.mxu0 %v17665_v22  ;;  %2905 = vmatprep.subr.bf16.mxu1 %v14797_v62  ;;  %v14812_v22 = vcombine.low %v1274_v7, %v1278_v8  ;;  %v1322_v62 = vld [vmem:[#allocation11 + $0x650] sm:$0xff]  ;;  %v1331_v7 = vld [vmem:[#allocation11 + $0x698] sm:$0xff]  ;;  %v14902_v55 = vcombine.low %v1363_v42, %v1367_v43 }
 0x361   : > { %2987 = vmatprep.subr.bf16.mxu0 %v14799_v1  ;;  %v1327_v1 = vld [vmem:[#allocation11 + $0x678] sm:$0xff]  ;;  %v14860_v9 = vcombine.low %v1322_v62, %v1326_v63 }
 0x362   : > { %2906 = vmatpush1.bf16.msra.mxu1 %v14796_v3  ;;  %v14861_v3 = vcombine.high %v1322_v62, %v1326_v63  ;;  %v1335_v8 = vld [vmem:[#allocation11 + $0x6b8] sm:$0xff]  ;;  %v14862_v10 = vcombine.low %v1323_v0, %v1327_v1  ;;  %v3059_v62 = vld [vmem:[#allocation14 + $0x8] sm:$0xff] }
 0x363   : > { %2988 = vmatpush1.bf16.msra.mxu0 %v14798_v4  ;;  %2907 = vmatprep.subr.bf16.mxu1 %v14805_v5  ;;  %v14863_v4 = vcombine.high %v1323_v0, %v1327_v1  ;;  %v1330_v5 = vld [vmem:[#allocation11 + $0x690] sm:$0xff]  ;;  %v14870_v52 = vcombine.low %v1331_v7, %v1335_v8  ;;  %v1371_v50 = vld [vmem:[#allocation11 + $0x7d8] sm:$0xff] }
 0x364   : > { %2989 = vmatprep.subr.bf16.mxu0 %v14807_v6  ;;  %v1334_v6 = vld [vmem:[#allocation11 + $0x6b0] sm:$0xff]  ;;  %v1375_v51 = vld [vmem:[#allocation11 + $0x7f8] sm:$0xff] }
 0x365   : > { %v14868_v18 = vcombine.low %v1330_v5, %v1334_v6  ;;  %v3071_v63 = vld [vmem:[#allocation14 + $0x68] sm:$0xff]  ;;  %v14910_v1 = vcombine.low %v1371_v50, %v1375_v51 }
 0x366   : > { %2908 = vmatpush1.bf16.msra.mxu1 %v14804_v11  ;;  %v14869_v11 = vcombine.high %v1330_v5, %v1334_v6  ;;  %v3083_v5 = vld [vmem:[#allocation14 + $0xc8] sm:$0xff] }
 0x367   : > { %2990 = vmatpush1.bf16.msra.mxu0 %v14806_v15  ;;  %2909 = vmatprep.subr.bf16.mxu1 %v14813_v12  ;;  %v14871_v15 = vcombine.high %v1331_v7, %v1335_v8  ;;  %v1338_v12 = vld [vmem:[#allocation11 + $0x6d0] sm:$0xff]  ;;  %v14914_v8 = vcombine.low %v3059_v62, %v3071_v63 }
 0x368   : > { %2991 = vmatprep.subr.bf16.mxu0 %v14815_v14  ;;  %v1342_v14 = vld [vmem:[#allocation11 + $0x6f0] sm:$0xff] }
 0x369   : > { %v14876_v25 = vcombine.low %v1338_v12, %v1342_v14  ;;  %v3095_v6 = vld [vmem:[#allocation14 + $0x128] sm:$0xff] }
 0x36a   : > { %2910 = vmatpush1.bf16.msra.mxu1 %v14812_v22  ;;  %v14877_v22 = vcombine.high %v1338_v12, %v1342_v14  ;;  %v3107_v12 = vld [vmem:[#allocation14 + $0x188] sm:$0xff] }
 0x36b   : > { %2992 = vmatpush1.bf16.msra.mxu0 %v14814_v19  ;;  %2911 = vmatprep.subr.bf16.mxu1 %v14821_v20  ;;  %v14879_v19 = vcombine.high %v1339_v16, %v1343_v17  ;;  %v1346_v20 = vld [vmem:[#allocation11 + $0x710] sm:$0xff]  ;;  %v14938_v17 = vcombine.low %v3083_v5, %v3095_v6 }
 0x36c   : > { %2993 = vmatprep.subr.bf16.mxu0 %v14823_v21  ;;  %v1350_v21 = vld [vmem:[#allocation11 + $0x730] sm:$0xff] }
 0x36d   : > { %v14884_v35 = vcombine.low %v1346_v20, %v1350_v21  ;;  %v3119_v14 = vld [vmem:[#allocation14 + $0x1e8] sm:$0xff] }
 0x36e   : > { %2912 = vmatpush1.bf16.msra.mxu1 %v14820_v27  ;;  %v14885_v27 = vcombine.high %v1346_v20, %v1350_v21  ;;  %v3131_v20 = vld [vmem:[#allocation14 + $0x248] sm:$0xff] }
 0x36f   : > { %2994 = vmatpush1.bf16.msra.mxu0 %v14822_v58  ;;  %2913 = vmatprep.subr.bf16.mxu1 %v14829_v30  ;;  %v14887_v58 = vcombine.high %v1347_v23, %v1351_v24  ;;  %v1354_v30 = vld [vmem:[#allocation11 + $0x750] sm:$0xff]  ;;  %v14962_v24 = vcombine.low %v3107_v12, %v3119_v14 }
 0x370   : > { %2995 = vmatprep.subr.bf16.mxu0 %v14831_v32  ;;  %v1358_v32 = vld [vmem:[#allocation11 + $0x770] sm:$0xff] }
 0x371   : > { %v14892_v44 = vcombine.low %v1354_v30, %v1358_v32  ;;  %v3143_v21 = vld [vmem:[#allocation14 + $0x2a8] sm:$0xff] }
 0x372   : > { %2914 = vmatpush1.bf16.msra.mxu1 %v14828_v37  ;;  %v14893_v37 = vcombine.high %v1354_v30, %v1358_v32  ;;  %v3167_v30 = vld [vmem:[#allocation14 + $0x368] sm:$0xff] }
 0x373   : > { %2996 = vmatpush1.bf16.msra.mxu0 %v14830_v38  ;;  %2915 = vmatprep.subr.bf16.mxu1 %v14837_v39  ;;  %v14895_v38 = vcombine.high %v1355_v33, %v1359_v34  ;;  %v1362_v39 = vld [vmem:[#allocation11 + $0x790] sm:$0xff]  ;;  %v14986_v33 = vcombine.low %v3131_v20, %v3143_v21 }
 0x374   : > { %2997 = vmatprep.subr.bf16.mxu0 %v14839_v41  ;;  %v1366_v41 = vld [vmem:[#allocation11 + $0x7b0] sm:$0xff] }
 0x375   : > { %v14900_v54 = vcombine.low %v1362_v39, %v1366_v41 }
 0x376   : > { %2916 = vmatpush1.bf16.msra.mxu1 %v14836_v46  ;;  %v14901_v46 = vcombine.high %v1362_v39, %v1366_v41  ;;  %v3191_v39 = vld [vmem:[#allocation14 + $0x428] sm:$0xff] }
 0x377   : > { %2998 = vmatpush1.bf16.msra.mxu0 %v14838_v47  ;;  %2917 = vmatprep.subr.bf16.mxu1 %v14845_v48  ;;  %v14903_v47 = vcombine.high %v1363_v42, %v1367_v43  ;;  %v1370_v48 = vld [vmem:[#allocation11 + $0x7d0] sm:$0xff] }
 0x378   : > { %2999 = vmatprep.subr.bf16.mxu0 %v14847_v49  ;;  %v1374_v49 = vld [vmem:[#allocation11 + $0x7f0] sm:$0xff] }
 0x379   : > { %v14908_v0 = vcombine.low %v1370_v48, %v1374_v49 }
 0x37a   : > { %2918 = vmatpush1.bf16.msra.mxu1 %v14844_v56  ;;  %v14909_v56 = vcombine.high %v1370_v48, %v1374_v49  ;;  %v3215_v48 = vld [vmem:[#allocation14 + $0x4e8] sm:$0xff] }
 0x37b   : > { %3000 = vmatpush1.bf16.msra.mxu0 %v14846_v57  ;;  %2919 = vmatprep.subr.bf16.mxu1 %v14853_v60  ;;  %v14911_v57 = vcombine.high %v1371_v50, %v1375_v51  ;;  %v3058_v60 = vld [vmem:[#allocation14] sm:$0xff] }
 0x37c   : > { %3001 = vmatprep.subr.bf16.mxu0 %v14855_v61  ;;  %v3070_v61 = vld [vmem:[#allocation14 + $0x60] sm:$0xff] }
 0x37d   : > { %v14912_v7 = vcombine.low %v3058_v60, %v3070_v61 }
 0x37e   : > { %2920 = vmatpush1.bf16.msra.mxu1 %v14852_v13  ;;  %v14913_v13 = vcombine.high %v3058_v60, %v3070_v61  ;;  %v3239_v60 = vld [vmem:[#allocation14 + $0x5a8] sm:$0xff] }
 0x37f   : > { %3002 = vmatpush1.bf16.msra.mxu0 %v14854_v2  ;;  %2921 = vmatprep.subr.bf16.mxu1 %v14861_v3  ;;  %v14915_v2 = vcombine.high %v3059_v62, %v3071_v63  ;;  %v3082_v3 = vld [vmem:[#allocation14 + $0xc0] sm:$0xff] }
 0x380   : > { %3003 = vmatprep.subr.bf16.mxu0 %v14863_v4  ;;  %v3094_v4 = vld [vmem:[#allocation14 + $0x120] sm:$0xff] }
 0x381   : > { %v14936_v16 = vcombine.low %v3082_v3, %v3094_v4 }
 0x382   : > { %2922 = vmatpush1.bf16.msra.mxu1 %v14860_v9  ;;  %v14937_v9 = vcombine.high %v3082_v3, %v3094_v4  ;;  %v3263_v3 = vld [vmem:[#allocation14 + $0x668] sm:$0xff] }
 0x383   : > { %3004 = vmatpush1.bf16.msra.mxu0 %v14862_v10  ;;  %2923 = vmatprep.subr.bf16.mxu1 %v14869_v11  ;;  %v14939_v10 = vcombine.high %v3083_v5, %v3095_v6  ;;  %v3106_v11 = vld [vmem:[#allocation14 + $0x180] sm:$0xff] }
 0x384   : > { %3005 = vmatprep.subr.bf16.mxu0 %v14871_v15  ;;  %v3118_v15 = vld [vmem:[#allocation14 + $0x1e0] sm:$0xff] }
 0x385   : > { %v14960_v23 = vcombine.low %v3106_v11, %v3118_v15 }
 0x386   : > { %2924 = vmatpush1.bf16.msra.mxu1 %v14868_v18  ;;  %v14961_v18 = vcombine.high %v3106_v11, %v3118_v15  ;;  %v3287_v11 = vld [vmem:[#allocation14 + $0x728] sm:$0xff] }
 0x387   : > { %3006 = vmatpush1.bf16.msra.mxu0 %v14870_v52  ;;  %2925 = vmatprep.subr.bf16.mxu1 %v14877_v22  ;;  %v14963_v52 = vcombine.high %v3107_v12, %v3119_v14  ;;  %v3130_v22 = vld [vmem:[#allocation14 + $0x240] sm:$0xff] }
 0x388   : > { %3007 = vmatprep.subr.bf16.mxu0 %v14879_v19  ;;  %v3142_v19 = vld [vmem:[#allocation14 + $0x2a0] sm:$0xff] }
 0x389   : > { %v14984_v32 = vcombine.low %v3130_v22, %v3142_v19 }
 0x38a   : > { %2926 = vmatpush1.bf16.msra.mxu1 %v14876_v25  ;;  %v14985_v25 = vcombine.high %v3130_v22, %v3142_v19  ;;  %v3311_v22 = vld [vmem:[#allocation14 + $0x7e8] sm:$0xff] }
 0x38b   : > { %3008 = vmatpush1.bf16.msra.mxu0 %v14878_v26  ;;  %2927 = vmatprep.subr.bf16.mxu1 %v14885_v27  ;;  %v3154_v26 = vld [vmem:[#allocation14 + $0x300] sm:$0xff] }
 0x38c   : > { %3009 = vmatprep.subr.bf16.mxu0 %v14887_v58  ;;  %v3166_v27 = vld [vmem:[#allocation14 + $0x360] sm:$0xff]  ;;  %v3155_v58 = vld [vmem:[#allocation14 + $0x308] sm:$0xff] }
 0x38d   : > { %v15009_v34 = vcombine.high %v3154_v26, %v3166_v27  ;;  %v15008_v41 = vcombine.low %v3154_v26, %v3166_v27  ;;  %v15010_v42 = vcombine.low %v3155_v58, %v3167_v30  ;;  %v3335_v26 = vld [vmem:[#allocation14 + $0x8a8] sm:$0xff] }
 0x38e   : > { %2928 = vmatpush1.bf16.msra.mxu1 %v14884_v35  ;;  %v15011_v35 = vcombine.high %v3155_v58, %v3167_v30 }
 0x38f   : > { %3010 = vmatpush1.bf16.msra.mxu0 %v14886_v36  ;;  %2929 = vmatprep.subr.bf16.mxu1 %v14893_v37  ;;  %v3178_v36 = vld [vmem:[#allocation14 + $0x3c0] sm:$0xff] }
 0x390   : > { %3011 = vmatprep.subr.bf16.mxu0 %v14895_v38  ;;  %v3190_v37 = vld [vmem:[#allocation14 + $0x420] sm:$0xff]  ;;  %v3179_v38 = vld [vmem:[#allocation14 + $0x3c8] sm:$0xff] }
 0x391   : > { %v15033_v43 = vcombine.high %v3178_v36, %v3190_v37  ;;  %v15032_v49 = vcombine.low %v3178_v36, %v3190_v37  ;;  %v15034_v50 = vcombine.low %v3179_v38, %v3191_v39  ;;  %v3359_v36 = vld [vmem:[#allocation14 + $0x968] sm:$0xff] }
 0x392   : > { %2930 = vmatpush1.bf16.msra.mxu1 %v14892_v44  ;;  %v15035_v44 = vcombine.high %v3179_v38, %v3191_v39 }
 0x393   : > { %3012 = vmatpush1.bf16.msra.mxu0 %v14894_v45  ;;  %2931 = vmatprep.subr.bf16.mxu1 %v14901_v46  ;;  %v3202_v45 = vld [vmem:[#allocation14 + $0x480] sm:$0xff] }
 0x394   : > { %3013 = vmatprep.subr.bf16.mxu0 %v14903_v47  ;;  %v3214_v46 = vld [vmem:[#allocation14 + $0x4e0] sm:$0xff]  ;;  %v3203_v47 = vld [vmem:[#allocation14 + $0x488] sm:$0xff] }
 0x395   : > { %v15057_v51 = vcombine.high %v3202_v45, %v3214_v46  ;;  %v15056_v61 = vcombine.low %v3202_v45, %v3214_v46  ;;  %v15058_v62 = vcombine.low %v3203_v47, %v3215_v48  ;;  %v3383_v45 = vld [vmem:[#allocation14 + $0xa28] sm:$0xff] }
 0x396   : > { %2932 = vmatpush1.bf16.msra.mxu1 %v14900_v54  ;;  %v15059_v54 = vcombine.high %v3203_v47, %v3215_v48 }
 0x397   : > { %3014 = vmatpush1.bf16.msra.mxu0 %v14902_v55  ;;  %2933 = vmatprep.subr.bf16.mxu1 %v14909_v56  ;;  %v3226_v55 = vld [vmem:[#allocation14 + $0x540] sm:$0xff] }
 0x398   : > { %3015 = vmatprep.subr.bf16.mxu0 %v14911_v57  ;;  %v3238_v56 = vld [vmem:[#allocation14 + $0x5a0] sm:$0xff]  ;;  %v3227_v57 = vld [vmem:[#allocation14 + $0x548] sm:$0xff] }
 0x399   : > { %v15081_v63 = vcombine.high %v3226_v55, %v3238_v56  ;;  %v15080_v4 = vcombine.low %v3226_v55, %v3238_v56  ;;  %v15082_v5 = vcombine.low %v3227_v57, %v3239_v60  ;;  %v3407_v55 = vld [vmem:[#allocation14 + $0xae8] sm:$0xff] }
 0x39a   : > { %2934 = vmatpush1.bf16.msra.mxu1 %v14908_v0  ;;  %v15083_v0 = vcombine.high %v3227_v57, %v3239_v60 }
 0x39b   : > { %3016 = vmatpush1.bf16.msra.mxu0 %v14910_v1  ;;  %12400 = vmatprep.subr.bf16.mxu1 %v14913_v13  ;;  %v3250_v1 = vld [vmem:[#allocation14 + $0x600] sm:$0xff] }
 0x39c   : > { %12564 = vmatprep.subr.bf16.mxu0 %v14915_v2  ;;  %v3262_v13 = vld [vmem:[#allocation14 + $0x660] sm:$0xff]  ;;  %v3251_v2 = vld [vmem:[#allocation14 + $0x608] sm:$0xff] }
 0x39d   : > { %2936 = vmatmul.mubr.bf16.vlgmr.msra.gmra.mrb[8].mxu1 %v17677_v40  ;;  %v15105_v6 = vcombine.high %v3250_v1, %v3262_v13  ;;  %v15104_v15 = vcombine.low %v3250_v1, %v3262_v13  ;;  %v15106_v12 = vcombine.low %v3251_v2, %v3263_v3  ;;  %v3431_v1 = vld [vmem:[#allocation14 + $0xba8] sm:$0xff] }
 0x39e   : > { %3018 = vmatmul.mubr.bf16.vlgmr.msra.gmra.mrb[12].mxu0 %v17677_v40  ;;  %12401 = vmatpush1.bf16.msra.mxu1 %v14912_v7  ;;  %v14987_v40 = vcombine.high %v3131_v20, %v3143_v21  ;;  %v15107_v7 = vcombine.high %v3251_v2, %v3263_v3 }
 0x39f   : > { %12565 = vmatpush1.bf16.msra.mxu0 %v14914_v8  ;;  %12402 = vmatprep.subr.bf16.mxu1 %v14937_v9  ;;  %v3274_v8 = vld [vmem:[#allocation14 + $0x6c0] sm:$0xff] }
 0x3a0   : > { %12566 = vmatprep.subr.bf16.mxu0 %v14939_v10  ;;  %v3286_v9 = vld [vmem:[#allocation14 + $0x720] sm:$0xff]  ;;  %v3275_v10 = vld [vmem:[#allocation14 + $0x6c8] sm:$0xff] }
 0x3a1   : > { %v15129_v14 = vcombine.high %v3274_v8, %v3286_v9  ;;  %v15128_v19 = vcombine.low %v3274_v8, %v3286_v9  ;;  %v15130_v20 = vcombine.low %v3275_v10, %v3287_v11  ;;  %v3455_v8 = vld [vmem:[#allocation14 + $0xc68] sm:$0xff] }
 0x3a2   : > { %12403 = vmatpush1.bf16.msra.mxu1 %v14936_v16  ;;  %v15131_v16 = vcombine.high %v3275_v10, %v3287_v11 }
 0x3a3   : > { %12567 = vmatpush1.bf16.msra.mxu0 %v14938_v17  ;;  %12404 = vmatprep.subr.bf16.mxu1 %v14961_v18  ;;  %v3298_v17 = vld [vmem:[#allocation14 + $0x780] sm:$0xff] }
 0x3a4   : > { %12568 = vmatprep.subr.bf16.mxu0 %v14963_v52  ;;  %v3310_v18 = vld [vmem:[#allocation14 + $0x7e0] sm:$0xff]  ;;  %v3299_v52 = vld [vmem:[#allocation14 + $0x788] sm:$0xff] }
 0x3a5   : > { %v15153_v21 = vcombine.high %v3298_v17, %v3310_v18  ;;  %v15152_v27 = vcombine.low %v3298_v17, %v3310_v18  ;;  %v15154_v58 = vcombine.low %v3299_v52, %v3311_v22 }
 0x3a6   : > { %12405 = vmatpush1.bf16.msra.mxu1 %v14960_v23  ;;  %v15155_v23 = vcombine.high %v3299_v52, %v3311_v22 }
 0x3a7   : > { %12569 = vmatpush1.bf16.msra.mxu0 %v14962_v24  ;;  %12406 = vmatprep.subr.bf16.mxu1 %v14985_v25  ;;  %v3322_v24 = vld [vmem:[#allocation14 + $0x840] sm:$0xff] }
 0x3a8   : > { %12570 = vmatprep.subr.bf16.mxu0 %v14987_v40  ;;  %v3334_v25 = vld [vmem:[#allocation14 + $0x8a0] sm:$0xff]  ;;  %v3323_v40 = vld [vmem:[#allocation14 + $0x848] sm:$0xff] }
 0x3a9   : > { %v15177_v30 = vcombine.high %v3322_v24, %v3334_v25  ;;  %v15176_v37 = vcombine.low %v3322_v24, %v3334_v25  ;;  %v15178_v38 = vcombine.low %v3323_v40, %v3335_v26 }
 0x3aa   : > { %12407 = vmatpush1.bf16.msra.mxu1 %v14984_v32  ;;  %v15179_v32 = vcombine.high %v3323_v40, %v3335_v26 }
 0x3ab   : > { %12571 = vmatpush1.bf16.msra.mxu0 %v14986_v33  ;;  %12408 = vmatprep.subr.bf16.mxu1 %v15009_v34  ;;  %v3346_v33 = vld [vmem:[#allocation14 + $0x900] sm:$0xff] }
 0x3ac   : > { %12572 = vmatprep.subr.bf16.mxu0 %v15011_v35  ;;  %v3358_v34 = vld [vmem:[#allocation14 + $0x960] sm:$0xff]  ;;  %v3347_v35 = vld [vmem:[#allocation14 + $0x908] sm:$0xff] }
 0x3ad   : > { %v15201_v39 = vcombine.high %v3346_v33, %v3358_v34  ;;  %v15200_v46 = vcombine.low %v3346_v33, %v3358_v34  ;;  %v15202_v47 = vcombine.low %v3347_v35, %v3359_v36  ;;  %v3466_v33 = vld [vmem:[#allocation14 + $0xcc0] sm:$0xff] }
 0x3ae   : > { %12409 = vmatpush1.bf16.msra.mxu1 %v15008_v41  ;;  %v15203_v41 = vcombine.high %v3347_v35, %v3359_v36  ;;  %v3478_v35 = vld [vmem:[#allocation14 + $0xd20] sm:$0xff]  ;;  %v3467_v36 = vld [vmem:[#allocation14 + $0xcc8] sm:$0xff] }
 0x3af   : > { %12573 = vmatpush1.bf16.msra.mxu0 %v15010_v42  ;;  %12410 = vmatprep.subr.bf16.mxu1 %v15033_v43  ;;  %v3370_v42 = vld [vmem:[#allocation14 + $0x9c0] sm:$0xff] }
 0x3b0   : > { %12574 = vmatprep.subr.bf16.mxu0 %v15035_v44  ;;  %v3382_v43 = vld [vmem:[#allocation14 + $0xa20] sm:$0xff]  ;;  %v3371_v44 = vld [vmem:[#allocation14 + $0x9c8] sm:$0xff] }
 0x3b1   : > { %v15225_v48 = vcombine.high %v3370_v42, %v3382_v43  ;;  %v15224_v56 = vcombine.low %v3370_v42, %v3382_v43  ;;  %v15226_v57 = vcombine.low %v3371_v44, %v3383_v45 }
 0x3b2   : > { %12411 = vmatpush1.bf16.msra.mxu1 %v15032_v49  ;;  %v15227_v49 = vcombine.high %v3371_v44, %v3383_v45  ;;  %v3490_v44 = vld [vmem:[#allocation14 + $0xd80] sm:$0xff]  ;;  %v15321_v45 = vcombine.high %v3466_v33, %v3478_v35 }
 0x3b3   : > { %12575 = vmatpush1.bf16.msra.mxu0 %v15034_v50  ;;  %12412 = vmatprep.subr.bf16.mxu1 %v15057_v51  ;;  %v3394_v50 = vld [vmem:[#allocation14 + $0xa80] sm:$0xff] }
 0x3b4   : > { %12576 = vmatprep.subr.bf16.mxu0 %v15059_v54  ;;  %v3406_v51 = vld [vmem:[#allocation14 + $0xae0] sm:$0xff]  ;;  %v3395_v54 = vld [vmem:[#allocation14 + $0xa88] sm:$0xff] }
 0x3b5   : > { %v15249_v60 = vcombine.high %v3394_v50, %v3406_v51  ;;  %v15248_v13 = vcombine.low %v3394_v50, %v3406_v51  ;;  %v15250_v2 = vcombine.low %v3395_v54, %v3407_v55  ;;  %v15320_v51 = vcombine.low %v3466_v33, %v3478_v35 }
 0x3b6   : > { %12413 = vmatpush1.bf16.msra.mxu1 %v15056_v61  ;;  %v15251_v61 = vcombine.high %v3395_v54, %v3407_v55 }
 0x3b7   : > { %12577 = vmatpush1.bf16.msra.mxu0 %v15058_v62  ;;  %12414 = vmatprep.subr.bf16.mxu1 %v15081_v63  ;;  %v3418_v62 = vld [vmem:[#allocation14 + $0xb40] sm:$0xff] }
 0x3b8   : > { %12578 = vmatprep.subr.bf16.mxu0 %v15083_v0  ;;  %v3430_v63 = vld [vmem:[#allocation14 + $0xba0] sm:$0xff]  ;;  %v3419_v0 = vld [vmem:[#allocation14 + $0xb48] sm:$0xff] }
 0x3b9   : > { %v15273_v3 = vcombine.high %v3418_v62, %v3430_v63  ;;  %v15272_v9 = vcombine.low %v3418_v62, %v3430_v63  ;;  %v15274_v10 = vcombine.low %v3419_v0, %v3431_v1  ;;  %v3527_v62 = vld [vmem:[#allocation14 + $0xea8] sm:$0xff] }
 0x3ba   : > { %12415 = vmatpush1.bf16.msra.mxu1 %v15080_v4  ;;  %v15275_v4 = vcombine.high %v3419_v0, %v3431_v1 }
 0x3bb   : > { %12579 = vmatpush1.bf16.msra.mxu0 %v15082_v5  ;;  %12416 = vmatprep.subr.bf16.mxu1 %v15105_v6  ;;  %v3442_v5 = vld [vmem:[#allocation14 + $0xc00] sm:$0xff] }
 0x3bc   : > { %12580 = vmatprep.subr.bf16.mxu0 %v15107_v7  ;;  %v3454_v6 = vld [vmem:[#allocation14 + $0xc60] sm:$0xff]  ;;  %v3443_v7 = vld [vmem:[#allocation14 + $0xc08] sm:$0xff] }
 0x3bd   : > { %v15297_v11 = vcombine.high %v3442_v5, %v3454_v6  ;;  %v15298_v42 = vcombine.low %v3443_v7, %v3455_v8 }
 0x3be   : > { %12417 = vmatpush1.bf16.msra.mxu1 %v15104_v15  ;;  %v15299_v15 = vcombine.high %v3443_v7, %v3455_v8 }
 0x3bf   : > { %12581 = vmatpush1.bf16.msra.mxu0 %v15106_v12  ;;  %12418 = vmatprep.subr.bf16.mxu1 %v15129_v14  ;;  %v17689_v12 = vld [vmem:[#allocation13] sm:$0xff] }
 0x3c0   : > { %12582 = vmatprep.subr.bf16.mxu0 %v15131_v16  ;;  %v1381_v14 = vrot.slane %v17689_v12, %v17639_v29  ;;  %v1385_v16 = vrot.slane %v17689_v12, %v17642_v31  ;;  %v1393_v17 = vrot.slane %v17689_v12, %v17649_v53 }
 0x3c2   : > { %12419 = vmatpush1.bf16.msra.mxu1 %v15128_v19 }
 0x3c3   : > { %12583 = vmatpush1.bf16.msra.mxu0 %v15130_v20  ;;  %12420 = vmatprep.subr.bf16.mxu1 %v15153_v21 }
 0x3c4   : > { %12584 = vmatprep.subr.bf16.mxu0 %v15155_v23 }
 0x3c6   : > { %12421 = vmatpush1.bf16.msra.mxu1 %v15152_v27 }
 0x3c7   : > { %12585 = vmatpush1.bf16.msra.mxu0 %v15154_v58  ;;  %12422 = vmatprep.subr.bf16.mxu1 %v15177_v30 }
 0x3c8   : > { %12586 = vmatprep.subr.bf16.mxu0 %v15179_v32 }
 0x3ca   : > { %12423 = vmatpush1.bf16.msra.mxu1 %v15176_v37  ;;  %v3479_v37 = vld [vmem:[#allocation14 + $0xd28] sm:$0xff] }
 0x3cb   : > { %12587 = vmatpush1.bf16.msra.mxu0 %v15178_v38  ;;  %12424 = vmatprep.subr.bf16.mxu1 %v15201_v39  ;;  %v15322_v54 = vcombine.low %v3467_v36, %v3479_v37 }
 0x3cc   : > { %12588 = vmatprep.subr.bf16.mxu0 %v15203_v41  ;;  %v15296_v41 = vcombine.low %v3442_v5, %v3454_v6  ;;  %v3551_v5 = vld [vmem:[#allocation14 + $0xf68] sm:$0xff] }
 0x3ce   : > { %12425 = vmatpush1.bf16.msra.mxu1 %v15200_v46  ;;  %v15323_v46 = vcombine.high %v3467_v36, %v3479_v37  ;;  %v3634_v37 = vld [vmem:[#allocation14 + $0x1200] sm:$0xff] }
 0x3cf   : > { %12589 = vmatpush1.bf16.msra.mxu0 %v15202_v47  ;;  %12426 = vmatprep.subr.bf16.mxu1 %v15225_v48  ;;  %v3502_v47 = vld [vmem:[#allocation14 + $0xde0] sm:$0xff]  ;;  %v3491_v48 = vld [vmem:[#allocation14 + $0xd88] sm:$0xff] }
 0x3d0   : > { %12590 = vmatprep.subr.bf16.mxu0 %v15227_v49  ;;  %v3503_v49 = vld [vmem:[#allocation14 + $0xde8] sm:$0xff]  ;;  %v15345_v55 = vcombine.high %v3490_v44, %v3502_v47  ;;  %v15344_v63 = vcombine.low %v3490_v44, %v3502_v47 }
 0x3d1   : > { %v15346_v0 = vcombine.low %v3491_v48, %v3503_v49 }
 0x3d2   : > { %12427 = vmatpush1.bf16.msra.mxu1 %v15224_v56  ;;  %v15347_v56 = vcombine.high %v3491_v48, %v3503_v49  ;;  %v3658_v48 = vld [vmem:[#allocation14 + $0x12c0] sm:$0xff] }
 0x3d3   : > { %12591 = vmatpush1.bf16.msra.mxu0 %v15226_v57  ;;  %12428 = vmatprep.subr.bf16.mxu1 %v15249_v60  ;;  %v3514_v57 = vld [vmem:[#allocation14 + $0xe40] sm:$0xff] }
 0x3d4   : > { %12592 = vmatprep.subr.bf16.mxu0 %v15251_v61  ;;  %v3526_v60 = vld [vmem:[#allocation14 + $0xea0] sm:$0xff]  ;;  %v3515_v61 = vld [vmem:[#allocation14 + $0xe48] sm:$0xff] }
 0x3d5   : > { %v15369_v1 = vcombine.high %v3514_v57, %v3526_v60  ;;  %v15368_v6 = vcombine.low %v3514_v57, %v3526_v60  ;;  %v15370_v7 = vcombine.low %v3515_v61, %v3527_v62  ;;  %v3670_v49 = vld [vmem:[#allocation14 + $0x1320] sm:$0xff] }
 0x3d6   : > { %12429 = vmatpush1.bf16.msra.mxu1 %v15248_v13  ;;  %v15371_v13 = vcombine.high %v3515_v61, %v3527_v62  ;;  %v15513_v57 = vcombine.high %v3658_v48, %v3670_v49  ;;  %v3682_v61 = vld [vmem:[#allocation14 + $0x1380] sm:$0xff] }
 0x3d7   : > { %12593 = vmatpush1.bf16.msra.mxu0 %v15250_v2  ;;  %12430 = vmatprep.subr.bf16.mxu1 %v15273_v3  ;;  %v3538_v2 = vld [vmem:[#allocation14 + $0xf00] sm:$0xff] }
 0x3d8   : > { %12594 = vmatprep.subr.bf16.mxu0 %v15275_v4  ;;  %v3550_v3 = vld [vmem:[#allocation14 + $0xf60] sm:$0xff]  ;;  %v3539_v4 = vld [vmem:[#allocation14 + $0xf08] sm:$0xff] }
 0x3d9   : > { %v15393_v8 = vcombine.high %v3538_v2, %v3550_v3  ;;  %v3694_v62 = vld [vmem:[#allocation14 + $0x13e0] sm:$0xff] }
 0x3da   : > { %12431 = vmatpush1.bf16.msra.mxu1 %v15272_v9  ;;  %v15395_v9 = vcombine.high %v3539_v4, %v3551_v5 }
 0x3db   : > { %12595 = vmatpush1.bf16.msra.mxu0 %v15274_v10  ;;  %12441 = vmatprep.subr.bf16.mxu1 %v15297_v11  ;;  %v3562_v10 = vld [vmem:[#allocation14 + $0xfc0] sm:$0xff] }
 0x3dc   : > { %12605 = vmatprep.subr.bf16.mxu0 %v15299_v15  ;;  %v3574_v11 = vld [vmem:[#allocation14 + $0x1020] sm:$0xff]  ;;  %v3563_v15 = vld [vmem:[#allocation14 + $0xfc8] sm:$0xff] }
 0x3f0   : > { %v2773_v18 = vpop.f32.mrb[4].mxu1  ;;  %v17697_v52 = vpop.f32.mrb[8].mxu0 }
 0x3f1   : > { %v16451_v22 = vadd.f32 %v2773_v18, %v1381_v14  ;;  %v2775_v19 = vpop.f32.mrb[5].mxu1  ;;  %v2857_v20 = vpop.f32.mrb[9].mxu0  ;;  %v3575_v14 = vld [vmem:[#allocation14 + $0x1028] sm:$0xff]  ;;  %v15417_v18 = vcombine.high %v3562_v10, %v3574_v11 }
 0x3f2   : > { %v16452_v21 = vadd.f32 %v2775_v19, %v1385_v16  ;;  %v16454_v23 = vadd.f32 %v2857_v20, %v1393_v17  ;;  %v2777_v24 = vpop.f32.mrb[6].mxu1  ;;  %v2859_v25 = vpop.f32.mrb[10].mxu0  ;;  %v15392_v16 = vcombine.low %v3538_v2, %v3550_v3  ;;  %v15394_v17 = vcombine.low %v3539_v4, %v3551_v5  ;;  %v3586_v19 = vld [vmem:[#allocation14 + $0x1080] sm:$0xff] }
 0x3f3   : > { %vm3026_vm6 = vcmp.gt.f32.partialorder %v16451_v22, 0.0  ;;  %v3034_v40 = vmul.f32 0.2, %v16451_v22  ;;  %v2778_v30 = vpop.f32.mrb[7].mxu1  ;;  %v2860_v32 = vpop.f32.mrb[11].mxu0  ;;  %v3598_v20 = vld [vmem:[#allocation14 + $0x10e0] sm:$0xff]  ;;  %v15416_v24 = vcombine.low %v3562_v10, %v3574_v11  ;;  %v15418_v25 = vcombine.low %v3563_v15, %v3575_v14 }
 0x3f4   : > { %vm3027_vm7 = vcmp.gt.f32.partialorder %v16452_v21, 0.0  ;;  %v3035_v26 = vmul.f32 0.2, %v16452_v21  ;;  %vm3029_vm8 = vcmp.gt.f32.partialorder %v16454_v23, 0.0  ;;  %v3037_v27 = vmul.f32 0.2, %v16454_v23 }
 0x3f5   : > { %v3042_v58 = vsel %vm3026_vm6, %v16451_v22, %v3034_v40  ;;  %v15419_v22 = vcombine.high %v3563_v15, %v3575_v14  ;;  %v15441_v40 = vcombine.high %v3586_v19, %v3598_v20  ;;  %v3611_v30 = vld [vmem:[#allocation14 + $0x1148] sm:$0xff]  ;;  %v15440_v33 = vcombine.low %v3586_v19, %v3598_v20  ;;  %v3706_v4 = vld [vmem:[#allocation14 + $0x1440] sm:$0xff] }
 0x3f6   : > { %v3043_v34 = vsel %vm3027_vm7, %v16452_v21, %v3035_v26  ;;  %v3045_v39 = vsel %vm3029_vm8, %v16454_v23, %v3037_v27  ;;  %v17701_v43 = vpack.c.bf16 %v3042_v58, %v3042_v58  ;;  %v3587_v21 = vld [vmem:[#allocation14 + $0x1088] sm:$0xff]  ;;  %v3610_v27 = vld [vmem:[#allocation14 + $0x1140] sm:$0xff]  ;;  %v15537_v2 = vcombine.high %v3682_v61, %v3694_v62 }
 0x3f7   : > { %v17699_v38 = vpack.c.bf16 %v3043_v34, %v3043_v34  ;;  %v17705_v50 = vpack.c.bf16 %v3045_v39, %v3045_v39  ;;  %v3599_v23 = vld [vmem:[#allocation14 + $0x10e8] sm:$0xff]  ;;  %v3622_v58 = vld [vmem:[#allocation14 + $0x11a0] sm:$0xff] }
 0x3f8   : > { %v15443_v26 = vcombine.high %v3587_v21, %v3599_v23  ;;  %v3623_v32 = vld [vmem:[#allocation14 + $0x11a8] sm:$0xff]  ;;  %v15442_v34 = vcombine.low %v3587_v21, %v3599_v23  ;;  %v15465_v35 = vcombine.high %v3610_v27, %v3622_v58  ;;  %v3646_v39 = vld [vmem:[#allocation14 + $0x1260] sm:$0xff]  ;;  %v15464_v44 = vcombine.low %v3610_v27, %v3622_v58 }
 0x3f9   : > { %12432 = vmatprep.mubr.bf16.mxu1 %v17699_v38  ;;  %12596 = vmatprep.mubr.bf16.mxu0 %v17699_v38  ;;  %v15467_v36 = vcombine.high %v3611_v30, %v3623_v32  ;;  %v3718_v5 = vld [vmem:[#allocation14 + $0x14a0] sm:$0xff] }
 0x3fa   : > { %12433 = vmatmul.mubr.bf16.vlgmr.msra.gmra.mrb[12].mxu1 %v17701_v43  ;;  %12597 = vmatmul.mubr.bf16.vlgmr.msra.gmra.mrb[16].mxu0 %v17701_v43  ;;  %v15561_v10 = vcombine.high %v3706_v4, %v3718_v5  ;;  %v3730_v15 = vld [vmem:[#allocation14 + $0x1500] sm:$0xff] }
 0x3fb   : > { %12442 = vmatpush1.bf16.msra.mxu1 %v15296_v41  ;;  %12606 = vmatpush1.bf16.msra.mxu0 %v15298_v42  ;;  %v3635_v41 = vld [vmem:[#allocation14 + $0x1208] sm:$0xff]  ;;  %v3742_v14 = vld [vmem:[#allocation14 + $0x1560] sm:$0xff] }
 0x3fc   : > { %12473 = vmatprep.mubr.bf16.mxu1 %v17705_v50  ;;  %12637 = vmatprep.mubr.bf16.mxu0 %v17705_v50  ;;  %v3647_v42 = vld [vmem:[#allocation14 + $0x1268] sm:$0xff]  ;;  %v15585_v19 = vcombine.high %v3730_v15, %v3742_v14  ;;  %v3754_v21 = vld [vmem:[#allocation14 + $0x15c0] sm:$0xff] }
 0x3fd   : > { %12443 = vmatprep.subr.bf16.mxu1 %v15321_v45  ;;  %12607 = vmatprep.subr.bf16.mxu0 %v15323_v46  ;;  %v15466_v45 = vcombine.low %v3611_v30, %v3623_v32  ;;  %v15489_v46 = vcombine.high %v3634_v37, %v3646_v39  ;;  %v15491_v47 = vcombine.high %v3635_v41, %v3647_v42  ;;  %v3766_v23 = vld [vmem:[#allocation14 + $0x1620] sm:$0xff] }
 0x3fe   : > { %v15609_v27 = vcombine.high %v3754_v21, %v3766_v23  ;;  %v3778_v30 = vld [vmem:[#allocation14 + $0x1680] sm:$0xff]  ;;  %v1389_v32 = vrot.slane %v17689_v12, %v17672_v59 }
 0x3ff   : > { %12444 = vmatpush1.bf16.msra.mxu1 %v15320_v51  ;;  %12608 = vmatpush1.bf16.msra.mxu0 %v15322_v54  ;;  %v3659_v51 = vld [vmem:[#allocation14 + $0x12c8] sm:$0xff] }
 0x400   : > { %12445 = vmatprep.subr.bf16.mxu1 %v15345_v55  ;;  %12609 = vmatprep.subr.bf16.mxu0 %v15347_v56  ;;  %v3671_v54 = vld [vmem:[#allocation14 + $0x1328] sm:$0xff]  ;;  %v15488_v55 = vcombine.low %v3634_v37, %v3646_v39  ;;  %v15490_v56 = vcombine.low %v3635_v41, %v3647_v42  ;;  %v3802_v42 = vld [vmem:[#allocation14 + $0x1740] sm:$0xff] }
 0x401   : > { %v15515_v60 = vcombine.high %v3659_v51, %v3671_v54 }
 0x403   : > { %12446 = vmatpush1.bf16.msra.mxu1 %v15344_v63  ;;  %12610 = vmatpush1.bf16.msra.mxu0 %v15346_v0  ;;  %v3683_v63 = vld [vmem:[#allocation14 + $0x1388] sm:$0xff] }
 0x404   : > { %12447 = vmatprep.subr.bf16.mxu1 %v15369_v1  ;;  %12611 = vmatprep.subr.bf16.mxu0 %v15371_v13  ;;  %v3695_v0 = vld [vmem:[#allocation14 + $0x13e8] sm:$0xff]  ;;  %v15512_v1 = vcombine.low %v3658_v48, %v3670_v49  ;;  %v15514_v13 = vcombine.low %v3659_v51, %v3671_v54 }
 0x405   : > { %v15539_v3 = vcombine.high %v3683_v63, %v3695_v0 }
 0x407   : > { %12448 = vmatpush1.bf16.msra.mxu1 %v15368_v6  ;;  %12612 = vmatpush1.bf16.msra.mxu0 %v15370_v7  ;;  %v3707_v6 = vld [vmem:[#allocation14 + $0x1448] sm:$0xff] }
 0x408   : > { %12449 = vmatprep.subr.bf16.mxu1 %v15393_v8  ;;  %12613 = vmatprep.subr.bf16.mxu0 %v15395_v9  ;;  %v3719_v7 = vld [vmem:[#allocation14 + $0x14a8] sm:$0xff]  ;;  %v15536_v8 = vcombine.low %v3682_v61, %v3694_v62  ;;  %v15538_v9 = vcombine.low %v3683_v63, %v3695_v0 }
 0x409   : > { %v15563_v11 = vcombine.high %v3707_v6, %v3719_v7  ;;  %v3839_v61 = vld [vmem:[#allocation14 + $0x1868] sm:$0xff] }
 0x40b   : > { %12450 = vmatpush1.bf16.msra.mxu1 %v15392_v16  ;;  %12614 = vmatpush1.bf16.msra.mxu0 %v15394_v17  ;;  %v3731_v16 = vld [vmem:[#allocation14 + $0x1508] sm:$0xff] }
 0x40c   : > { %12451 = vmatprep.subr.bf16.mxu1 %v15417_v18  ;;  %12615 = vmatprep.subr.bf16.mxu0 %v15419_v22  ;;  %v3743_v17 = vld [vmem:[#allocation14 + $0x1568] sm:$0xff]  ;;  %v15560_v18 = vcombine.low %v3706_v4, %v3718_v5  ;;  %v15562_v22 = vcombine.low %v3707_v6, %v3719_v7 }
 0x40d   : > { %v15587_v20 = vcombine.high %v3731_v16, %v3743_v17  ;;  %v3863_v4 = vld [vmem:[#allocation14 + $0x1928] sm:$0xff] }
 0x40f   : > { %12452 = vmatpush1.bf16.msra.mxu1 %v15416_v24  ;;  %12616 = vmatpush1.bf16.msra.mxu0 %v15418_v25  ;;  %v3755_v24 = vld [vmem:[#allocation14 + $0x15c8] sm:$0xff] }
 0x410   : > { %12453 = vmatprep.subr.bf16.mxu1 %v15441_v40  ;;  %12617 = vmatprep.subr.bf16.mxu0 %v15443_v26  ;;  %v3767_v25 = vld [vmem:[#allocation14 + $0x1628] sm:$0xff]  ;;  %v15584_v40 = vcombine.low %v3730_v15, %v3742_v14  ;;  %v15586_v26 = vcombine.low %v3731_v16, %v3743_v17 }
 0x411   : > { %v15611_v58 = vcombine.high %v3755_v24, %v3767_v25  ;;  %v15610_v37 = vcombine.low %v3755_v24, %v3767_v25  ;;  %v3875_v15 = vld [vmem:[#allocation14 + $0x1988] sm:$0xff] }
 0x412   : > { %v3887_v14 = vld [vmem:[#allocation14 + $0x19e8] sm:$0xff] }
 0x413   : > { %12454 = vmatpush1.bf16.msra.mxu1 %v15440_v33  ;;  %12618 = vmatpush1.bf16.msra.mxu0 %v15442_v34  ;;  %v3790_v33 = vld [vmem:[#allocation14 + $0x16e0] sm:$0xff]  ;;  %v3779_v34 = vld [vmem:[#allocation14 + $0x1688] sm:$0xff]  ;;  %v15730_v25 = vcombine.low %v3875_v15, %v3887_v14 }
 0x414   : > { %12455 = vmatprep.subr.bf16.mxu1 %v15465_v35  ;;  %12619 = vmatprep.subr.bf16.mxu0 %v15467_v36  ;;  %v3791_v35 = vld [vmem:[#allocation14 + $0x16e8] sm:$0xff]  ;;  %v15608_v36 = vcombine.low %v3754_v21, %v3766_v23  ;;  %v15633_v39 = vcombine.high %v3778_v30, %v3790_v33  ;;  %v15632_v48 = vcombine.low %v3778_v30, %v3790_v33 }
 0x415   : > { %v15635_v41 = vcombine.high %v3779_v34, %v3791_v35  ;;  %v15634_v49 = vcombine.low %v3779_v34, %v3791_v35  ;;  %v3899_v21 = vld [vmem:[#allocation14 + $0x1a48] sm:$0xff] }
 0x416   : > { %v3911_v23 = vld [vmem:[#allocation14 + $0x1aa8] sm:$0xff] }
 0x417   : > { %12456 = vmatpush1.bf16.msra.mxu1 %v15464_v44  ;;  %12620 = vmatpush1.bf16.msra.mxu0 %v15466_v45  ;;  %v16453_v44 = vadd.f32 %v17697_v52, %v1389_v32  ;;  %v3814_v45 = vld [vmem:[#allocation14 + $0x17a0] sm:$0xff]  ;;  %v3923_v30 = vld [vmem:[#allocation14 + $0x1b08] sm:$0xff]  ;;  %v15754_v34 = vcombine.low %v3899_v21, %v3911_v23 }
 0x418   : > { %12457 = vmatprep.subr.bf16.mxu1 %v15489_v46  ;;  %12621 = vmatprep.subr.bf16.mxu0 %v15491_v47  ;;  %v3803_v46 = vld [vmem:[#allocation14 + $0x1748] sm:$0xff]  ;;  %v15657_v51 = vcombine.high %v3802_v42, %v3814_v45  ;;  %v15656_v52 = vcombine.low %v3802_v42, %v3814_v45 }
 0x419   : > { %v3815_v47 = vld [vmem:[#allocation14 + $0x17a8] sm:$0xff]  ;;  %vm3028_vm9 = vcmp.gt.f32.partialorder %v16453_v44, 0.0 }
 0x41a   : > { %v15659_v54 = vcombine.high %v3803_v46, %v3815_v47  ;;  %v15658_v62 = vcombine.low %v3803_v46, %v3815_v47  ;;  %v3935_v32 = vld [vmem:[#allocation14 + $0x1b68] sm:$0xff] }
 0x41b   : > { %12458 = vmatpush1.bf16.msra.mxu1 %v15488_v55  ;;  %12622 = vmatpush1.bf16.msra.mxu0 %v15490_v56  ;;  %v3826_v55 = vld [vmem:[#allocation14 + $0x1800] sm:$0xff]  ;;  %v3036_v56 = vmul.f32 0.2, %v16453_v44  ;;  %v3959_v42 = vld [vmem:[#allocation14 + $0x1c28] sm:$0xff]  ;;  %v15778_v45 = vcombine.low %v3923_v30, %v3935_v32 }
 0x41c   : > { %12459 = vmatprep.subr.bf16.mxu1 %v15513_v57  ;;  %12623 = vmatprep.subr.bf16.mxu0 %v15515_v60  ;;  %v3838_v57 = vld [vmem:[#allocation14 + $0x1860] sm:$0xff]  ;;  %v3827_v60 = vld [vmem:[#allocation14 + $0x1808] sm:$0xff] }
 0x41d   : > { %v15681_v63 = vcombine.high %v3826_v55, %v3838_v57  ;;  %v15683_v0 = vcombine.high %v3827_v60, %v3839_v61  ;;  %v15680_v5 = vcombine.low %v3826_v55, %v3838_v57  ;;  %v15682_v6 = vcombine.low %v3827_v60, %v3839_v61  ;;  %v3994_v61 = vld [vmem:[#allocation14 + $0x1d40] sm:$0xff] }
 0x41f   : > { %12460 = vmatpush1.bf16.msra.mxu1 %v15512_v1  ;;  %12624 = vmatpush1.bf16.msra.mxu0 %v15514_v13  ;;  %v3850_v1 = vld [vmem:[#allocation14 + $0x18c0] sm:$0xff]  ;;  %v3044_v13 = vsel %vm3028_vm9, %v16453_v44, %v3036_v56 }
 0x420   : > { %12461 = vmatprep.subr.bf16.mxu1 %v15537_v2  ;;  %12625 = vmatprep.subr.bf16.mxu0 %v15539_v3  ;;  %v3862_v2 = vld [vmem:[#allocation14 + $0x1920] sm:$0xff]  ;;  %v3851_v3 = vld [vmem:[#allocation14 + $0x18c8] sm:$0xff]  ;;  %v17714_v7 = vpack.c.bf16 %v3044_v13, %v3044_v13 }
 0x421   : > { %v15704_v16 = vcombine.low %v3850_v1, %v3862_v2  ;;  %v15706_v17 = vcombine.low %v3851_v3, %v3863_v4 }
 0x423   : > { %12462 = vmatpush1.bf16.msra.mxu1 %v15536_v8  ;;  %12626 = vmatpush1.bf16.msra.mxu0 %v15538_v9  ;;  %v15705_v8 = vcombine.high %v3850_v1, %v3862_v2  ;;  %v15707_v9 = vcombine.high %v3851_v3, %v3863_v4  ;;  %v4018_v3 = vld [vmem:[#allocation14 + $0x1e00] sm:$0xff] }
 0x424   : > { %12463 = vmatprep.subr.bf16.mxu1 %v15561_v10  ;;  %12627 = vmatprep.subr.bf16.mxu0 %v15563_v11  ;;  %v3874_v10 = vld [vmem:[#allocation14 + $0x1980] sm:$0xff] }
 0x425   : > { %v3886_v11 = vld [vmem:[#allocation14 + $0x19e0] sm:$0xff] }
 0x426   : > { %v15728_v24 = vcombine.low %v3874_v10, %v3886_v11  ;;  %v4030_v4 = vld [vmem:[#allocation14 + $0x1e60] sm:$0xff] }
 0x427   : > { %12464 = vmatpush1.bf16.msra.mxu1 %v15560_v18  ;;  %12628 = vmatpush1.bf16.msra.mxu0 %v15562_v22  ;;  %v15729_v18 = vcombine.high %v3874_v10, %v3886_v11  ;;  %v15731_v22 = vcombine.high %v3875_v15, %v3887_v14  ;;  %v15873_v10 = vcombine.high %v4018_v3, %v4030_v4  ;;  %v4042_v15 = vld [vmem:[#allocation14 + $0x1ec0] sm:$0xff] }
 0x428   : > { %12465 = vmatprep.subr.bf16.mxu1 %v15585_v19  ;;  %12629 = vmatprep.subr.bf16.mxu0 %v15587_v20  ;;  %v3898_v19 = vld [vmem:[#allocation14 + $0x1a40] sm:$0xff] }
 0x429   : > { %v3910_v20 = vld [vmem:[#allocation14 + $0x1aa0] sm:$0xff] }
 0x42a   : > { %v15752_v33 = vcombine.low %v3898_v19, %v3910_v20  ;;  %v4054_v14 = vld [vmem:[#allocation14 + $0x1f20] sm:$0xff] }
 0x42b   : > { %12466 = vmatpush1.bf16.msra.mxu1 %v15584_v40  ;;  %12630 = vmatpush1.bf16.msra.mxu0 %v15586_v26  ;;  %v15753_v40 = vcombine.high %v3898_v19, %v3910_v20  ;;  %v15755_v26 = vcombine.high %v3899_v21, %v3911_v23  ;;  %v15897_v19 = vcombine.high %v4042_v15, %v4054_v14  ;;  %v4066_v21 = vld [vmem:[#allocation14 + $0x1f80] sm:$0xff] }
 0x42c   : > { %12467 = vmatprep.subr.bf16.mxu1 %v15609_v27  ;;  %12631 = vmatprep.subr.bf16.mxu0 %v15611_v58  ;;  %v3922_v27 = vld [vmem:[#allocation14 + $0x1b00] sm:$0xff] }
 0x42d   : > { %v3934_v58 = vld [vmem:[#allocation14 + $0x1b60] sm:$0xff] }
 0x42e   : > { %v15777_v35 = vcombine.high %v3922_v27, %v3934_v58  ;;  %v15776_v44 = vcombine.low %v3922_v27, %v3934_v58  ;;  %v4078_v23 = vld [vmem:[#allocation14 + $0x1fe0] sm:$0xff] }
 0x42f   : > { %12468 = vmatpush1.bf16.msra.mxu1 %v15608_v36  ;;  %12632 = vmatpush1.bf16.msra.mxu0 %v15610_v37  ;;  %v15779_v36 = vcombine.high %v3923_v30, %v3935_v32  ;;  %v3946_v37 = vld [vmem:[#allocation14 + $0x1bc0] sm:$0xff]  ;;  %v15921_v27 = vcombine.high %v4066_v21, %v4078_v23 }
 0x430   : > { %12469 = vmatprep.subr.bf16.mxu1 %v15633_v39  ;;  %12633 = vmatprep.subr.bf16.mxu0 %v15635_v41  ;;  %v3958_v39 = vld [vmem:[#allocation14 + $0x1c20] sm:$0xff]  ;;  %v3947_v41 = vld [vmem:[#allocation14 + $0x1bc8] sm:$0xff] }
 0x431   : > { %v15801_v46 = vcombine.high %v3946_v37, %v3958_v39  ;;  %v15803_v47 = vcombine.high %v3947_v41, %v3959_v42  ;;  %v15800_v55 = vcombine.low %v3946_v37, %v3958_v39  ;;  %v15802_v56 = vcombine.low %v3947_v41, %v3959_v42  ;;  %v4090_v30 = vld [vmem:[#allocation14 + $0x2040] sm:$0xff] }
 0x432   : > { %v4102_v32 = vld [vmem:[#allocation14 + $0x20a0] sm:$0xff] }
 0x433   : > { %12470 = vmatpush1.bf16.msra.mxu1 %v15632_v48  ;;  %12634 = vmatpush1.bf16.msra.mxu0 %v15634_v49  ;;  %v3970_v48 = vld [vmem:[#allocation14 + $0x1c80] sm:$0xff]  ;;  %v15945_v37 = vcombine.high %v4090_v30, %v4102_v32 }
 0x434   : > { %12471 = vmatprep.subr.bf16.mxu1 %v15657_v51  ;;  %12635 = vmatprep.subr.bf16.mxu0 %v15659_v54  ;;  %v3982_v49 = vld [vmem:[#allocation14 + $0x1ce0] sm:$0xff]  ;;  %v3971_v51 = vld [vmem:[#allocation14 + $0x1c88] sm:$0xff] }
 0x435   : > { %v3983_v54 = vld [vmem:[#allocation14 + $0x1ce8] sm:$0xff]  ;;  %v15825_v57 = vcombine.high %v3970_v48, %v3982_v49  ;;  %v4114_v41 = vld [vmem:[#allocation14 + $0x2100] sm:$0xff] }
 0x436   : > { %v15827_v60 = vcombine.high %v3971_v51, %v3983_v54  ;;  %v15826_v1 = vcombine.low %v3971_v51, %v3983_v54  ;;  %v4126_v42 = vld [vmem:[#allocation14 + $0x2160] sm:$0xff] }
 0x437   : > { %12472 = vmatpush1.bf16.msra.mxu1 %v15656_v52  ;;  %12636 = vmatpush1.bf16.msra.mxu0 %v15658_v62  ;;  %v4006_v52 = vld [vmem:[#allocation14 + $0x1da0] sm:$0xff]  ;;  %v3995_v62 = vld [vmem:[#allocation14 + $0x1d48] sm:$0xff] }
 0x438   : > { %12482 = vmatprep.subr.bf16.mxu1 %v15681_v63  ;;  %12646 = vmatprep.subr.bf16.mxu0 %v15683_v0  ;;  %v4007_v63 = vld [vmem:[#allocation14 + $0x1da8] sm:$0xff]  ;;  %v15824_v0 = vcombine.low %v3970_v48, %v3982_v49  ;;  %v15849_v13 = vcombine.high %v3994_v61, %v4006_v52  ;;  %v15969_v48 = vcombine.high %v4114_v41, %v4126_v42  ;;  %v4138_v51 = vld [vmem:[#allocation14 + $0x21c0] sm:$0xff] }
 0x439   : > { %v15851_v2 = vcombine.high %v3995_v62, %v4007_v63  ;;  %v4150_v54 = vld [vmem:[#allocation14 + $0x2220] sm:$0xff] }
 0x43a   : > { %12474 = vmatmul.mubr.bf16.vlgmr.msra.gmra.mrb[12].mxu1 %v17714_v7  ;;  %12638 = vmatmul.mubr.bf16.vlgmr.msra.gmra.mrb[16].mxu0 %v17714_v7 }
 0x43b   : > { %12483 = vmatpush1.bf16.msra.mxu1 %v15680_v5  ;;  %12647 = vmatpush1.bf16.msra.mxu0 %v15682_v6  ;;  %v4019_v5 = vld [vmem:[#allocation14 + $0x1e08] sm:$0xff] }
 0x43c   : > { %12484 = vmatprep.subr.bf16.mxu1 %v15705_v8  ;;  %12648 = vmatprep.subr.bf16.mxu0 %v15707_v9  ;;  %v4031_v6 = vld [vmem:[#allocation14 + $0x1e68] sm:$0xff]  ;;  %v15848_v8 = vcombine.low %v3994_v61, %v4006_v52  ;;  %v15850_v9 = vcombine.low %v3995_v62, %v4007_v63  ;;  %v15993_v61 = vcombine.high %v4138_v51, %v4150_v54  ;;  %v4162_v62 = vld [vmem:[#allocation14 + $0x2280] sm:$0xff]  ;;  %v17719_v63 = vsub.s32 4, %v17636_v28 }
 0x43d   : > { %v15875_v11 = vcombine.high %v4019_v5, %v4031_v6 }
 0x43f   : > { %12485 = vmatpush1.bf16.msra.mxu1 %v15704_v16  ;;  %12649 = vmatpush1.bf16.msra.mxu0 %v15706_v17  ;;  %v4043_v16 = vld [vmem:[#allocation14 + $0x1ec8] sm:$0xff] }
 0x440   : > { %12486 = vmatprep.subr.bf16.mxu1 %v15729_v18  ;;  %12650 = vmatprep.subr.bf16.mxu0 %v15731_v22  ;;  %v4055_v17 = vld [vmem:[#allocation14 + $0x1f28] sm:$0xff]  ;;  %v15872_v18 = vcombine.low %v4018_v3, %v4030_v4  ;;  %v15874_v22 = vcombine.low %v4019_v5, %v4031_v6  ;;  %v15992_v3 = vcombine.low %v4138_v51, %v4150_v54  ;;  %v17725_v5 = vsub.s32 7, %v17636_v28  ;;  %v4246_v54 = vld [vmem:[#allocation14 + $0x2520] sm:$0xff] }
 0x441   : > { %v15899_v20 = vcombine.high %v4043_v16, %v4055_v17 }
 0x443   : > { %12487 = vmatpush1.bf16.msra.mxu1 %v15728_v24  ;;  %12651 = vmatpush1.bf16.msra.mxu0 %v15730_v25  ;;  %v4067_v24 = vld [vmem:[#allocation14 + $0x1f88] sm:$0xff] }
 0x444   : > { %12488 = vmatprep.subr.bf16.mxu1 %v15753_v40  ;;  %12652 = vmatprep.subr.bf16.mxu0 %v15755_v26  ;;  %v4079_v25 = vld [vmem:[#allocation14 + $0x1fe8] sm:$0xff]  ;;  %v15896_v40 = vcombine.low %v4042_v15, %v4054_v14  ;;  %v15898_v26 = vcombine.low %v4043_v16, %v4055_v17  ;;  %v1409_v17 = vrot.slane %v17689_v12, %v17725_v5 }
 0x445   : > { %v15923_v58 = vcombine.high %v4067_v24, %v4079_v25  ;;  %v4187_v15 = vld [vmem:[#allocation14 + $0x2348] sm:$0xff] }
 0x446   : > { %v4199_v14 = vld [vmem:[#allocation14 + $0x23a8] sm:$0xff] }
 0x447   : > { %12489 = vmatpush1.bf16.msra.mxu1 %v15752_v33  ;;  %12653 = vmatpush1.bf16.msra.mxu0 %v15754_v34  ;;  %v4091_v33 = vld [vmem:[#allocation14 + $0x2048] sm:$0xff] }
 0x448   : > { %12490 = vmatprep.subr.bf16.mxu1 %v15777_v35  ;;  %12654 = vmatprep.subr.bf16.mxu0 %v15779_v36  ;;  %v4103_v34 = vld [vmem:[#allocation14 + $0x20a8] sm:$0xff]  ;;  %v15920_v35 = vcombine.low %v4066_v21, %v4078_v23  ;;  %v15922_v36 = vcombine.low %v4067_v24, %v4079_v25  ;;  %v16043_v21 = vcombine.high %v4187_v15, %v4199_v14  ;;  %v4210_v23 = vld [vmem:[#allocation14 + $0x2400] sm:$0xff] }
 0x449   : > { %v15947_v39 = vcombine.high %v4091_v33, %v4103_v34 }
 0x44b   : > { %12491 = vmatpush1.bf16.msra.mxu1 %v15776_v44  ;;  %12655 = vmatpush1.bf16.msra.mxu0 %v15778_v45  ;;  %v4115_v44 = vld [vmem:[#allocation14 + $0x2108] sm:$0xff] }
 0x44c   : > { %12492 = vmatprep.subr.bf16.mxu1 %v15801_v46  ;;  %12656 = vmatprep.subr.bf16.mxu0 %v15803_v47  ;;  %v4127_v45 = vld [vmem:[#allocation14 + $0x2168] sm:$0xff]  ;;  %v15944_v46 = vcombine.low %v4090_v30, %v4102_v32  ;;  %v15946_v47 = vcombine.low %v4091_v33, %v4103_v34 }
 0x44d   : > { %v15971_v49 = vcombine.high %v4115_v44, %v4127_v45 }
 0x44f   : > { %12493 = vmatpush1.bf16.msra.mxu1 %v15800_v55  ;;  %12657 = vmatpush1.bf16.msra.mxu0 %v15802_v56  ;;  %v4139_v55 = vld [vmem:[#allocation14 + $0x21c8] sm:$0xff] }
 0x450   : > { %12494 = vmatprep.subr.bf16.mxu1 %v15825_v57  ;;  %12658 = vmatprep.subr.bf16.mxu0 %v15827_v60  ;;  %v4151_v56 = vld [vmem:[#allocation14 + $0x2228] sm:$0xff]  ;;  %v15968_v57 = vcombine.low %v4114_v41, %v4126_v42  ;;  %v15970_v60 = vcombine.low %v4115_v44, %v4127_v45 }
 0x451   : > { %v15995_v52 = vcombine.high %v4139_v55, %v4151_v56  ;;  %v15994_v4 = vcombine.low %v4139_v55, %v4151_v56  ;;  %v4235_v55 = vld [vmem:[#allocation14 + $0x24c8] sm:$0xff] }
 0x452   : > { %v4247_v56 = vld [vmem:[#allocation14 + $0x2528] sm:$0xff] }
 0x453   : > { %12495 = vmatpush1.bf16.msra.mxu1 %v15824_v0  ;;  %12659 = vmatpush1.bf16.msra.mxu0 %v15826_v1  ;;  %v4174_v0 = vld [vmem:[#allocation14 + $0x22e0] sm:$0xff]  ;;  %v4163_v1 = vld [vmem:[#allocation14 + $0x2288] sm:$0xff] }
 0x454   : > { %12496 = vmatprep.subr.bf16.mxu1 %v15849_v13  ;;  %12660 = vmatprep.subr.bf16.mxu0 %v15851_v2  ;;  %v4175_v13 = vld [vmem:[#allocation14 + $0x22e8] sm:$0xff]  ;;  %v17722_v2 = vsub.s32 5, %v17636_v28  ;;  %v16017_v6 = vcombine.high %v4162_v62, %v4174_v0 }
 0x456   : > { %v1401_v16 = vrot.slane %v17689_v12, %v17722_v2 }
 0x457   : > { %12497 = vmatpush1.bf16.msra.mxu1 %v15848_v8  ;;  %12661 = vmatpush1.bf16.msra.mxu0 %v15850_v9  ;;  %v16019_v8 = vcombine.high %v4163_v1, %v4175_v13  ;;  %v4186_v9 = vld [vmem:[#allocation14 + $0x2340] sm:$0xff] }
 0x458   : > { %12498 = vmatprep.subr.bf16.mxu1 %v15873_v10  ;;  %12662 = vmatprep.subr.bf16.mxu0 %v15875_v11  ;;  %v1397_v10 = vrot.slane %v17689_v12, %v17719_v63  ;;  %v4198_v11 = vld [vmem:[#allocation14 + $0x23a0] sm:$0xff] }
 0x459   : > { %v16040_v34 = vcombine.low %v4186_v9, %v4198_v11 }
 0x45b   : > { %12499 = vmatpush1.bf16.msra.mxu1 %v15872_v18  ;;  %12663 = vmatpush1.bf16.msra.mxu0 %v15874_v22  ;;  %v16016_v18 = vcombine.low %v4162_v62, %v4174_v0  ;;  %v16018_v22 = vcombine.low %v4163_v1, %v4175_v13  ;;  %v4258_v62 = vld [vmem:[#allocation14 + $0x2580] sm:$0xff]  ;;  %v16091_v1 = vcombine.high %v4235_v55, %v4247_v56 }
 0x45c   : > { %12500 = vmatprep.subr.bf16.mxu1 %v15897_v19  ;;  %12664 = vmatprep.subr.bf16.mxu0 %v15899_v20  ;;  %v16041_v20 = vcombine.high %v4186_v9, %v4198_v11  ;;  %v4270_v13 = vld [vmem:[#allocation14 + $0x25e0] sm:$0xff]  ;;  %v16090_v9 = vcombine.low %v4235_v55, %v4247_v56  ;;  %v4379_v55 = vld [vmem:[#allocation14 + $0x2948] sm:$0xff] }
 0x45d   : > { %v4391_v56 = vld [vmem:[#allocation14 + $0x29a8] sm:$0xff] }
 0x45f   : > { %12501 = vmatpush1.bf16.msra.mxu1 %v15896_v40  ;;  %12665 = vmatpush1.bf16.msra.mxu0 %v15898_v26  ;;  %v4222_v26 = vld [vmem:[#allocation14 + $0x2460] sm:$0xff] }
 0x460   : > { %12502 = vmatprep.subr.bf16.mxu1 %v15921_v27  ;;  %12666 = vmatprep.subr.bf16.mxu0 %v15923_v58  ;;  %v4211_v27 = vld [vmem:[#allocation14 + $0x2408] sm:$0xff]  ;;  %v16065_v42 = vcombine.high %v4210_v23, %v4222_v26  ;;  %v16064_v51 = vcombine.low %v4210_v23, %v4222_v26  ;;  %v4318_v23 = vld [vmem:[#allocation14 + $0x2760] sm:$0xff] }
 0x461   : > { %v4223_v58 = vld [vmem:[#allocation14 + $0x2468] sm:$0xff] }
 0x462   : > { %v16067_v44 = vcombine.high %v4211_v27, %v4223_v58 }
 0x463   : > { %12503 = vmatpush1.bf16.msra.mxu1 %v15920_v35  ;;  %12667 = vmatpush1.bf16.msra.mxu0 %v15922_v36 }
 0x464   : > { %12504 = vmatprep.subr.bf16.mxu1 %v15945_v37  ;;  %12668 = vmatprep.subr.bf16.mxu0 %v15947_v39  ;;  %v16042_v39 = vcombine.low %v4187_v15, %v4199_v14  ;;  %v4282_v15 = vld [vmem:[#allocation14 + $0x2640] sm:$0xff] }
 0x465   : > { %v4294_v14 = vld [vmem:[#allocation14 + $0x26a0] sm:$0xff] }
 0x466   : > { %v16136_v26 = vcombine.low %v4282_v15, %v4294_v14 }
 0x467   : > { %12505 = vmatpush1.bf16.msra.mxu1 %v15944_v46  ;;  %12669 = vmatpush1.bf16.msra.mxu0 %v15946_v47 }
 0x468   : > { %12506 = vmatprep.subr.bf16.mxu1 %v15969_v48  ;;  %12670 = vmatprep.subr.bf16.mxu0 %v15971_v49  ;;  %v4234_v48 = vld [vmem:[#allocation14 + $0x24c0] sm:$0xff] }
 0x469   : > { %v16089_v0 = vcombine.high %v4234_v48, %v4246_v54 }
 0x46b   : > { %12507 = vmatpush1.bf16.msra.mxu1 %v15968_v57  ;;  %12671 = vmatpush1.bf16.msra.mxu0 %v15970_v60 }
 0x46c   : > { %12508 = vmatprep.subr.bf16.mxu1 %v15993_v61  ;;  %12672 = vmatprep.subr.bf16.mxu0 %v15995_v52  ;;  %v16066_v61 = vcombine.low %v4211_v27, %v4223_v58 }
 0x46f   : > { %12509 = vmatpush1.bf16.msra.mxu1 %v15992_v3  ;;  %12673 = vmatpush1.bf16.msra.mxu0 %v15994_v4  ;;  %v4259_v3 = vld [vmem:[#allocation14 + $0x2588] sm:$0xff] }
 0x470   : > { %v2937_v19 = vpop.f32.mrb[8].mxu1  ;;  %12510 = vmatprep.subr.bf16.mxu1 %v16017_v6  ;;  %12674 = vmatprep.subr.bf16.mxu0 %v16019_v8  ;;  %v4271_v4 = vld [vmem:[#allocation14 + $0x25e8] sm:$0xff]  ;;  %v16088_v8 = vcombine.low %v4234_v48, %v4246_v54  ;;  %v4390_v54 = vld [vmem:[#allocation14 + $0x29a0] sm:$0xff] }
 0x471   : > { %v16455_v24 = vadd.f32 %v2937_v19, %v1397_v10  ;;  %v17733_v25 = vpop.f32.mrb[12].mxu0  ;;  %v2939_v40 = vpop.f32.mrb[9].mxu1  ;;  %v16113_v10 = vcombine.high %v4258_v62, %v4270_v13  ;;  %v16115_v11 = vcombine.high %v4259_v3, %v4271_v4  ;;  %v16137_v19 = vcombine.high %v4282_v15, %v4294_v14  ;;  %v4426_v15 = vld [vmem:[#allocation14 + $0x2ac0] sm:$0xff] }
 0x472   : > { %v16456_v30 = vadd.f32 %v2939_v40, %v1401_v16  ;;  %v3021_v32 = vpop.f32.mrb[13].mxu0  ;;  %v2941_v33 = vpop.f32.mrb[10].mxu1  ;;  %v4283_v16 = vld [vmem:[#allocation14 + $0x2648] sm:$0xff]  ;;  %v4438_v14 = vld [vmem:[#allocation14 + $0x2b20] sm:$0xff] }
 0x473   : > { %vm3030_vm10 = vcmp.gt.f32.partialorder %v16455_v24, 0.0  ;;  %v3038_v12 = vmul.f32 0.2, %v16455_v24  ;;  %v16458_v35 = vadd.f32 %v3021_v32, %v1409_v17  ;;  %v3023_v36 = vpop.f32.mrb[14].mxu0  ;;  %12511 = vmatpush1.bf16.msra.mxu1 %v16016_v18  ;;  %12675 = vmatpush1.bf16.msra.mxu0 %v16018_v22  ;;  %v2942_v37 = vpop.f32.mrb[11].mxu1  ;;  %v4295_v17 = vld [vmem:[#allocation14 + $0x26a8] sm:$0xff]  ;;  %v16112_v18 = vcombine.low %v4258_v62, %v4270_v13 }
 0x474   : > { %vm3031_vm11 = vcmp.gt.f32.partialorder %v16456_v30, 0.0  ;;  %v3039_v41 = vmul.f32 0.2, %v16456_v30  ;;  %12512 = vmatprep.subr.bf16.mxu1 %v16041_v20  ;;  %12676 = vmatprep.subr.bf16.mxu0 %v16043_v21  ;;  %v3024_v47 = vpop.f32.mrb[15].mxu0  ;;  %v16114_v22 = vcombine.low %v4259_v3, %v4271_v4  ;;  %v16139_v20 = vcombine.high %v4283_v16, %v4295_v17  ;;  %v4306_v21 = vld [vmem:[#allocation14 + $0x2700] sm:$0xff]  ;;  %v4319_v40 = vld [vmem:[#allocation14 + $0x2768] sm:$0xff] }
 0x475   : > { %v3046_v45 = vsel %vm3030_vm10, %v16455_v24, %v3038_v12  ;;  %vm3033_vm12 = vcmp.gt.f32.partialorder %v16458_v35, 0.0  ;;  %v3041_v46 = vmul.f32 0.2, %v16458_v35  ;;  %v4307_v24 = vld [vmem:[#allocation14 + $0x2708] sm:$0xff]  ;;  %v16138_v27 = vcombine.low %v4283_v16, %v4295_v17  ;;  %v4330_v32 = vld [vmem:[#allocation14 + $0x27c0] sm:$0xff] }
 0x476   : > { %v3047_v49 = vsel %vm3031_vm11, %v16456_v30, %v3039_v41  ;;  %v17737_v52 = vpack.c.bf16 %v3046_v45, %v3046_v45  ;;  %v16161_v58 = vcombine.high %v4306_v21, %v4318_v23  ;;  %v16163_v30 = vcombine.high %v4307_v24, %v4319_v40  ;;  %v4342_v33 = vld [vmem:[#allocation14 + $0x2820] sm:$0xff]  ;;  %v4343_v12 = vld [vmem:[#allocation14 + $0x2828] sm:$0xff] }
 0x477   : > { %v17735_v57 = vpack.c.bf16 %v3047_v49, %v3047_v49  ;;  %v3049_v60 = vsel %vm3033_vm12, %v16458_v35, %v3041_v46  ;;  %12513 = vmatpush1.bf16.msra.mxu1 %v16040_v34  ;;  %12677 = vmatpush1.bf16.msra.mxu0 %v16042_v39  ;;  %v4331_v34 = vld [vmem:[#allocation14 + $0x27c8] sm:$0xff]  ;;  %v16160_v35 = vcombine.low %v4306_v21, %v4318_v23  ;;  %v4354_v41 = vld [vmem:[#allocation14 + $0x2880] sm:$0xff] }
 0x478   : > { %12523 = vmatprep.subr.bf16.mxu1 %v16065_v42  ;;  %12687 = vmatprep.subr.bf16.mxu0 %v16067_v44  ;;  %v17741_v6 = vpack.c.bf16 %v3049_v60, %v3049_v60  ;;  %v16162_v36 = vcombine.low %v4307_v24, %v4319_v40  ;;  %v16185_v37 = vcombine.high %v4330_v32, %v4342_v33  ;;  %v4366_v42 = vld [vmem:[#allocation14 + $0x28e0] sm:$0xff]  ;;  %v4355_v44 = vld [vmem:[#allocation14 + $0x2888] sm:$0xff] }
 0x479   : > { %12514 = vmatprep.mubr.bf16.mxu1 %v17735_v57  ;;  %12678 = vmatprep.mubr.bf16.mxu0 %v17735_v57  ;;  %v16187_v39 = vcombine.high %v4331_v34, %v4343_v12  ;;  %v4367_v45 = vld [vmem:[#allocation14 + $0x28e8] sm:$0xff]  ;;  %v16184_v46 = vcombine.low %v4330_v32, %v4342_v33  ;;  %v16186_v47 = vcombine.low %v4331_v34, %v4343_v12  ;;  %v4414_v13 = vld [vmem:[#allocation14 + $0x2a60] sm:$0xff] }
 0x47a   : > { %12515 = vmatmul.mubr.bf16.vlgmr.msra.gmra.mrb[12].mxu1 %v17737_v52  ;;  %12679 = vmatmul.mubr.bf16.vlgmr.msra.gmra.mrb[16].mxu0 %v17737_v52  ;;  %v16209_v48 = vcombine.high %v4354_v41, %v4366_v42  ;;  %v16211_v49 = vcombine.high %v4355_v44, %v4367_v45  ;;  %v16208_v60 = vcombine.low %v4354_v41, %v4366_v42  ;;  %v4403_v3 = vld [vmem:[#allocation14 + $0x2a08] sm:$0xff]  ;;  %v4450_v21 = vld [vmem:[#allocation14 + $0x2b80] sm:$0xff] }
 0x47b   : > { %12524 = vmatpush1.bf16.msra.mxu1 %v16064_v51  ;;  %12688 = vmatpush1.bf16.msra.mxu0 %v16066_v61  ;;  %v4378_v51 = vld [vmem:[#allocation14 + $0x2940] sm:$0xff]  ;;  %v16210_v61 = vcombine.low %v4355_v44, %v4367_v45  ;;  %v4415_v4 = vld [vmem:[#allocation14 + $0x2a68] sm:$0xff] }
 0x47c   : > { %12555 = vmatprep.mubr.bf16.mxu1 %v17741_v6  ;;  %12719 = vmatprep.mubr.bf16.mxu0 %v17741_v6  ;;  %v16233_v62 = vcombine.high %v4378_v51, %v4390_v54  ;;  %v4427_v16 = vld [vmem:[#allocation14 + $0x2ac8] sm:$0xff]  ;;  %v4462_v23 = vld [vmem:[#allocation14 + $0x2be0] sm:$0xff] }
 0x47d   : > { %12525 = vmatprep.subr.bf16.mxu1 %v16089_v0  ;;  %12689 = vmatprep.subr.bf16.mxu0 %v16091_v1  ;;  %v16235_v0 = vcombine.high %v4379_v55, %v4391_v56  ;;  %v4402_v1 = vld [vmem:[#allocation14 + $0x2a00] sm:$0xff]  ;;  %v4439_v17 = vld [vmem:[#allocation14 + $0x2b28] sm:$0xff] }
 0x47e   : > { %v4451_v24 = vld [vmem:[#allocation14 + $0x2b88] sm:$0xff]  ;;  %v4474_v32 = vld [vmem:[#allocation14 + $0x2c40] sm:$0xff] }
 0x47f   : > { %12526 = vmatpush1.bf16.msra.mxu1 %v16088_v8  ;;  %12690 = vmatpush1.bf16.msra.mxu0 %v16090_v9  ;;  %v16232_v8 = vcombine.low %v4378_v51, %v4390_v54  ;;  %v16234_v9 = vcombine.low %v4379_v55, %v4391_v56  ;;  %v4463_v40 = vld [vmem:[#allocation14 + $0x2be8] sm:$0xff]  ;;  %v4486_v33 = vld [vmem:[#allocation14 + $0x2ca0] sm:$0xff]  ;;  %v17748_v54 = vsub.s32 6, %v17636_v28 }
 0x480   : > { %12527 = vmatprep.subr.bf16.mxu1 %v16113_v10  ;;  %12691 = vmatprep.subr.bf16.mxu0 %v16115_v11  ;;  %v16257_v10 = vcombine.high %v4402_v1, %v4414_v13  ;;  %v16259_v11 = vcombine.high %v4403_v3, %v4415_v4  ;;  %v4475_v34 = vld [vmem:[#allocation14 + $0x2c48] sm:$0xff]  ;;  %v4498_v41 = vld [vmem:[#allocation14 + $0x2d00] sm:$0xff] }
 0x481   : > { %v4487_v12 = vld [vmem:[#allocation14 + $0x2ca8] sm:$0xff]  ;;  %v4510_v42 = vld [vmem:[#allocation14 + $0x2d60] sm:$0xff] }
 0x482   : > { %v4499_v44 = vld [vmem:[#allocation14 + $0x2d08] sm:$0xff]  ;;  %v4522_v51 = vld [vmem:[#allocation14 + $0x2dc0] sm:$0xff] }
 0x483   : > { %12528 = vmatpush1.bf16.msra.mxu1 %v16112_v18  ;;  %12692 = vmatpush1.bf16.msra.mxu0 %v16114_v22  ;;  %v16256_v18 = vcombine.low %v4402_v1, %v4414_v13  ;;  %v16258_v22 = vcombine.low %v4403_v3, %v4415_v4  ;;  %v4511_v45 = vld [vmem:[#allocation14 + $0x2d68] sm:$0xff]  ;;  %v4534_v55 = vld [vmem:[#allocation14 + $0x2e20] sm:$0xff]  ;;  %v16901_v3 = vld [vmem:[#allocation13] sm:$0xff] }
 0x484   : > { %12529 = vmatprep.subr.bf16.mxu1 %v16137_v19  ;;  %12693 = vmatprep.subr.bf16.mxu0 %v16139_v20  ;;  %v16281_v19 = vcombine.high %v4426_v15, %v4438_v14  ;;  %v16283_v20 = vcombine.high %v4427_v16, %v4439_v17  ;;  %v4523_v56 = vld [vmem:[#allocation14 + $0x2dc8] sm:$0xff]  ;;  %v4546_v13 = vld [vmem:[#allocation14 + $0x2e80] sm:$0xff]  ;;  %v1405_v4 = vrot.slane %v16901_v3, %v17748_v54 }
 0x485   : > { %v16376_v28 = vcombine.low %v4522_v51, %v4534_v55 }
 0x487   : > { %12530 = vmatpush1.bf16.msra.mxu1 %v16136_v26  ;;  %12694 = vmatpush1.bf16.msra.mxu0 %v16138_v27  ;;  %v16280_v26 = vcombine.low %v4426_v15, %v4438_v14  ;;  %v16282_v27 = vcombine.low %v4427_v16, %v4439_v17  ;;  %v4570_v16 = vld [vmem:[#allocation14 + $0x2f40] sm:$0xff]  ;;  %v16457_v17 = vadd.f32 %v17733_v25, %v1405_v4 }
 0x488   : > { %12531 = vmatprep.subr.bf16.mxu1 %v16161_v58  ;;  %12695 = vmatprep.subr.bf16.mxu0 %v16163_v30  ;;  %v16305_v58 = vcombine.high %v4450_v21, %v4462_v23  ;;  %v16307_v30 = vcombine.high %v4451_v24, %v4463_v40 }
 0x489   : > { %vm3032_vm13 = vcmp.gt.f32.partialorder %v16457_v17, 0.0 }
 0x48b   : > { %12532 = vmatpush1.bf16.msra.mxu1 %v16160_v35  ;;  %12696 = vmatpush1.bf16.msra.mxu0 %v16162_v36  ;;  %v16304_v35 = vcombine.low %v4450_v21, %v4462_v23  ;;  %v16306_v36 = vcombine.low %v4451_v24, %v4463_v40  ;;  %v3060_v40 = vld [vmem:[#allocation14 + $0x10] sm:$0xff] }
 0x48c   : > { %12533 = vmatprep.subr.bf16.mxu1 %v16185_v37  ;;  %12697 = vmatprep.subr.bf16.mxu0 %v16187_v39  ;;  %v16329_v37 = vcombine.high %v4474_v32, %v4486_v33  ;;  %v16331_v39 = vcombine.high %v4475_v34, %v4487_v12 }
 0x48f   : > { %12534 = vmatpush1.bf16.msra.mxu1 %v16184_v46  ;;  %12698 = vmatpush1.bf16.msra.mxu0 %v16186_v47  ;;  %v16328_v46 = vcombine.low %v4474_v32, %v4486_v33  ;;  %v16330_v47 = vcombine.low %v4475_v34, %v4487_v12 }
 0x490   : > { %12535 = vmatprep.subr.bf16.mxu1 %v16209_v48  ;;  %12699 = vmatprep.subr.bf16.mxu0 %v16211_v49  ;;  %v16353_v48 = vcombine.high %v4498_v41, %v4510_v42  ;;  %v16355_v49 = vcombine.high %v4499_v44, %v4511_v45 }
 0x493   : > { %12536 = vmatpush1.bf16.msra.mxu1 %v16208_v60  ;;  %12700 = vmatpush1.bf16.msra.mxu0 %v16210_v61  ;;  %v4535_v60 = vld [vmem:[#allocation14 + $0x2e28] sm:$0xff]  ;;  %v16352_v61 = vcombine.low %v4498_v41, %v4510_v42 }
 0x494   : > { %12537 = vmatprep.subr.bf16.mxu1 %v16233_v62  ;;  %12701 = vmatprep.subr.bf16.mxu0 %v16235_v0  ;;  %v16354_v62 = vcombine.low %v4499_v44, %v4511_v45  ;;  %v16377_v0 = vcombine.high %v4522_v51, %v4534_v55  ;;  %v16379_v1 = vcombine.high %v4523_v56, %v4535_v60  ;;  %v3121_v51 = vld [vmem:[#allocation14 + $0x1f8] sm:$0xff] }
 0x497   : > { %12538 = vmatpush1.bf16.msra.mxu1 %v16232_v8  ;;  %12702 = vmatpush1.bf16.msra.mxu0 %v16234_v9  ;;  %v4558_v8 = vld [vmem:[#allocation14 + $0x2ee0] sm:$0xff]  ;;  %v4547_v9 = vld [vmem:[#allocation14 + $0x2e88] sm:$0xff] }
 0x498   : > { %12539 = vmatprep.subr.bf16.mxu1 %v16257_v10  ;;  %12703 = vmatprep.subr.bf16.mxu0 %v16259_v11  ;;  %v4559_v10 = vld [vmem:[#allocation14 + $0x2ee8] sm:$0xff]  ;;  %v16378_v11 = vcombine.low %v4523_v56, %v4535_v60  ;;  %v16401_v15 = vcombine.high %v4546_v13, %v4558_v8 }
 0x499   : > { %v16403_v14 = vcombine.high %v4547_v9, %v4559_v10  ;;  %v16402_v21 = vcombine.low %v4547_v9, %v4559_v10  ;;  %v3156_v10 = vld [vmem:[#allocation14 + $0x310] sm:$0xff] }
 0x49b   : > { %12540 = vmatpush1.bf16.msra.mxu1 %v16256_v18  ;;  %12704 = vmatpush1.bf16.msra.mxu0 %v16258_v22  ;;  %v4582_v18 = vld [vmem:[#allocation14 + $0x2fa0] sm:$0xff]  ;;  %v4571_v22 = vld [vmem:[#allocation14 + $0x2f48] sm:$0xff] }
 0x49c   : > { %12541 = vmatprep.subr.bf16.mxu1 %v16281_v19  ;;  %12705 = vmatprep.subr.bf16.mxu0 %v16283_v20  ;;  %v4583_v19 = vld [vmem:[#allocation14 + $0x2fa8] sm:$0xff]  ;;  %v16400_v20 = vcombine.low %v4546_v13, %v4558_v8  ;;  %v16425_v23 = vcombine.high %v4570_v16, %v4582_v18  ;;  %v16424_v25 = vcombine.low %v4570_v16, %v4582_v18  ;;  %v3145_v13 = vld [vmem:[#allocation14 + $0x2b8] sm:$0xff] }
 0x49d   : > { %v16427_v24 = vcombine.high %v4571_v22, %v4583_v19  ;;  %v16426_v32 = vcombine.low %v4571_v22, %v4583_v19  ;;  %v3180_v22 = vld [vmem:[#allocation14 + $0x3d0] sm:$0xff] }
 0x49e   : > { %v3192_v19 = vld [vmem:[#allocation14 + $0x430] sm:$0xff] }
 0x49f   : > { %12542 = vmatpush1.bf16.msra.mxu1 %v16280_v26  ;;  %12706 = vmatpush1.bf16.msra.mxu0 %v16282_v27  ;;  %v3040_v26 = vmul.f32 0.2, %v16457_v17  ;;  %v3072_v27 = vld [vmem:[#allocation14 + $0x70] sm:$0xff] }
 0x4a0   : > { %12543 = vmatprep.subr.bf16.mxu1 %v16305_v58  ;;  %12707 = vmatprep.subr.bf16.mxu0 %v16307_v30  ;;  %v3061_v58 = vld [vmem:[#allocation14 + $0x18] sm:$0xff]  ;;  %v14917_v33 = vcombine.high %v3060_v40, %v3072_v27  ;;  %v14916_v41 = vcombine.low %v3060_v40, %v3072_v27  ;;  %v15037_v40 = vcombine.high %v3180_v22, %v3192_v19  ;;  %v3204_v27 = vld [vmem:[#allocation14 + $0x490] sm:$0xff] }
 0x4a1   : > { %v3073_v30 = vld [vmem:[#allocation14 + $0x78] sm:$0xff]  ;;  %v3048_v12 = vsel %vm3032_vm13, %v16457_v17, %v3040_v26 }
 0x4a2   : > { %v14919_v34 = vcombine.high %v3061_v58, %v3073_v30  ;;  %v17752_v42 = vpack.c.bf16 %v3048_v12, %v3048_v12  ;;  %v14918_v44 = vcombine.low %v3061_v58, %v3073_v30  ;;  %v3216_v58 = vld [vmem:[#allocation14 + $0x4f0] sm:$0xff]  ;;  %v3205_v30 = vld [vmem:[#allocation14 + $0x498] sm:$0xff] }
 0x4a3   : > { %12544 = vmatpush1.bf16.msra.mxu1 %v16304_v35  ;;  %12708 = vmatpush1.bf16.msra.mxu0 %v16306_v36  ;;  %v3084_v35 = vld [vmem:[#allocation14 + $0xd0] sm:$0xff] }
 0x4a4   : > { %12545 = vmatprep.subr.bf16.mxu1 %v16329_v37  ;;  %12709 = vmatprep.subr.bf16.mxu0 %v16331_v39  ;;  %v3096_v36 = vld [vmem:[#allocation14 + $0x130] sm:$0xff]  ;;  %v3085_v37 = vld [vmem:[#allocation14 + $0xd8] sm:$0xff] }
 0x4a5   : > { %v3097_v39 = vld [vmem:[#allocation14 + $0x138] sm:$0xff]  ;;  %v14941_v45 = vcombine.high %v3084_v35, %v3096_v36  ;;  %v14940_v55 = vcombine.low %v3084_v35, %v3096_v36  ;;  %v3228_v35 = vld [vmem:[#allocation14 + $0x550] sm:$0xff] }
 0x4a6   : > { %v14942_v56 = vcombine.low %v3085_v37, %v3097_v39  ;;  %v3240_v36 = vld [vmem:[#allocation14 + $0x5b0] sm:$0xff] }
 0x4a7   : > { %12546 = vmatpush1.bf16.msra.mxu1 %v16328_v46  ;;  %12710 = vmatpush1.bf16.msra.mxu0 %v16330_v47  ;;  %v14943_v46 = vcombine.high %v3085_v37, %v3097_v39  ;;  %v3108_v47 = vld [vmem:[#allocation14 + $0x190] sm:$0xff]  ;;  %v3229_v37 = vld [vmem:[#allocation14 + $0x558] sm:$0xff] }
 0x4a8   : > { %12547 = vmatprep.subr.bf16.mxu1 %v16353_v48  ;;  %12711 = vmatprep.subr.bf16.mxu0 %v16355_v49  ;;  %v3120_v48 = vld [vmem:[#allocation14 + $0x1f0] sm:$0xff]  ;;  %v3109_v49 = vld [vmem:[#allocation14 + $0x198] sm:$0xff] }
 0x4a9   : > { %v14965_v60 = vcombine.high %v3108_v47, %v3120_v48  ;;  %v14964_v3 = vcombine.low %v3108_v47, %v3120_v48  ;;  %v14966_v4 = vcombine.low %v3109_v49, %v3121_v51  ;;  %v3241_v39 = vld [vmem:[#allocation14 + $0x5b8] sm:$0xff]  ;;  %v3252_v47 = vld [vmem:[#allocation14 + $0x610] sm:$0xff] }
 0x4aa   : > { %v3264_v48 = vld [vmem:[#allocation14 + $0x670] sm:$0xff] }
 0x4ab   : > { %12548 = vmatpush1.bf16.msra.mxu1 %v16352_v61  ;;  %12712 = vmatpush1.bf16.msra.mxu0 %v16354_v62  ;;  %v14967_v61 = vcombine.high %v3109_v49, %v3121_v51  ;;  %v3132_v62 = vld [vmem:[#allocation14 + $0x250] sm:$0xff]  ;;  %v3253_v49 = vld [vmem:[#allocation14 + $0x618] sm:$0xff] }
 0x4ac   : > { %12549 = vmatprep.subr.bf16.mxu1 %v16377_v0  ;;  %12713 = vmatprep.subr.bf16.mxu0 %v16379_v1  ;;  %v3144_v0 = vld [vmem:[#allocation14 + $0x2b0] sm:$0xff]  ;;  %v3133_v1 = vld [vmem:[#allocation14 + $0x258] sm:$0xff] }
 0x4ad   : > { %v14989_v8 = vcombine.high %v3132_v62, %v3144_v0  ;;  %v14991_v9 = vcombine.high %v3133_v1, %v3145_v13  ;;  %v14990_v16 = vcombine.low %v3133_v1, %v3145_v13  ;;  %v3265_v51 = vld [vmem:[#allocation14 + $0x678] sm:$0xff] }
 0x4ae   : > { %v3277_v1 = vld [vmem:[#allocation14 + $0x6d8] sm:$0xff] }
 0x4af   : > { %12550 = vmatpush1.bf16.msra.mxu1 %v16376_v28  ;;  %12714 = vmatpush1.bf16.msra.mxu0 %v16378_v11  ;;  %v3168_v28 = vld [vmem:[#allocation14 + $0x370] sm:$0xff]  ;;  %v3157_v11 = vld [vmem:[#allocation14 + $0x318] sm:$0xff] }
 0x4b0   : > { %12551 = vmatprep.subr.bf16.mxu1 %v16401_v15  ;;  %12715 = vmatprep.subr.bf16.mxu0 %v16403_v14  ;;  %v3169_v15 = vld [vmem:[#allocation14 + $0x378] sm:$0xff]  ;;  %v14988_v14 = vcombine.low %v3132_v62, %v3144_v0  ;;  %v15013_v17 = vcombine.high %v3156_v10, %v3168_v28  ;;  %v3276_v62 = vld [vmem:[#allocation14 + $0x6d0] sm:$0xff] }
 0x4b1   : > { %v15015_v18 = vcombine.high %v3157_v11, %v3169_v15  ;;  %v3288_v0 = vld [vmem:[#allocation14 + $0x730] sm:$0xff]  ;;  %v3289_v13 = vld [vmem:[#allocation14 + $0x738] sm:$0xff] }
 0x4b3   : > { %12552 = vmatpush1.bf16.msra.mxu1 %v16400_v20  ;;  %12716 = vmatpush1.bf16.msra.mxu0 %v16402_v21  ;;  %v3181_v20 = vld [vmem:[#allocation14 + $0x3d8] sm:$0xff] }
 0x4b4   : > { %12553 = vmatprep.subr.bf16.mxu1 %v16425_v23  ;;  %12717 = vmatprep.subr.bf16.mxu0 %v16427_v24  ;;  %v3193_v21 = vld [vmem:[#allocation14 + $0x438] sm:$0xff]  ;;  %v15012_v23 = vcombine.low %v3156_v10, %v3168_v28  ;;  %v15014_v24 = vcombine.low %v3157_v11, %v3169_v15  ;;  %v3300_v10 = vld [vmem:[#allocation14 + $0x790] sm:$0xff] }
 0x4b5   : > { %v15039_v26 = vcombine.high %v3181_v20, %v3193_v21  ;;  %v3312_v28 = vld [vmem:[#allocation14 + $0x7f0] sm:$0xff]  ;;  %v3301_v11 = vld [vmem:[#allocation14 + $0x798] sm:$0xff] }
 0x4b6   : > { %v3313_v15 = vld [vmem:[#allocation14 + $0x7f8] sm:$0xff] }
 0x4b7   : > { %12554 = vmatpush1.bf16.msra.mxu1 %v16424_v25  ;;  %12718 = vmatpush1.bf16.msra.mxu0 %v16426_v32  ;;  %v3217_v25 = vld [vmem:[#allocation14 + $0x4f8] sm:$0xff]  ;;  %v15036_v32 = vcombine.low %v3180_v22, %v3192_v19  ;;  %v3324_v22 = vld [vmem:[#allocation14 + $0x850] sm:$0xff] }
 0x4b8   : > { %12728 = vmatprep.subr.bf16.mxu1 %v14917_v33  ;;  %12892 = vmatprep.subr.bf16.mxu0 %v14919_v34  ;;  %v15038_v33 = vcombine.low %v3181_v20, %v3193_v21  ;;  %v15061_v34 = vcombine.high %v3204_v27, %v3216_v58  ;;  %v15063_v12 = vcombine.high %v3205_v30, %v3217_v25  ;;  %v3336_v19 = vld [vmem:[#allocation14 + $0x8b0] sm:$0xff]  ;;  %v3325_v20 = vld [vmem:[#allocation14 + $0x858] sm:$0xff] }
 0x4b9   : > { %v3337_v21 = vld [vmem:[#allocation14 + $0x8b8] sm:$0xff] }
 0x4ba   : > { %12556 = vmatmul.mubr.bf16.vlgmr.msra.gmra.mrb[12].mxu1 %v17752_v42  ;;  %12720 = vmatmul.mubr.bf16.vlgmr.msra.gmra.mrb[16].mxu0 %v17752_v42 }
 0x4bb   : > { %12729 = vmatpush1.bf16.msra.mxu1 %v14916_v41  ;;  %12760 = vmatprep.mubr.bf16.mxu1 %v17699_v38  ;;  %v15060_v41 = vcombine.low %v3204_v27, %v3216_v58  ;;  %v3348_v27 = vld [vmem:[#allocation14 + $0x910] sm:$0xff] }
 0x4bc   : > { %12893 = vmatpush1.bf16.msra.mxu0 %v14918_v44  ;;  %12924 = vmatprep.mubr.bf16.mxu0 %v17699_v38  ;;  %v15062_v44 = vcombine.low %v3205_v30, %v3217_v25  ;;  %v3360_v58 = vld [vmem:[#allocation14 + $0x970] sm:$0xff]  ;;  %v3349_v30 = vld [vmem:[#allocation14 + $0x918] sm:$0xff] }
 0x4bd   : > { %12730 = vmatprep.subr.bf16.mxu1 %v14941_v45  ;;  %12894 = vmatprep.subr.bf16.mxu0 %v14943_v46  ;;  %v15085_v45 = vcombine.high %v3228_v35, %v3240_v36  ;;  %v15087_v46 = vcombine.high %v3229_v37, %v3241_v39  ;;  %v3361_v25 = vld [vmem:[#allocation14 + $0x978] sm:$0xff] }
 0x4bf   : > { %12731 = vmatpush1.bf16.msra.mxu1 %v14940_v55  ;;  %v15084_v55 = vcombine.low %v3228_v35, %v3240_v36  ;;  %v3372_v35 = vld [vmem:[#allocation14 + $0x9d0] sm:$0xff] }
 0x4c0   : > { %12895 = vmatpush1.bf16.msra.mxu0 %v14942_v56  ;;  %12732 = vmatprep.subr.bf16.mxu1 %v14965_v60  ;;  %v15086_v56 = vcombine.low %v3229_v37, %v3241_v39  ;;  %v15109_v60 = vcombine.high %v3252_v47, %v3264_v48  ;;  %v3384_v36 = vld [vmem:[#allocation14 + $0xa30] sm:$0xff]  ;;  %v3373_v37 = vld [vmem:[#allocation14 + $0x9d8] sm:$0xff] }
 0x4c1   : > { %12896 = vmatprep.subr.bf16.mxu0 %v14967_v61  ;;  %v15111_v61 = vcombine.high %v3253_v49, %v3265_v51  ;;  %v3385_v39 = vld [vmem:[#allocation14 + $0xa38] sm:$0xff] }
 0x4c3   : > { %12733 = vmatpush1.bf16.msra.mxu1 %v14964_v3  ;;  %v15108_v3 = vcombine.low %v3252_v47, %v3264_v48  ;;  %v3396_v47 = vld [vmem:[#allocation14 + $0xa90] sm:$0xff] }
 0x4c4   : > { %12897 = vmatpush1.bf16.msra.mxu0 %v14966_v4  ;;  %12734 = vmatprep.subr.bf16.mxu1 %v14989_v8  ;;  %v15110_v4 = vcombine.low %v3253_v49, %v3265_v51  ;;  %v15133_v8 = vcombine.high %v3276_v62, %v3288_v0  ;;  %v3408_v48 = vld [vmem:[#allocation14 + $0xaf0] sm:$0xff]  ;;  %v3397_v49 = vld [vmem:[#allocation14 + $0xa98] sm:$0xff] }
 0x4c5   : > { %12898 = vmatprep.subr.bf16.mxu0 %v14991_v9  ;;  %v15135_v9 = vcombine.high %v3277_v1, %v3289_v13  ;;  %v3409_v51 = vld [vmem:[#allocation14 + $0xaf8] sm:$0xff] }
 0x4c7   : > { %12735 = vmatpush1.bf16.msra.mxu1 %v14988_v14  ;;  %v15132_v14 = vcombine.low %v3276_v62, %v3288_v0  ;;  %v3420_v62 = vld [vmem:[#allocation14 + $0xb50] sm:$0xff] }
 0x4c8   : > { %12899 = vmatpush1.bf16.msra.mxu0 %v14990_v16  ;;  %12736 = vmatprep.subr.bf16.mxu1 %v15013_v17  ;;  %v15134_v16 = vcombine.low %v3277_v1, %v3289_v13  ;;  %v15157_v17 = vcombine.high %v3300_v10, %v3312_v28  ;;  %v3432_v0 = vld [vmem:[#allocation14 + $0xbb0] sm:$0xff]  ;;  %v3421_v1 = vld [vmem:[#allocation14 + $0xb58] sm:$0xff] }
 0x4c9   : > { %12900 = vmatprep.subr.bf16.mxu0 %v15015_v18  ;;  %v15159_v18 = vcombine.high %v3301_v11, %v3313_v15  ;;  %v3433_v13 = vld [vmem:[#allocation14 + $0xbb8] sm:$0xff] }
 0x4cb   : > { %12737 = vmatpush1.bf16.msra.mxu1 %v15012_v23  ;;  %v15156_v23 = vcombine.low %v3300_v10, %v3312_v28  ;;  %v3444_v10 = vld [vmem:[#allocation14 + $0xc10] sm:$0xff] }
 0x4cc   : > { %12901 = vmatpush1.bf16.msra.mxu0 %v15014_v24  ;;  %12738 = vmatprep.subr.bf16.mxu1 %v15037_v40  ;;  %v15158_v24 = vcombine.low %v3301_v11, %v3313_v15  ;;  %v15181_v40 = vcombine.high %v3324_v22, %v3336_v19  ;;  %v3456_v28 = vld [vmem:[#allocation14 + $0xc70] sm:$0xff]  ;;  %v3445_v11 = vld [vmem:[#allocation14 + $0xc18] sm:$0xff] }
 0x4cd   : > { %12902 = vmatprep.subr.bf16.mxu0 %v15039_v26  ;;  %v15183_v26 = vcombine.high %v3325_v20, %v3337_v21  ;;  %v3457_v15 = vld [vmem:[#allocation14 + $0xc78] sm:$0xff] }
 0x4cf   : > { %12739 = vmatpush1.bf16.msra.mxu1 %v15036_v32  ;;  %v15180_v32 = vcombine.low %v3324_v22, %v3336_v19  ;;  %v3468_v22 = vld [vmem:[#allocation14 + $0xcd0] sm:$0xff] }
 0x4d0   : > { %12903 = vmatpush1.bf16.msra.mxu0 %v15038_v33  ;;  %12740 = vmatprep.subr.bf16.mxu1 %v15061_v34  ;;  %v15182_v33 = vcombine.low %v3325_v20, %v3337_v21  ;;  %v15205_v34 = vcombine.high %v3348_v27, %v3360_v58  ;;  %v3480_v19 = vld [vmem:[#allocation14 + $0xd30] sm:$0xff]  ;;  %v15300_v20 = vcombine.low %v3444_v10, %v3456_v28  ;;  %v3469_v21 = vld [vmem:[#allocation14 + $0xcd8] sm:$0xff] }
 0x4d1   : > { %12904 = vmatprep.subr.bf16.mxu0 %v15063_v12  ;;  %v15207_v12 = vcombine.high %v3349_v30, %v3361_v25 }
 0x4d3   : > { %12741 = vmatpush1.bf16.msra.mxu1 %v15060_v41  ;;  %v15204_v41 = vcombine.low %v3348_v27, %v3360_v58  ;;  %v3504_v27 = vld [vmem:[#allocation14 + $0xdf0] sm:$0xff] }
 0x4d4   : > { %12905 = vmatpush1.bf16.msra.mxu0 %v15062_v44  ;;  %12742 = vmatprep.subr.bf16.mxu1 %v15085_v45  ;;  %v15206_v44 = vcombine.low %v3349_v30, %v3361_v25  ;;  %v15229_v45 = vcombine.high %v3372_v35, %v3384_v36  ;;  %v3493_v30 = vld [vmem:[#allocation14 + $0xd98] sm:$0xff] }
 0x4d5   : > { %12906 = vmatprep.subr.bf16.mxu0 %v15087_v46  ;;  %v15231_v46 = vcombine.high %v3373_v37, %v3385_v39  ;;  %v3505_v25 = vld [vmem:[#allocation14 + $0xdf8] sm:$0xff] }
 0x4d7   : > { %12743 = vmatpush1.bf16.msra.mxu1 %v15084_v55  ;;  %v15228_v55 = vcombine.low %v3372_v35, %v3384_v36  ;;  %v3516_v35 = vld [vmem:[#allocation14 + $0xe50] sm:$0xff] }
 0x4d8   : > { %12907 = vmatpush1.bf16.msra.mxu0 %v15086_v56  ;;  %12744 = vmatprep.subr.bf16.mxu1 %v15109_v60  ;;  %v15230_v56 = vcombine.low %v3373_v37, %v3385_v39  ;;  %v15253_v60 = vcombine.high %v3396_v47, %v3408_v48  ;;  %v3528_v36 = vld [vmem:[#allocation14 + $0xeb0] sm:$0xff]  ;;  %v3517_v37 = vld [vmem:[#allocation14 + $0xe58] sm:$0xff] }
 0x4d9   : > { %12908 = vmatprep.subr.bf16.mxu0 %v15111_v61  ;;  %v15255_v61 = vcombine.high %v3397_v49, %v3409_v51  ;;  %v3529_v39 = vld [vmem:[#allocation14 + $0xeb8] sm:$0xff] }
 0x4db   : > { %12745 = vmatpush1.bf16.msra.mxu1 %v15108_v3  ;;  %v15252_v3 = vcombine.low %v3396_v47, %v3408_v48  ;;  %v3540_v47 = vld [vmem:[#allocation14 + $0xf10] sm:$0xff] }
 0x4dc   : > { %12909 = vmatpush1.bf16.msra.mxu0 %v15110_v4  ;;  %12746 = vmatprep.subr.bf16.mxu1 %v15133_v8  ;;  %v15254_v4 = vcombine.low %v3397_v49, %v3409_v51  ;;  %v15277_v8 = vcombine.high %v3420_v62, %v3432_v0  ;;  %v3552_v48 = vld [vmem:[#allocation14 + $0xf70] sm:$0xff]  ;;  %v3541_v49 = vld [vmem:[#allocation14 + $0xf18] sm:$0xff] }
 0x4dd   : > { %12910 = vmatprep.subr.bf16.mxu0 %v15135_v9  ;;  %v15279_v9 = vcombine.high %v3421_v1, %v3433_v13  ;;  %v3553_v51 = vld [vmem:[#allocation14 + $0xf78] sm:$0xff] }
 0x4df   : > { %12747 = vmatpush1.bf16.msra.mxu1 %v15132_v14  ;;  %v15276_v14 = vcombine.low %v3420_v62, %v3432_v0  ;;  %v3564_v62 = vld [vmem:[#allocation14 + $0xfd0] sm:$0xff] }
 0x4e0   : > { %12911 = vmatpush1.bf16.msra.mxu0 %v15134_v16  ;;  %12748 = vmatprep.subr.bf16.mxu1 %v15157_v17  ;;  %v15278_v16 = vcombine.low %v3421_v1, %v3433_v13  ;;  %v15301_v17 = vcombine.high %v3444_v10, %v3456_v28  ;;  %v3576_v0 = vld [vmem:[#allocation14 + $0x1030] sm:$0xff]  ;;  %v3565_v1 = vld [vmem:[#allocation14 + $0xfd8] sm:$0xff] }
 0x4e1   : > { %12912 = vmatprep.subr.bf16.mxu0 %v15159_v18  ;;  %v15303_v18 = vcombine.high %v3445_v11, %v3457_v15  ;;  %v3577_v13 = vld [vmem:[#allocation14 + $0x1038] sm:$0xff]  ;;  %v3588_v10 = vld [vmem:[#allocation14 + $0x1090] sm:$0xff] }
 0x4e2   : > { %v3600_v28 = vld [vmem:[#allocation14 + $0x10f0] sm:$0xff] }
 0x4e3   : > { %12749 = vmatpush1.bf16.msra.mxu1 %v15156_v23  ;;  %v3481_v23 = vld [vmem:[#allocation14 + $0xd38] sm:$0xff] }
 0x4e4   : > { %12913 = vmatpush1.bf16.msra.mxu0 %v15158_v24  ;;  %12750 = vmatprep.subr.bf16.mxu1 %v15181_v40  ;;  %v15302_v24 = vcombine.low %v3445_v11, %v3457_v15  ;;  %v15325_v40 = vcombine.high %v3468_v22, %v3480_v19  ;;  %v15327_v58 = vcombine.high %v3469_v21, %v3481_v23  ;;  %v3589_v11 = vld [vmem:[#allocation14 + $0x1098] sm:$0xff] }
 0x4e5   : > { %12914 = vmatprep.subr.bf16.mxu0 %v15183_v26  ;;  %v3492_v26 = vld [vmem:[#allocation14 + $0xd90] sm:$0xff]  ;;  %v3601_v15 = vld [vmem:[#allocation14 + $0x10f8] sm:$0xff] }
 0x4e7   : > { %12751 = vmatpush1.bf16.msra.mxu1 %v15180_v32  ;;  %v15324_v32 = vcombine.low %v3468_v22, %v3480_v19  ;;  %v3612_v22 = vld [vmem:[#allocation14 + $0x1150] sm:$0xff] }
 0x4e8   : > { %12915 = vmatpush1.bf16.msra.mxu0 %v15182_v33  ;;  %12752 = vmatprep.subr.bf16.mxu1 %v15205_v34  ;;  %v15326_v33 = vcombine.low %v3469_v21, %v3481_v23  ;;  %v15349_v34 = vcombine.high %v3492_v26, %v3504_v27  ;;  %v3624_v19 = vld [vmem:[#allocation14 + $0x11b0] sm:$0xff]  ;;  %v3625_v21 = vld [vmem:[#allocation14 + $0x11b8] sm:$0xff]  ;;  %v15444_v23 = vcombine.low %v3588_v10, %v3600_v28 }
 0x4e9   : > { %12916 = vmatprep.subr.bf16.mxu0 %v15207_v12  ;;  %v15351_v12 = vcombine.high %v3493_v30, %v3505_v25 }
 0x4eb   : > { %12753 = vmatpush1.bf16.msra.mxu1 %v15204_v41  ;;  %v15348_v41 = vcombine.low %v3492_v26, %v3504_v27  ;;  %v3636_v27 = vld [vmem:[#allocation14 + $0x1210] sm:$0xff] }
 0x4ec   : > { %12917 = vmatpush1.bf16.msra.mxu0 %v15206_v44  ;;  %12754 = vmatprep.subr.bf16.mxu1 %v15229_v45  ;;  %v15350_v44 = vcombine.low %v3493_v30, %v3505_v25  ;;  %v15373_v45 = vcombine.high %v3516_v35, %v3528_v36  ;;  %v3637_v30 = vld [vmem:[#allocation14 + $0x1218] sm:$0xff] }
 0x4ed   : > { %12918 = vmatprep.subr.bf16.mxu0 %v15231_v46  ;;  %v15375_v46 = vcombine.high %v3517_v37, %v3529_v39  ;;  %v3649_v25 = vld [vmem:[#allocation14 + $0x1278] sm:$0xff] }
 0x4ef   : > { %12755 = vmatpush1.bf16.msra.mxu1 %v15228_v55  ;;  %v15372_v55 = vcombine.low %v3516_v35, %v3528_v36  ;;  %v3660_v35 = vld [vmem:[#allocation14 + $0x12d0] sm:$0xff] }
 0x4f0   : > { %12919 = vmatpush1.bf16.msra.mxu0 %v15230_v56  ;;  %12756 = vmatprep.subr.bf16.mxu1 %v15253_v60  ;;  %v15374_v56 = vcombine.low %v3517_v37, %v3529_v39  ;;  %v15397_v60 = vcombine.high %v3540_v47, %v3552_v48  ;;  %v3672_v36 = vld [vmem:[#allocation14 + $0x1330] sm:$0xff]  ;;  %v3661_v37 = vld [vmem:[#allocation14 + $0x12d8] sm:$0xff] }
 0x4f1   : > { %12920 = vmatprep.subr.bf16.mxu0 %v15255_v61  ;;  %v15399_v61 = vcombine.high %v3541_v49, %v3553_v51  ;;  %v3673_v39 = vld [vmem:[#allocation14 + $0x1338] sm:$0xff] }
 0x4f3   : > { %12757 = vmatpush1.bf16.msra.mxu1 %v15252_v3  ;;  %v15396_v3 = vcombine.low %v3540_v47, %v3552_v48  ;;  %v3684_v47 = vld [vmem:[#allocation14 + $0x1390] sm:$0xff] }
 0x4f4   : > { %12921 = vmatpush1.bf16.msra.mxu0 %v15254_v4  ;;  %12758 = vmatprep.subr.bf16.mxu1 %v15277_v8  ;;  %v15398_v4 = vcombine.low %v3541_v49, %v3553_v51  ;;  %v15421_v8 = vcombine.high %v3564_v62, %v3576_v0  ;;  %v3696_v48 = vld [vmem:[#allocation14 + $0x13f0] sm:$0xff]  ;;  %v3685_v49 = vld [vmem:[#allocation14 + $0x1398] sm:$0xff] }
 0x4f5   : > { %12922 = vmatprep.subr.bf16.mxu0 %v15279_v9  ;;  %v15423_v9 = vcombine.high %v3565_v1, %v3577_v13  ;;  %v3697_v51 = vld [vmem:[#allocation14 + $0x13f8] sm:$0xff] }
 0x4f7   : > { %12759 = vmatpush1.bf16.msra.mxu1 %v15276_v14  ;;  %v15420_v14 = vcombine.low %v3564_v62, %v3576_v0  ;;  %v3708_v62 = vld [vmem:[#allocation14 + $0x1450] sm:$0xff] }
 0x4f8   : > { %12923 = vmatpush1.bf16.msra.mxu0 %v15278_v16  ;;  %12769 = vmatprep.subr.bf16.mxu1 %v15301_v17  ;;  %v15422_v16 = vcombine.low %v3565_v1, %v3577_v13  ;;  %v15445_v17 = vcombine.high %v3588_v10, %v3600_v28  ;;  %v3720_v0 = vld [vmem:[#allocation14 + $0x14b0] sm:$0xff]  ;;  %v3709_v1 = vld [vmem:[#allocation14 + $0x1458] sm:$0xff] }
 0x4f9   : > { %12933 = vmatprep.subr.bf16.mxu0 %v15303_v18  ;;  %v15447_v18 = vcombine.high %v3589_v11, %v3601_v15  ;;  %v3721_v13 = vld [vmem:[#allocation14 + $0x14b8] sm:$0xff]  ;;  %v3732_v10 = vld [vmem:[#allocation14 + $0x1510] sm:$0xff] }
 0x4fa   : > { %12761 = vmatmul.mubr.bf16.vlgmr.msra.gmra.mrb[16].mxu1 %v17701_v43  ;;  %v3744_v28 = vld [vmem:[#allocation14 + $0x1570] sm:$0xff] }
 0x4fb   : > { %12925 = vmatmul.mubr.bf16.vlgmr.msra.gmra.mrb[20].mxu0 %v17701_v43  ;;  %12770 = vmatpush1.bf16.msra.mxu1 %v15300_v20  ;;  %v3613_v20 = vld [vmem:[#allocation14 + $0x1158] sm:$0xff] }
 0x4fc   : > { %12801 = vmatprep.mubr.bf16.mxu1 %v17705_v50  ;;  %12934 = vmatpush1.bf16.msra.mxu0 %v15302_v24  ;;  %v15446_v24 = vcombine.low %v3589_v11, %v3601_v15  ;;  %v15471_v26 = vcombine.high %v3613_v20, %v3625_v21  ;;  %v3733_v11 = vld [vmem:[#allocation14 + $0x1518] sm:$0xff] }
 0x4fd   : > { %12965 = vmatprep.mubr.bf16.mxu0 %v17705_v50  ;;  %12771 = vmatprep.subr.bf16.mxu1 %v15325_v40  ;;  %v15469_v40 = vcombine.high %v3612_v22, %v3624_v19  ;;  %v3745_v15 = vld [vmem:[#allocation14 + $0x1578] sm:$0xff] }
 0x4fe   : > { %12935 = vmatprep.subr.bf16.mxu0 %v15327_v58  ;;  %v3648_v58 = vld [vmem:[#allocation14 + $0x1270] sm:$0xff] }
 0x4ff   : > { %12772 = vmatpush1.bf16.msra.mxu1 %v15324_v32  ;;  %v15468_v32 = vcombine.low %v3612_v22, %v3624_v19  ;;  %v3756_v22 = vld [vmem:[#allocation14 + $0x15d0] sm:$0xff] }
 0x500   : > { %12936 = vmatpush1.bf16.msra.mxu0 %v15326_v33  ;;  %12773 = vmatprep.subr.bf16.mxu1 %v15349_v34  ;;  %v15470_v33 = vcombine.low %v3613_v20, %v3625_v21  ;;  %v15493_v34 = vcombine.high %v3636_v27, %v3648_v58  ;;  %v3768_v19 = vld [vmem:[#allocation14 + $0x1630] sm:$0xff]  ;;  %v3757_v20 = vld [vmem:[#allocation14 + $0x15d8] sm:$0xff] }
 0x501   : > { %12937 = vmatprep.subr.bf16.mxu0 %v15351_v12  ;;  %v15495_v12 = vcombine.high %v3637_v30, %v3649_v25  ;;  %v3769_v21 = vld [vmem:[#allocation14 + $0x1638] sm:$0xff] }
 0x503   : > { %12774 = vmatpush1.bf16.msra.mxu1 %v15348_v41  ;;  %v15492_v41 = vcombine.low %v3636_v27, %v3648_v58  ;;  %v3780_v27 = vld [vmem:[#allocation14 + $0x1690] sm:$0xff] }
 0x504   : > { %12938 = vmatpush1.bf16.msra.mxu0 %v15350_v44  ;;  %12775 = vmatprep.subr.bf16.mxu1 %v15373_v45  ;;  %v15494_v44 = vcombine.low %v3637_v30, %v3649_v25  ;;  %v15517_v45 = vcombine.high %v3660_v35, %v3672_v36  ;;  %v3792_v58 = vld [vmem:[#allocation14 + $0x16f0] sm:$0xff]  ;;  %v3781_v30 = vld [vmem:[#allocation14 + $0x1698] sm:$0xff] }
 0x505   : > { %12939 = vmatprep.subr.bf16.mxu0 %v15375_v46  ;;  %v15519_v46 = vcombine.high %v3661_v37, %v3673_v39  ;;  %v3793_v25 = vld [vmem:[#allocation14 + $0x16f8] sm:$0xff] }
 0x507   : > { %12776 = vmatpush1.bf16.msra.mxu1 %v15372_v55  ;;  %v15516_v55 = vcombine.low %v3660_v35, %v3672_v36  ;;  %v3804_v35 = vld [vmem:[#allocation14 + $0x1750] sm:$0xff] }
 0x508   : > { %12940 = vmatpush1.bf16.msra.mxu0 %v15374_v56  ;;  %12777 = vmatprep.subr.bf16.mxu1 %v15397_v60  ;;  %v15518_v56 = vcombine.low %v3661_v37, %v3673_v39  ;;  %v15541_v60 = vcombine.high %v3684_v47, %v3696_v48  ;;  %v3816_v36 = vld [vmem:[#allocation14 + $0x17b0] sm:$0xff]  ;;  %v3805_v37 = vld [vmem:[#allocation14 + $0x1758] sm:$0xff] }
 0x509   : > { %12941 = vmatprep.subr.bf16.mxu0 %v15399_v61  ;;  %v15543_v61 = vcombine.high %v3685_v49, %v3697_v51  ;;  %v3817_v39 = vld [vmem:[#allocation14 + $0x17b8] sm:$0xff] }
 0x50b   : > { %12778 = vmatpush1.bf16.msra.mxu1 %v15396_v3  ;;  %v15540_v3 = vcombine.low %v3684_v47, %v3696_v48  ;;  %v3828_v47 = vld [vmem:[#allocation14 + $0x1810] sm:$0xff] }
 0x50c   : > { %12942 = vmatpush1.bf16.msra.mxu0 %v15398_v4  ;;  %12779 = vmatprep.subr.bf16.mxu1 %v15421_v8  ;;  %v15542_v4 = vcombine.low %v3685_v49, %v3697_v51  ;;  %v15565_v8 = vcombine.high %v3708_v62, %v3720_v0  ;;  %v3840_v48 = vld [vmem:[#allocation14 + $0x1870] sm:$0xff]  ;;  %v3829_v49 = vld [vmem:[#allocation14 + $0x1818] sm:$0xff] }
 0x50d   : > { %12943 = vmatprep.subr.bf16.mxu0 %v15423_v9  ;;  %v15567_v9 = vcombine.high %v3709_v1, %v3721_v13  ;;  %v3841_v51 = vld [vmem:[#allocation14 + $0x1878] sm:$0xff] }
 0x50f   : > { %12780 = vmatpush1.bf16.msra.mxu1 %v15420_v14  ;;  %v15564_v14 = vcombine.low %v3708_v62, %v3720_v0  ;;  %v3852_v62 = vld [vmem:[#allocation14 + $0x18d0] sm:$0xff] }
 0x510   : > { %12944 = vmatpush1.bf16.msra.mxu0 %v15422_v16  ;;  %12781 = vmatprep.subr.bf16.mxu1 %v15445_v17  ;;  %v15566_v16 = vcombine.low %v3709_v1, %v3721_v13  ;;  %v15589_v17 = vcombine.high %v3732_v10, %v3744_v28  ;;  %v3864_v0 = vld [vmem:[#allocation14 + $0x1930] sm:$0xff]  ;;  %v15684_v1 = vcombine.low %v3828_v47, %v3840_v48  ;;  %v3853_v13 = vld [vmem:[#allocation14 + $0x18d8] sm:$0xff] }
 0x511   : > { %12945 = vmatprep.subr.bf16.mxu0 %v15447_v18  ;;  %v15591_v18 = vcombine.high %v3733_v11, %v3745_v15 }
 0x513   : > { %12782 = vmatpush1.bf16.msra.mxu1 %v15444_v23  ;;  %v15588_v23 = vcombine.low %v3732_v10, %v3744_v28  ;;  %v3888_v10 = vld [vmem:[#allocation14 + $0x19f0] sm:$0xff] }
 0x514   : > { %12946 = vmatpush1.bf16.msra.mxu0 %v15446_v24  ;;  %12783 = vmatprep.subr.bf16.mxu1 %v15469_v40  ;;  %v15590_v24 = vcombine.low %v3733_v11, %v3745_v15  ;;  %v15613_v40 = vcombine.high %v3756_v22, %v3768_v19  ;;  %v3877_v11 = vld [vmem:[#allocation14 + $0x1998] sm:$0xff] }
 0x515   : > { %12947 = vmatprep.subr.bf16.mxu0 %v15471_v26  ;;  %v15615_v26 = vcombine.high %v3757_v20, %v3769_v21  ;;  %v3889_v15 = vld [vmem:[#allocation14 + $0x19f8] sm:$0xff] }
 0x517   : > { %12784 = vmatpush1.bf16.msra.mxu1 %v15468_v32  ;;  %v15612_v32 = vcombine.low %v3756_v22, %v3768_v19  ;;  %v3900_v22 = vld [vmem:[#allocation14 + $0x1a50] sm:$0xff] }
 0x518   : > { %12948 = vmatpush1.bf16.msra.mxu0 %v15470_v33  ;;  %12785 = vmatprep.subr.bf16.mxu1 %v15493_v34  ;;  %v15614_v33 = vcombine.low %v3757_v20, %v3769_v21  ;;  %v15637_v34 = vcombine.high %v3780_v27, %v3792_v58  ;;  %v3912_v19 = vld [vmem:[#allocation14 + $0x1ab0] sm:$0xff]  ;;  %v3901_v20 = vld [vmem:[#allocation14 + $0x1a58] sm:$0xff] }
 0x519   : > { %12949 = vmatprep.subr.bf16.mxu0 %v15495_v12  ;;  %v15639_v12 = vcombine.high %v3781_v30, %v3793_v25  ;;  %v3913_v21 = vld [vmem:[#allocation14 + $0x1ab8] sm:$0xff] }
 0x51b   : > { %12786 = vmatpush1.bf16.msra.mxu1 %v15492_v41  ;;  %v15636_v41 = vcombine.low %v3780_v27, %v3792_v58  ;;  %v3924_v27 = vld [vmem:[#allocation14 + $0x1b10] sm:$0xff] }
 0x51c   : > { %12950 = vmatpush1.bf16.msra.mxu0 %v15494_v44  ;;  %12787 = vmatprep.subr.bf16.mxu1 %v15517_v45  ;;  %v15638_v44 = vcombine.low %v3781_v30, %v3793_v25  ;;  %v15661_v45 = vcombine.high %v3804_v35, %v3816_v36  ;;  %v3936_v58 = vld [vmem:[#allocation14 + $0x1b70] sm:$0xff]  ;;  %v3925_v30 = vld [vmem:[#allocation14 + $0x1b18] sm:$0xff] }
 0x51d   : > { %12951 = vmatprep.subr.bf16.mxu0 %v15519_v46  ;;  %v15663_v46 = vcombine.high %v3805_v37, %v3817_v39  ;;  %v3937_v25 = vld [vmem:[#allocation14 + $0x1b78] sm:$0xff] }
 0x51f   : > { %12788 = vmatpush1.bf16.msra.mxu1 %v15516_v55  ;;  %v15660_v55 = vcombine.low %v3804_v35, %v3816_v36  ;;  %v3948_v35 = vld [vmem:[#allocation14 + $0x1bd0] sm:$0xff] }
 0x520   : > { %12952 = vmatpush1.bf16.msra.mxu0 %v15518_v56  ;;  %12789 = vmatprep.subr.bf16.mxu1 %v15541_v60  ;;  %v15662_v56 = vcombine.low %v3805_v37, %v3817_v39  ;;  %v15685_v60 = vcombine.high %v3828_v47, %v3840_v48  ;;  %v3960_v36 = vld [vmem:[#allocation14 + $0x1c30] sm:$0xff]  ;;  %v3949_v37 = vld [vmem:[#allocation14 + $0x1bd8] sm:$0xff] }
 0x521   : > { %12953 = vmatprep.subr.bf16.mxu0 %v15543_v61  ;;  %v15687_v61 = vcombine.high %v3829_v49, %v3841_v51  ;;  %v3961_v39 = vld [vmem:[#allocation14 + $0x1c38] sm:$0xff]  ;;  %v3972_v47 = vld [vmem:[#allocation14 + $0x1c90] sm:$0xff] }
 0x522   : > { %v3984_v48 = vld [vmem:[#allocation14 + $0x1cf0] sm:$0xff] }
 0x523   : > { %12790 = vmatpush1.bf16.msra.mxu1 %v15540_v3  ;;  %v3865_v3 = vld [vmem:[#allocation14 + $0x1938] sm:$0xff] }
 0x524   : > { %12954 = vmatpush1.bf16.msra.mxu0 %v15542_v4  ;;  %12791 = vmatprep.subr.bf16.mxu1 %v15565_v8  ;;  %v15686_v4 = vcombine.low %v3829_v49, %v3841_v51  ;;  %v15709_v8 = vcombine.high %v3852_v62, %v3864_v0  ;;  %v15711_v28 = vcombine.high %v3853_v13, %v3865_v3  ;;  %v3973_v49 = vld [vmem:[#allocation14 + $0x1c98] sm:$0xff] }
 0x525   : > { %12955 = vmatprep.subr.bf16.mxu0 %v15567_v9  ;;  %v3876_v9 = vld [vmem:[#allocation14 + $0x1990] sm:$0xff]  ;;  %v3985_v51 = vld [vmem:[#allocation14 + $0x1cf8] sm:$0xff] }
 0x527   : > { %12792 = vmatpush1.bf16.msra.mxu1 %v15564_v14  ;;  %v15708_v14 = vcombine.low %v3852_v62, %v3864_v0  ;;  %v3996_v62 = vld [vmem:[#allocation14 + $0x1d50] sm:$0xff] }
 0x528   : > { %12956 = vmatpush1.bf16.msra.mxu0 %v15566_v16  ;;  %12793 = vmatprep.subr.bf16.mxu1 %v15589_v17  ;;  %v15710_v16 = vcombine.low %v3853_v13, %v3865_v3  ;;  %v15733_v17 = vcombine.high %v3876_v9, %v3888_v10  ;;  %v4008_v0 = vld [vmem:[#allocation14 + $0x1db0] sm:$0xff]  ;;  %v4009_v13 = vld [vmem:[#allocation14 + $0x1db8] sm:$0xff]  ;;  %v15828_v3 = vcombine.low %v3972_v47, %v3984_v48 }
 0x529   : > { %12957 = vmatprep.subr.bf16.mxu0 %v15591_v18  ;;  %v15735_v18 = vcombine.high %v3877_v11, %v3889_v15 }
 0x52b   : > { %12794 = vmatpush1.bf16.msra.mxu1 %v15588_v23  ;;  %v15732_v23 = vcombine.low %v3876_v9, %v3888_v10  ;;  %v4020_v10 = vld [vmem:[#allocation14 + $0x1e10] sm:$0xff] }
 0x52c   : > { %12958 = vmatpush1.bf16.msra.mxu0 %v15590_v24  ;;  %12795 = vmatprep.subr.bf16.mxu1 %v15613_v40  ;;  %v15734_v24 = vcombine.low %v3877_v11, %v3889_v15  ;;  %v15757_v40 = vcombine.high %v3900_v22, %v3912_v19  ;;  %v4021_v11 = vld [vmem:[#allocation14 + $0x1e18] sm:$0xff] }
 0x52d   : > { %12959 = vmatprep.subr.bf16.mxu0 %v15615_v26  ;;  %v15759_v26 = vcombine.high %v3901_v20, %v3913_v21  ;;  %v4033_v15 = vld [vmem:[#allocation14 + $0x1e78] sm:$0xff] }
 0x52f   : > { %12796 = vmatpush1.bf16.msra.mxu1 %v15612_v32  ;;  %v15756_v32 = vcombine.low %v3900_v22, %v3912_v19  ;;  %v4044_v22 = vld [vmem:[#allocation14 + $0x1ed0] sm:$0xff] }
 0x530   : > { %12960 = vmatpush1.bf16.msra.mxu0 %v15614_v33  ;;  %12797 = vmatprep.subr.bf16.mxu1 %v15637_v34  ;;  %v15758_v33 = vcombine.low %v3901_v20, %v3913_v21  ;;  %v15781_v34 = vcombine.high %v3924_v27, %v3936_v58  ;;  %v4056_v19 = vld [vmem:[#allocation14 + $0x1f30] sm:$0xff]  ;;  %v4045_v20 = vld [vmem:[#allocation14 + $0x1ed8] sm:$0xff] }
 0x531   : > { %12961 = vmatprep.subr.bf16.mxu0 %v15639_v12  ;;  %v15783_v12 = vcombine.high %v3925_v30, %v3937_v25  ;;  %v4057_v21 = vld [vmem:[#allocation14 + $0x1f38] sm:$0xff] }
 0x533   : > { %12798 = vmatpush1.bf16.msra.mxu1 %v15636_v41  ;;  %v15780_v41 = vcombine.low %v3924_v27, %v3936_v58  ;;  %v4068_v27 = vld [vmem:[#allocation14 + $0x1f90] sm:$0xff] }
 0x534   : > { %12962 = vmatpush1.bf16.msra.mxu0 %v15638_v44  ;;  %12799 = vmatprep.subr.bf16.mxu1 %v15661_v45  ;;  %v15782_v44 = vcombine.low %v3925_v30, %v3937_v25  ;;  %v15805_v45 = vcombine.high %v3948_v35, %v3960_v36  ;;  %v4080_v58 = vld [vmem:[#allocation14 + $0x1ff0] sm:$0xff]  ;;  %v4069_v30 = vld [vmem:[#allocation14 + $0x1f98] sm:$0xff] }
 0x535   : > { %12963 = vmatprep.subr.bf16.mxu0 %v15663_v46  ;;  %v15807_v46 = vcombine.high %v3949_v37, %v3961_v39  ;;  %v4081_v25 = vld [vmem:[#allocation14 + $0x1ff8] sm:$0xff] }
 0x537   : > { %12800 = vmatpush1.bf16.msra.mxu1 %v15660_v55  ;;  %v15804_v55 = vcombine.low %v3948_v35, %v3960_v36  ;;  %v4092_v35 = vld [vmem:[#allocation14 + $0x2050] sm:$0xff] }
 0x538   : > { %12964 = vmatpush1.bf16.msra.mxu0 %v15662_v56  ;;  %12810 = vmatprep.subr.bf16.mxu1 %v15685_v60  ;;  %v15806_v56 = vcombine.low %v3949_v37, %v3961_v39  ;;  %v15829_v60 = vcombine.high %v3972_v47, %v3984_v48  ;;  %v4104_v36 = vld [vmem:[#allocation14 + $0x20b0] sm:$0xff]  ;;  %v4093_v37 = vld [vmem:[#allocation14 + $0x2058] sm:$0xff] }
 0x539   : > { %12974 = vmatprep.subr.bf16.mxu0 %v15687_v61  ;;  %v15831_v61 = vcombine.high %v3973_v49, %v3985_v51  ;;  %v4105_v39 = vld [vmem:[#allocation14 + $0x20b8] sm:$0xff]  ;;  %v4116_v47 = vld [vmem:[#allocation14 + $0x2110] sm:$0xff] }
 0x53a   : > { %12802 = vmatmul.mubr.bf16.vlgmr.msra.gmra.mrb[16].mxu1 %v17714_v7  ;;  %v4128_v48 = vld [vmem:[#allocation14 + $0x2170] sm:$0xff] }
 0x53b   : > { %12966 = vmatmul.mubr.bf16.vlgmr.msra.gmra.mrb[20].mxu0 %v17714_v7  ;;  %12811 = vmatpush1.bf16.msra.mxu1 %v15684_v1  ;;  %v3997_v1 = vld [vmem:[#allocation14 + $0x1d58] sm:$0xff] }
 0x53c   : > { %12842 = vmatprep.mubr.bf16.mxu1 %v17735_v57  ;;  %12975 = vmatpush1.bf16.msra.mxu0 %v15686_v4  ;;  %v15830_v4 = vcombine.low %v3973_v49, %v3985_v51  ;;  %v15855_v9 = vcombine.high %v3997_v1, %v4009_v13  ;;  %v4117_v49 = vld [vmem:[#allocation14 + $0x2118] sm:$0xff] }
 0x53d   : > { %13006 = vmatprep.mubr.bf16.mxu0 %v17735_v57  ;;  %12812 = vmatprep.subr.bf16.mxu1 %v15709_v8  ;;  %v15853_v8 = vcombine.high %v3996_v62, %v4008_v0  ;;  %v4129_v51 = vld [vmem:[#allocation14 + $0x2178] sm:$0xff] }
 0x53e   : > { %12976 = vmatprep.subr.bf16.mxu0 %v15711_v28  ;;  %v4032_v28 = vld [vmem:[#allocation14 + $0x1e70] sm:$0xff] }
 0x53f   : > { %12813 = vmatpush1.bf16.msra.mxu1 %v15708_v14  ;;  %v15852_v14 = vcombine.low %v3996_v62, %v4008_v0  ;;  %v4140_v62 = vld [vmem:[#allocation14 + $0x21d0] sm:$0xff] }
 0x540   : > { %12977 = vmatpush1.bf16.msra.mxu0 %v15710_v16  ;;  %12814 = vmatprep.subr.bf16.mxu1 %v15733_v17  ;;  %v15854_v16 = vcombine.low %v3997_v1, %v4009_v13  ;;  %v15877_v17 = vcombine.high %v4020_v10, %v4032_v28  ;;  %v4152_v0 = vld [vmem:[#allocation14 + $0x2230] sm:$0xff]  ;;  %v4141_v1 = vld [vmem:[#allocation14 + $0x21d8] sm:$0xff] }
 0x541   : > { %12978 = vmatprep.subr.bf16.mxu0 %v15735_v18  ;;  %v15879_v18 = vcombine.high %v4021_v11, %v4033_v15  ;;  %v4153_v13 = vld [vmem:[#allocation14 + $0x2238] sm:$0xff] }
 0x543   : > { %12815 = vmatpush1.bf16.msra.mxu1 %v15732_v23  ;;  %v15876_v23 = vcombine.low %v4020_v10, %v4032_v28  ;;  %v4164_v10 = vld [vmem:[#allocation14 + $0x2290] sm:$0xff] }
 0x544   : > { %12979 = vmatpush1.bf16.msra.mxu0 %v15734_v24  ;;  %12816 = vmatprep.subr.bf16.mxu1 %v15757_v40  ;;  %v15878_v24 = vcombine.low %v4021_v11, %v4033_v15  ;;  %v15901_v40 = vcombine.high %v4044_v22, %v4056_v19  ;;  %v4176_v28 = vld [vmem:[#allocation14 + $0x22f0] sm:$0xff]  ;;  %v4165_v11 = vld [vmem:[#allocation14 + $0x2298] sm:$0xff] }
 0x545   : > { %12980 = vmatprep.subr.bf16.mxu0 %v15759_v26  ;;  %v15903_v26 = vcombine.high %v4045_v20, %v4057_v21  ;;  %v4177_v15 = vld [vmem:[#allocation14 + $0x22f8] sm:$0xff] }
 0x547   : > { %12817 = vmatpush1.bf16.msra.mxu1 %v15756_v32  ;;  %v15900_v32 = vcombine.low %v4044_v22, %v4056_v19  ;;  %v4188_v22 = vld [vmem:[#allocation14 + $0x2350] sm:$0xff] }
 0x548   : > { %12981 = vmatpush1.bf16.msra.mxu0 %v15758_v33  ;;  %12818 = vmatprep.subr.bf16.mxu1 %v15781_v34  ;;  %v15902_v33 = vcombine.low %v4045_v20, %v4057_v21  ;;  %v15925_v34 = vcombine.high %v4068_v27, %v4080_v58  ;;  %v4200_v19 = vld [vmem:[#allocation14 + $0x23b0] sm:$0xff]  ;;  %v4189_v20 = vld [vmem:[#allocation14 + $0x2358] sm:$0xff] }
 0x549   : > { %12982 = vmatprep.subr.bf16.mxu0 %v15783_v12  ;;  %v15927_v12 = vcombine.high %v4069_v30, %v4081_v25  ;;  %v4201_v21 = vld [vmem:[#allocation14 + $0x23b8] sm:$0xff] }
 0x54b   : > { %12819 = vmatpush1.bf16.msra.mxu1 %v15780_v41  ;;  %v15924_v41 = vcombine.low %v4068_v27, %v4080_v58  ;;  %v4212_v27 = vld [vmem:[#allocation14 + $0x2410] sm:$0xff] }
 0x54c   : > { %12983 = vmatpush1.bf16.msra.mxu0 %v15782_v44  ;;  %12820 = vmatprep.subr.bf16.mxu1 %v15805_v45  ;;  %v15926_v44 = vcombine.low %v4069_v30, %v4081_v25  ;;  %v15949_v45 = vcombine.high %v4092_v35, %v4104_v36  ;;  %v4224_v58 = vld [vmem:[#allocation14 + $0x2470] sm:$0xff]  ;;  %v4213_v30 = vld [vmem:[#allocation14 + $0x2418] sm:$0xff] }
 0x54d   : > { %12984 = vmatprep.subr.bf16.mxu0 %v15807_v46  ;;  %v15951_v46 = vcombine.high %v4093_v37, %v4105_v39  ;;  %v4225_v25 = vld [vmem:[#allocation14 + $0x2478] sm:$0xff] }
 0x54f   : > { %12821 = vmatpush1.bf16.msra.mxu1 %v15804_v55  ;;  %v15948_v55 = vcombine.low %v4092_v35, %v4104_v36  ;;  %v4236_v35 = vld [vmem:[#allocation14 + $0x24d0] sm:$0xff] }
 0x550   : > { %12985 = vmatpush1.bf16.msra.mxu0 %v15806_v56  ;;  %12822 = vmatprep.subr.bf16.mxu1 %v15829_v60  ;;  %v15950_v56 = vcombine.low %v4093_v37, %v4105_v39  ;;  %v15973_v60 = vcombine.high %v4116_v47, %v4128_v48  ;;  %v4248_v36 = vld [vmem:[#allocation14 + $0x2530] sm:$0xff]  ;;  %v16068_v37 = vcombine.low %v4212_v27, %v4224_v58  ;;  %v4237_v39 = vld [vmem:[#allocation14 + $0x24d8] sm:$0xff] }
 0x551   : > { %12986 = vmatprep.subr.bf16.mxu0 %v15831_v61  ;;  %v15975_v61 = vcombine.high %v4117_v49, %v4129_v51 }
 0x553   : > { %12823 = vmatpush1.bf16.msra.mxu1 %v15828_v3  ;;  %v15972_v3 = vcombine.low %v4116_v47, %v4128_v48  ;;  %v4272_v47 = vld [vmem:[#allocation14 + $0x25f0] sm:$0xff] }
 0x554   : > { %12987 = vmatpush1.bf16.msra.mxu0 %v15830_v4  ;;  %12824 = vmatprep.subr.bf16.mxu1 %v15853_v8  ;;  %v15974_v4 = vcombine.low %v4117_v49, %v4129_v51  ;;  %v15997_v8 = vcombine.high %v4140_v62, %v4152_v0  ;;  %v4261_v49 = vld [vmem:[#allocation14 + $0x2598] sm:$0xff] }
 0x555   : > { %12988 = vmatprep.subr.bf16.mxu0 %v15855_v9  ;;  %v15999_v9 = vcombine.high %v4141_v1, %v4153_v13  ;;  %v4273_v51 = vld [vmem:[#allocation14 + $0x25f8] sm:$0xff] }
 0x557   : > { %12825 = vmatpush1.bf16.msra.mxu1 %v15852_v14  ;;  %v15996_v14 = vcombine.low %v4140_v62, %v4152_v0  ;;  %v4284_v62 = vld [vmem:[#allocation14 + $0x2650] sm:$0xff] }
 0x558   : > { %12989 = vmatpush1.bf16.msra.mxu0 %v15854_v16  ;;  %12826 = vmatprep.subr.bf16.mxu1 %v15877_v17  ;;  %v15998_v16 = vcombine.low %v4141_v1, %v4153_v13  ;;  %v16021_v17 = vcombine.high %v4164_v10, %v4176_v28  ;;  %v4296_v0 = vld [vmem:[#allocation14 + $0x26b0] sm:$0xff]  ;;  %v4285_v1 = vld [vmem:[#allocation14 + $0x2658] sm:$0xff] }
 0x559   : > { %12990 = vmatprep.subr.bf16.mxu0 %v15879_v18  ;;  %v16023_v18 = vcombine.high %v4165_v11, %v4177_v15  ;;  %v4297_v13 = vld [vmem:[#allocation14 + $0x26b8] sm:$0xff] }
 0x55b   : > { %12827 = vmatpush1.bf16.msra.mxu1 %v15876_v23  ;;  %v16020_v23 = vcombine.low %v4164_v10, %v4176_v28  ;;  %v4308_v10 = vld [vmem:[#allocation14 + $0x2710] sm:$0xff] }
 0x55c   : > { %12991 = vmatpush1.bf16.msra.mxu0 %v15878_v24  ;;  %12828 = vmatprep.subr.bf16.mxu1 %v15901_v40  ;;  %v16022_v24 = vcombine.low %v4165_v11, %v4177_v15  ;;  %v16045_v40 = vcombine.high %v4188_v22, %v4200_v19  ;;  %v4320_v28 = vld [vmem:[#allocation14 + $0x2770] sm:$0xff]  ;;  %v4309_v11 = vld [vmem:[#allocation14 + $0x2718] sm:$0xff] }
 0x55d   : > { %12992 = vmatprep.subr.bf16.mxu0 %v15903_v26  ;;  %v16047_v26 = vcombine.high %v4189_v20, %v4201_v21  ;;  %v4321_v15 = vld [vmem:[#allocation14 + $0x2778] sm:$0xff] }
 0x55f   : > { %12829 = vmatpush1.bf16.msra.mxu1 %v15900_v32  ;;  %v16044_v32 = vcombine.low %v4188_v22, %v4200_v19  ;;  %v4332_v22 = vld [vmem:[#allocation14 + $0x27d0] sm:$0xff] }
 0x560   : > { %12993 = vmatpush1.bf16.msra.mxu0 %v15902_v33  ;;  %12830 = vmatprep.subr.bf16.mxu1 %v15925_v34  ;;  %v16046_v33 = vcombine.low %v4189_v20, %v4201_v21  ;;  %v16069_v34 = vcombine.high %v4212_v27, %v4224_v58  ;;  %v4344_v19 = vld [vmem:[#allocation14 + $0x2830] sm:$0xff]  ;;  %v4333_v20 = vld [vmem:[#allocation14 + $0x27d8] sm:$0xff] }
 0x561   : > { %12994 = vmatprep.subr.bf16.mxu0 %v15927_v12  ;;  %v16071_v12 = vcombine.high %v4213_v30, %v4225_v25  ;;  %v4345_v21 = vld [vmem:[#allocation14 + $0x2838] sm:$0xff]  ;;  %v4356_v58 = vld [vmem:[#allocation14 + $0x2890] sm:$0xff] }
 0x562   : > { %v16191_v27 = vcombine.high %v4333_v20, %v4345_v21 }
 0x563   : > { %12831 = vmatpush1.bf16.msra.mxu1 %v15924_v41  ;;  %v4249_v41 = vld [vmem:[#allocation14 + $0x2538] sm:$0xff] }
 0x564   : > { %12995 = vmatpush1.bf16.msra.mxu0 %v15926_v44  ;;  %12832 = vmatprep.subr.bf16.mxu1 %v15949_v45  ;;  %v16070_v44 = vcombine.low %v4213_v30, %v4225_v25  ;;  %v16093_v45 = vcombine.high %v4236_v35, %v4248_v36  ;;  %v16095_v48 = vcombine.high %v4237_v39, %v4249_v41  ;;  %v4368_v30 = vld [vmem:[#allocation14 + $0x28f0] sm:$0xff] }
 0x565   : > { %12996 = vmatprep.subr.bf16.mxu0 %v15951_v46  ;;  %v4260_v46 = vld [vmem:[#allocation14 + $0x2590] sm:$0xff] }
 0x567   : > { %12833 = vmatpush1.bf16.msra.mxu1 %v15948_v55  ;;  %v16092_v55 = vcombine.low %v4236_v35, %v4248_v36  ;;  %v16188_v36 = vcombine.low %v4332_v22, %v4344_v19 }
 0x568   : > { %12997 = vmatpush1.bf16.msra.mxu0 %v15950_v56  ;;  %12834 = vmatprep.subr.bf16.mxu1 %v15973_v60  ;;  %v16094_v56 = vcombine.low %v4237_v39, %v4249_v41  ;;  %v16117_v60 = vcombine.high %v4260_v46, %v4272_v47  ;;  %v16213_v39 = vcombine.high %v4356_v58, %v4368_v30 }
 0x569   : > { %12998 = vmatprep.subr.bf16.mxu0 %v15975_v61  ;;  %v16119_v61 = vcombine.high %v4261_v49, %v4273_v51 }
 0x56b   : > { %12835 = vmatpush1.bf16.msra.mxu1 %v15972_v3  ;;  %v16116_v3 = vcombine.low %v4260_v46, %v4272_v47  ;;  %v4380_v46 = vld [vmem:[#allocation14 + $0x2950] sm:$0xff] }
 0x56c   : > { %12999 = vmatpush1.bf16.msra.mxu0 %v15974_v4  ;;  %12836 = vmatprep.subr.bf16.mxu1 %v15997_v8  ;;  %v16118_v4 = vcombine.low %v4261_v49, %v4273_v51  ;;  %v16141_v8 = vcombine.high %v4284_v62, %v4296_v0  ;;  %v4392_v47 = vld [vmem:[#allocation14 + $0x29b0] sm:$0xff] }
 0x56d   : > { %13000 = vmatprep.subr.bf16.mxu0 %v15999_v9  ;;  %v16143_v9 = vcombine.high %v4285_v1, %v4297_v13 }
 0x56f   : > { %12837 = vmatpush1.bf16.msra.mxu1 %v15996_v14  ;;  %v16140_v14 = vcombine.low %v4284_v62, %v4296_v0 }
 0x570   : > { %13001 = vmatpush1.bf16.msra.mxu0 %v15998_v16  ;;  %12838 = vmatprep.subr.bf16.mxu1 %v16021_v17  ;;  %v16142_v16 = vcombine.low %v4285_v1, %v4297_v13  ;;  %v16165_v17 = vcombine.high %v4308_v10, %v4320_v28  ;;  %v16212_v13 = vcombine.low %v4356_v58, %v4368_v30  ;;  %v4452_v58 = vld [vmem:[#allocation14 + $0x2b90] sm:$0xff] }
 0x571   : > { %13002 = vmatprep.subr.bf16.mxu0 %v16023_v18  ;;  %v16167_v18 = vcombine.high %v4309_v11, %v4321_v15  ;;  %v4464_v30 = vld [vmem:[#allocation14 + $0x2bf0] sm:$0xff] }
 0x573   : > { %12839 = vmatpush1.bf16.msra.mxu1 %v16020_v23  ;;  %v16164_v23 = vcombine.low %v4308_v10, %v4320_v28  ;;  %v4404_v28 = vld [vmem:[#allocation14 + $0x2a10] sm:$0xff] }
 0x574   : > { %13003 = vmatpush1.bf16.msra.mxu0 %v16022_v24  ;;  %12840 = vmatprep.subr.bf16.mxu1 %v16045_v40  ;;  %v4594_v24 = vld [vmem:[#allocation16] sm:$0xff]  ;;  %v16166_v40 = vcombine.low %v4309_v11, %v4321_v15  ;;  %v4416_v11 = vld [vmem:[#allocation14 + $0x2a70] sm:$0xff]  ;;  %v4405_v15 = vld [vmem:[#allocation14 + $0x2a18] sm:$0xff] }
 0x575   : > { %13004 = vmatprep.subr.bf16.mxu0 %v16047_v26  ;;  %v16189_v26 = vcombine.high %v4332_v22, %v4344_v19  ;;  %v4603_v25 = vrot.slane %v4594_v24, %v17639_v29  ;;  %v4615_v35 = vrot.slane %v4594_v24, %v17649_v53  ;;  %v4428_v19 = vld [vmem:[#allocation14 + $0x2ad0] sm:$0xff] }
 0x577   : > { %12841 = vmatpush1.bf16.msra.mxu1 %v16044_v32  ;;  %v4611_v32 = vrot.slane %v4594_v24, %v17672_v59 }
 0x578   : > { %13005 = vmatpush1.bf16.msra.mxu0 %v16046_v33  ;;  %12851 = vmatprep.subr.bf16.mxu1 %v16069_v34  ;;  %v4357_v33 = vld [vmem:[#allocation14 + $0x2898] sm:$0xff] }
 0x579   : > { %13015 = vmatprep.subr.bf16.mxu0 %v16071_v12  ;;  %v4369_v34 = vld [vmem:[#allocation14 + $0x28f8] sm:$0xff]  ;;  %v4607_v12 = vrot.slane %v4594_v24, %v17642_v31  ;;  %v16260_v24 = vcombine.low %v4404_v28, %v4416_v11 }
 0x57a   : > { %12843 = vmatmul.mubr.bf16.vlgmr.msra.gmra.mrb[16].mxu1 %v17737_v52 }
 0x57b   : > { %13007 = vmatmul.mubr.bf16.vlgmr.msra.gmra.mrb[20].mxu0 %v17737_v52  ;;  %12852 = vmatpush1.bf16.msra.mxu1 %v16068_v37  ;;  %v16190_v37 = vcombine.low %v4333_v20, %v4345_v21  ;;  %v4440_v20 = vld [vmem:[#allocation14 + $0x2b30] sm:$0xff]  ;;  %v4429_v21 = vld [vmem:[#allocation14 + $0x2ad8] sm:$0xff] }
 0x57c   : > { %12883 = vmatprep.mubr.bf16.mxu1 %v17741_v6  ;;  %13016 = vmatpush1.bf16.msra.mxu0 %v16070_v44 }
 0x57d   : > { %13047 = vmatprep.mubr.bf16.mxu0 %v17741_v6  ;;  %12853 = vmatprep.subr.bf16.mxu1 %v16093_v45  ;;  %v16215_v45 = vcombine.high %v4357_v33, %v4369_v34 }
 0x57e   : > { %13017 = vmatprep.subr.bf16.mxu0 %v16095_v48 }
 0x57f   : > { %12854 = vmatpush1.bf16.msra.mxu1 %v16092_v55 }
 0x580   : > { %13018 = vmatpush1.bf16.msra.mxu0 %v16094_v56  ;;  %12855 = vmatprep.subr.bf16.mxu1 %v16117_v60  ;;  %v4381_v56 = vld [vmem:[#allocation14 + $0x2958] sm:$0xff] }
 0x581   : > { %13019 = vmatprep.subr.bf16.mxu0 %v16119_v61  ;;  %v4393_v60 = vld [vmem:[#allocation14 + $0x29b8] sm:$0xff] }
 0x582   : > { %v16239_v10 = vcombine.high %v4381_v56, %v4393_v60 }
 0x583   : > { %12856 = vmatpush1.bf16.msra.mxu1 %v16116_v3 }
 0x584   : > { %13020 = vmatpush1.bf16.msra.mxu0 %v16118_v4  ;;  %12857 = vmatprep.subr.bf16.mxu1 %v16141_v8  ;;  %v16214_v8 = vcombine.low %v4357_v33, %v4369_v34  ;;  %v16284_v33 = vcombine.low %v4428_v19, %v4440_v20 }
 0x585   : > { %13021 = vmatprep.subr.bf16.mxu0 %v16143_v9  ;;  %v16237_v9 = vcombine.high %v4380_v46, %v4392_v47 }
 0x587   : > { %12858 = vmatpush1.bf16.msra.mxu1 %v16140_v14  ;;  %v4417_v14 = vld [vmem:[#allocation14 + $0x2a78] sm:$0xff] }
 0x588   : > { %13022 = vmatpush1.bf16.msra.mxu0 %v16142_v16  ;;  %12859 = vmatprep.subr.bf16.mxu1 %v16165_v17  ;;  %v16236_v16 = vcombine.low %v4380_v46, %v4392_v47  ;;  %v16238_v17 = vcombine.low %v4381_v56, %v4393_v60  ;;  %v16263_v22 = vcombine.high %v4405_v15, %v4417_v14 }
 0x589   : > { %13023 = vmatprep.subr.bf16.mxu0 %v16167_v18  ;;  %v16261_v18 = vcombine.high %v4404_v28, %v4416_v11  ;;  %v4548_v28 = vld [vmem:[#allocation14 + $0x2e90] sm:$0xff] }
 0x58a   : > { %v4560_v11 = vld [vmem:[#allocation14 + $0x2ef0] sm:$0xff] }
 0x58b   : > { %12860 = vmatpush1.bf16.msra.mxu1 %v16164_v23  ;;  %v4441_v23 = vld [vmem:[#allocation14 + $0x2b38] sm:$0xff] }
 0x58c   : > { %13024 = vmatpush1.bf16.msra.mxu0 %v16166_v40  ;;  %12861 = vmatprep.subr.bf16.mxu1 %v16189_v26  ;;  %v16262_v40 = vcombine.low %v4405_v15, %v4417_v14  ;;  %v16285_v26 = vcombine.high %v4428_v19, %v4440_v20  ;;  %v16286_v34 = vcombine.low %v4429_v21, %v4441_v23  ;;  %v4549_v15 = vld [vmem:[#allocation14 + $0x2e98] sm:$0xff]  ;;  %v4572_v19 = vld [vmem:[#allocation14 + $0x2f50] sm:$0xff] }
 0x58d   : > { %v12557_v41 = vpop.f32.mrb[12].mxu1  ;;  %v12721_v44 = vpop.f32.mrb[16].mxu0  ;;  %13025 = vmatprep.subr.bf16.mxu0 %v16191_v27  ;;  %v16287_v27 = vcombine.high %v4429_v21, %v4441_v23  ;;  %v4561_v14 = vld [vmem:[#allocation14 + $0x2ef8] sm:$0xff]  ;;  %v4584_v20 = vld [vmem:[#allocation14 + $0x2fb0] sm:$0xff] }
 0x58e   : > { %v16459_v48 = vadd.f32 %v12557_v41, %v4603_v25  ;;  %v16461_v49 = vadd.f32 %v12721_v44, %v4611_v32  ;;  %v12559_v51 = vpop.f32.mrb[13].mxu1  ;;  %v12723_v55 = vpop.f32.mrb[17].mxu0  ;;  %v4453_v25 = vld [vmem:[#allocation14 + $0x2b98] sm:$0xff]  ;;  %v16308_v44 = vcombine.low %v4452_v58, %v4464_v30 }
 0x58f   : > { %v16460_v61 = vadd.f32 %v12559_v51, %v4607_v12  ;;  %v16462_v62 = vadd.f32 %v12723_v55, %v4615_v35  ;;  %v12561_v0 = vpop.f32.mrb[14].mxu1  ;;  %v12725_v1 = vpop.f32.mrb[18].mxu0  ;;  %12862 = vmatpush1.bf16.msra.mxu1 %v16188_v36  ;;  %v4465_v32 = vld [vmem:[#allocation14 + $0x2bf8] sm:$0xff]  ;;  %v16309_v12 = vcombine.high %v4452_v58, %v4464_v30  ;;  %v4476_v36 = vld [vmem:[#allocation14 + $0x2c50] sm:$0xff]  ;;  %v3062_v58 = vld [vmem:[#allocation14 + $0x20] sm:$0xff] }
 0x590   : > { %14368 = vst [vmem:[%s17777_s22] sm:$0xff] %v16459_v48  ;;  %14370 = vst [vmem:[%s17777_s22 + $0x10] sm:$0xff] %v16461_v49  ;;  %13026 = vmatpush1.bf16.msra.mxu0 %v16190_v37  ;;  %v12562_v3 = vpop.f32.mrb[15].mxu1  ;;  %v12726_v4 = vpop.f32.mrb[19].mxu0  ;;  %12863 = vmatprep.subr.bf16.mxu1 %v16213_v39  ;;  %v16311_v35 = vcombine.high %v4453_v25, %v4465_v32  ;;  %v4488_v37 = vld [vmem:[#allocation14 + $0x2cb0] sm:$0xff]  ;;  %v4477_v39 = vld [vmem:[#allocation14 + $0x2c58] sm:$0xff] }
 0x591   : > { %14369 = vst [vmem:[%s17777_s22 + $0x8] sm:$0xff] %v16460_v61  ;;  %14371 = vst [vmem:[%s17777_s22 + $0x18] sm:$0xff] %v16462_v62  ;;  %13027 = vmatprep.subr.bf16.mxu0 %v16215_v45  ;;  %v4489_v41 = vld [vmem:[#allocation14 + $0x2cb8] sm:$0xff]  ;;  %v16310_v45 = vcombine.low %v4453_v25, %v4465_v32  ;;  %v16333_v46 = vcombine.high %v4476_v36, %v4488_v37  ;;  %v4500_v48 = vld [vmem:[#allocation14 + $0x2d10] sm:$0xff]  ;;  %v16332_v56 = vcombine.low %v4476_v36, %v4488_v37 }
 0x592   : > { %v16335_v47 = vcombine.high %v4477_v39, %v4489_v41  ;;  %v4512_v49 = vld [vmem:[#allocation14 + $0x2d70] sm:$0xff]  ;;  %v4501_v51 = vld [vmem:[#allocation14 + $0x2d18] sm:$0xff]  ;;  %v16334_v60 = vcombine.low %v4477_v39, %v4489_v41  ;;  %v3074_v30 = vld [vmem:[#allocation14 + $0x80] sm:$0xff] }
 0x593   : > { %12864 = vmatpush1.bf16.msra.mxu1 %v16212_v13  ;;  %v4513_v55 = vld [vmem:[#allocation14 + $0x2d78] sm:$0xff]  ;;  %v16357_v61 = vcombine.high %v4500_v48, %v4512_v49  ;;  %v4524_v0 = vld [vmem:[#allocation14 + $0x2dd0] sm:$0xff]  ;;  %v16356_v4 = vcombine.low %v4500_v48, %v4512_v49  ;;  %v3063_v25 = vld [vmem:[#allocation14 + $0x28] sm:$0xff]  ;;  %v14920_v39 = vcombine.low %v3062_v58, %v3074_v30 }
 0x594   : > { %13028 = vmatpush1.bf16.msra.mxu0 %v16214_v8  ;;  %12865 = vmatprep.subr.bf16.mxu1 %v16237_v9  ;;  %v16359_v62 = vcombine.high %v4501_v51, %v4513_v55  ;;  %v4536_v1 = vld [vmem:[#allocation14 + $0x2e30] sm:$0xff]  ;;  %v4525_v13 = vld [vmem:[#allocation14 + $0x2dd8] sm:$0xff]  ;;  %v16358_v8 = vcombine.low %v4501_v51, %v4513_v55  ;;  %v3075_v32 = vld [vmem:[#allocation14 + $0x88] sm:$0xff] }
 0x595   : > { %13029 = vmatprep.subr.bf16.mxu0 %v16239_v10  ;;  %v4537_v3 = vld [vmem:[#allocation14 + $0x2e38] sm:$0xff]  ;;  %v16381_v9 = vcombine.high %v4524_v0, %v4536_v1  ;;  %v3086_v36 = vld [vmem:[#allocation14 + $0xe0] sm:$0xff]  ;;  %v3087_v41 = vld [vmem:[#allocation14 + $0xe8] sm:$0xff] }
 0x596   : > { %v16383_v10 = vcombine.high %v4525_v13, %v4537_v3  ;;  %v4573_v21 = vld [vmem:[#allocation14 + $0x2f58] sm:$0xff]  ;;  %v3098_v37 = vld [vmem:[#allocation14 + $0x140] sm:$0xff]  ;;  %v3111_v51 = vld [vmem:[#allocation14 + $0x1a8] sm:$0xff] }
 0x597   : > { %12866 = vmatpush1.bf16.msra.mxu1 %v16236_v16  ;;  %v16380_v16 = vcombine.low %v4524_v0, %v4536_v1  ;;  %v4585_v23 = vld [vmem:[#allocation14 + $0x2fb8] sm:$0xff]  ;;  %v3122_v48 = vld [vmem:[#allocation14 + $0x200] sm:$0xff]  ;;  %v3123_v55 = vld [vmem:[#allocation14 + $0x208] sm:$0xff] }
 0x598   : > { %13030 = vmatpush1.bf16.msra.mxu0 %v16238_v17  ;;  %12867 = vmatprep.subr.bf16.mxu1 %v16261_v18  ;;  %v16382_v17 = vcombine.low %v4525_v13, %v4537_v3  ;;  %v16405_v18 = vcombine.high %v4548_v28, %v4560_v11  ;;  %v3134_v0 = vld [vmem:[#allocation14 + $0x260] sm:$0xff]  ;;  %v3135_v13 = vld [vmem:[#allocation14 + $0x268] sm:$0xff] }
 0x599   : > { %13031 = vmatprep.subr.bf16.mxu0 %v16263_v22  ;;  %v16407_v22 = vcombine.high %v4549_v15, %v4561_v14  ;;  %v3146_v1 = vld [vmem:[#allocation14 + $0x2c0] sm:$0xff]  ;;  %v3147_v3 = vld [vmem:[#allocation14 + $0x2c8] sm:$0xff] }
 0x59b   : > { %12868 = vmatpush1.bf16.msra.mxu1 %v16260_v24  ;;  %v16404_v24 = vcombine.low %v4548_v28, %v4560_v11  ;;  %v3158_v28 = vld [vmem:[#allocation14 + $0x320] sm:$0xff] }
 0x59c   : > { %13032 = vmatpush1.bf16.msra.mxu0 %v16262_v40  ;;  %12869 = vmatprep.subr.bf16.mxu1 %v16285_v26  ;;  %v16406_v40 = vcombine.low %v4549_v15, %v4561_v14  ;;  %v16429_v26 = vcombine.high %v4572_v19, %v4584_v20  ;;  %v3170_v11 = vld [vmem:[#allocation14 + $0x380] sm:$0xff]  ;;  %v3159_v15 = vld [vmem:[#allocation14 + $0x328] sm:$0xff] }
 0x59d   : > { %13033 = vmatprep.subr.bf16.mxu0 %v16287_v27  ;;  %v16431_v27 = vcombine.high %v4573_v21, %v4585_v23  ;;  %v3171_v14 = vld [vmem:[#allocation14 + $0x388] sm:$0xff] }
 0x59f   : > { %12870 = vmatpush1.bf16.msra.mxu1 %v16284_v33  ;;  %v16428_v33 = vcombine.low %v4572_v19, %v4584_v20  ;;  %v3182_v19 = vld [vmem:[#allocation14 + $0x3e0] sm:$0xff] }
 0x5a0   : > { %13034 = vmatpush1.bf16.msra.mxu0 %v16286_v34  ;;  %12871 = vmatprep.subr.bf16.mxu1 %v16309_v12  ;;  %v16430_v34 = vcombine.low %v4573_v21, %v4585_v23  ;;  %v14921_v12 = vcombine.high %v3062_v58, %v3074_v30  ;;  %v3194_v20 = vld [vmem:[#allocation14 + $0x440] sm:$0xff]  ;;  %v3183_v21 = vld [vmem:[#allocation14 + $0x3e8] sm:$0xff] }
 0x5a1   : > { %13035 = vmatprep.subr.bf16.mxu0 %v16311_v35  ;;  %v14923_v35 = vcombine.high %v3063_v25, %v3075_v32  ;;  %v3195_v23 = vld [vmem:[#allocation14 + $0x448] sm:$0xff]  ;;  %v3206_v58 = vld [vmem:[#allocation14 + $0x4a0] sm:$0xff] }
 0x5a2   : > { %v3218_v30 = vld [vmem:[#allocation14 + $0x500] sm:$0xff] }
 0x5a3   : > { %12872 = vmatpush1.bf16.msra.mxu1 %v16308_v44  ;;  %v3099_v44 = vld [vmem:[#allocation14 + $0x148] sm:$0xff] }
 0x5a4   : > { %13036 = vmatpush1.bf16.msra.mxu0 %v16310_v45  ;;  %12873 = vmatprep.subr.bf16.mxu1 %v16333_v46  ;;  %v14922_v45 = vcombine.low %v3063_v25, %v3075_v32  ;;  %v14945_v46 = vcombine.high %v3086_v36, %v3098_v37  ;;  %v14947_v49 = vcombine.high %v3087_v41, %v3099_v44  ;;  %v3207_v25 = vld [vmem:[#allocation14 + $0x4a8] sm:$0xff] }
 0x5a5   : > { %13037 = vmatprep.subr.bf16.mxu0 %v16335_v47  ;;  %v3110_v47 = vld [vmem:[#allocation14 + $0x1a0] sm:$0xff]  ;;  %v3219_v32 = vld [vmem:[#allocation14 + $0x508] sm:$0xff] }
 0x5a7   : > { %12874 = vmatpush1.bf16.msra.mxu1 %v16332_v56  ;;  %v14944_v56 = vcombine.low %v3086_v36, %v3098_v37  ;;  %v3230_v36 = vld [vmem:[#allocation14 + $0x560] sm:$0xff] }
 0x5a8   : > { %13038 = vmatpush1.bf16.msra.mxu0 %v16334_v60  ;;  %12875 = vmatprep.subr.bf16.mxu1 %v16357_v61  ;;  %v14946_v60 = vcombine.low %v3087_v41, %v3099_v44  ;;  %v14969_v61 = vcombine.high %v3110_v47, %v3122_v48  ;;  %v3242_v37 = vld [vmem:[#allocation14 + $0x5c0] sm:$0xff]  ;;  %v3243_v41 = vld [vmem:[#allocation14 + $0x5c8] sm:$0xff]  ;;  %v15064_v44 = vcombine.low %v3206_v58, %v3218_v30 }
 0x5a9   : > { %13039 = vmatprep.subr.bf16.mxu0 %v16359_v62  ;;  %v14971_v62 = vcombine.high %v3111_v51, %v3123_v55 }
 0x5ab   : > { %12876 = vmatpush1.bf16.msra.mxu1 %v16356_v4  ;;  %v14968_v4 = vcombine.low %v3110_v47, %v3122_v48  ;;  %v3254_v48 = vld [vmem:[#allocation14 + $0x620] sm:$0xff] }
 0x5ac   : > { %13040 = vmatpush1.bf16.msra.mxu0 %v16358_v8  ;;  %12877 = vmatprep.subr.bf16.mxu1 %v16381_v9  ;;  %v14970_v8 = vcombine.low %v3111_v51, %v3123_v55  ;;  %v14993_v9 = vcombine.high %v3134_v0, %v3146_v1  ;;  %v3255_v51 = vld [vmem:[#allocation14 + $0x628] sm:$0xff] }
 0x5ad   : > { %13041 = vmatprep.subr.bf16.mxu0 %v16383_v10  ;;  %v14995_v10 = vcombine.high %v3135_v13, %v3147_v3  ;;  %v3267_v55 = vld [vmem:[#allocation14 + $0x688] sm:$0xff] }
 0x5af   : > { %12878 = vmatpush1.bf16.msra.mxu1 %v16380_v16  ;;  %v14992_v16 = vcombine.low %v3134_v0, %v3146_v1  ;;  %v3278_v0 = vld [vmem:[#allocation14 + $0x6e0] sm:$0xff] }
 0x5b0   : > { %13042 = vmatpush1.bf16.msra.mxu0 %v16382_v17  ;;  %12879 = vmatprep.subr.bf16.mxu1 %v16405_v18  ;;  %v14994_v17 = vcombine.low %v3135_v13, %v3147_v3  ;;  %v15017_v18 = vcombine.high %v3158_v28, %v3170_v11  ;;  %v3290_v1 = vld [vmem:[#allocation14 + $0x740] sm:$0xff]  ;;  %v3279_v13 = vld [vmem:[#allocation14 + $0x6e8] sm:$0xff] }
 0x5b1   : > { %13043 = vmatprep.subr.bf16.mxu0 %v16407_v22  ;;  %v15019_v22 = vcombine.high %v3159_v15, %v3171_v14  ;;  %v3291_v3 = vld [vmem:[#allocation14 + $0x748] sm:$0xff] }
 0x5b3   : > { %12880 = vmatpush1.bf16.msra.mxu1 %v16404_v24  ;;  %v15016_v24 = vcombine.low %v3158_v28, %v3170_v11  ;;  %v3302_v28 = vld [vmem:[#allocation14 + $0x7a0] sm:$0xff] }
 0x5b4   : > { %13044 = vmatpush1.bf16.msra.mxu0 %v16406_v40  ;;  %12881 = vmatprep.subr.bf16.mxu1 %v16429_v26  ;;  %v15018_v40 = vcombine.low %v3159_v15, %v3171_v14  ;;  %v15041_v26 = vcombine.high %v3182_v19, %v3194_v20  ;;  %v3314_v11 = vld [vmem:[#allocation14 + $0x800] sm:$0xff]  ;;  %v3303_v15 = vld [vmem:[#allocation14 + $0x7a8] sm:$0xff] }
 0x5b5   : > { %13045 = vmatprep.subr.bf16.mxu0 %v16431_v27  ;;  %v15043_v27 = vcombine.high %v3183_v21, %v3195_v23  ;;  %v3315_v14 = vld [vmem:[#allocation14 + $0x808] sm:$0xff] }
 0x5b7   : > { %12882 = vmatpush1.bf16.msra.mxu1 %v16428_v33  ;;  %v15040_v33 = vcombine.low %v3182_v19, %v3194_v20  ;;  %v3326_v19 = vld [vmem:[#allocation14 + $0x860] sm:$0xff] }
 0x5b8   : > { %13046 = vmatpush1.bf16.msra.mxu0 %v16430_v34  ;;  %13056 = vmatprep.subr.bf16.mxu1 %v14921_v12  ;;  %v15042_v34 = vcombine.low %v3183_v21, %v3195_v23  ;;  %v15065_v12 = vcombine.high %v3206_v58, %v3218_v30  ;;  %v3338_v20 = vld [vmem:[#allocation14 + $0x8c0] sm:$0xff]  ;;  %v3327_v21 = vld [vmem:[#allocation14 + $0x868] sm:$0xff] }
 0x5b9   : > { %13220 = vmatprep.subr.bf16.mxu0 %v14923_v35  ;;  %v15067_v35 = vcombine.high %v3207_v25, %v3219_v32  ;;  %v3339_v23 = vld [vmem:[#allocation14 + $0x8c8] sm:$0xff]  ;;  %v3350_v58 = vld [vmem:[#allocation14 + $0x920] sm:$0xff] }
 0x5ba   : > { %12884 = vmatmul.mubr.bf16.vlgmr.msra.gmra.mrb[16].mxu1 %v17752_v42  ;;  %v3362_v30 = vld [vmem:[#allocation14 + $0x980] sm:$0xff] }
 0x5bb   : > { %13048 = vmatmul.mubr.bf16.vlgmr.msra.gmra.mrb[20].mxu0 %v17752_v42  ;;  %13057 = vmatpush1.bf16.msra.mxu1 %v14920_v39  ;;  %v3231_v39 = vld [vmem:[#allocation14 + $0x568] sm:$0xff] }
 0x5bc   : > { %13088 = vmatprep.mubr.bf16.mxu1 %v17699_v38  ;;  %13221 = vmatpush1.bf16.msra.mxu0 %v14922_v45  ;;  %v15066_v45 = vcombine.low %v3207_v25, %v3219_v32  ;;  %v15091_v47 = vcombine.high %v3231_v39, %v3243_v41  ;;  %v3351_v25 = vld [vmem:[#allocation14 + $0x928] sm:$0xff] }
 0x5bd   : > { %13252 = vmatprep.mubr.bf16.mxu0 %v17699_v38  ;;  %13058 = vmatprep.subr.bf16.mxu1 %v14945_v46  ;;  %v15089_v46 = vcombine.high %v3230_v36, %v3242_v37  ;;  %v3363_v32 = vld [vmem:[#allocation14 + $0x988] sm:$0xff] }
 0x5be   : > { %13222 = vmatprep.subr.bf16.mxu0 %v14947_v49  ;;  %v3266_v49 = vld [vmem:[#allocation14 + $0x680] sm:$0xff] }
 0x5bf   : > { %13059 = vmatpush1.bf16.msra.mxu1 %v14944_v56  ;;  %v15088_v56 = vcombine.low %v3230_v36, %v3242_v37  ;;  %v3374_v36 = vld [vmem:[#allocation14 + $0x9e0] sm:$0xff] }
 0x5c0   : > { %13223 = vmatpush1.bf16.msra.mxu0 %v14946_v60  ;;  %13060 = vmatprep.subr.bf16.mxu1 %v14969_v61  ;;  %v15090_v60 = vcombine.low %v3231_v39, %v3243_v41  ;;  %v15113_v61 = vcombine.high %v3254_v48, %v3266_v49  ;;  %v3386_v37 = vld [vmem:[#allocation14 + $0xa40] sm:$0xff]  ;;  %v3375_v39 = vld [vmem:[#allocation14 + $0x9e8] sm:$0xff] }
 0x5c1   : > { %13224 = vmatprep.subr.bf16.mxu0 %v14971_v62  ;;  %v15115_v62 = vcombine.high %v3255_v51, %v3267_v55  ;;  %v3387_v41 = vld [vmem:[#allocation14 + $0xa48] sm:$0xff] }
 0x5c3   : > { %13061 = vmatpush1.bf16.msra.mxu1 %v14968_v4  ;;  %v15112_v4 = vcombine.low %v3254_v48, %v3266_v49  ;;  %v3398_v48 = vld [vmem:[#allocation14 + $0xaa0] sm:$0xff] }
 0x5c4   : > { %13225 = vmatpush1.bf16.msra.mxu0 %v14970_v8  ;;  %13062 = vmatprep.subr.bf16.mxu1 %v14993_v9  ;;  %v15114_v8 = vcombine.low %v3255_v51, %v3267_v55  ;;  %v15137_v9 = vcombine.high %v3278_v0, %v3290_v1  ;;  %v3410_v49 = vld [vmem:[#allocation14 + $0xb00] sm:$0xff]  ;;  %v3399_v51 = vld [vmem:[#allocation14 + $0xaa8] sm:$0xff] }
 0x5c5   : > { %13226 = vmatprep.subr.bf16.mxu0 %v14995_v10  ;;  %v15139_v10 = vcombine.high %v3279_v13, %v3291_v3  ;;  %v3411_v55 = vld [vmem:[#allocation14 + $0xb08] sm:$0xff] }
 0x5c7   : > { %13063 = vmatpush1.bf16.msra.mxu1 %v14992_v16  ;;  %v15136_v16 = vcombine.low %v3278_v0, %v3290_v1  ;;  %v3422_v0 = vld [vmem:[#allocation14 + $0xb60] sm:$0xff] }
 0x5c8   : > { %13227 = vmatpush1.bf16.msra.mxu0 %v14994_v17  ;;  %13064 = vmatprep.subr.bf16.mxu1 %v15017_v18  ;;  %v15138_v17 = vcombine.low %v3279_v13, %v3291_v3  ;;  %v15161_v18 = vcombine.high %v3302_v28, %v3314_v11  ;;  %v3434_v1 = vld [vmem:[#allocation14 + $0xbc0] sm:$0xff]  ;;  %v3423_v13 = vld [vmem:[#allocation14 + $0xb68] sm:$0xff] }
 0x5c9   : > { %13228 = vmatprep.subr.bf16.mxu0 %v15019_v22  ;;  %v15163_v22 = vcombine.high %v3303_v15, %v3315_v14  ;;  %v3435_v3 = vld [vmem:[#allocation14 + $0xbc8] sm:$0xff] }
 0x5cb   : > { %13065 = vmatpush1.bf16.msra.mxu1 %v15016_v24  ;;  %v15160_v24 = vcombine.low %v3302_v28, %v3314_v11  ;;  %v3446_v28 = vld [vmem:[#allocation14 + $0xc20] sm:$0xff] }
 0x5cc   : > { %13229 = vmatpush1.bf16.msra.mxu0 %v15018_v40  ;;  %13066 = vmatprep.subr.bf16.mxu1 %v15041_v26  ;;  %v15162_v40 = vcombine.low %v3303_v15, %v3315_v14  ;;  %v15185_v26 = vcombine.high %v3326_v19, %v3338_v20  ;;  %v3458_v11 = vld [vmem:[#allocation14 + $0xc80] sm:$0xff]  ;;  %v3447_v15 = vld [vmem:[#allocation14 + $0xc28] sm:$0xff] }
 0x5cd   : > { %13230 = vmatprep.subr.bf16.mxu0 %v15043_v27  ;;  %v15187_v27 = vcombine.high %v3327_v21, %v3339_v23  ;;  %v3459_v14 = vld [vmem:[#allocation14 + $0xc88] sm:$0xff] }
 0x5cf   : > { %13067 = vmatpush1.bf16.msra.mxu1 %v15040_v33  ;;  %v15184_v33 = vcombine.low %v3326_v19, %v3338_v20  ;;  %v3470_v19 = vld [vmem:[#allocation14 + $0xce0] sm:$0xff] }
 0x5d0   : > { %13231 = vmatpush1.bf16.msra.mxu0 %v15042_v34  ;;  %13068 = vmatprep.subr.bf16.mxu1 %v15065_v12  ;;  %v15186_v34 = vcombine.low %v3327_v21, %v3339_v23  ;;  %v15209_v12 = vcombine.high %v3350_v58, %v3362_v30  ;;  %v3482_v20 = vld [vmem:[#allocation14 + $0xd40] sm:$0xff]  ;;  %v15304_v21 = vcombine.low %v3446_v28, %v3458_v11  ;;  %v3471_v23 = vld [vmem:[#allocation14 + $0xce8] sm:$0xff] }
 0x5d1   : > { %13232 = vmatprep.subr.bf16.mxu0 %v15067_v35  ;;  %v15211_v35 = vcombine.high %v3351_v25, %v3363_v32 }
 0x5d3   : > { %13069 = vmatpush1.bf16.msra.mxu1 %v15064_v44  ;;  %v15208_v44 = vcombine.low %v3350_v58, %v3362_v30  ;;  %v3506_v58 = vld [vmem:[#allocation14 + $0xe00] sm:$0xff] }
 0x5d4   : > { %13233 = vmatpush1.bf16.msra.mxu0 %v15066_v45  ;;  %13070 = vmatprep.subr.bf16.mxu1 %v15089_v46  ;;  %v15210_v45 = vcombine.low %v3351_v25, %v3363_v32  ;;  %v15233_v46 = vcombine.high %v3374_v36, %v3386_v37  ;;  %v3495_v25 = vld [vmem:[#allocation14 + $0xda8] sm:$0xff] }
 0x5d5   : > { %13234 = vmatprep.subr.bf16.mxu0 %v15091_v47  ;;  %v15235_v47 = vcombine.high %v3375_v39, %v3387_v41  ;;  %v3507_v32 = vld [vmem:[#allocation14 + $0xe08] sm:$0xff] }
 0x5d7   : > { %13071 = vmatpush1.bf16.msra.mxu1 %v15088_v56  ;;  %v15232_v56 = vcombine.low %v3374_v36, %v3386_v37  ;;  %v3518_v36 = vld [vmem:[#allocation14 + $0xe60] sm:$0xff] }
 0x5d8   : > { %13235 = vmatpush1.bf16.msra.mxu0 %v15090_v60  ;;  %13072 = vmatprep.subr.bf16.mxu1 %v15113_v61  ;;  %v15234_v60 = vcombine.low %v3375_v39, %v3387_v41  ;;  %v15257_v61 = vcombine.high %v3398_v48, %v3410_v49  ;;  %v3530_v37 = vld [vmem:[#allocation14 + $0xec0] sm:$0xff]  ;;  %v3519_v39 = vld [vmem:[#allocation14 + $0xe68] sm:$0xff] }
 0x5d9   : > { %13236 = vmatprep.subr.bf16.mxu0 %v15115_v62  ;;  %v15259_v62 = vcombine.high %v3399_v51, %v3411_v55  ;;  %v3531_v41 = vld [vmem:[#allocation14 + $0xec8] sm:$0xff] }
 0x5db   : > { %13073 = vmatpush1.bf16.msra.mxu1 %v15112_v4  ;;  %v15256_v4 = vcombine.low %v3398_v48, %v3410_v49  ;;  %v3542_v48 = vld [vmem:[#allocation14 + $0xf20] sm:$0xff] }
 0x5dc   : > { %13237 = vmatpush1.bf16.msra.mxu0 %v15114_v8  ;;  %13074 = vmatprep.subr.bf16.mxu1 %v15137_v9  ;;  %v15258_v8 = vcombine.low %v3399_v51, %v3411_v55  ;;  %v15281_v9 = vcombine.high %v3422_v0, %v3434_v1  ;;  %v3554_v49 = vld [vmem:[#allocation14 + $0xf80] sm:$0xff]  ;;  %v3543_v51 = vld [vmem:[#allocation14 + $0xf28] sm:$0xff] }
 0x5dd   : > { %13238 = vmatprep.subr.bf16.mxu0 %v15139_v10  ;;  %v15283_v10 = vcombine.high %v3423_v13, %v3435_v3  ;;  %v3555_v55 = vld [vmem:[#allocation14 + $0xf88] sm:$0xff] }
 0x5df   : > { %13075 = vmatpush1.bf16.msra.mxu1 %v15136_v16  ;;  %v15280_v16 = vcombine.low %v3422_v0, %v3434_v1  ;;  %v3566_v0 = vld [vmem:[#allocation14 + $0xfe0] sm:$0xff] }
 0x5e0   : > { %13239 = vmatpush1.bf16.msra.mxu0 %v15138_v17  ;;  %13076 = vmatprep.subr.bf16.mxu1 %v15161_v18  ;;  %v15282_v17 = vcombine.low %v3423_v13, %v3435_v3  ;;  %v15305_v18 = vcombine.high %v3446_v28, %v3458_v11  ;;  %v3578_v1 = vld [vmem:[#allocation14 + $0x1040] sm:$0xff]  ;;  %v3567_v13 = vld [vmem:[#allocation14 + $0xfe8] sm:$0xff] }
 0x5e1   : > { %13240 = vmatprep.subr.bf16.mxu0 %v15163_v22  ;;  %v15307_v22 = vcombine.high %v3447_v15, %v3459_v14  ;;  %v3579_v3 = vld [vmem:[#allocation14 + $0x1048] sm:$0xff]  ;;  %v3590_v28 = vld [vmem:[#allocation14 + $0x10a0] sm:$0xff] }
 0x5e2   : > { %v3602_v11 = vld [vmem:[#allocation14 + $0x1100] sm:$0xff] }
 0x5e3   : > { %13077 = vmatpush1.bf16.msra.mxu1 %v15160_v24  ;;  %v3483_v24 = vld [vmem:[#allocation14 + $0xd48] sm:$0xff] }
 0x5e4   : > { %13241 = vmatpush1.bf16.msra.mxu0 %v15162_v40  ;;  %13078 = vmatprep.subr.bf16.mxu1 %v15185_v26  ;;  %v15306_v40 = vcombine.low %v3447_v15, %v3459_v14  ;;  %v15329_v26 = vcombine.high %v3470_v19, %v3482_v20  ;;  %v15331_v30 = vcombine.high %v3471_v23, %v3483_v24  ;;  %v3591_v15 = vld [vmem:[#allocation14 + $0x10a8] sm:$0xff] }
 0x5e5   : > { %13242 = vmatprep.subr.bf16.mxu0 %v15187_v27  ;;  %v3494_v27 = vld [vmem:[#allocation14 + $0xda0] sm:$0xff]  ;;  %v3603_v14 = vld [vmem:[#allocation14 + $0x1108] sm:$0xff] }
 0x5e7   : > { %13079 = vmatpush1.bf16.msra.mxu1 %v15184_v33  ;;  %v15328_v33 = vcombine.low %v3470_v19, %v3482_v20  ;;  %v3614_v19 = vld [vmem:[#allocation14 + $0x1160] sm:$0xff] }
 0x5e8   : > { %13243 = vmatpush1.bf16.msra.mxu0 %v15186_v34  ;;  %13080 = vmatprep.subr.bf16.mxu1 %v15209_v12  ;;  %v15330_v34 = vcombine.low %v3471_v23, %v3483_v24  ;;  %v15353_v12 = vcombine.high %v3494_v27, %v3506_v58  ;;  %v3626_v20 = vld [vmem:[#allocation14 + $0x11c0] sm:$0xff]  ;;  %v3627_v23 = vld [vmem:[#allocation14 + $0x11c8] sm:$0xff]  ;;  %v15448_v24 = vcombine.low %v3590_v28, %v3602_v11 }
 0x5e9   : > { %13244 = vmatprep.subr.bf16.mxu0 %v15211_v35  ;;  %v15355_v35 = vcombine.high %v3495_v25, %v3507_v32 }
 0x5eb   : > { %13081 = vmatpush1.bf16.msra.mxu1 %v15208_v44  ;;  %v15352_v44 = vcombine.low %v3494_v27, %v3506_v58  ;;  %v3638_v58 = vld [vmem:[#allocation14 + $0x1220] sm:$0xff] }
 0x5ec   : > { %13245 = vmatpush1.bf16.msra.mxu0 %v15210_v45  ;;  %13082 = vmatprep.subr.bf16.mxu1 %v15233_v46  ;;  %v15354_v45 = vcombine.low %v3495_v25, %v3507_v32  ;;  %v15377_v46 = vcombine.high %v3518_v36, %v3530_v37  ;;  %v3639_v25 = vld [vmem:[#allocation14 + $0x1228] sm:$0xff] }
 0x5ed   : > { %13246 = vmatprep.subr.bf16.mxu0 %v15235_v47  ;;  %v15379_v47 = vcombine.high %v3519_v39, %v3531_v41  ;;  %v3651_v32 = vld [vmem:[#allocation14 + $0x1288] sm:$0xff] }
 0x5ef   : > { %13083 = vmatpush1.bf16.msra.mxu1 %v15232_v56  ;;  %v15376_v56 = vcombine.low %v3518_v36, %v3530_v37  ;;  %v3662_v36 = vld [vmem:[#allocation14 + $0x12e0] sm:$0xff] }
 0x5f0   : > { %13247 = vmatpush1.bf16.msra.mxu0 %v15234_v60  ;;  %13084 = vmatprep.subr.bf16.mxu1 %v15257_v61  ;;  %v15378_v60 = vcombine.low %v3519_v39, %v3531_v41  ;;  %v15401_v61 = vcombine.high %v3542_v48, %v3554_v49  ;;  %v3674_v37 = vld [vmem:[#allocation14 + $0x1340] sm:$0xff]  ;;  %v3663_v39 = vld [vmem:[#allocation14 + $0x12e8] sm:$0xff] }
 0x5f1   : > { %13248 = vmatprep.subr.bf16.mxu0 %v15259_v62  ;;  %v15403_v62 = vcombine.high %v3543_v51, %v3555_v55  ;;  %v3675_v41 = vld [vmem:[#allocation14 + $0x1348] sm:$0xff] }
 0x5f3   : > { %13085 = vmatpush1.bf16.msra.mxu1 %v15256_v4  ;;  %v15400_v4 = vcombine.low %v3542_v48, %v3554_v49  ;;  %v3686_v48 = vld [vmem:[#allocation14 + $0x13a0] sm:$0xff] }
 0x5f4   : > { %13249 = vmatpush1.bf16.msra.mxu0 %v15258_v8  ;;  %13086 = vmatprep.subr.bf16.mxu1 %v15281_v9  ;;  %v15402_v8 = vcombine.low %v3543_v51, %v3555_v55  ;;  %v15425_v9 = vcombine.high %v3566_v0, %v3578_v1  ;;  %v3698_v49 = vld [vmem:[#allocation14 + $0x1400] sm:$0xff]  ;;  %v3687_v51 = vld [vmem:[#allocation14 + $0x13a8] sm:$0xff] }
 0x5f5   : > { %13250 = vmatprep.subr.bf16.mxu0 %v15283_v10  ;;  %v15427_v10 = vcombine.high %v3567_v13, %v3579_v3  ;;  %v3699_v55 = vld [vmem:[#allocation14 + $0x1408] sm:$0xff] }
 0x5f7   : > { %13087 = vmatpush1.bf16.msra.mxu1 %v15280_v16  ;;  %v15424_v16 = vcombine.low %v3566_v0, %v3578_v1  ;;  %v3710_v0 = vld [vmem:[#allocation14 + $0x1460] sm:$0xff] }
 0x5f8   : > { %13251 = vmatpush1.bf16.msra.mxu0 %v15282_v17  ;;  %13097 = vmatprep.subr.bf16.mxu1 %v15305_v18  ;;  %v15426_v17 = vcombine.low %v3567_v13, %v3579_v3  ;;  %v15449_v18 = vcombine.high %v3590_v28, %v3602_v11  ;;  %v3722_v1 = vld [vmem:[#allocation14 + $0x14c0] sm:$0xff]  ;;  %v3711_v13 = vld [vmem:[#allocation14 + $0x1468] sm:$0xff] }
 0x5f9   : > { %13261 = vmatprep.subr.bf16.mxu0 %v15307_v22  ;;  %v15451_v22 = vcombine.high %v3591_v15, %v3603_v14  ;;  %v3723_v3 = vld [vmem:[#allocation14 + $0x14c8] sm:$0xff]  ;;  %v3734_v28 = vld [vmem:[#allocation14 + $0x1520] sm:$0xff] }
 0x5fa   : > { %13089 = vmatmul.mubr.bf16.vlgmr.msra.gmra.mrb[20].mxu1 %v17701_v43  ;;  %v3746_v11 = vld [vmem:[#allocation14 + $0x1580] sm:$0xff] }
 0x5fb   : > { %13253 = vmatmul.mubr.bf16.vlgmr.msra.gmra.mrb[24].mxu0 %v17701_v43  ;;  %13098 = vmatpush1.bf16.msra.mxu1 %v15304_v21  ;;  %v3615_v21 = vld [vmem:[#allocation14 + $0x1168] sm:$0xff] }
 0x5fc   : > { %13129 = vmatprep.mubr.bf16.mxu1 %v17705_v50  ;;  %13262 = vmatpush1.bf16.msra.mxu0 %v15306_v40  ;;  %v15450_v40 = vcombine.low %v3591_v15, %v3603_v14  ;;  %v15475_v27 = vcombine.high %v3615_v21, %v3627_v23  ;;  %v3735_v15 = vld [vmem:[#allocation14 + $0x1528] sm:$0xff] }
 0x5fd   : > { %13293 = vmatprep.mubr.bf16.mxu0 %v17705_v50  ;;  %13099 = vmatprep.subr.bf16.mxu1 %v15329_v26  ;;  %v15473_v26 = vcombine.high %v3614_v19, %v3626_v20  ;;  %v3747_v14 = vld [vmem:[#allocation14 + $0x1588] sm:$0xff] }
 0x5fe   : > { %13263 = vmatprep.subr.bf16.mxu0 %v15331_v30  ;;  %v3650_v30 = vld [vmem:[#allocation14 + $0x1280] sm:$0xff] }
 0x5ff   : > { %13100 = vmatpush1.bf16.msra.mxu1 %v15328_v33  ;;  %v15472_v33 = vcombine.low %v3614_v19, %v3626_v20  ;;  %v3758_v19 = vld [vmem:[#allocation14 + $0x15e0] sm:$0xff] }
 0x600   : > { %13264 = vmatpush1.bf16.msra.mxu0 %v15330_v34  ;;  %13101 = vmatprep.subr.bf16.mxu1 %v15353_v12  ;;  %v15474_v34 = vcombine.low %v3615_v21, %v3627_v23  ;;  %v15497_v12 = vcombine.high %v3638_v58, %v3650_v30  ;;  %v3770_v20 = vld [vmem:[#allocation14 + $0x1640] sm:$0xff]  ;;  %v3759_v21 = vld [vmem:[#allocation14 + $0x15e8] sm:$0xff] }
 0x601   : > { %13265 = vmatprep.subr.bf16.mxu0 %v15355_v35  ;;  %v15499_v35 = vcombine.high %v3639_v25, %v3651_v32  ;;  %v3771_v23 = vld [vmem:[#allocation14 + $0x1648] sm:$0xff] }
 0x603   : > { %13102 = vmatpush1.bf16.msra.mxu1 %v15352_v44  ;;  %v15496_v44 = vcombine.low %v3638_v58, %v3650_v30  ;;  %v3782_v58 = vld [vmem:[#allocation14 + $0x16a0] sm:$0xff] }
 0x604   : > { %13266 = vmatpush1.bf16.msra.mxu0 %v15354_v45  ;;  %13103 = vmatprep.subr.bf16.mxu1 %v15377_v46  ;;  %v15498_v45 = vcombine.low %v3639_v25, %v3651_v32  ;;  %v15521_v46 = vcombine.high %v3662_v36, %v3674_v37  ;;  %v3794_v30 = vld [vmem:[#allocation14 + $0x1700] sm:$0xff]  ;;  %v3783_v25 = vld [vmem:[#allocation14 + $0x16a8] sm:$0xff] }
 0x605   : > { %13267 = vmatprep.subr.bf16.mxu0 %v15379_v47  ;;  %v15523_v47 = vcombine.high %v3663_v39, %v3675_v41  ;;  %v3795_v32 = vld [vmem:[#allocation14 + $0x1708] sm:$0xff] }
 0x607   : > { %13104 = vmatpush1.bf16.msra.mxu1 %v15376_v56  ;;  %v15520_v56 = vcombine.low %v3662_v36, %v3674_v37  ;;  %v3806_v36 = vld [vmem:[#allocation14 + $0x1760] sm:$0xff] }
 0x608   : > { %13268 = vmatpush1.bf16.msra.mxu0 %v15378_v60  ;;  %13105 = vmatprep.subr.bf16.mxu1 %v15401_v61  ;;  %v15522_v60 = vcombine.low %v3663_v39, %v3675_v41  ;;  %v15545_v61 = vcombine.high %v3686_v48, %v3698_v49  ;;  %v3818_v37 = vld [vmem:[#allocation14 + $0x17c0] sm:$0xff]  ;;  %v3807_v39 = vld [vmem:[#allocation14 + $0x1768] sm:$0xff] }
 0x609   : > { %13269 = vmatprep.subr.bf16.mxu0 %v15403_v62  ;;  %v15547_v62 = vcombine.high %v3687_v51, %v3699_v55  ;;  %v3819_v41 = vld [vmem:[#allocation14 + $0x17c8] sm:$0xff] }
 0x60b   : > { %13106 = vmatpush1.bf16.msra.mxu1 %v15400_v4  ;;  %v15544_v4 = vcombine.low %v3686_v48, %v3698_v49  ;;  %v3830_v48 = vld [vmem:[#allocation14 + $0x1820] sm:$0xff] }
 0x60c   : > { %13270 = vmatpush1.bf16.msra.mxu0 %v15402_v8  ;;  %13107 = vmatprep.subr.bf16.mxu1 %v15425_v9  ;;  %v15546_v8 = vcombine.low %v3687_v51, %v3699_v55  ;;  %v15569_v9 = vcombine.high %v3710_v0, %v3722_v1  ;;  %v3842_v49 = vld [vmem:[#allocation14 + $0x1880] sm:$0xff]  ;;  %v3831_v51 = vld [vmem:[#allocation14 + $0x1828] sm:$0xff] }
 0x60d   : > { %13271 = vmatprep.subr.bf16.mxu0 %v15427_v10  ;;  %v15571_v10 = vcombine.high %v3711_v13, %v3723_v3  ;;  %v3843_v55 = vld [vmem:[#allocation14 + $0x1888] sm:$0xff] }
 0x60f   : > { %13108 = vmatpush1.bf16.msra.mxu1 %v15424_v16  ;;  %v15568_v16 = vcombine.low %v3710_v0, %v3722_v1  ;;  %v3854_v0 = vld [vmem:[#allocation14 + $0x18e0] sm:$0xff] }
 0x610   : > { %13272 = vmatpush1.bf16.msra.mxu0 %v15426_v17  ;;  %13109 = vmatprep.subr.bf16.mxu1 %v15449_v18  ;;  %v15570_v17 = vcombine.low %v3711_v13, %v3723_v3  ;;  %v15593_v18 = vcombine.high %v3734_v28, %v3746_v11  ;;  %v3866_v1 = vld [vmem:[#allocation14 + $0x1940] sm:$0xff]  ;;  %v15688_v13 = vcombine.low %v3830_v48, %v3842_v49  ;;  %v3855_v3 = vld [vmem:[#allocation14 + $0x18e8] sm:$0xff] }
 0x611   : > { %13273 = vmatprep.subr.bf16.mxu0 %v15451_v22  ;;  %v15595_v22 = vcombine.high %v3735_v15, %v3747_v14 }
 0x613   : > { %13110 = vmatpush1.bf16.msra.mxu1 %v15448_v24  ;;  %v15592_v24 = vcombine.low %v3734_v28, %v3746_v11  ;;  %v3890_v28 = vld [vmem:[#allocation14 + $0x1a00] sm:$0xff] }
 0x614   : > { %13274 = vmatpush1.bf16.msra.mxu0 %v15450_v40  ;;  %13111 = vmatprep.subr.bf16.mxu1 %v15473_v26  ;;  %v15594_v40 = vcombine.low %v3735_v15, %v3747_v14  ;;  %v15617_v26 = vcombine.high %v3758_v19, %v3770_v20  ;;  %v3879_v15 = vld [vmem:[#allocation14 + $0x19a8] sm:$0xff] }
 0x615   : > { %13275 = vmatprep.subr.bf16.mxu0 %v15475_v27  ;;  %v15619_v27 = vcombine.high %v3759_v21, %v3771_v23  ;;  %v3891_v14 = vld [vmem:[#allocation14 + $0x1a08] sm:$0xff] }
 0x617   : > { %13112 = vmatpush1.bf16.msra.mxu1 %v15472_v33  ;;  %v15616_v33 = vcombine.low %v3758_v19, %v3770_v20  ;;  %v3902_v19 = vld [vmem:[#allocation14 + $0x1a60] sm:$0xff] }
 0x618   : > { %13276 = vmatpush1.bf16.msra.mxu0 %v15474_v34  ;;  %13113 = vmatprep.subr.bf16.mxu1 %v15497_v12  ;;  %v15618_v34 = vcombine.low %v3759_v21, %v3771_v23  ;;  %v15641_v12 = vcombine.high %v3782_v58, %v3794_v30  ;;  %v3914_v20 = vld [vmem:[#allocation14 + $0x1ac0] sm:$0xff]  ;;  %v3903_v21 = vld [vmem:[#allocation14 + $0x1a68] sm:$0xff] }
 0x619   : > { %13277 = vmatprep.subr.bf16.mxu0 %v15499_v35  ;;  %v15643_v35 = vcombine.high %v3783_v25, %v3795_v32  ;;  %v3915_v23 = vld [vmem:[#allocation14 + $0x1ac8] sm:$0xff] }
 0x61b   : > { %13114 = vmatpush1.bf16.msra.mxu1 %v15496_v44  ;;  %v15640_v44 = vcombine.low %v3782_v58, %v3794_v30  ;;  %v3926_v58 = vld [vmem:[#allocation14 + $0x1b20] sm:$0xff] }
 0x61c   : > { %13278 = vmatpush1.bf16.msra.mxu0 %v15498_v45  ;;  %13115 = vmatprep.subr.bf16.mxu1 %v15521_v46  ;;  %v15642_v45 = vcombine.low %v3783_v25, %v3795_v32  ;;  %v15665_v46 = vcombine.high %v3806_v36, %v3818_v37  ;;  %v3938_v30 = vld [vmem:[#allocation14 + $0x1b80] sm:$0xff]  ;;  %v3927_v25 = vld [vmem:[#allocation14 + $0x1b28] sm:$0xff] }
 0x61d   : > { %13279 = vmatprep.subr.bf16.mxu0 %v15523_v47  ;;  %v15667_v47 = vcombine.high %v3807_v39, %v3819_v41  ;;  %v3939_v32 = vld [vmem:[#allocation14 + $0x1b88] sm:$0xff] }
 0x61f   : > { %13116 = vmatpush1.bf16.msra.mxu1 %v15520_v56  ;;  %v15664_v56 = vcombine.low %v3806_v36, %v3818_v37  ;;  %v3950_v36 = vld [vmem:[#allocation14 + $0x1be0] sm:$0xff] }
 0x620   : > { %13280 = vmatpush1.bf16.msra.mxu0 %v15522_v60  ;;  %13117 = vmatprep.subr.bf16.mxu1 %v15545_v61  ;;  %v15666_v60 = vcombine.low %v3807_v39, %v3819_v41  ;;  %v15689_v61 = vcombine.high %v3830_v48, %v3842_v49  ;;  %v3962_v37 = vld [vmem:[#allocation14 + $0x1c40] sm:$0xff]  ;;  %v3951_v39 = vld [vmem:[#allocation14 + $0x1be8] sm:$0xff] }
 0x621   : > { %13281 = vmatprep.subr.bf16.mxu0 %v15547_v62  ;;  %v15691_v62 = vcombine.high %v3831_v51, %v3843_v55  ;;  %v3963_v41 = vld [vmem:[#allocation14 + $0x1c48] sm:$0xff]  ;;  %v3974_v48 = vld [vmem:[#allocation14 + $0x1ca0] sm:$0xff] }
 0x622   : > { %v3986_v49 = vld [vmem:[#allocation14 + $0x1d00] sm:$0xff] }
 0x623   : > { %13118 = vmatpush1.bf16.msra.mxu1 %v15544_v4  ;;  %v3867_v4 = vld [vmem:[#allocation14 + $0x1948] sm:$0xff] }
 0x624   : > { %13282 = vmatpush1.bf16.msra.mxu0 %v15546_v8  ;;  %13119 = vmatprep.subr.bf16.mxu1 %v15569_v9  ;;  %v15690_v8 = vcombine.low %v3831_v51, %v3843_v55  ;;  %v15713_v9 = vcombine.high %v3854_v0, %v3866_v1  ;;  %v15715_v11 = vcombine.high %v3855_v3, %v3867_v4  ;;  %v3975_v51 = vld [vmem:[#allocation14 + $0x1ca8] sm:$0xff] }
 0x625   : > { %13283 = vmatprep.subr.bf16.mxu0 %v15571_v10  ;;  %v3878_v10 = vld [vmem:[#allocation14 + $0x19a0] sm:$0xff]  ;;  %v3987_v55 = vld [vmem:[#allocation14 + $0x1d08] sm:$0xff] }
 0x627   : > { %13120 = vmatpush1.bf16.msra.mxu1 %v15568_v16  ;;  %v15712_v16 = vcombine.low %v3854_v0, %v3866_v1  ;;  %v3998_v0 = vld [vmem:[#allocation14 + $0x1d60] sm:$0xff] }
 0x628   : > { %13284 = vmatpush1.bf16.msra.mxu0 %v15570_v17  ;;  %13121 = vmatprep.subr.bf16.mxu1 %v15593_v18  ;;  %v15714_v17 = vcombine.low %v3855_v3, %v3867_v4  ;;  %v15737_v18 = vcombine.high %v3878_v10, %v3890_v28  ;;  %v4010_v1 = vld [vmem:[#allocation14 + $0x1dc0] sm:$0xff]  ;;  %v4011_v3 = vld [vmem:[#allocation14 + $0x1dc8] sm:$0xff]  ;;  %v15832_v4 = vcombine.low %v3974_v48, %v3986_v49 }
 0x629   : > { %13285 = vmatprep.subr.bf16.mxu0 %v15595_v22  ;;  %v15739_v22 = vcombine.high %v3879_v15, %v3891_v14 }
 0x62b   : > { %13122 = vmatpush1.bf16.msra.mxu1 %v15592_v24  ;;  %v15736_v24 = vcombine.low %v3878_v10, %v3890_v28  ;;  %v4022_v28 = vld [vmem:[#allocation14 + $0x1e20] sm:$0xff] }
 0x62c   : > { %13286 = vmatpush1.bf16.msra.mxu0 %v15594_v40  ;;  %13123 = vmatprep.subr.bf16.mxu1 %v15617_v26  ;;  %v15738_v40 = vcombine.low %v3879_v15, %v3891_v14  ;;  %v15761_v26 = vcombine.high %v3902_v19, %v3914_v20  ;;  %v4023_v15 = vld [vmem:[#allocation14 + $0x1e28] sm:$0xff] }
 0x62d   : > { %13287 = vmatprep.subr.bf16.mxu0 %v15619_v27  ;;  %v15763_v27 = vcombine.high %v3903_v21, %v3915_v23  ;;  %v4035_v14 = vld [vmem:[#allocation14 + $0x1e88] sm:$0xff] }
 0x62f   : > { %13124 = vmatpush1.bf16.msra.mxu1 %v15616_v33  ;;  %v15760_v33 = vcombine.low %v3902_v19, %v3914_v20  ;;  %v4046_v19 = vld [vmem:[#allocation14 + $0x1ee0] sm:$0xff] }
 0x630   : > { %13288 = vmatpush1.bf16.msra.mxu0 %v15618_v34  ;;  %13125 = vmatprep.subr.bf16.mxu1 %v15641_v12  ;;  %v15762_v34 = vcombine.low %v3903_v21, %v3915_v23  ;;  %v15785_v12 = vcombine.high %v3926_v58, %v3938_v30  ;;  %v4058_v20 = vld [vmem:[#allocation14 + $0x1f40] sm:$0xff]  ;;  %v4047_v21 = vld [vmem:[#allocation14 + $0x1ee8] sm:$0xff] }
 0x631   : > { %13289 = vmatprep.subr.bf16.mxu0 %v15643_v35  ;;  %v15787_v35 = vcombine.high %v3927_v25, %v3939_v32  ;;  %v4059_v23 = vld [vmem:[#allocation14 + $0x1f48] sm:$0xff] }
 0x633   : > { %13126 = vmatpush1.bf16.msra.mxu1 %v15640_v44  ;;  %v15784_v44 = vcombine.low %v3926_v58, %v3938_v30  ;;  %v4070_v58 = vld [vmem:[#allocation14 + $0x1fa0] sm:$0xff] }
 0x634   : > { %13290 = vmatpush1.bf16.msra.mxu0 %v15642_v45  ;;  %13127 = vmatprep.subr.bf16.mxu1 %v15665_v46  ;;  %v15786_v45 = vcombine.low %v3927_v25, %v3939_v32  ;;  %v15809_v46 = vcombine.high %v3950_v36, %v3962_v37  ;;  %v4082_v30 = vld [vmem:[#allocation14 + $0x2000] sm:$0xff]  ;;  %v4071_v25 = vld [vmem:[#allocation14 + $0x1fa8] sm:$0xff] }
 0x635   : > { %13291 = vmatprep.subr.bf16.mxu0 %v15667_v47  ;;  %v15811_v47 = vcombine.high %v3951_v39, %v3963_v41  ;;  %v4083_v32 = vld [vmem:[#allocation14 + $0x2008] sm:$0xff] }
 0x637   : > { %13128 = vmatpush1.bf16.msra.mxu1 %v15664_v56  ;;  %v15808_v56 = vcombine.low %v3950_v36, %v3962_v37  ;;  %v4094_v36 = vld [vmem:[#allocation14 + $0x2060] sm:$0xff] }
 0x638   : > { %13292 = vmatpush1.bf16.msra.mxu0 %v15666_v60  ;;  %13138 = vmatprep.subr.bf16.mxu1 %v15689_v61  ;;  %v15810_v60 = vcombine.low %v3951_v39, %v3963_v41  ;;  %v15833_v61 = vcombine.high %v3974_v48, %v3986_v49  ;;  %v4106_v37 = vld [vmem:[#allocation14 + $0x20c0] sm:$0xff]  ;;  %v4095_v39 = vld [vmem:[#allocation14 + $0x2068] sm:$0xff] }
 0x639   : > { %13302 = vmatprep.subr.bf16.mxu0 %v15691_v62  ;;  %v15835_v62 = vcombine.high %v3975_v51, %v3987_v55  ;;  %v4107_v41 = vld [vmem:[#allocation14 + $0x20c8] sm:$0xff]  ;;  %v4118_v48 = vld [vmem:[#allocation14 + $0x2120] sm:$0xff] }
 0x63a   : > { %13130 = vmatmul.mubr.bf16.vlgmr.msra.gmra.mrb[20].mxu1 %v17714_v7  ;;  %v4130_v49 = vld [vmem:[#allocation14 + $0x2180] sm:$0xff] }
 0x63b   : > { %13294 = vmatmul.mubr.bf16.vlgmr.msra.gmra.mrb[24].mxu0 %v17714_v7  ;;  %13139 = vmatpush1.bf16.msra.mxu1 %v15688_v13  ;;  %v3999_v13 = vld [vmem:[#allocation14 + $0x1d68] sm:$0xff] }
 0x63c   : > { %13170 = vmatprep.mubr.bf16.mxu1 %v17735_v57  ;;  %13303 = vmatpush1.bf16.msra.mxu0 %v15690_v8  ;;  %v15834_v8 = vcombine.low %v3975_v51, %v3987_v55  ;;  %v15859_v10 = vcombine.high %v3999_v13, %v4011_v3  ;;  %v4119_v51 = vld [vmem:[#allocation14 + $0x2128] sm:$0xff] }
 0x63d   : > { %13334 = vmatprep.mubr.bf16.mxu0 %v17735_v57  ;;  %13140 = vmatprep.subr.bf16.mxu1 %v15713_v9  ;;  %v15857_v9 = vcombine.high %v3998_v0, %v4010_v1  ;;  %v4131_v55 = vld [vmem:[#allocation14 + $0x2188] sm:$0xff] }
 0x63e   : > { %13304 = vmatprep.subr.bf16.mxu0 %v15715_v11  ;;  %v4034_v11 = vld [vmem:[#allocation14 + $0x1e80] sm:$0xff] }
 0x63f   : > { %13141 = vmatpush1.bf16.msra.mxu1 %v15712_v16  ;;  %v15856_v16 = vcombine.low %v3998_v0, %v4010_v1  ;;  %v4142_v0 = vld [vmem:[#allocation14 + $0x21e0] sm:$0xff] }
 0x640   : > { %13305 = vmatpush1.bf16.msra.mxu0 %v15714_v17  ;;  %13142 = vmatprep.subr.bf16.mxu1 %v15737_v18  ;;  %v15858_v17 = vcombine.low %v3999_v13, %v4011_v3  ;;  %v15881_v18 = vcombine.high %v4022_v28, %v4034_v11  ;;  %v4154_v1 = vld [vmem:[#allocation14 + $0x2240] sm:$0xff]  ;;  %v4143_v13 = vld [vmem:[#allocation14 + $0x21e8] sm:$0xff] }
 0x641   : > { %13306 = vmatprep.subr.bf16.mxu0 %v15739_v22  ;;  %v15883_v22 = vcombine.high %v4023_v15, %v4035_v14  ;;  %v4155_v3 = vld [vmem:[#allocation14 + $0x2248] sm:$0xff] }
 0x643   : > { %13143 = vmatpush1.bf16.msra.mxu1 %v15736_v24  ;;  %v15880_v24 = vcombine.low %v4022_v28, %v4034_v11  ;;  %v4166_v28 = vld [vmem:[#allocation14 + $0x22a0] sm:$0xff] }
 0x644   : > { %13307 = vmatpush1.bf16.msra.mxu0 %v15738_v40  ;;  %13144 = vmatprep.subr.bf16.mxu1 %v15761_v26  ;;  %v15882_v40 = vcombine.low %v4023_v15, %v4035_v14  ;;  %v15905_v26 = vcombine.high %v4046_v19, %v4058_v20  ;;  %v4178_v11 = vld [vmem:[#allocation14 + $0x2300] sm:$0xff]  ;;  %v4167_v15 = vld [vmem:[#allocation14 + $0x22a8] sm:$0xff] }
 0x645   : > { %13308 = vmatprep.subr.bf16.mxu0 %v15763_v27  ;;  %v15907_v27 = vcombine.high %v4047_v21, %v4059_v23  ;;  %v4179_v14 = vld [vmem:[#allocation14 + $0x2308] sm:$0xff] }
 0x647   : > { %13145 = vmatpush1.bf16.msra.mxu1 %v15760_v33  ;;  %v15904_v33 = vcombine.low %v4046_v19, %v4058_v20  ;;  %v4190_v19 = vld [vmem:[#allocation14 + $0x2360] sm:$0xff] }
 0x648   : > { %13309 = vmatpush1.bf16.msra.mxu0 %v15762_v34  ;;  %13146 = vmatprep.subr.bf16.mxu1 %v15785_v12  ;;  %v15906_v34 = vcombine.low %v4047_v21, %v4059_v23  ;;  %v15929_v12 = vcombine.high %v4070_v58, %v4082_v30  ;;  %v4202_v20 = vld [vmem:[#allocation14 + $0x23c0] sm:$0xff]  ;;  %v4191_v21 = vld [vmem:[#allocation14 + $0x2368] sm:$0xff] }
 0x649   : > { %13310 = vmatprep.subr.bf16.mxu0 %v15787_v35  ;;  %v15931_v35 = vcombine.high %v4071_v25, %v4083_v32  ;;  %v4203_v23 = vld [vmem:[#allocation14 + $0x23c8] sm:$0xff] }
 0x64b   : > { %13147 = vmatpush1.bf16.msra.mxu1 %v15784_v44  ;;  %v15928_v44 = vcombine.low %v4070_v58, %v4082_v30  ;;  %v4214_v58 = vld [vmem:[#allocation14 + $0x2420] sm:$0xff] }
 0x64c   : > { %13311 = vmatpush1.bf16.msra.mxu0 %v15786_v45  ;;  %13148 = vmatprep.subr.bf16.mxu1 %v15809_v46  ;;  %v15930_v45 = vcombine.low %v4071_v25, %v4083_v32  ;;  %v15953_v46 = vcombine.high %v4094_v36, %v4106_v37  ;;  %v4226_v30 = vld [vmem:[#allocation14 + $0x2480] sm:$0xff]  ;;  %v4215_v25 = vld [vmem:[#allocation14 + $0x2428] sm:$0xff] }
 0x64d   : > { %13312 = vmatprep.subr.bf16.mxu0 %v15811_v47  ;;  %v15955_v47 = vcombine.high %v4095_v39, %v4107_v41  ;;  %v4227_v32 = vld [vmem:[#allocation14 + $0x2488] sm:$0xff] }
 0x64f   : > { %13149 = vmatpush1.bf16.msra.mxu1 %v15808_v56  ;;  %v15952_v56 = vcombine.low %v4094_v36, %v4106_v37  ;;  %v4238_v36 = vld [vmem:[#allocation14 + $0x24e0] sm:$0xff] }
 0x650   : > { %13313 = vmatpush1.bf16.msra.mxu0 %v15810_v60  ;;  %13150 = vmatprep.subr.bf16.mxu1 %v15833_v61  ;;  %v15954_v60 = vcombine.low %v4095_v39, %v4107_v41  ;;  %v15977_v61 = vcombine.high %v4118_v48, %v4130_v49  ;;  %v4250_v37 = vld [vmem:[#allocation14 + $0x2540] sm:$0xff]  ;;  %v16072_v39 = vcombine.low %v4214_v58, %v4226_v30  ;;  %v4239_v41 = vld [vmem:[#allocation14 + $0x24e8] sm:$0xff] }
 0x651   : > { %13314 = vmatprep.subr.bf16.mxu0 %v15835_v62  ;;  %v15979_v62 = vcombine.high %v4119_v51, %v4131_v55 }
 0x653   : > { %13151 = vmatpush1.bf16.msra.mxu1 %v15832_v4  ;;  %v15976_v4 = vcombine.low %v4118_v48, %v4130_v49  ;;  %v4274_v48 = vld [vmem:[#allocation14 + $0x2600] sm:$0xff] }
 0x654   : > { %13315 = vmatpush1.bf16.msra.mxu0 %v15834_v8  ;;  %13152 = vmatprep.subr.bf16.mxu1 %v15857_v9  ;;  %v15978_v8 = vcombine.low %v4119_v51, %v4131_v55  ;;  %v16001_v9 = vcombine.high %v4142_v0, %v4154_v1  ;;  %v4263_v51 = vld [vmem:[#allocation14 + $0x25a8] sm:$0xff] }
 0x655   : > { %13316 = vmatprep.subr.bf16.mxu0 %v15859_v10  ;;  %v16003_v10 = vcombine.high %v4143_v13, %v4155_v3  ;;  %v4275_v55 = vld [vmem:[#allocation14 + $0x2608] sm:$0xff] }
 0x657   : > { %13153 = vmatpush1.bf16.msra.mxu1 %v15856_v16  ;;  %v16000_v16 = vcombine.low %v4142_v0, %v4154_v1  ;;  %v4286_v0 = vld [vmem:[#allocation14 + $0x2660] sm:$0xff] }
 0x658   : > { %13317 = vmatpush1.bf16.msra.mxu0 %v15858_v17  ;;  %13154 = vmatprep.subr.bf16.mxu1 %v15881_v18  ;;  %v16002_v17 = vcombine.low %v4143_v13, %v4155_v3  ;;  %v16025_v18 = vcombine.high %v4166_v28, %v4178_v11  ;;  %v4298_v1 = vld [vmem:[#allocation14 + $0x26c0] sm:$0xff]  ;;  %v4287_v13 = vld [vmem:[#allocation14 + $0x2668] sm:$0xff] }
 0x659   : > { %13318 = vmatprep.subr.bf16.mxu0 %v15883_v22  ;;  %v16027_v22 = vcombine.high %v4167_v15, %v4179_v14  ;;  %v4299_v3 = vld [vmem:[#allocation14 + $0x26c8] sm:$0xff] }
 0x65b   : > { %13155 = vmatpush1.bf16.msra.mxu1 %v15880_v24  ;;  %v16024_v24 = vcombine.low %v4166_v28, %v4178_v11  ;;  %v4310_v28 = vld [vmem:[#allocation14 + $0x2720] sm:$0xff] }
 0x65c   : > { %13319 = vmatpush1.bf16.msra.mxu0 %v15882_v40  ;;  %13156 = vmatprep.subr.bf16.mxu1 %v15905_v26  ;;  %v16026_v40 = vcombine.low %v4167_v15, %v4179_v14  ;;  %v16049_v26 = vcombine.high %v4190_v19, %v4202_v20  ;;  %v4322_v11 = vld [vmem:[#allocation14 + $0x2780] sm:$0xff]  ;;  %v4311_v15 = vld [vmem:[#allocation14 + $0x2728] sm:$0xff] }
 0x65d   : > { %13320 = vmatprep.subr.bf16.mxu0 %v15907_v27  ;;  %v16051_v27 = vcombine.high %v4191_v21, %v4203_v23  ;;  %v4323_v14 = vld [vmem:[#allocation14 + $0x2788] sm:$0xff] }
 0x65f   : > { %13157 = vmatpush1.bf16.msra.mxu1 %v15904_v33  ;;  %v16048_v33 = vcombine.low %v4190_v19, %v4202_v20  ;;  %v4334_v19 = vld [vmem:[#allocation14 + $0x27e0] sm:$0xff] }
 0x660   : > { %13321 = vmatpush1.bf16.msra.mxu0 %v15906_v34  ;;  %13158 = vmatprep.subr.bf16.mxu1 %v15929_v12  ;;  %v16050_v34 = vcombine.low %v4191_v21, %v4203_v23  ;;  %v16073_v12 = vcombine.high %v4214_v58, %v4226_v30  ;;  %v4346_v20 = vld [vmem:[#allocation14 + $0x2840] sm:$0xff]  ;;  %v4335_v21 = vld [vmem:[#allocation14 + $0x27e8] sm:$0xff] }
 0x661   : > { %13322 = vmatprep.subr.bf16.mxu0 %v15931_v35  ;;  %v16075_v35 = vcombine.high %v4215_v25, %v4227_v32  ;;  %v4347_v23 = vld [vmem:[#allocation14 + $0x2848] sm:$0xff]  ;;  %v4358_v58 = vld [vmem:[#allocation14 + $0x28a0] sm:$0xff] }
 0x662   : > { %v4370_v30 = vld [vmem:[#allocation14 + $0x2900] sm:$0xff] }
 0x663   : > { %13159 = vmatpush1.bf16.msra.mxu1 %v15928_v44  ;;  %v4251_v44 = vld [vmem:[#allocation14 + $0x2548] sm:$0xff] }
 0x664   : > { %13323 = vmatpush1.bf16.msra.mxu0 %v15930_v45  ;;  %13160 = vmatprep.subr.bf16.mxu1 %v15953_v46  ;;  %v16074_v45 = vcombine.low %v4215_v25, %v4227_v32  ;;  %v16097_v46 = vcombine.high %v4238_v36, %v4250_v37  ;;  %v16099_v49 = vcombine.high %v4239_v41, %v4251_v44  ;;  %v16902_v25 = vld [vmem:[#allocation16] sm:$0xff] }
 0x665   : > { %13324 = vmatprep.subr.bf16.mxu0 %v15955_v47  ;;  %v4262_v47 = vld [vmem:[#allocation14 + $0x25a0] sm:$0xff]  ;;  %v4619_v32 = vrot.slane %v16902_v25, %v17719_v63 }
 0x667   : > { %13161 = vmatpush1.bf16.msra.mxu1 %v15952_v56  ;;  %v16096_v56 = vcombine.low %v4238_v36, %v4250_v37  ;;  %v16192_v36 = vcombine.low %v4334_v19, %v4346_v20  ;;  %v4631_v37 = vrot.slane %v16902_v25, %v17725_v5 }
 0x668   : > { %13325 = vmatpush1.bf16.msra.mxu0 %v15954_v60  ;;  %13162 = vmatprep.subr.bf16.mxu1 %v15977_v61  ;;  %v16098_v60 = vcombine.low %v4239_v41, %v4251_v44  ;;  %v16121_v61 = vcombine.high %v4262_v47, %v4274_v48  ;;  %v16217_v41 = vcombine.high %v4358_v58, %v4370_v30 }
 0x669   : > { %13326 = vmatprep.subr.bf16.mxu0 %v15979_v62  ;;  %v16123_v62 = vcombine.high %v4263_v51, %v4275_v55 }
 0x66b   : > { %13163 = vmatpush1.bf16.msra.mxu1 %v15976_v4  ;;  %v16120_v4 = vcombine.low %v4262_v47, %v4274_v48  ;;  %v4394_v47 = vld [vmem:[#allocation14 + $0x29c0] sm:$0xff] }
 0x66c   : > { %13327 = vmatpush1.bf16.msra.mxu0 %v15978_v8  ;;  %13164 = vmatprep.subr.bf16.mxu1 %v16001_v9  ;;  %v16122_v8 = vcombine.low %v4263_v51, %v4275_v55  ;;  %v16145_v9 = vcombine.high %v4286_v0, %v4298_v1  ;;  %v4383_v55 = vld [vmem:[#allocation14 + $0x2968] sm:$0xff] }
 0x66d   : > { %13328 = vmatprep.subr.bf16.mxu0 %v16003_v10  ;;  %v16147_v10 = vcombine.high %v4287_v13, %v4299_v3 }
 0x66f   : > { %13165 = vmatpush1.bf16.msra.mxu1 %v16000_v16  ;;  %v16144_v16 = vcombine.low %v4286_v0, %v4298_v1  ;;  %v16216_v1 = vcombine.low %v4358_v58, %v4370_v30  ;;  %v4454_v30 = vld [vmem:[#allocation14 + $0x2ba0] sm:$0xff] }
 0x670   : > { %13329 = vmatpush1.bf16.msra.mxu0 %v16002_v17  ;;  %13166 = vmatprep.subr.bf16.mxu1 %v16025_v18  ;;  %v16146_v17 = vcombine.low %v4287_v13, %v4299_v3  ;;  %v16169_v18 = vcombine.high %v4310_v28, %v4322_v11 }
 0x671   : > { %13330 = vmatprep.subr.bf16.mxu0 %v16027_v22  ;;  %v16171_v22 = vcombine.high %v4311_v15, %v4323_v14 }
 0x673   : > { %13167 = vmatpush1.bf16.msra.mxu1 %v16024_v24  ;;  %v16168_v24 = vcombine.low %v4310_v28, %v4322_v11  ;;  %v4406_v11 = vld [vmem:[#allocation14 + $0x2a20] sm:$0xff] }
 0x674   : > { %13331 = vmatpush1.bf16.msra.mxu0 %v16026_v40  ;;  %13168 = vmatprep.subr.bf16.mxu1 %v16049_v26  ;;  %v16170_v40 = vcombine.low %v4311_v15, %v4323_v14  ;;  %v16193_v26 = vcombine.high %v4334_v19, %v4346_v20  ;;  %v4418_v15 = vld [vmem:[#allocation14 + $0x2a80] sm:$0xff]  ;;  %v4407_v14 = vld [vmem:[#allocation14 + $0x2a28] sm:$0xff] }
 0x675   : > { %13332 = vmatprep.subr.bf16.mxu0 %v16051_v27  ;;  %v16195_v27 = vcombine.high %v4335_v21, %v4347_v23  ;;  %v4430_v20 = vld [vmem:[#allocation14 + $0x2ae0] sm:$0xff] }
 0x677   : > { %13169 = vmatpush1.bf16.msra.mxu1 %v16048_v33  ;;  %v4359_v33 = vld [vmem:[#allocation14 + $0x28a8] sm:$0xff] }
 0x678   : > { %13333 = vmatpush1.bf16.msra.mxu0 %v16050_v34  ;;  %13179 = vmatprep.subr.bf16.mxu1 %v16073_v12  ;;  %v4371_v34 = vld [vmem:[#allocation14 + $0x2908] sm:$0xff]  ;;  %v4627_v12 = vrot.slane %v16902_v25, %v17748_v54 }
 0x679   : > { %13343 = vmatprep.subr.bf16.mxu0 %v16075_v35  ;;  %v4623_v35 = vrot.slane %v16902_v25, %v17722_v2  ;;  %v4466_v25 = vld [vmem:[#allocation14 + $0x2c00] sm:$0xff] }
 0x67a   : > { %13171 = vmatmul.mubr.bf16.vlgmr.msra.gmra.mrb[20].mxu1 %v17737_v52 }
 0x67b   : > { %13335 = vmatmul.mubr.bf16.vlgmr.msra.gmra.mrb[24].mxu0 %v17737_v52  ;;  %13180 = vmatpush1.bf16.msra.mxu1 %v16072_v39  ;;  %v16194_v39 = vcombine.low %v4335_v21, %v4347_v23  ;;  %v4442_v21 = vld [vmem:[#allocation14 + $0x2b40] sm:$0xff]  ;;  %v4431_v23 = vld [vmem:[#allocation14 + $0x2ae8] sm:$0xff] }
 0x67c   : > { %13211 = vmatprep.mubr.bf16.mxu1 %v17741_v6  ;;  %13344 = vmatpush1.bf16.msra.mxu0 %v16074_v45  ;;  %v16219_v45 = vcombine.high %v4359_v33, %v4371_v34 }
 0x67d   : > { %13375 = vmatprep.mubr.bf16.mxu0 %v17741_v6  ;;  %13181 = vmatprep.subr.bf16.mxu1 %v16097_v46  ;;  %v4382_v46 = vld [vmem:[#allocation14 + $0x2960] sm:$0xff] }
 0x67e   : > { %13345 = vmatprep.subr.bf16.mxu0 %v16099_v49 }
 0x67f   : > { %13182 = vmatpush1.bf16.msra.mxu1 %v16096_v56  ;;  %v4395_v56 = vld [vmem:[#allocation14 + $0x29c8] sm:$0xff] }
 0x680   : > { %13346 = vmatpush1.bf16.msra.mxu0 %v16098_v60  ;;  %13183 = vmatprep.subr.bf16.mxu1 %v16121_v61  ;;  %v16243_v28 = vcombine.high %v4383_v55, %v4395_v56 }
 0x681   : > { %13347 = vmatprep.subr.bf16.mxu0 %v16123_v62 }
 0x683   : > { %13184 = vmatpush1.bf16.msra.mxu1 %v16120_v4 }
 0x684   : > { %13348 = vmatpush1.bf16.msra.mxu0 %v16122_v8  ;;  %13185 = vmatprep.subr.bf16.mxu1 %v16145_v9  ;;  %v16218_v8 = vcombine.low %v4359_v33, %v4371_v34  ;;  %v16241_v9 = vcombine.high %v4382_v46, %v4394_v47  ;;  %v4467_v33 = vld [vmem:[#allocation14 + $0x2c08] sm:$0xff]  ;;  %v16288_v34 = vcombine.low %v4430_v20, %v4442_v21 }
 0x685   : > { %13349 = vmatprep.subr.bf16.mxu0 %v16147_v10 }
 0x687   : > { %13186 = vmatpush1.bf16.msra.mxu1 %v16144_v16  ;;  %v4419_v16 = vld [vmem:[#allocation14 + $0x2a88] sm:$0xff] }
 0x688   : > { %13350 = vmatpush1.bf16.msra.mxu0 %v16146_v17  ;;  %13187 = vmatprep.subr.bf16.mxu1 %v16169_v18  ;;  %v16240_v17 = vcombine.low %v4382_v46, %v4394_v47  ;;  %v16242_v18 = vcombine.low %v4383_v55, %v4395_v56  ;;  %v16267_v19 = vcombine.high %v4407_v14, %v4419_v16  ;;  %v4503_v55 = vld [vmem:[#allocation14 + $0x2d28] sm:$0xff] }
 0x689   : > { %13351 = vmatprep.subr.bf16.mxu0 %v16171_v22  ;;  %v16265_v22 = vcombine.high %v4406_v11, %v4418_v15  ;;  %v4515_v56 = vld [vmem:[#allocation14 + $0x2d88] sm:$0xff] }
 0x68b   : > { %13188 = vmatpush1.bf16.msra.mxu1 %v16168_v24  ;;  %v4443_v24 = vld [vmem:[#allocation14 + $0x2b48] sm:$0xff] }
 0x68c   : > { %13352 = vmatpush1.bf16.msra.mxu0 %v16170_v40  ;;  %13189 = vmatprep.subr.bf16.mxu1 %v16193_v26  ;;  %v16264_v40 = vcombine.low %v4406_v11, %v4418_v15  ;;  %v16266_v26 = vcombine.low %v4407_v14, %v4419_v16  ;;  %v16291_v58 = vcombine.high %v4431_v23, %v4443_v24  ;;  %v4550_v11 = vld [vmem:[#allocation14 + $0x2ea0] sm:$0xff]  ;;  %v4551_v14 = vld [vmem:[#allocation14 + $0x2ea8] sm:$0xff] }
 0x68d   : > { %v12885_v44 = vpop.f32.mrb[16].mxu1  ;;  %13353 = vmatprep.subr.bf16.mxu0 %v16195_v27  ;;  %v16289_v27 = vcombine.high %v4430_v20, %v4442_v21  ;;  %v4562_v15 = vld [vmem:[#allocation14 + $0x2f00] sm:$0xff]  ;;  %v4563_v16 = vld [vmem:[#allocation14 + $0x2f08] sm:$0xff] }
 0x68e   : > { %v16463_v48 = vadd.f32 %v12885_v44, %v4619_v32  ;;  %v13049_v49 = vpop.f32.mrb[20].mxu0  ;;  %v12887_v51 = vpop.f32.mrb[17].mxu1  ;;  %v4455_v32 = vld [vmem:[#allocation14 + $0x2ba8] sm:$0xff]  ;;  %v4574_v20 = vld [vmem:[#allocation14 + $0x2f60] sm:$0xff] }
 0x68f   : > { %v16465_v60 = vadd.f32 %v13049_v49, %v4627_v12  ;;  %v16464_v61 = vadd.f32 %v12887_v51, %v4623_v35  ;;  %v13051_v62 = vpop.f32.mrb[21].mxu0  ;;  %v12889_v0 = vpop.f32.mrb[18].mxu1  ;;  %13190 = vmatpush1.bf16.msra.mxu1 %v16192_v36  ;;  %v16290_v12 = vcombine.low %v4431_v23, %v4443_v24  ;;  %v16313_v35 = vcombine.high %v4454_v30, %v4466_v25  ;;  %v4491_v44 = vld [vmem:[#allocation14 + $0x2cc8] sm:$0xff]  ;;  %v4502_v49 = vld [vmem:[#allocation14 + $0x2d20] sm:$0xff] }
 0x690   : > { %14372 = vst [vmem:[%s17777_s22 + $0x20] sm:$0xff] %v16463_v48  ;;  %v16466_v13 = vadd.f32 %v13051_v62, %v4631_v37  ;;  %v13053_v3 = vpop.f32.mrb[22].mxu0  ;;  %13354 = vmatpush1.bf16.msra.mxu0 %v16194_v39  ;;  %v12890_v4 = vpop.f32.mrb[19].mxu1  ;;  %13191 = vmatprep.subr.bf16.mxu1 %v16217_v41  ;;  %v16315_v36 = vcombine.high %v4455_v32, %v4467_v33  ;;  %v4478_v37 = vld [vmem:[#allocation14 + $0x2c60] sm:$0xff]  ;;  %v4479_v41 = vld [vmem:[#allocation14 + $0x2c68] sm:$0xff] }
 0x691   : > { %14374 = vst [vmem:[%s17777_s22 + $0x30] sm:$0xff] %v16465_v60  ;;  %14373 = vst [vmem:[%s17777_s22 + $0x28] sm:$0xff] %v16464_v61  ;;  %v13054_v10 = vpop.f32.mrb[23].mxu0  ;;  %13355 = vmatprep.subr.bf16.mxu0 %v16219_v45  ;;  %v4490_v39 = vld [vmem:[#allocation14 + $0x2cc0] sm:$0xff]  ;;  %v16312_v45 = vcombine.low %v4454_v30, %v4466_v25  ;;  %v16314_v46 = vcombine.low %v4455_v32, %v4467_v33  ;;  %v16339_v48 = vcombine.high %v4479_v41, %v4491_v44  ;;  %v4527_v3 = vld [vmem:[#allocation14 + $0x2de8] sm:$0xff] }
 0x692   : > { %14375 = vst [vmem:[%s17777_s22 + $0x38] sm:$0xff] %v16466_v13  ;;  %v16337_v47 = vcombine.high %v4478_v37, %v4490_v39  ;;  %v4514_v51 = vld [vmem:[#allocation14 + $0x2d80] sm:$0xff]  ;;  %v16336_v60 = vcombine.low %v4478_v37, %v4490_v39  ;;  %v16338_v61 = vcombine.low %v4479_v41, %v4491_v44  ;;  %v16363_v0 = vcombine.high %v4503_v55, %v4515_v56  ;;  %v4539_v4 = vld [vmem:[#allocation14 + $0x2e48] sm:$0xff]  ;;  %v3064_v30 = vld [vmem:[#allocation14 + $0x30] sm:$0xff] }
 0x693   : > { %13192 = vmatpush1.bf16.msra.mxu1 %v16216_v1  ;;  %v16361_v62 = vcombine.high %v4502_v49, %v4514_v51  ;;  %v4526_v1 = vld [vmem:[#allocation14 + $0x2de0] sm:$0xff]  ;;  %v4575_v23 = vld [vmem:[#allocation14 + $0x2f68] sm:$0xff]  ;;  %v3076_v25 = vld [vmem:[#allocation14 + $0x90] sm:$0xff] }
 0x694   : > { %13356 = vmatpush1.bf16.msra.mxu0 %v16218_v8  ;;  %13193 = vmatprep.subr.bf16.mxu1 %v16241_v9  ;;  %v4538_v13 = vld [vmem:[#allocation14 + $0x2e40] sm:$0xff]  ;;  %v16360_v8 = vcombine.low %v4502_v49, %v4514_v51  ;;  %v16362_v9 = vcombine.low %v4503_v55, %v4515_v56  ;;  %v4587_v24 = vld [vmem:[#allocation14 + $0x2fc8] sm:$0xff]  ;;  %v3065_v32 = vld [vmem:[#allocation14 + $0x38] sm:$0xff]  ;;  %v14924_v41 = vcombine.low %v3064_v30, %v3076_v25 }
 0x695   : > { %13357 = vmatprep.subr.bf16.mxu0 %v16243_v28  ;;  %v16385_v10 = vcombine.high %v4526_v1, %v4538_v13  ;;  %v16387_v28 = vcombine.high %v4527_v3, %v4539_v4  ;;  %v4586_v21 = vld [vmem:[#allocation14 + $0x2fc0] sm:$0xff]  ;;  %v3077_v33 = vld [vmem:[#allocation14 + $0x98] sm:$0xff]  ;;  %v3088_v37 = vld [vmem:[#allocation14 + $0xf0] sm:$0xff] }
 0x696   : > { %v3100_v39 = vld [vmem:[#allocation14 + $0x150] sm:$0xff]  ;;  %v3089_v44 = vld [vmem:[#allocation14 + $0xf8] sm:$0xff] }
 0x697   : > { %13194 = vmatpush1.bf16.msra.mxu1 %v16240_v17  ;;  %v16384_v17 = vcombine.low %v4526_v1, %v4538_v13  ;;  %v3124_v49 = vld [vmem:[#allocation14 + $0x210] sm:$0xff]  ;;  %v3113_v55 = vld [vmem:[#allocation14 + $0x1b8] sm:$0xff] }
 0x698   : > { %13358 = vmatpush1.bf16.msra.mxu0 %v16242_v18  ;;  %13195 = vmatprep.subr.bf16.mxu1 %v16265_v22  ;;  %v16386_v18 = vcombine.low %v4527_v3, %v4539_v4  ;;  %v16409_v22 = vcombine.high %v4550_v11, %v4562_v15  ;;  %v3125_v56 = vld [vmem:[#allocation14 + $0x218] sm:$0xff]  ;;  %v3136_v1 = vld [vmem:[#allocation14 + $0x270] sm:$0xff] }
 0x699   : > { %13359 = vmatprep.subr.bf16.mxu0 %v16267_v19  ;;  %v16411_v19 = vcombine.high %v4551_v14, %v4563_v16  ;;  %v3148_v13 = vld [vmem:[#allocation14 + $0x2d0] sm:$0xff]  ;;  %v3137_v3 = vld [vmem:[#allocation14 + $0x278] sm:$0xff] }
 0x69a   : > { %v3149_v4 = vld [vmem:[#allocation14 + $0x2d8] sm:$0xff] }
 0x69b   : > { %13196 = vmatpush1.bf16.msra.mxu1 %v16264_v40  ;;  %v16408_v40 = vcombine.low %v4550_v11, %v4562_v15  ;;  %v3160_v11 = vld [vmem:[#allocation14 + $0x330] sm:$0xff] }
 0x69c   : > { %13360 = vmatpush1.bf16.msra.mxu0 %v16266_v26  ;;  %13197 = vmatprep.subr.bf16.mxu1 %v16289_v27  ;;  %v16410_v26 = vcombine.low %v4551_v14, %v4563_v16  ;;  %v16433_v27 = vcombine.high %v4574_v20, %v4586_v21  ;;  %v3172_v15 = vld [vmem:[#allocation14 + $0x390] sm:$0xff]  ;;  %v3161_v14 = vld [vmem:[#allocation14 + $0x338] sm:$0xff] }
 0x69d   : > { %13361 = vmatprep.subr.bf16.mxu0 %v16291_v58  ;;  %v16435_v58 = vcombine.high %v4575_v23, %v4587_v24  ;;  %v3173_v16 = vld [vmem:[#allocation14 + $0x398] sm:$0xff] }
 0x69f   : > { %13198 = vmatpush1.bf16.msra.mxu1 %v16288_v34  ;;  %v16432_v34 = vcombine.low %v4574_v20, %v4586_v21  ;;  %v3184_v20 = vld [vmem:[#allocation14 + $0x3f0] sm:$0xff] }
 0x6a0   : > { %13362 = vmatpush1.bf16.msra.mxu0 %v16290_v12  ;;  %13199 = vmatprep.subr.bf16.mxu1 %v16313_v35  ;;  %v16434_v12 = vcombine.low %v4575_v23, %v4587_v24  ;;  %v14925_v35 = vcombine.high %v3064_v30, %v3076_v25  ;;  %v3196_v21 = vld [vmem:[#allocation14 + $0x450] sm:$0xff]  ;;  %v3185_v23 = vld [vmem:[#allocation14 + $0x3f8] sm:$0xff] }
 0x6a1   : > { %13363 = vmatprep.subr.bf16.mxu0 %v16315_v36  ;;  %v14927_v36 = vcombine.high %v3065_v32, %v3077_v33  ;;  %v3197_v24 = vld [vmem:[#allocation14 + $0x458] sm:$0xff]  ;;  %v3208_v30 = vld [vmem:[#allocation14 + $0x4b0] sm:$0xff] }
 0x6a2   : > { %v3220_v25 = vld [vmem:[#allocation14 + $0x510] sm:$0xff] }
 0x6a3   : > { %13200 = vmatpush1.bf16.msra.mxu1 %v16312_v45  ;;  %v3101_v45 = vld [vmem:[#allocation14 + $0x158] sm:$0xff] }
 0x6a4   : > { %13364 = vmatpush1.bf16.msra.mxu0 %v16314_v46  ;;  %13201 = vmatprep.subr.bf16.mxu1 %v16337_v47  ;;  %v14926_v46 = vcombine.low %v3065_v32, %v3077_v33  ;;  %v14949_v47 = vcombine.high %v3088_v37, %v3100_v39  ;;  %v14951_v51 = vcombine.high %v3089_v44, %v3101_v45  ;;  %v3209_v32 = vld [vmem:[#allocation14 + $0x4b8] sm:$0xff] }
 0x6a5   : > { %13365 = vmatprep.subr.bf16.mxu0 %v16339_v48  ;;  %v3112_v48 = vld [vmem:[#allocation14 + $0x1b0] sm:$0xff]  ;;  %v3221_v33 = vld [vmem:[#allocation14 + $0x518] sm:$0xff] }
 0x6a7   : > { %13202 = vmatpush1.bf16.msra.mxu1 %v16336_v60  ;;  %v14948_v60 = vcombine.low %v3088_v37, %v3100_v39  ;;  %v3232_v37 = vld [vmem:[#allocation14 + $0x570] sm:$0xff] }
 0x6a8   : > { %13366 = vmatpush1.bf16.msra.mxu0 %v16338_v61  ;;  %13203 = vmatprep.subr.bf16.mxu1 %v16361_v62  ;;  %v14950_v61 = vcombine.low %v3089_v44, %v3101_v45  ;;  %v14973_v62 = vcombine.high %v3112_v48, %v3124_v49  ;;  %v3244_v39 = vld [vmem:[#allocation14 + $0x5d0] sm:$0xff]  ;;  %v3245_v44 = vld [vmem:[#allocation14 + $0x5d8] sm:$0xff]  ;;  %v15068_v45 = vcombine.low %v3208_v30, %v3220_v25 }
 0x6a9   : > { %13367 = vmatprep.subr.bf16.mxu0 %v16363_v0  ;;  %v14975_v0 = vcombine.high %v3113_v55, %v3125_v56 }
 0x6ab   : > { %13204 = vmatpush1.bf16.msra.mxu1 %v16360_v8  ;;  %v14972_v8 = vcombine.low %v3112_v48, %v3124_v49  ;;  %v3256_v49 = vld [vmem:[#allocation14 + $0x630] sm:$0xff] }
 0x6ac   : > { %13368 = vmatpush1.bf16.msra.mxu0 %v16362_v9  ;;  %13205 = vmatprep.subr.bf16.mxu1 %v16385_v10  ;;  %v14974_v9 = vcombine.low %v3113_v55, %v3125_v56  ;;  %v14997_v10 = vcombine.high %v3136_v1, %v3148_v13  ;;  %v3257_v55 = vld [vmem:[#allocation14 + $0x638] sm:$0xff] }
 0x6ad   : > { %13369 = vmatprep.subr.bf16.mxu0 %v16387_v28  ;;  %v14999_v28 = vcombine.high %v3137_v3, %v3149_v4  ;;  %v3269_v56 = vld [vmem:[#allocation14 + $0x698] sm:$0xff] }
 0x6af   : > { %13206 = vmatpush1.bf16.msra.mxu1 %v16384_v17  ;;  %v14996_v17 = vcombine.low %v3136_v1, %v3148_v13  ;;  %v3280_v1 = vld [vmem:[#allocation14 + $0x6f0] sm:$0xff] }
 0x6b0   : > { %13370 = vmatpush1.bf16.msra.mxu0 %v16386_v18  ;;  %13207 = vmatprep.subr.bf16.mxu1 %v16409_v22  ;;  %v14998_v18 = vcombine.low %v3137_v3, %v3149_v4  ;;  %v15021_v22 = vcombine.high %v3160_v11, %v3172_v15  ;;  %v3292_v13 = vld [vmem:[#allocation14 + $0x750] sm:$0xff]  ;;  %v3281_v3 = vld [vmem:[#allocation14 + $0x6f8] sm:$0xff] }
 0x6b1   : > { %13371 = vmatprep.subr.bf16.mxu0 %v16411_v19  ;;  %v15023_v19 = vcombine.high %v3161_v14, %v3173_v16  ;;  %v3293_v4 = vld [vmem:[#allocation14 + $0x758] sm:$0xff] }
 0x6b3   : > { %13208 = vmatpush1.bf16.msra.mxu1 %v16408_v40  ;;  %v15020_v40 = vcombine.low %v3160_v11, %v3172_v15  ;;  %v3304_v11 = vld [vmem:[#allocation14 + $0x7b0] sm:$0xff] }
 0x6b4   : > { %13372 = vmatpush1.bf16.msra.mxu0 %v16410_v26  ;;  %13209 = vmatprep.subr.bf16.mxu1 %v16433_v27  ;;  %v15022_v26 = vcombine.low %v3161_v14, %v3173_v16  ;;  %v15045_v27 = vcombine.high %v3184_v20, %v3196_v21  ;;  %v3316_v15 = vld [vmem:[#allocation14 + $0x810] sm:$0xff]  ;;  %v3305_v14 = vld [vmem:[#allocation14 + $0x7b8] sm:$0xff] }
 0x6b5   : > { %13373 = vmatprep.subr.bf16.mxu0 %v16435_v58  ;;  %v15047_v58 = vcombine.high %v3185_v23, %v3197_v24  ;;  %v3317_v16 = vld [vmem:[#allocation14 + $0x818] sm:$0xff] }
 0x6b7   : > { %13210 = vmatpush1.bf16.msra.mxu1 %v16432_v34  ;;  %v15044_v34 = vcombine.low %v3184_v20, %v3196_v21  ;;  %v3328_v20 = vld [vmem:[#allocation14 + $0x870] sm:$0xff] }
 0x6b8   : > { %13374 = vmatpush1.bf16.msra.mxu0 %v16434_v12  ;;  %13384 = vmatprep.subr.bf16.mxu1 %v14925_v35  ;;  %v15046_v12 = vcombine.low %v3185_v23, %v3197_v24  ;;  %v15069_v35 = vcombine.high %v3208_v30, %v3220_v25  ;;  %v3340_v21 = vld [vmem:[#allocation14 + $0x8d0] sm:$0xff]  ;;  %v3329_v23 = vld [vmem:[#allocation14 + $0x878] sm:$0xff] }
 0x6b9   : > { %13548 = vmatprep.subr.bf16.mxu0 %v14927_v36  ;;  %v15071_v36 = vcombine.high %v3209_v32, %v3221_v33  ;;  %v3341_v24 = vld [vmem:[#allocation14 + $0x8d8] sm:$0xff]  ;;  %v3352_v30 = vld [vmem:[#allocation14 + $0x930] sm:$0xff] }
 0x6ba   : > { %13212 = vmatmul.mubr.bf16.vlgmr.msra.gmra.mrb[20].mxu1 %v17752_v42  ;;  %v3364_v25 = vld [vmem:[#allocation14 + $0x990] sm:$0xff] }
 0x6bb   : > { %13376 = vmatmul.mubr.bf16.vlgmr.msra.gmra.mrb[24].mxu0 %v17752_v42  ;;  %13385 = vmatpush1.bf16.msra.mxu1 %v14924_v41  ;;  %v3233_v41 = vld [vmem:[#allocation14 + $0x578] sm:$0xff] }
 0x6bc   : > { %13416 = vmatprep.mubr.bf16.mxu1 %v17699_v38  ;;  %13549 = vmatpush1.bf16.msra.mxu0 %v14926_v46  ;;  %v15070_v46 = vcombine.low %v3209_v32, %v3221_v33  ;;  %v15095_v48 = vcombine.high %v3233_v41, %v3245_v44  ;;  %v3353_v32 = vld [vmem:[#allocation14 + $0x938] sm:$0xff] }
 0x6bd   : > { %13580 = vmatprep.mubr.bf16.mxu0 %v17699_v38  ;;  %13386 = vmatprep.subr.bf16.mxu1 %v14949_v47  ;;  %v15093_v47 = vcombine.high %v3232_v37, %v3244_v39  ;;  %v3365_v33 = vld [vmem:[#allocation14 + $0x998] sm:$0xff] }
 0x6be   : > { %13550 = vmatprep.subr.bf16.mxu0 %v14951_v51  ;;  %v3268_v51 = vld [vmem:[#allocation14 + $0x690] sm:$0xff] }
 0x6bf   : > { %13387 = vmatpush1.bf16.msra.mxu1 %v14948_v60  ;;  %v15092_v60 = vcombine.low %v3232_v37, %v3244_v39  ;;  %v3376_v37 = vld [vmem:[#allocation14 + $0x9f0] sm:$0xff] }
 0x6c0   : > { %13551 = vmatpush1.bf16.msra.mxu0 %v14950_v61  ;;  %13388 = vmatprep.subr.bf16.mxu1 %v14973_v62  ;;  %v15094_v61 = vcombine.low %v3233_v41, %v3245_v44  ;;  %v15117_v62 = vcombine.high %v3256_v49, %v3268_v51  ;;  %v3388_v39 = vld [vmem:[#allocation14 + $0xa50] sm:$0xff]  ;;  %v3377_v41 = vld [vmem:[#allocation14 + $0x9f8] sm:$0xff] }
 0x6c1   : > { %13552 = vmatprep.subr.bf16.mxu0 %v14975_v0  ;;  %v15119_v0 = vcombine.high %v3257_v55, %v3269_v56  ;;  %v3389_v44 = vld [vmem:[#allocation14 + $0xa58] sm:$0xff] }
 0x6c3   : > { %13389 = vmatpush1.bf16.msra.mxu1 %v14972_v8  ;;  %v15116_v8 = vcombine.low %v3256_v49, %v3268_v51  ;;  %v3400_v49 = vld [vmem:[#allocation14 + $0xab0] sm:$0xff] }
 0x6c4   : > { %13553 = vmatpush1.bf16.msra.mxu0 %v14974_v9  ;;  %13390 = vmatprep.subr.bf16.mxu1 %v14997_v10  ;;  %v15118_v9 = vcombine.low %v3257_v55, %v3269_v56  ;;  %v15141_v10 = vcombine.high %v3280_v1, %v3292_v13  ;;  %v3412_v51 = vld [vmem:[#allocation14 + $0xb10] sm:$0xff]  ;;  %v3401_v55 = vld [vmem:[#allocation14 + $0xab8] sm:$0xff] }
 0x6c5   : > { %13554 = vmatprep.subr.bf16.mxu0 %v14999_v28  ;;  %v15143_v28 = vcombine.high %v3281_v3, %v3293_v4  ;;  %v3413_v56 = vld [vmem:[#allocation14 + $0xb18] sm:$0xff] }
 0x6c7   : > { %13391 = vmatpush1.bf16.msra.mxu1 %v14996_v17  ;;  %v15140_v17 = vcombine.low %v3280_v1, %v3292_v13  ;;  %v3424_v1 = vld [vmem:[#allocation14 + $0xb70] sm:$0xff] }
 0x6c8   : > { %13555 = vmatpush1.bf16.msra.mxu0 %v14998_v18  ;;  %13392 = vmatprep.subr.bf16.mxu1 %v15021_v22  ;;  %v15142_v18 = vcombine.low %v3281_v3, %v3293_v4  ;;  %v15165_v22 = vcombine.high %v3304_v11, %v3316_v15  ;;  %v3436_v13 = vld [vmem:[#allocation14 + $0xbd0] sm:$0xff]  ;;  %v3425_v3 = vld [vmem:[#allocation14 + $0xb78] sm:$0xff] }
 0x6c9   : > { %13556 = vmatprep.subr.bf16.mxu0 %v15023_v19  ;;  %v15167_v19 = vcombine.high %v3305_v14, %v3317_v16  ;;  %v3437_v4 = vld [vmem:[#allocation14 + $0xbd8] sm:$0xff] }
 0x6cb   : > { %13393 = vmatpush1.bf16.msra.mxu1 %v15020_v40  ;;  %v15164_v40 = vcombine.low %v3304_v11, %v3316_v15  ;;  %v3448_v11 = vld [vmem:[#allocation14 + $0xc30] sm:$0xff] }
 0x6cc   : > { %13557 = vmatpush1.bf16.msra.mxu0 %v15022_v26  ;;  %13394 = vmatprep.subr.bf16.mxu1 %v15045_v27  ;;  %v15166_v26 = vcombine.low %v3305_v14, %v3317_v16  ;;  %v15189_v27 = vcombine.high %v3328_v20, %v3340_v21  ;;  %v3460_v15 = vld [vmem:[#allocation14 + $0xc90] sm:$0xff]  ;;  %v3449_v14 = vld [vmem:[#allocation14 + $0xc38] sm:$0xff] }
 0x6cd   : > { %13558 = vmatprep.subr.bf16.mxu0 %v15047_v58  ;;  %v15191_v58 = vcombine.high %v3329_v23, %v3341_v24  ;;  %v3461_v16 = vld [vmem:[#allocation14 + $0xc98] sm:$0xff] }
 0x6cf   : > { %13395 = vmatpush1.bf16.msra.mxu1 %v15044_v34  ;;  %v15188_v34 = vcombine.low %v3328_v20, %v3340_v21  ;;  %v3472_v20 = vld [vmem:[#allocation14 + $0xcf0] sm:$0xff] }
 0x6d0   : > { %13559 = vmatpush1.bf16.msra.mxu0 %v15046_v12  ;;  %13396 = vmatprep.subr.bf16.mxu1 %v15069_v35  ;;  %v15190_v12 = vcombine.low %v3329_v23, %v3341_v24  ;;  %v15213_v35 = vcombine.high %v3352_v30, %v3364_v25  ;;  %v3484_v21 = vld [vmem:[#allocation14 + $0xd50] sm:$0xff]  ;;  %v15308_v23 = vcombine.low %v3448_v11, %v3460_v15  ;;  %v3473_v24 = vld [vmem:[#allocation14 + $0xcf8] sm:$0xff] }
 0x6d1   : > { %13560 = vmatprep.subr.bf16.mxu0 %v15071_v36  ;;  %v15215_v36 = vcombine.high %v3353_v32, %v3365_v33 }
 0x6d3   : > { %13397 = vmatpush1.bf16.msra.mxu1 %v15068_v45  ;;  %v15212_v45 = vcombine.low %v3352_v30, %v3364_v25  ;;  %v3508_v30 = vld [vmem:[#allocation14 + $0xe10] sm:$0xff] }
 0x6d4   : > { %13561 = vmatpush1.bf16.msra.mxu0 %v15070_v46  ;;  %13398 = vmatprep.subr.bf16.mxu1 %v15093_v47  ;;  %v15214_v46 = vcombine.low %v3353_v32, %v3365_v33  ;;  %v15237_v47 = vcombine.high %v3376_v37, %v3388_v39  ;;  %v3497_v32 = vld [vmem:[#allocation14 + $0xdb8] sm:$0xff] }
 0x6d5   : > { %13562 = vmatprep.subr.bf16.mxu0 %v15095_v48  ;;  %v15239_v48 = vcombine.high %v3377_v41, %v3389_v44  ;;  %v3509_v33 = vld [vmem:[#allocation14 + $0xe18] sm:$0xff] }
 0x6d7   : > { %13399 = vmatpush1.bf16.msra.mxu1 %v15092_v60  ;;  %v15236_v60 = vcombine.low %v3376_v37, %v3388_v39  ;;  %v3520_v37 = vld [vmem:[#allocation14 + $0xe70] sm:$0xff] }
 0x6d8   : > { %13563 = vmatpush1.bf16.msra.mxu0 %v15094_v61  ;;  %13400 = vmatprep.subr.bf16.mxu1 %v15117_v62  ;;  %v15238_v61 = vcombine.low %v3377_v41, %v3389_v44  ;;  %v15261_v62 = vcombine.high %v3400_v49, %v3412_v51  ;;  %v3532_v39 = vld [vmem:[#allocation14 + $0xed0] sm:$0xff]  ;;  %v3521_v41 = vld [vmem:[#allocation14 + $0xe78] sm:$0xff] }
 0x6d9   : > { %13564 = vmatprep.subr.bf16.mxu0 %v15119_v0  ;;  %v15263_v0 = vcombine.high %v3401_v55, %v3413_v56  ;;  %v3533_v44 = vld [vmem:[#allocation14 + $0xed8] sm:$0xff] }
 0x6db   : > { %13401 = vmatpush1.bf16.msra.mxu1 %v15116_v8  ;;  %v15260_v8 = vcombine.low %v3400_v49, %v3412_v51  ;;  %v3544_v49 = vld [vmem:[#allocation14 + $0xf30] sm:$0xff] }
 0x6dc   : > { %13565 = vmatpush1.bf16.msra.mxu0 %v15118_v9  ;;  %13402 = vmatprep.subr.bf16.mxu1 %v15141_v10  ;;  %v15262_v9 = vcombine.low %v3401_v55, %v3413_v56  ;;  %v15285_v10 = vcombine.high %v3424_v1, %v3436_v13  ;;  %v3556_v51 = vld [vmem:[#allocation14 + $0xf90] sm:$0xff]  ;;  %v3545_v55 = vld [vmem:[#allocation14 + $0xf38] sm:$0xff] }
 0x6dd   : > { %13566 = vmatprep.subr.bf16.mxu0 %v15143_v28  ;;  %v15287_v28 = vcombine.high %v3425_v3, %v3437_v4  ;;  %v3557_v56 = vld [vmem:[#allocation14 + $0xf98] sm:$0xff] }
 0x6df   : > { %13403 = vmatpush1.bf16.msra.mxu1 %v15140_v17  ;;  %v15284_v17 = vcombine.low %v3424_v1, %v3436_v13  ;;  %v3568_v1 = vld [vmem:[#allocation14 + $0xff0] sm:$0xff] }
 0x6e0   : > { %13567 = vmatpush1.bf16.msra.mxu0 %v15142_v18  ;;  %13404 = vmatprep.subr.bf16.mxu1 %v15165_v22  ;;  %v15286_v18 = vcombine.low %v3425_v3, %v3437_v4  ;;  %v15309_v22 = vcombine.high %v3448_v11, %v3460_v15  ;;  %v3580_v13 = vld [vmem:[#allocation14 + $0x1050] sm:$0xff]  ;;  %v3569_v3 = vld [vmem:[#allocation14 + $0xff8] sm:$0xff] }
 0x6e1   : > { %13568 = vmatprep.subr.bf16.mxu0 %v15167_v19  ;;  %v15311_v19 = vcombine.high %v3449_v14, %v3461_v16  ;;  %v3581_v4 = vld [vmem:[#allocation14 + $0x1058] sm:$0xff]  ;;  %v3592_v11 = vld [vmem:[#allocation14 + $0x10b0] sm:$0xff] }
 0x6e2   : > { %v3604_v15 = vld [vmem:[#allocation14 + $0x1110] sm:$0xff] }
 0x6e3   : > { %13405 = vmatpush1.bf16.msra.mxu1 %v15164_v40  ;;  %v3485_v40 = vld [vmem:[#allocation14 + $0xd58] sm:$0xff] }
 0x6e4   : > { %13569 = vmatpush1.bf16.msra.mxu0 %v15166_v26  ;;  %13406 = vmatprep.subr.bf16.mxu1 %v15189_v27  ;;  %v15310_v26 = vcombine.low %v3449_v14, %v3461_v16  ;;  %v15333_v27 = vcombine.high %v3472_v20, %v3484_v21  ;;  %v15335_v25 = vcombine.high %v3473_v24, %v3485_v40  ;;  %v3593_v14 = vld [vmem:[#allocation14 + $0x10b8] sm:$0xff] }
 0x6e5   : > { %13570 = vmatprep.subr.bf16.mxu0 %v15191_v58  ;;  %v3496_v58 = vld [vmem:[#allocation14 + $0xdb0] sm:$0xff]  ;;  %v3605_v16 = vld [vmem:[#allocation14 + $0x1118] sm:$0xff] }
 0x6e7   : > { %13407 = vmatpush1.bf16.msra.mxu1 %v15188_v34  ;;  %v15332_v34 = vcombine.low %v3472_v20, %v3484_v21  ;;  %v3616_v20 = vld [vmem:[#allocation14 + $0x1170] sm:$0xff] }
 0x6e8   : > { %13571 = vmatpush1.bf16.msra.mxu0 %v15190_v12  ;;  %13408 = vmatprep.subr.bf16.mxu1 %v15213_v35  ;;  %v15334_v12 = vcombine.low %v3473_v24, %v3485_v40  ;;  %v15357_v35 = vcombine.high %v3496_v58, %v3508_v30  ;;  %v3628_v21 = vld [vmem:[#allocation14 + $0x11d0] sm:$0xff]  ;;  %v3629_v24 = vld [vmem:[#allocation14 + $0x11d8] sm:$0xff]  ;;  %v15452_v40 = vcombine.low %v3592_v11, %v3604_v15 }
 0x6e9   : > { %13572 = vmatprep.subr.bf16.mxu0 %v15215_v36  ;;  %v15359_v36 = vcombine.high %v3497_v32, %v3509_v33 }
 0x6eb   : > { %13409 = vmatpush1.bf16.msra.mxu1 %v15212_v45  ;;  %v15356_v45 = vcombine.low %v3496_v58, %v3508_v30  ;;  %v3640_v30 = vld [vmem:[#allocation14 + $0x1230] sm:$0xff] }
 0x6ec   : > { %13573 = vmatpush1.bf16.msra.mxu0 %v15214_v46  ;;  %13410 = vmatprep.subr.bf16.mxu1 %v15237_v47  ;;  %v15358_v46 = vcombine.low %v3497_v32, %v3509_v33  ;;  %v15381_v47 = vcombine.high %v3520_v37, %v3532_v39  ;;  %v3641_v32 = vld [vmem:[#allocation14 + $0x1238] sm:$0xff] }
 0x6ed   : > { %13574 = vmatprep.subr.bf16.mxu0 %v15239_v48  ;;  %v15383_v48 = vcombine.high %v3521_v41, %v3533_v44  ;;  %v3653_v33 = vld [vmem:[#allocation14 + $0x1298] sm:$0xff] }
 0x6ef   : > { %13411 = vmatpush1.bf16.msra.mxu1 %v15236_v60  ;;  %v15380_v60 = vcombine.low %v3520_v37, %v3532_v39  ;;  %v3664_v37 = vld [vmem:[#allocation14 + $0x12f0] sm:$0xff] }
 0x6f0   : > { %13575 = vmatpush1.bf16.msra.mxu0 %v15238_v61  ;;  %13412 = vmatprep.subr.bf16.mxu1 %v15261_v62  ;;  %v15382_v61 = vcombine.low %v3521_v41, %v3533_v44  ;;  %v15405_v62 = vcombine.high %v3544_v49, %v3556_v51  ;;  %v3676_v39 = vld [vmem:[#allocation14 + $0x1350] sm:$0xff]  ;;  %v3665_v41 = vld [vmem:[#allocation14 + $0x12f8] sm:$0xff] }
 0x6f1   : > { %13576 = vmatprep.subr.bf16.mxu0 %v15263_v0  ;;  %v15407_v0 = vcombine.high %v3545_v55, %v3557_v56  ;;  %v3677_v44 = vld [vmem:[#allocation14 + $0x1358] sm:$0xff] }
 0x6f3   : > { %13413 = vmatpush1.bf16.msra.mxu1 %v15260_v8  ;;  %v15404_v8 = vcombine.low %v3544_v49, %v3556_v51  ;;  %v3688_v49 = vld [vmem:[#allocation14 + $0x13b0] sm:$0xff] }
 0x6f4   : > { %13577 = vmatpush1.bf16.msra.mxu0 %v15262_v9  ;;  %13414 = vmatprep.subr.bf16.mxu1 %v15285_v10  ;;  %v15406_v9 = vcombine.low %v3545_v55, %v3557_v56  ;;  %v15429_v10 = vcombine.high %v3568_v1, %v3580_v13  ;;  %v3700_v51 = vld [vmem:[#allocation14 + $0x1410] sm:$0xff]  ;;  %v3689_v55 = vld [vmem:[#allocation14 + $0x13b8] sm:$0xff] }
 0x6f5   : > { %13578 = vmatprep.subr.bf16.mxu0 %v15287_v28  ;;  %v15431_v28 = vcombine.high %v3569_v3, %v3581_v4  ;;  %v3701_v56 = vld [vmem:[#allocation14 + $0x1418] sm:$0xff] }
 0x6f7   : > { %13415 = vmatpush1.bf16.msra.mxu1 %v15284_v17  ;;  %v15428_v17 = vcombine.low %v3568_v1, %v3580_v13  ;;  %v3712_v1 = vld [vmem:[#allocation14 + $0x1470] sm:$0xff] }
 0x6f8   : > { %13579 = vmatpush1.bf16.msra.mxu0 %v15286_v18  ;;  %13425 = vmatprep.subr.bf16.mxu1 %v15309_v22  ;;  %v15430_v18 = vcombine.low %v3569_v3, %v3581_v4  ;;  %v15453_v22 = vcombine.high %v3592_v11, %v3604_v15  ;;  %v3724_v13 = vld [vmem:[#allocation14 + $0x14d0] sm:$0xff]  ;;  %v3713_v3 = vld [vmem:[#allocation14 + $0x1478] sm:$0xff] }
 0x6f9   : > { %13589 = vmatprep.subr.bf16.mxu0 %v15311_v19  ;;  %v15455_v19 = vcombine.high %v3593_v14, %v3605_v16  ;;  %v3725_v4 = vld [vmem:[#allocation14 + $0x14d8] sm:$0xff]  ;;  %v3736_v11 = vld [vmem:[#allocation14 + $0x1530] sm:$0xff] }
 0x6fa   : > { %13417 = vmatmul.mubr.bf16.vlgmr.msra.gmra.mrb[24].mxu1 %v17701_v43  ;;  %v3748_v15 = vld [vmem:[#allocation14 + $0x1590] sm:$0xff] }
 0x6fb   : > { %13581 = vmatmul.mubr.bf16.vlgmr.msra.gmra.mrb[28].mxu0 %v17701_v43  ;;  %13426 = vmatpush1.bf16.msra.mxu1 %v15308_v23  ;;  %v3617_v23 = vld [vmem:[#allocation14 + $0x1178] sm:$0xff] }
 0x6fc   : > { %13457 = vmatprep.mubr.bf16.mxu1 %v17705_v50  ;;  %13590 = vmatpush1.bf16.msra.mxu0 %v15310_v26  ;;  %v15454_v26 = vcombine.low %v3593_v14, %v3605_v16  ;;  %v15479_v58 = vcombine.high %v3617_v23, %v3629_v24  ;;  %v3737_v14 = vld [vmem:[#allocation14 + $0x1538] sm:$0xff] }
 0x6fd   : > { %13621 = vmatprep.mubr.bf16.mxu0 %v17705_v50  ;;  %13427 = vmatprep.subr.bf16.mxu1 %v15333_v27  ;;  %v15477_v27 = vcombine.high %v3616_v20, %v3628_v21  ;;  %v3749_v16 = vld [vmem:[#allocation14 + $0x1598] sm:$0xff] }
 0x6fe   : > { %13591 = vmatprep.subr.bf16.mxu0 %v15335_v25  ;;  %v3652_v25 = vld [vmem:[#allocation14 + $0x1290] sm:$0xff] }
 0x6ff   : > { %13428 = vmatpush1.bf16.msra.mxu1 %v15332_v34  ;;  %v15476_v34 = vcombine.low %v3616_v20, %v3628_v21  ;;  %v3760_v20 = vld [vmem:[#allocation14 + $0x15f0] sm:$0xff] }
 0x700   : > { %13592 = vmatpush1.bf16.msra.mxu0 %v15334_v12  ;;  %13429 = vmatprep.subr.bf16.mxu1 %v15357_v35  ;;  %v15478_v12 = vcombine.low %v3617_v23, %v3629_v24  ;;  %v15501_v35 = vcombine.high %v3640_v30, %v3652_v25  ;;  %v3772_v21 = vld [vmem:[#allocation14 + $0x1650] sm:$0xff]  ;;  %v3761_v23 = vld [vmem:[#allocation14 + $0x15f8] sm:$0xff] }
 0x701   : > { %13593 = vmatprep.subr.bf16.mxu0 %v15359_v36  ;;  %v15503_v36 = vcombine.high %v3641_v32, %v3653_v33  ;;  %v3773_v24 = vld [vmem:[#allocation14 + $0x1658] sm:$0xff] }
 0x703   : > { %13430 = vmatpush1.bf16.msra.mxu1 %v15356_v45  ;;  %v15500_v45 = vcombine.low %v3640_v30, %v3652_v25  ;;  %v3784_v30 = vld [vmem:[#allocation14 + $0x16b0] sm:$0xff] }
 0x704   : > { %13594 = vmatpush1.bf16.msra.mxu0 %v15358_v46  ;;  %13431 = vmatprep.subr.bf16.mxu1 %v15381_v47  ;;  %v15502_v46 = vcombine.low %v3641_v32, %v3653_v33  ;;  %v15525_v47 = vcombine.high %v3664_v37, %v3676_v39  ;;  %v3796_v25 = vld [vmem:[#allocation14 + $0x1710] sm:$0xff]  ;;  %v3785_v32 = vld [vmem:[#allocation14 + $0x16b8] sm:$0xff] }
 0x705   : > { %13595 = vmatprep.subr.bf16.mxu0 %v15383_v48  ;;  %v15527_v48 = vcombine.high %v3665_v41, %v3677_v44  ;;  %v3797_v33 = vld [vmem:[#allocation14 + $0x1718] sm:$0xff] }
 0x707   : > { %13432 = vmatpush1.bf16.msra.mxu1 %v15380_v60  ;;  %v15524_v60 = vcombine.low %v3664_v37, %v3676_v39  ;;  %v3808_v37 = vld [vmem:[#allocation14 + $0x1770] sm:$0xff] }
 0x708   : > { %13596 = vmatpush1.bf16.msra.mxu0 %v15382_v61  ;;  %13433 = vmatprep.subr.bf16.mxu1 %v15405_v62  ;;  %v15526_v61 = vcombine.low %v3665_v41, %v3677_v44  ;;  %v15549_v62 = vcombine.high %v3688_v49, %v3700_v51  ;;  %v3820_v39 = vld [vmem:[#allocation14 + $0x17d0] sm:$0xff]  ;;  %v3809_v41 = vld [vmem:[#allocation14 + $0x1778] sm:$0xff] }
 0x709   : > { %13597 = vmatprep.subr.bf16.mxu0 %v15407_v0  ;;  %v15551_v0 = vcombine.high %v3689_v55, %v3701_v56  ;;  %v3821_v44 = vld [vmem:[#allocation14 + $0x17d8] sm:$0xff] }
 0x70b   : > { %13434 = vmatpush1.bf16.msra.mxu1 %v15404_v8  ;;  %v15548_v8 = vcombine.low %v3688_v49, %v3700_v51  ;;  %v3832_v49 = vld [vmem:[#allocation14 + $0x1830] sm:$0xff] }
 0x70c   : > { %13598 = vmatpush1.bf16.msra.mxu0 %v15406_v9  ;;  %13435 = vmatprep.subr.bf16.mxu1 %v15429_v10  ;;  %v15550_v9 = vcombine.low %v3689_v55, %v3701_v56  ;;  %v15573_v10 = vcombine.high %v3712_v1, %v3724_v13  ;;  %v3844_v51 = vld [vmem:[#allocation14 + $0x1890] sm:$0xff]  ;;  %v3833_v55 = vld [vmem:[#allocation14 + $0x1838] sm:$0xff] }
 0x70d   : > { %13599 = vmatprep.subr.bf16.mxu0 %v15431_v28  ;;  %v15575_v28 = vcombine.high %v3713_v3, %v3725_v4  ;;  %v3845_v56 = vld [vmem:[#allocation14 + $0x1898] sm:$0xff] }
 0x70f   : > { %13436 = vmatpush1.bf16.msra.mxu1 %v15428_v17  ;;  %v15572_v17 = vcombine.low %v3712_v1, %v3724_v13  ;;  %v3856_v1 = vld [vmem:[#allocation14 + $0x18f0] sm:$0xff] }
 0x710   : > { %13600 = vmatpush1.bf16.msra.mxu0 %v15430_v18  ;;  %13437 = vmatprep.subr.bf16.mxu1 %v15453_v22  ;;  %v15574_v18 = vcombine.low %v3713_v3, %v3725_v4  ;;  %v15597_v22 = vcombine.high %v3736_v11, %v3748_v15  ;;  %v3868_v13 = vld [vmem:[#allocation14 + $0x1950] sm:$0xff]  ;;  %v15692_v3 = vcombine.low %v3832_v49, %v3844_v51  ;;  %v3857_v4 = vld [vmem:[#allocation14 + $0x18f8] sm:$0xff] }
 0x711   : > { %13601 = vmatprep.subr.bf16.mxu0 %v15455_v19  ;;  %v15599_v19 = vcombine.high %v3737_v14, %v3749_v16 }
 0x713   : > { %13438 = vmatpush1.bf16.msra.mxu1 %v15452_v40  ;;  %v15596_v40 = vcombine.low %v3736_v11, %v3748_v15  ;;  %v3892_v11 = vld [vmem:[#allocation14 + $0x1a10] sm:$0xff] }
 0x714   : > { %13602 = vmatpush1.bf16.msra.mxu0 %v15454_v26  ;;  %13439 = vmatprep.subr.bf16.mxu1 %v15477_v27  ;;  %v15598_v26 = vcombine.low %v3737_v14, %v3749_v16  ;;  %v15621_v27 = vcombine.high %v3760_v20, %v3772_v21  ;;  %v3881_v14 = vld [vmem:[#allocation14 + $0x19b8] sm:$0xff] }
 0x715   : > { %13603 = vmatprep.subr.bf16.mxu0 %v15479_v58  ;;  %v15623_v58 = vcombine.high %v3761_v23, %v3773_v24  ;;  %v3893_v16 = vld [vmem:[#allocation14 + $0x1a18] sm:$0xff] }
 0x717   : > { %13440 = vmatpush1.bf16.msra.mxu1 %v15476_v34  ;;  %v15620_v34 = vcombine.low %v3760_v20, %v3772_v21  ;;  %v3904_v20 = vld [vmem:[#allocation14 + $0x1a70] sm:$0xff] }
 0x718   : > { %13604 = vmatpush1.bf16.msra.mxu0 %v15478_v12  ;;  %13441 = vmatprep.subr.bf16.mxu1 %v15501_v35  ;;  %v15622_v12 = vcombine.low %v3761_v23, %v3773_v24  ;;  %v15645_v35 = vcombine.high %v3784_v30, %v3796_v25  ;;  %v3916_v21 = vld [vmem:[#allocation14 + $0x1ad0] sm:$0xff]  ;;  %v3905_v23 = vld [vmem:[#allocation14 + $0x1a78] sm:$0xff] }
 0x719   : > { %13605 = vmatprep.subr.bf16.mxu0 %v15503_v36  ;;  %v15647_v36 = vcombine.high %v3785_v32, %v3797_v33  ;;  %v3917_v24 = vld [vmem:[#allocation14 + $0x1ad8] sm:$0xff] }
 0x71b   : > { %13442 = vmatpush1.bf16.msra.mxu1 %v15500_v45  ;;  %v15644_v45 = vcombine.low %v3784_v30, %v3796_v25  ;;  %v3928_v30 = vld [vmem:[#allocation14 + $0x1b30] sm:$0xff] }
 0x71c   : > { %13606 = vmatpush1.bf16.msra.mxu0 %v15502_v46  ;;  %13443 = vmatprep.subr.bf16.mxu1 %v15525_v47  ;;  %v15646_v46 = vcombine.low %v3785_v32, %v3797_v33  ;;  %v15669_v47 = vcombine.high %v3808_v37, %v3820_v39  ;;  %v3940_v25 = vld [vmem:[#allocation14 + $0x1b90] sm:$0xff]  ;;  %v3929_v32 = vld [vmem:[#allocation14 + $0x1b38] sm:$0xff] }
 0x71d   : > { %13607 = vmatprep.subr.bf16.mxu0 %v15527_v48  ;;  %v15671_v48 = vcombine.high %v3809_v41, %v3821_v44  ;;  %v3941_v33 = vld [vmem:[#allocation14 + $0x1b98] sm:$0xff] }
 0x71f   : > { %13444 = vmatpush1.bf16.msra.mxu1 %v15524_v60  ;;  %v15668_v60 = vcombine.low %v3808_v37, %v3820_v39  ;;  %v3952_v37 = vld [vmem:[#allocation14 + $0x1bf0] sm:$0xff] }
 0x720   : > { %13608 = vmatpush1.bf16.msra.mxu0 %v15526_v61  ;;  %13445 = vmatprep.subr.bf16.mxu1 %v15549_v62  ;;  %v15670_v61 = vcombine.low %v3809_v41, %v3821_v44  ;;  %v15693_v62 = vcombine.high %v3832_v49, %v3844_v51  ;;  %v3964_v39 = vld [vmem:[#allocation14 + $0x1c50] sm:$0xff]  ;;  %v3953_v41 = vld [vmem:[#allocation14 + $0x1bf8] sm:$0xff] }
 0x721   : > { %13609 = vmatprep.subr.bf16.mxu0 %v15551_v0  ;;  %v15695_v0 = vcombine.high %v3833_v55, %v3845_v56  ;;  %v3965_v44 = vld [vmem:[#allocation14 + $0x1c58] sm:$0xff]  ;;  %v3976_v49 = vld [vmem:[#allocation14 + $0x1cb0] sm:$0xff] }
 0x722   : > { %v3988_v51 = vld [vmem:[#allocation14 + $0x1d10] sm:$0xff] }
 0x723   : > { %13446 = vmatpush1.bf16.msra.mxu1 %v15548_v8  ;;  %v3869_v8 = vld [vmem:[#allocation14 + $0x1958] sm:$0xff] }
 0x724   : > { %13610 = vmatpush1.bf16.msra.mxu0 %v15550_v9  ;;  %13447 = vmatprep.subr.bf16.mxu1 %v15573_v10  ;;  %v15694_v9 = vcombine.low %v3833_v55, %v3845_v56  ;;  %v15717_v10 = vcombine.high %v3856_v1, %v3868_v13  ;;  %v15719_v15 = vcombine.high %v3857_v4, %v3869_v8  ;;  %v3977_v55 = vld [vmem:[#allocation14 + $0x1cb8] sm:$0xff] }
 0x725   : > { %13611 = vmatprep.subr.bf16.mxu0 %v15575_v28  ;;  %v3880_v28 = vld [vmem:[#allocation14 + $0x19b0] sm:$0xff]  ;;  %v3989_v56 = vld [vmem:[#allocation14 + $0x1d18] sm:$0xff] }
 0x727   : > { %13448 = vmatpush1.bf16.msra.mxu1 %v15572_v17  ;;  %v15716_v17 = vcombine.low %v3856_v1, %v3868_v13  ;;  %v4000_v1 = vld [vmem:[#allocation14 + $0x1d70] sm:$0xff] }
 0x728   : > { %13612 = vmatpush1.bf16.msra.mxu0 %v15574_v18  ;;  %13449 = vmatprep.subr.bf16.mxu1 %v15597_v22  ;;  %v15718_v18 = vcombine.low %v3857_v4, %v3869_v8  ;;  %v15741_v22 = vcombine.high %v3880_v28, %v3892_v11  ;;  %v4012_v13 = vld [vmem:[#allocation14 + $0x1dd0] sm:$0xff]  ;;  %v4013_v4 = vld [vmem:[#allocation14 + $0x1dd8] sm:$0xff]  ;;  %v15836_v8 = vcombine.low %v3976_v49, %v3988_v51 }
 0x729   : > { %13613 = vmatprep.subr.bf16.mxu0 %v15599_v19  ;;  %v15743_v19 = vcombine.high %v3881_v14, %v3893_v16 }
 0x72b   : > { %13450 = vmatpush1.bf16.msra.mxu1 %v15596_v40  ;;  %v15740_v40 = vcombine.low %v3880_v28, %v3892_v11  ;;  %v4024_v11 = vld [vmem:[#allocation14 + $0x1e30] sm:$0xff] }
 0x72c   : > { %13614 = vmatpush1.bf16.msra.mxu0 %v15598_v26  ;;  %13451 = vmatprep.subr.bf16.mxu1 %v15621_v27  ;;  %v15742_v26 = vcombine.low %v3881_v14, %v3893_v16  ;;  %v15765_v27 = vcombine.high %v3904_v20, %v3916_v21  ;;  %v4025_v14 = vld [vmem:[#allocation14 + $0x1e38] sm:$0xff] }
 0x72d   : > { %13615 = vmatprep.subr.bf16.mxu0 %v15623_v58  ;;  %v15767_v58 = vcombine.high %v3905_v23, %v3917_v24  ;;  %v4037_v16 = vld [vmem:[#allocation14 + $0x1e98] sm:$0xff] }
 0x72f   : > { %13452 = vmatpush1.bf16.msra.mxu1 %v15620_v34  ;;  %v15764_v34 = vcombine.low %v3904_v20, %v3916_v21  ;;  %v4048_v20 = vld [vmem:[#allocation14 + $0x1ef0] sm:$0xff] }
 0x730   : > { %13616 = vmatpush1.bf16.msra.mxu0 %v15622_v12  ;;  %13453 = vmatprep.subr.bf16.mxu1 %v15645_v35  ;;  %v15766_v12 = vcombine.low %v3905_v23, %v3917_v24  ;;  %v15789_v35 = vcombine.high %v3928_v30, %v3940_v25  ;;  %v4060_v21 = vld [vmem:[#allocation14 + $0x1f50] sm:$0xff]  ;;  %v4049_v23 = vld [vmem:[#allocation14 + $0x1ef8] sm:$0xff] }
 0x731   : > { %13617 = vmatprep.subr.bf16.mxu0 %v15647_v36  ;;  %v15791_v36 = vcombine.high %v3929_v32, %v3941_v33  ;;  %v4061_v24 = vld [vmem:[#allocation14 + $0x1f58] sm:$0xff] }
 0x733   : > { %13454 = vmatpush1.bf16.msra.mxu1 %v15644_v45  ;;  %v15788_v45 = vcombine.low %v3928_v30, %v3940_v25  ;;  %v4072_v30 = vld [vmem:[#allocation14 + $0x1fb0] sm:$0xff] }
 0x734   : > { %13618 = vmatpush1.bf16.msra.mxu0 %v15646_v46  ;;  %13455 = vmatprep.subr.bf16.mxu1 %v15669_v47  ;;  %v15790_v46 = vcombine.low %v3929_v32, %v3941_v33  ;;  %v15813_v47 = vcombine.high %v3952_v37, %v3964_v39  ;;  %v4084_v25 = vld [vmem:[#allocation14 + $0x2010] sm:$0xff]  ;;  %v4073_v32 = vld [vmem:[#allocation14 + $0x1fb8] sm:$0xff] }
 0x735   : > { %13619 = vmatprep.subr.bf16.mxu0 %v15671_v48  ;;  %v15815_v48 = vcombine.high %v3953_v41, %v3965_v44  ;;  %v4085_v33 = vld [vmem:[#allocation14 + $0x2018] sm:$0xff] }
 0x737   : > { %13456 = vmatpush1.bf16.msra.mxu1 %v15668_v60  ;;  %v15812_v60 = vcombine.low %v3952_v37, %v3964_v39  ;;  %v4096_v37 = vld [vmem:[#allocation14 + $0x2070] sm:$0xff] }
 0x738   : > { %13620 = vmatpush1.bf16.msra.mxu0 %v15670_v61  ;;  %13466 = vmatprep.subr.bf16.mxu1 %v15693_v62  ;;  %v15814_v61 = vcombine.low %v3953_v41, %v3965_v44  ;;  %v15837_v62 = vcombine.high %v3976_v49, %v3988_v51  ;;  %v4108_v39 = vld [vmem:[#allocation14 + $0x20d0] sm:$0xff]  ;;  %v4097_v41 = vld [vmem:[#allocation14 + $0x2078] sm:$0xff] }
 0x739   : > { %13630 = vmatprep.subr.bf16.mxu0 %v15695_v0  ;;  %v15839_v0 = vcombine.high %v3977_v55, %v3989_v56  ;;  %v4109_v44 = vld [vmem:[#allocation14 + $0x20d8] sm:$0xff]  ;;  %v4120_v49 = vld [vmem:[#allocation14 + $0x2130] sm:$0xff] }
 0x73a   : > { %13458 = vmatmul.mubr.bf16.vlgmr.msra.gmra.mrb[24].mxu1 %v17714_v7  ;;  %v4132_v51 = vld [vmem:[#allocation14 + $0x2190] sm:$0xff] }
 0x73b   : > { %13622 = vmatmul.mubr.bf16.vlgmr.msra.gmra.mrb[28].mxu0 %v17714_v7  ;;  %13467 = vmatpush1.bf16.msra.mxu1 %v15692_v3  ;;  %v4001_v3 = vld [vmem:[#allocation14 + $0x1d78] sm:$0xff] }
 0x73c   : > { %13498 = vmatprep.mubr.bf16.mxu1 %v17735_v57  ;;  %13631 = vmatpush1.bf16.msra.mxu0 %v15694_v9  ;;  %v15838_v9 = vcombine.low %v3977_v55, %v3989_v56  ;;  %v15863_v28 = vcombine.high %v4001_v3, %v4013_v4  ;;  %v4121_v55 = vld [vmem:[#allocation14 + $0x2138] sm:$0xff] }
 0x73d   : > { %13662 = vmatprep.mubr.bf16.mxu0 %v17735_v57  ;;  %13468 = vmatprep.subr.bf16.mxu1 %v15717_v10  ;;  %v15861_v10 = vcombine.high %v4000_v1, %v4012_v13  ;;  %v4133_v56 = vld [vmem:[#allocation14 + $0x2198] sm:$0xff] }
 0x73e   : > { %13632 = vmatprep.subr.bf16.mxu0 %v15719_v15  ;;  %v4036_v15 = vld [vmem:[#allocation14 + $0x1e90] sm:$0xff] }
 0x73f   : > { %13469 = vmatpush1.bf16.msra.mxu1 %v15716_v17  ;;  %v15860_v17 = vcombine.low %v4000_v1, %v4012_v13  ;;  %v4144_v1 = vld [vmem:[#allocation14 + $0x21f0] sm:$0xff] }
 0x740   : > { %13633 = vmatpush1.bf16.msra.mxu0 %v15718_v18  ;;  %13470 = vmatprep.subr.bf16.mxu1 %v15741_v22  ;;  %v15862_v18 = vcombine.low %v4001_v3, %v4013_v4  ;;  %v15885_v22 = vcombine.high %v4024_v11, %v4036_v15  ;;  %v4156_v13 = vld [vmem:[#allocation14 + $0x2250] sm:$0xff]  ;;  %v4145_v3 = vld [vmem:[#allocation14 + $0x21f8] sm:$0xff] }
 0x741   : > { %13634 = vmatprep.subr.bf16.mxu0 %v15743_v19  ;;  %v15887_v19 = vcombine.high %v4025_v14, %v4037_v16  ;;  %v4157_v4 = vld [vmem:[#allocation14 + $0x2258] sm:$0xff] }
 0x743   : > { %13471 = vmatpush1.bf16.msra.mxu1 %v15740_v40  ;;  %v15884_v40 = vcombine.low %v4024_v11, %v4036_v15  ;;  %v4168_v11 = vld [vmem:[#allocation14 + $0x22b0] sm:$0xff] }
 0x744   : > { %13635 = vmatpush1.bf16.msra.mxu0 %v15742_v26  ;;  %13472 = vmatprep.subr.bf16.mxu1 %v15765_v27  ;;  %v15886_v26 = vcombine.low %v4025_v14, %v4037_v16  ;;  %v15909_v27 = vcombine.high %v4048_v20, %v4060_v21  ;;  %v4180_v15 = vld [vmem:[#allocation14 + $0x2310] sm:$0xff]  ;;  %v4169_v14 = vld [vmem:[#allocation14 + $0x22b8] sm:$0xff] }
 0x745   : > { %13636 = vmatprep.subr.bf16.mxu0 %v15767_v58  ;;  %v15911_v58 = vcombine.high %v4049_v23, %v4061_v24  ;;  %v4181_v16 = vld [vmem:[#allocation14 + $0x2318] sm:$0xff] }
 0x747   : > { %13473 = vmatpush1.bf16.msra.mxu1 %v15764_v34  ;;  %v15908_v34 = vcombine.low %v4048_v20, %v4060_v21  ;;  %v4192_v20 = vld [vmem:[#allocation14 + $0x2370] sm:$0xff] }
 0x748   : > { %13637 = vmatpush1.bf16.msra.mxu0 %v15766_v12  ;;  %13474 = vmatprep.subr.bf16.mxu1 %v15789_v35  ;;  %v15910_v12 = vcombine.low %v4049_v23, %v4061_v24  ;;  %v15933_v35 = vcombine.high %v4072_v30, %v4084_v25  ;;  %v4204_v21 = vld [vmem:[#allocation14 + $0x23d0] sm:$0xff]  ;;  %v4193_v23 = vld [vmem:[#allocation14 + $0x2378] sm:$0xff] }
 0x749   : > { %13638 = vmatprep.subr.bf16.mxu0 %v15791_v36  ;;  %v15935_v36 = vcombine.high %v4073_v32, %v4085_v33  ;;  %v4205_v24 = vld [vmem:[#allocation14 + $0x23d8] sm:$0xff] }
 0x74b   : > { %13475 = vmatpush1.bf16.msra.mxu1 %v15788_v45  ;;  %v15932_v45 = vcombine.low %v4072_v30, %v4084_v25  ;;  %v4216_v30 = vld [vmem:[#allocation14 + $0x2430] sm:$0xff] }
 0x74c   : > { %13639 = vmatpush1.bf16.msra.mxu0 %v15790_v46  ;;  %13476 = vmatprep.subr.bf16.mxu1 %v15813_v47  ;;  %v15934_v46 = vcombine.low %v4073_v32, %v4085_v33  ;;  %v15957_v47 = vcombine.high %v4096_v37, %v4108_v39  ;;  %v4228_v25 = vld [vmem:[#allocation14 + $0x2490] sm:$0xff]  ;;  %v4217_v32 = vld [vmem:[#allocation14 + $0x2438] sm:$0xff] }
 0x74d   : > { %13640 = vmatprep.subr.bf16.mxu0 %v15815_v48  ;;  %v15959_v48 = vcombine.high %v4097_v41, %v4109_v44  ;;  %v4229_v33 = vld [vmem:[#allocation14 + $0x2498] sm:$0xff] }
 0x74f   : > { %13477 = vmatpush1.bf16.msra.mxu1 %v15812_v60  ;;  %v15956_v60 = vcombine.low %v4096_v37, %v4108_v39  ;;  %v4240_v37 = vld [vmem:[#allocation14 + $0x24f0] sm:$0xff] }
 0x750   : > { %13641 = vmatpush1.bf16.msra.mxu0 %v15814_v61  ;;  %13478 = vmatprep.subr.bf16.mxu1 %v15837_v62  ;;  %v15958_v61 = vcombine.low %v4097_v41, %v4109_v44  ;;  %v15981_v62 = vcombine.high %v4120_v49, %v4132_v51  ;;  %v4252_v39 = vld [vmem:[#allocation14 + $0x2550] sm:$0xff]  ;;  %v16076_v41 = vcombine.low %v4216_v30, %v4228_v25  ;;  %v4241_v44 = vld [vmem:[#allocation14 + $0x24f8] sm:$0xff] }
 0x751   : > { %13642 = vmatprep.subr.bf16.mxu0 %v15839_v0  ;;  %v15983_v0 = vcombine.high %v4121_v55, %v4133_v56 }
 0x753   : > { %13479 = vmatpush1.bf16.msra.mxu1 %v15836_v8  ;;  %v15980_v8 = vcombine.low %v4120_v49, %v4132_v51  ;;  %v4276_v49 = vld [vmem:[#allocation14 + $0x2610] sm:$0xff] }
 0x754   : > { %13643 = vmatpush1.bf16.msra.mxu0 %v15838_v9  ;;  %13480 = vmatprep.subr.bf16.mxu1 %v15861_v10  ;;  %v15982_v9 = vcombine.low %v4121_v55, %v4133_v56  ;;  %v16005_v10 = vcombine.high %v4144_v1, %v4156_v13  ;;  %v4265_v55 = vld [vmem:[#allocation14 + $0x25b8] sm:$0xff] }
 0x755   : > { %13644 = vmatprep.subr.bf16.mxu0 %v15863_v28  ;;  %v16007_v28 = vcombine.high %v4145_v3, %v4157_v4  ;;  %v4277_v56 = vld [vmem:[#allocation14 + $0x2618] sm:$0xff] }
 0x757   : > { %13481 = vmatpush1.bf16.msra.mxu1 %v15860_v17  ;;  %v16004_v17 = vcombine.low %v4144_v1, %v4156_v13  ;;  %v4288_v1 = vld [vmem:[#allocation14 + $0x2670] sm:$0xff] }
 0x758   : > { %13645 = vmatpush1.bf16.msra.mxu0 %v15862_v18  ;;  %13482 = vmatprep.subr.bf16.mxu1 %v15885_v22  ;;  %v16006_v18 = vcombine.low %v4145_v3, %v4157_v4  ;;  %v16029_v22 = vcombine.high %v4168_v11, %v4180_v15  ;;  %v4300_v13 = vld [vmem:[#allocation14 + $0x26d0] sm:$0xff]  ;;  %v4289_v3 = vld [vmem:[#allocation14 + $0x2678] sm:$0xff] }
 0x759   : > { %13646 = vmatprep.subr.bf16.mxu0 %v15887_v19  ;;  %v16031_v19 = vcombine.high %v4169_v14, %v4181_v16  ;;  %v4301_v4 = vld [vmem:[#allocation14 + $0x26d8] sm:$0xff] }
 0x75b   : > { %13483 = vmatpush1.bf16.msra.mxu1 %v15884_v40  ;;  %v16028_v40 = vcombine.low %v4168_v11, %v4180_v15  ;;  %v4312_v11 = vld [vmem:[#allocation14 + $0x2730] sm:$0xff] }
 0x75c   : > { %13647 = vmatpush1.bf16.msra.mxu0 %v15886_v26  ;;  %13484 = vmatprep.subr.bf16.mxu1 %v15909_v27  ;;  %v16030_v26 = vcombine.low %v4169_v14, %v4181_v16  ;;  %v16053_v27 = vcombine.high %v4192_v20, %v4204_v21  ;;  %v4324_v15 = vld [vmem:[#allocation14 + $0x2790] sm:$0xff]  ;;  %v4313_v14 = vld [vmem:[#allocation14 + $0x2738] sm:$0xff] }
 0x75d   : > { %13648 = vmatprep.subr.bf16.mxu0 %v15911_v58  ;;  %v16055_v58 = vcombine.high %v4193_v23, %v4205_v24  ;;  %v4325_v16 = vld [vmem:[#allocation14 + $0x2798] sm:$0xff] }
 0x75f   : > { %13485 = vmatpush1.bf16.msra.mxu1 %v15908_v34  ;;  %v16052_v34 = vcombine.low %v4192_v20, %v4204_v21  ;;  %v4336_v20 = vld [vmem:[#allocation14 + $0x27f0] sm:$0xff] }
 0x760   : > { %13649 = vmatpush1.bf16.msra.mxu0 %v15910_v12  ;;  %13486 = vmatprep.subr.bf16.mxu1 %v15933_v35  ;;  %v16054_v12 = vcombine.low %v4193_v23, %v4205_v24  ;;  %v16077_v35 = vcombine.high %v4216_v30, %v4228_v25  ;;  %v4348_v21 = vld [vmem:[#allocation14 + $0x2850] sm:$0xff]  ;;  %v4337_v23 = vld [vmem:[#allocation14 + $0x27f8] sm:$0xff] }
 0x761   : > { %13650 = vmatprep.subr.bf16.mxu0 %v15935_v36  ;;  %v16079_v36 = vcombine.high %v4217_v32, %v4229_v33  ;;  %v4349_v24 = vld [vmem:[#allocation14 + $0x2858] sm:$0xff]  ;;  %v4360_v25 = vld [vmem:[#allocation14 + $0x28b0] sm:$0xff] }
 0x762   : > { %v16199_v30 = vcombine.high %v4337_v23, %v4349_v24 }
 0x763   : > { %13487 = vmatpush1.bf16.msra.mxu1 %v15932_v45  ;;  %v4253_v45 = vld [vmem:[#allocation14 + $0x2558] sm:$0xff] }
 0x764   : > { %13651 = vmatpush1.bf16.msra.mxu0 %v15934_v46  ;;  %13488 = vmatprep.subr.bf16.mxu1 %v15957_v47  ;;  %v16078_v46 = vcombine.low %v4217_v32, %v4229_v33  ;;  %v16101_v47 = vcombine.high %v4240_v37, %v4252_v39  ;;  %v16103_v51 = vcombine.high %v4241_v44, %v4253_v45  ;;  %v4372_v32 = vld [vmem:[#allocation14 + $0x2910] sm:$0xff] }
 0x765   : > { %13652 = vmatprep.subr.bf16.mxu0 %v15959_v48  ;;  %v4264_v48 = vld [vmem:[#allocation14 + $0x25b0] sm:$0xff] }
 0x767   : > { %13489 = vmatpush1.bf16.msra.mxu1 %v15956_v60  ;;  %v16100_v60 = vcombine.low %v4240_v37, %v4252_v39  ;;  %v16196_v37 = vcombine.low %v4336_v20, %v4348_v21 }
 0x768   : > { %13653 = vmatpush1.bf16.msra.mxu0 %v15958_v61  ;;  %13490 = vmatprep.subr.bf16.mxu1 %v15981_v62  ;;  %v16102_v61 = vcombine.low %v4241_v44, %v4253_v45  ;;  %v16125_v62 = vcombine.high %v4264_v48, %v4276_v49  ;;  %v16221_v44 = vcombine.high %v4360_v25, %v4372_v32 }
 0x769   : > { %13654 = vmatprep.subr.bf16.mxu0 %v15983_v0  ;;  %v16127_v0 = vcombine.high %v4265_v55, %v4277_v56 }
 0x76b   : > { %13491 = vmatpush1.bf16.msra.mxu1 %v15980_v8  ;;  %v16124_v8 = vcombine.low %v4264_v48, %v4276_v49  ;;  %v4396_v48 = vld [vmem:[#allocation14 + $0x29d0] sm:$0xff] }
 0x76c   : > { %13655 = vmatpush1.bf16.msra.mxu0 %v15982_v9  ;;  %13492 = vmatprep.subr.bf16.mxu1 %v16005_v10  ;;  %v16126_v9 = vcombine.low %v4265_v55, %v4277_v56  ;;  %v16149_v10 = vcombine.high %v4288_v1, %v4300_v13  ;;  %v4385_v56 = vld [vmem:[#allocation14 + $0x2978] sm:$0xff] }
 0x76d   : > { %13656 = vmatprep.subr.bf16.mxu0 %v16007_v28  ;;  %v16151_v28 = vcombine.high %v4289_v3, %v4301_v4 }
 0x76f   : > { %13493 = vmatpush1.bf16.msra.mxu1 %v16004_v17  ;;  %v16148_v17 = vcombine.low %v4288_v1, %v4300_v13  ;;  %v16220_v13 = vcombine.low %v4360_v25, %v4372_v32  ;;  %v4456_v25 = vld [vmem:[#allocation14 + $0x2bb0] sm:$0xff] }
 0x770   : > { %13657 = vmatpush1.bf16.msra.mxu0 %v16006_v18  ;;  %13494 = vmatprep.subr.bf16.mxu1 %v16029_v22  ;;  %v16150_v18 = vcombine.low %v4289_v3, %v4301_v4  ;;  %v16173_v22 = vcombine.high %v4312_v11, %v4324_v15  ;;  %v4468_v32 = vld [vmem:[#allocation14 + $0x2c10] sm:$0xff] }
 0x771   : > { %13658 = vmatprep.subr.bf16.mxu0 %v16031_v19  ;;  %v16175_v19 = vcombine.high %v4313_v14, %v4325_v16 }
 0x773   : > { %13495 = vmatpush1.bf16.msra.mxu1 %v16028_v40  ;;  %v16172_v40 = vcombine.low %v4312_v11, %v4324_v15  ;;  %v4408_v15 = vld [vmem:[#allocation14 + $0x2a30] sm:$0xff] }
 0x774   : > { %13659 = vmatpush1.bf16.msra.mxu0 %v16030_v26  ;;  %13496 = vmatprep.subr.bf16.mxu1 %v16053_v27  ;;  %v4595_v26 = vld [vmem:[#allocation16 + $0x8] sm:$0xff]  ;;  %v16174_v27 = vcombine.low %v4313_v14, %v4325_v16  ;;  %v4420_v14 = vld [vmem:[#allocation14 + $0x2a90] sm:$0xff]  ;;  %v4409_v16 = vld [vmem:[#allocation14 + $0x2a38] sm:$0xff] }
 0x775   : > { %13660 = vmatprep.subr.bf16.mxu0 %v16055_v58  ;;  %v16197_v58 = vcombine.high %v4336_v20, %v4348_v21  ;;  %v4635_v33 = vrot.slane %v4595_v26, %v17639_v29  ;;  %v4647_v39 = vrot.slane %v4595_v26, %v17649_v53  ;;  %v4432_v21 = vld [vmem:[#allocation14 + $0x2af0] sm:$0xff] }
 0x777   : > { %13497 = vmatpush1.bf16.msra.mxu1 %v16052_v34  ;;  %v4361_v34 = vld [vmem:[#allocation14 + $0x28b8] sm:$0xff] }
 0x778   : > { %13661 = vmatpush1.bf16.msra.mxu0 %v16054_v12  ;;  %13507 = vmatprep.subr.bf16.mxu1 %v16077_v35  ;;  %v4373_v12 = vld [vmem:[#allocation14 + $0x2918] sm:$0xff]  ;;  %v4643_v35 = vrot.slane %v4595_v26, %v17672_v59 }
 0x779   : > { %13671 = vmatprep.subr.bf16.mxu0 %v16079_v36  ;;  %v4639_v36 = vrot.slane %v4595_v26, %v17642_v31  ;;  %v16268_v26 = vcombine.low %v4408_v15, %v4420_v14 }
 0x77a   : > { %13499 = vmatmul.mubr.bf16.vlgmr.msra.gmra.mrb[24].mxu1 %v17737_v52 }
 0x77b   : > { %13663 = vmatmul.mubr.bf16.vlgmr.msra.gmra.mrb[28].mxu0 %v17737_v52  ;;  %13508 = vmatpush1.bf16.msra.mxu1 %v16076_v41  ;;  %v16198_v41 = vcombine.low %v4337_v23, %v4349_v24  ;;  %v4444_v23 = vld [vmem:[#allocation14 + $0x2b50] sm:$0xff]  ;;  %v4433_v24 = vld [vmem:[#allocation14 + $0x2af8] sm:$0xff] }
 0x77c   : > { %13539 = vmatprep.mubr.bf16.mxu1 %v17741_v6  ;;  %13672 = vmatpush1.bf16.msra.mxu0 %v16078_v46  ;;  %v16223_v46 = vcombine.high %v4361_v34, %v4373_v12 }
 0x77d   : > { %13703 = vmatprep.mubr.bf16.mxu0 %v17741_v6  ;;  %13509 = vmatprep.subr.bf16.mxu1 %v16101_v47  ;;  %v4384_v47 = vld [vmem:[#allocation14 + $0x2970] sm:$0xff] }
 0x77e   : > { %13673 = vmatprep.subr.bf16.mxu0 %v16103_v51 }
 0x77f   : > { %13510 = vmatpush1.bf16.msra.mxu1 %v16100_v60  ;;  %v4397_v60 = vld [vmem:[#allocation14 + $0x29d8] sm:$0xff] }
 0x780   : > { %13674 = vmatpush1.bf16.msra.mxu0 %v16102_v61  ;;  %13511 = vmatprep.subr.bf16.mxu1 %v16125_v62  ;;  %v16247_v11 = vcombine.high %v4385_v56, %v4397_v60 }
 0x781   : > { %13675 = vmatprep.subr.bf16.mxu0 %v16127_v0 }
 0x783   : > { %13512 = vmatpush1.bf16.msra.mxu1 %v16124_v8 }
 0x784   : > { %13676 = vmatpush1.bf16.msra.mxu0 %v16126_v9  ;;  %13513 = vmatprep.subr.bf16.mxu1 %v16149_v10  ;;  %v16222_v9 = vcombine.low %v4361_v34, %v4373_v12  ;;  %v16245_v10 = vcombine.high %v4384_v47, %v4396_v48  ;;  %v4469_v34 = vld [vmem:[#allocation14 + $0x2c18] sm:$0xff]  ;;  %v16292_v12 = vcombine.low %v4432_v21, %v4444_v23 }
 0x785   : > { %13677 = vmatprep.subr.bf16.mxu0 %v16151_v28 }
 0x787   : > { %13514 = vmatpush1.bf16.msra.mxu1 %v16148_v17  ;;  %v4421_v17 = vld [vmem:[#allocation14 + $0x2a98] sm:$0xff] }
 0x788   : > { %13678 = vmatpush1.bf16.msra.mxu0 %v16150_v18  ;;  %13515 = vmatprep.subr.bf16.mxu1 %v16173_v22  ;;  %v16244_v18 = vcombine.low %v4384_v47, %v4396_v48  ;;  %v16246_v22 = vcombine.low %v4385_v56, %v4397_v60  ;;  %v16271_v20 = vcombine.high %v4409_v16, %v4421_v17  ;;  %v4505_v56 = vld [vmem:[#allocation14 + $0x2d38] sm:$0xff] }
 0x789   : > { %13679 = vmatprep.subr.bf16.mxu0 %v16175_v19  ;;  %v16269_v19 = vcombine.high %v4408_v15, %v4420_v14  ;;  %v4517_v60 = vld [vmem:[#allocation14 + $0x2d98] sm:$0xff]  ;;  %v4552_v15 = vld [vmem:[#allocation14 + $0x2eb0] sm:$0xff] }
 0x78a   : > { %v4564_v14 = vld [vmem:[#allocation14 + $0x2f10] sm:$0xff] }
 0x78b   : > { %13516 = vmatpush1.bf16.msra.mxu1 %v16172_v40  ;;  %v4445_v40 = vld [vmem:[#allocation14 + $0x2b58] sm:$0xff] }
 0x78c   : > { %13680 = vmatpush1.bf16.msra.mxu0 %v16174_v27  ;;  %13517 = vmatprep.subr.bf16.mxu1 %v16197_v58  ;;  %v16270_v27 = vcombine.low %v4409_v16, %v4421_v17  ;;  %v16293_v58 = vcombine.high %v4432_v21, %v4444_v23  ;;  %v4553_v16 = vld [vmem:[#allocation14 + $0x2eb8] sm:$0xff]  ;;  %v4576_v21 = vld [vmem:[#allocation14 + $0x2f70] sm:$0xff] }
 0x78d   : > { %v13213_v45 = vpop.f32.mrb[20].mxu1  ;;  %13681 = vmatprep.subr.bf16.mxu0 %v16199_v30  ;;  %v16295_v30 = vcombine.high %v4433_v24, %v4445_v40  ;;  %v4565_v17 = vld [vmem:[#allocation14 + $0x2f18] sm:$0xff]  ;;  %v4588_v23 = vld [vmem:[#allocation14 + $0x2fd0] sm:$0xff] }
 0x78e   : > { %v16467_v49 = vadd.f32 %v13213_v45, %v4635_v33  ;;  %v13377_v51 = vpop.f32.mrb[24].mxu0  ;;  %v13215_v55 = vpop.f32.mrb[21].mxu1  ;;  %v4457_v33 = vld [vmem:[#allocation14 + $0x2bb8] sm:$0xff] }
 0x78f   : > { %v16469_v61 = vadd.f32 %v13377_v51, %v4643_v35  ;;  %v16468_v62 = vadd.f32 %v13215_v55, %v4639_v36  ;;  %v13379_v0 = vpop.f32.mrb[25].mxu0  ;;  %v13217_v1 = vpop.f32.mrb[22].mxu1  ;;  %13518 = vmatpush1.bf16.msra.mxu1 %v16196_v37  ;;  %v16294_v35 = vcombine.low %v4433_v24, %v4445_v40  ;;  %v16317_v36 = vcombine.high %v4456_v25, %v4468_v32  ;;  %v4493_v45 = vld [vmem:[#allocation14 + $0x2cd8] sm:$0xff]  ;;  %v4504_v51 = vld [vmem:[#allocation14 + $0x2d30] sm:$0xff] }
 0x790   : > { %14376 = vst [vmem:[%s17777_s22 + $0x40] sm:$0xff] %v16467_v49  ;;  %v16470_v3 = vadd.f32 %v13379_v0, %v4647_v39  ;;  %v13381_v4 = vpop.f32.mrb[26].mxu0  ;;  %13682 = vmatpush1.bf16.msra.mxu0 %v16198_v41  ;;  %v13218_v8 = vpop.f32.mrb[23].mxu1  ;;  %13519 = vmatprep.subr.bf16.mxu1 %v16221_v44  ;;  %v16319_v37 = vcombine.high %v4457_v33, %v4469_v34  ;;  %v4480_v39 = vld [vmem:[#allocation14 + $0x2c70] sm:$0xff]  ;;  %v4481_v44 = vld [vmem:[#allocation14 + $0x2c78] sm:$0xff] }
 0x791   : > { %14378 = vst [vmem:[%s17777_s22 + $0x50] sm:$0xff] %v16469_v61  ;;  %14377 = vst [vmem:[%s17777_s22 + $0x48] sm:$0xff] %v16468_v62  ;;  %v13382_v28 = vpop.f32.mrb[27].mxu0  ;;  %13683 = vmatprep.subr.bf16.mxu0 %v16223_v46  ;;  %v4492_v41 = vld [vmem:[#allocation14 + $0x2cd0] sm:$0xff]  ;;  %v16316_v46 = vcombine.low %v4456_v25, %v4468_v32  ;;  %v16318_v47 = vcombine.low %v4457_v33, %v4469_v34  ;;  %v16343_v49 = vcombine.high %v4481_v44, %v4493_v45  ;;  %v4529_v4 = vld [vmem:[#allocation14 + $0x2df8] sm:$0xff] }
 0x792   : > { %14379 = vst [vmem:[%s17777_s22 + $0x58] sm:$0xff] %v16470_v3  ;;  %v16341_v48 = vcombine.high %v4480_v39, %v4492_v41  ;;  %v4516_v55 = vld [vmem:[#allocation14 + $0x2d90] sm:$0xff]  ;;  %v16340_v61 = vcombine.low %v4480_v39, %v4492_v41  ;;  %v16342_v62 = vcombine.low %v4481_v44, %v4493_v45  ;;  %v16367_v1 = vcombine.high %v4505_v56, %v4517_v60  ;;  %v4541_v8 = vld [vmem:[#allocation14 + $0x2e58] sm:$0xff]  ;;  %v3066_v25 = vld [vmem:[#allocation14 + $0x40] sm:$0xff] }
 0x793   : > { %13520 = vmatpush1.bf16.msra.mxu1 %v16220_v13  ;;  %v16365_v0 = vcombine.high %v4504_v51, %v4516_v55  ;;  %v4528_v13 = vld [vmem:[#allocation14 + $0x2df0] sm:$0xff]  ;;  %v4577_v24 = vld [vmem:[#allocation14 + $0x2f78] sm:$0xff]  ;;  %v3078_v32 = vld [vmem:[#allocation14 + $0xa0] sm:$0xff] }
 0x794   : > { %13684 = vmatpush1.bf16.msra.mxu0 %v16222_v9  ;;  %13521 = vmatprep.subr.bf16.mxu1 %v16245_v10  ;;  %v4540_v3 = vld [vmem:[#allocation14 + $0x2e50] sm:$0xff]  ;;  %v16364_v9 = vcombine.low %v4504_v51, %v4516_v55  ;;  %v16366_v10 = vcombine.low %v4505_v56, %v4517_v60  ;;  %v4589_v40 = vld [vmem:[#allocation14 + $0x2fd8] sm:$0xff]  ;;  %v3067_v33 = vld [vmem:[#allocation14 + $0x48] sm:$0xff]  ;;  %v14928_v44 = vcombine.low %v3066_v25, %v3078_v32 }
 0x795   : > { %13685 = vmatprep.subr.bf16.mxu0 %v16247_v11  ;;  %v16389_v28 = vcombine.high %v4528_v13, %v4540_v3  ;;  %v16391_v11 = vcombine.high %v4529_v4, %v4541_v8  ;;  %v3079_v34 = vld [vmem:[#allocation14 + $0xa8] sm:$0xff]  ;;  %v3090_v39 = vld [vmem:[#allocation14 + $0x100] sm:$0xff] }
 0x796   : > { %v3102_v41 = vld [vmem:[#allocation14 + $0x160] sm:$0xff]  ;;  %v3091_v45 = vld [vmem:[#allocation14 + $0x108] sm:$0xff] }
 0x797   : > { %13522 = vmatpush1.bf16.msra.mxu1 %v16244_v18  ;;  %v16388_v18 = vcombine.low %v4528_v13, %v4540_v3  ;;  %v3126_v51 = vld [vmem:[#allocation14 + $0x220] sm:$0xff]  ;;  %v3115_v56 = vld [vmem:[#allocation14 + $0x1c8] sm:$0xff] }
 0x798   : > { %13686 = vmatpush1.bf16.msra.mxu0 %v16246_v22  ;;  %13523 = vmatprep.subr.bf16.mxu1 %v16269_v19  ;;  %v16390_v22 = vcombine.low %v4529_v4, %v4541_v8  ;;  %v16413_v19 = vcombine.high %v4552_v15, %v4564_v14  ;;  %v3127_v60 = vld [vmem:[#allocation14 + $0x228] sm:$0xff]  ;;  %v3138_v13 = vld [vmem:[#allocation14 + $0x280] sm:$0xff] }
 0x799   : > { %13687 = vmatprep.subr.bf16.mxu0 %v16271_v20  ;;  %v16415_v20 = vcombine.high %v4553_v16, %v4565_v17  ;;  %v3150_v3 = vld [vmem:[#allocation14 + $0x2e0] sm:$0xff]  ;;  %v3139_v4 = vld [vmem:[#allocation14 + $0x288] sm:$0xff] }
 0x79a   : > { %v3151_v8 = vld [vmem:[#allocation14 + $0x2e8] sm:$0xff] }
 0x79b   : > { %13524 = vmatpush1.bf16.msra.mxu1 %v16268_v26  ;;  %v16412_v26 = vcombine.low %v4552_v15, %v4564_v14  ;;  %v3162_v15 = vld [vmem:[#allocation14 + $0x340] sm:$0xff] }
 0x79c   : > { %13688 = vmatpush1.bf16.msra.mxu0 %v16270_v27  ;;  %13525 = vmatprep.subr.bf16.mxu1 %v16293_v58  ;;  %v16414_v27 = vcombine.low %v4553_v16, %v4565_v17  ;;  %v16437_v58 = vcombine.high %v4576_v21, %v4588_v23  ;;  %v3174_v14 = vld [vmem:[#allocation14 + $0x3a0] sm:$0xff]  ;;  %v3163_v16 = vld [vmem:[#allocation14 + $0x348] sm:$0xff] }
 0x79d   : > { %13689 = vmatprep.subr.bf16.mxu0 %v16295_v30  ;;  %v16439_v30 = vcombine.high %v4577_v24, %v4589_v40  ;;  %v3175_v17 = vld [vmem:[#allocation14 + $0x3a8] sm:$0xff] }
 0x79f   : > { %13526 = vmatpush1.bf16.msra.mxu1 %v16292_v12  ;;  %v16436_v12 = vcombine.low %v4576_v21, %v4588_v23  ;;  %v3186_v21 = vld [vmem:[#allocation14 + $0x400] sm:$0xff] }
 0x7a0   : > { %13690 = vmatpush1.bf16.msra.mxu0 %v16294_v35  ;;  %13527 = vmatprep.subr.bf16.mxu1 %v16317_v36  ;;  %v16438_v35 = vcombine.low %v4577_v24, %v4589_v40  ;;  %v14929_v36 = vcombine.high %v3066_v25, %v3078_v32  ;;  %v3198_v23 = vld [vmem:[#allocation14 + $0x460] sm:$0xff]  ;;  %v3187_v24 = vld [vmem:[#allocation14 + $0x408] sm:$0xff] }
 0x7a1   : > { %13691 = vmatprep.subr.bf16.mxu0 %v16319_v37  ;;  %v14931_v37 = vcombine.high %v3067_v33, %v3079_v34  ;;  %v3199_v40 = vld [vmem:[#allocation14 + $0x468] sm:$0xff]  ;;  %v3210_v25 = vld [vmem:[#allocation14 + $0x4c0] sm:$0xff] }
 0x7a2   : > { %v3222_v32 = vld [vmem:[#allocation14 + $0x520] sm:$0xff] }
 0x7a3   : > { %13528 = vmatpush1.bf16.msra.mxu1 %v16316_v46  ;;  %v3103_v46 = vld [vmem:[#allocation14 + $0x168] sm:$0xff] }
 0x7a4   : > { %13692 = vmatpush1.bf16.msra.mxu0 %v16318_v47  ;;  %13529 = vmatprep.subr.bf16.mxu1 %v16341_v48  ;;  %v14930_v47 = vcombine.low %v3067_v33, %v3079_v34  ;;  %v14953_v48 = vcombine.high %v3090_v39, %v3102_v41  ;;  %v14955_v55 = vcombine.high %v3091_v45, %v3103_v46  ;;  %v3211_v33 = vld [vmem:[#allocation14 + $0x4c8] sm:$0xff] }
 0x7a5   : > { %13693 = vmatprep.subr.bf16.mxu0 %v16343_v49  ;;  %v3114_v49 = vld [vmem:[#allocation14 + $0x1c0] sm:$0xff]  ;;  %v3223_v34 = vld [vmem:[#allocation14 + $0x528] sm:$0xff] }
 0x7a7   : > { %13530 = vmatpush1.bf16.msra.mxu1 %v16340_v61  ;;  %v14952_v61 = vcombine.low %v3090_v39, %v3102_v41  ;;  %v3234_v39 = vld [vmem:[#allocation14 + $0x580] sm:$0xff] }
 0x7a8   : > { %13694 = vmatpush1.bf16.msra.mxu0 %v16342_v62  ;;  %13531 = vmatprep.subr.bf16.mxu1 %v16365_v0  ;;  %v14954_v62 = vcombine.low %v3091_v45, %v3103_v46  ;;  %v14977_v0 = vcombine.high %v3114_v49, %v3126_v51  ;;  %v3246_v41 = vld [vmem:[#allocation14 + $0x5e0] sm:$0xff]  ;;  %v3247_v45 = vld [vmem:[#allocation14 + $0x5e8] sm:$0xff]  ;;  %v15072_v46 = vcombine.low %v3210_v25, %v3222_v32 }
 0x7a9   : > { %13695 = vmatprep.subr.bf16.mxu0 %v16367_v1  ;;  %v14979_v1 = vcombine.high %v3115_v56, %v3127_v60 }
 0x7ab   : > { %13532 = vmatpush1.bf16.msra.mxu1 %v16364_v9  ;;  %v14976_v9 = vcombine.low %v3114_v49, %v3126_v51  ;;  %v3258_v51 = vld [vmem:[#allocation14 + $0x640] sm:$0xff] }
 0x7ac   : > { %13696 = vmatpush1.bf16.msra.mxu0 %v16366_v10  ;;  %13533 = vmatprep.subr.bf16.mxu1 %v16389_v28  ;;  %v14978_v10 = vcombine.low %v3115_v56, %v3127_v60  ;;  %v15001_v28 = vcombine.high %v3138_v13, %v3150_v3  ;;  %v3259_v56 = vld [vmem:[#allocation14 + $0x648] sm:$0xff] }
 0x7ad   : > { %13697 = vmatprep.subr.bf16.mxu0 %v16391_v11  ;;  %v15003_v11 = vcombine.high %v3139_v4, %v3151_v8  ;;  %v3271_v60 = vld [vmem:[#allocation14 + $0x6a8] sm:$0xff] }
 0x7af   : > { %13534 = vmatpush1.bf16.msra.mxu1 %v16388_v18  ;;  %v15000_v18 = vcombine.low %v3138_v13, %v3150_v3  ;;  %v3282_v13 = vld [vmem:[#allocation14 + $0x700] sm:$0xff] }
 0x7b0   : > { %13698 = vmatpush1.bf16.msra.mxu0 %v16390_v22  ;;  %13535 = vmatprep.subr.bf16.mxu1 %v16413_v19  ;;  %v15002_v22 = vcombine.low %v3139_v4, %v3151_v8  ;;  %v15025_v19 = vcombine.high %v3162_v15, %v3174_v14  ;;  %v3294_v3 = vld [vmem:[#allocation14 + $0x760] sm:$0xff]  ;;  %v3283_v4 = vld [vmem:[#allocation14 + $0x708] sm:$0xff] }
 0x7b1   : > { %13699 = vmatprep.subr.bf16.mxu0 %v16415_v20  ;;  %v15027_v20 = vcombine.high %v3163_v16, %v3175_v17  ;;  %v3295_v8 = vld [vmem:[#allocation14 + $0x768] sm:$0xff] }
 0x7b3   : > { %13536 = vmatpush1.bf16.msra.mxu1 %v16412_v26  ;;  %v15024_v26 = vcombine.low %v3162_v15, %v3174_v14  ;;  %v3306_v15 = vld [vmem:[#allocation14 + $0x7c0] sm:$0xff] }
 0x7b4   : > { %13700 = vmatpush1.bf16.msra.mxu0 %v16414_v27  ;;  %13537 = vmatprep.subr.bf16.mxu1 %v16437_v58  ;;  %v15026_v27 = vcombine.low %v3163_v16, %v3175_v17  ;;  %v15049_v58 = vcombine.high %v3186_v21, %v3198_v23  ;;  %v3318_v14 = vld [vmem:[#allocation14 + $0x820] sm:$0xff]  ;;  %v3307_v16 = vld [vmem:[#allocation14 + $0x7c8] sm:$0xff] }
 0x7b5   : > { %13701 = vmatprep.subr.bf16.mxu0 %v16439_v30  ;;  %v15051_v30 = vcombine.high %v3187_v24, %v3199_v40  ;;  %v3319_v17 = vld [vmem:[#allocation14 + $0x828] sm:$0xff] }
 0x7b7   : > { %13538 = vmatpush1.bf16.msra.mxu1 %v16436_v12  ;;  %v15048_v12 = vcombine.low %v3186_v21, %v3198_v23  ;;  %v3330_v21 = vld [vmem:[#allocation14 + $0x880] sm:$0xff] }
 0x7b8   : > { %13702 = vmatpush1.bf16.msra.mxu0 %v16438_v35  ;;  %13712 = vmatprep.subr.bf16.mxu1 %v14929_v36  ;;  %v15050_v35 = vcombine.low %v3187_v24, %v3199_v40  ;;  %v15073_v36 = vcombine.high %v3210_v25, %v3222_v32  ;;  %v3342_v23 = vld [vmem:[#allocation14 + $0x8e0] sm:$0xff]  ;;  %v3331_v24 = vld [vmem:[#allocation14 + $0x888] sm:$0xff] }
 0x7b9   : > { %13876 = vmatprep.subr.bf16.mxu0 %v14931_v37  ;;  %v15075_v37 = vcombine.high %v3211_v33, %v3223_v34  ;;  %v3343_v40 = vld [vmem:[#allocation14 + $0x8e8] sm:$0xff]  ;;  %v3354_v25 = vld [vmem:[#allocation14 + $0x940] sm:$0xff] }
 0x7ba   : > { %13540 = vmatmul.mubr.bf16.vlgmr.msra.gmra.mrb[24].mxu1 %v17752_v42  ;;  %v3366_v32 = vld [vmem:[#allocation14 + $0x9a0] sm:$0xff] }
 0x7bb   : > { %13704 = vmatmul.mubr.bf16.vlgmr.msra.gmra.mrb[28].mxu0 %v17752_v42  ;;  %13713 = vmatpush1.bf16.msra.mxu1 %v14928_v44  ;;  %v3235_v44 = vld [vmem:[#allocation14 + $0x588] sm:$0xff] }
 0x7bc   : > { %13744 = vmatprep.mubr.bf16.mxu1 %v17699_v38  ;;  %13877 = vmatpush1.bf16.msra.mxu0 %v14930_v47  ;;  %v15074_v47 = vcombine.low %v3211_v33, %v3223_v34  ;;  %v15099_v49 = vcombine.high %v3235_v44, %v3247_v45  ;;  %v3355_v33 = vld [vmem:[#allocation14 + $0x948] sm:$0xff] }
 0x7bd   : > { %13908 = vmatprep.mubr.bf16.mxu0 %v17699_v38  ;;  %13714 = vmatprep.subr.bf16.mxu1 %v14953_v48  ;;  %v15097_v48 = vcombine.high %v3234_v39, %v3246_v41  ;;  %v3367_v34 = vld [vmem:[#allocation14 + $0x9a8] sm:$0xff] }
 0x7be   : > { %13878 = vmatprep.subr.bf16.mxu0 %v14955_v55  ;;  %v3270_v55 = vld [vmem:[#allocation14 + $0x6a0] sm:$0xff] }
 0x7bf   : > { %13715 = vmatpush1.bf16.msra.mxu1 %v14952_v61  ;;  %v15096_v61 = vcombine.low %v3234_v39, %v3246_v41  ;;  %v3378_v39 = vld [vmem:[#allocation14 + $0xa00] sm:$0xff] }
 0x7c0   : > { %13879 = vmatpush1.bf16.msra.mxu0 %v14954_v62  ;;  %13716 = vmatprep.subr.bf16.mxu1 %v14977_v0  ;;  %v15098_v62 = vcombine.low %v3235_v44, %v3247_v45  ;;  %v15121_v0 = vcombine.high %v3258_v51, %v3270_v55  ;;  %v3390_v41 = vld [vmem:[#allocation14 + $0xa60] sm:$0xff]  ;;  %v3379_v44 = vld [vmem:[#allocation14 + $0xa08] sm:$0xff] }
 0x7c1   : > { %13880 = vmatprep.subr.bf16.mxu0 %v14979_v1  ;;  %v15123_v1 = vcombine.high %v3259_v56, %v3271_v60  ;;  %v3391_v45 = vld [vmem:[#allocation14 + $0xa68] sm:$0xff] }
 0x7c3   : > { %13717 = vmatpush1.bf16.msra.mxu1 %v14976_v9  ;;  %v15120_v9 = vcombine.low %v3258_v51, %v3270_v55  ;;  %v3402_v51 = vld [vmem:[#allocation14 + $0xac0] sm:$0xff] }
 0x7c4   : > { %13881 = vmatpush1.bf16.msra.mxu0 %v14978_v10  ;;  %13718 = vmatprep.subr.bf16.mxu1 %v15001_v28  ;;  %v15122_v10 = vcombine.low %v3259_v56, %v3271_v60  ;;  %v15145_v28 = vcombine.high %v3282_v13, %v3294_v3  ;;  %v3414_v55 = vld [vmem:[#allocation14 + $0xb20] sm:$0xff]  ;;  %v3403_v56 = vld [vmem:[#allocation14 + $0xac8] sm:$0xff] }
 0x7c5   : > { %13882 = vmatprep.subr.bf16.mxu0 %v15003_v11  ;;  %v15147_v11 = vcombine.high %v3283_v4, %v3295_v8  ;;  %v3415_v60 = vld [vmem:[#allocation14 + $0xb28] sm:$0xff] }
 0x7c7   : > { %13719 = vmatpush1.bf16.msra.mxu1 %v15000_v18  ;;  %v15144_v18 = vcombine.low %v3282_v13, %v3294_v3  ;;  %v3426_v13 = vld [vmem:[#allocation14 + $0xb80] sm:$0xff] }
 0x7c8   : > { %13883 = vmatpush1.bf16.msra.mxu0 %v15002_v22  ;;  %13720 = vmatprep.subr.bf16.mxu1 %v15025_v19  ;;  %v15146_v22 = vcombine.low %v3283_v4, %v3295_v8  ;;  %v15169_v19 = vcombine.high %v3306_v15, %v3318_v14  ;;  %v3438_v3 = vld [vmem:[#allocation14 + $0xbe0] sm:$0xff]  ;;  %v3427_v4 = vld [vmem:[#allocation14 + $0xb88] sm:$0xff] }
 0x7c9   : > { %13884 = vmatprep.subr.bf16.mxu0 %v15027_v20  ;;  %v15171_v20 = vcombine.high %v3307_v16, %v3319_v17  ;;  %v3439_v8 = vld [vmem:[#allocation14 + $0xbe8] sm:$0xff] }
 0x7cb   : > { %13721 = vmatpush1.bf16.msra.mxu1 %v15024_v26  ;;  %v15168_v26 = vcombine.low %v3306_v15, %v3318_v14  ;;  %v3450_v15 = vld [vmem:[#allocation14 + $0xc40] sm:$0xff] }
 0x7cc   : > { %13885 = vmatpush1.bf16.msra.mxu0 %v15026_v27  ;;  %13722 = vmatprep.subr.bf16.mxu1 %v15049_v58  ;;  %v15170_v27 = vcombine.low %v3307_v16, %v3319_v17  ;;  %v15193_v58 = vcombine.high %v3330_v21, %v3342_v23  ;;  %v3462_v14 = vld [vmem:[#allocation14 + $0xca0] sm:$0xff]  ;;  %v3451_v16 = vld [vmem:[#allocation14 + $0xc48] sm:$0xff] }
 0x7cd   : > { %13886 = vmatprep.subr.bf16.mxu0 %v15051_v30  ;;  %v15195_v30 = vcombine.high %v3331_v24, %v3343_v40  ;;  %v3463_v17 = vld [vmem:[#allocation14 + $0xca8] sm:$0xff] }
 0x7cf   : > { %13723 = vmatpush1.bf16.msra.mxu1 %v15048_v12  ;;  %v15192_v12 = vcombine.low %v3330_v21, %v3342_v23  ;;  %v3474_v21 = vld [vmem:[#allocation14 + $0xd00] sm:$0xff] }
 0x7d0   : > { %13887 = vmatpush1.bf16.msra.mxu0 %v15050_v35  ;;  %13724 = vmatprep.subr.bf16.mxu1 %v15073_v36  ;;  %v15194_v35 = vcombine.low %v3331_v24, %v3343_v40  ;;  %v15217_v36 = vcombine.high %v3354_v25, %v3366_v32  ;;  %v3486_v23 = vld [vmem:[#allocation14 + $0xd60] sm:$0xff]  ;;  %v15312_v24 = vcombine.low %v3450_v15, %v3462_v14  ;;  %v3475_v40 = vld [vmem:[#allocation14 + $0xd08] sm:$0xff] }
 0x7d1   : > { %13888 = vmatprep.subr.bf16.mxu0 %v15075_v37  ;;  %v15219_v37 = vcombine.high %v3355_v33, %v3367_v34 }
 0x7d3   : > { %13725 = vmatpush1.bf16.msra.mxu1 %v15072_v46  ;;  %v15216_v46 = vcombine.low %v3354_v25, %v3366_v32  ;;  %v3510_v25 = vld [vmem:[#allocation14 + $0xe20] sm:$0xff] }
 0x7d4   : > { %13889 = vmatpush1.bf16.msra.mxu0 %v15074_v47  ;;  %13726 = vmatprep.subr.bf16.mxu1 %v15097_v48  ;;  %v15218_v47 = vcombine.low %v3355_v33, %v3367_v34  ;;  %v15241_v48 = vcombine.high %v3378_v39, %v3390_v41  ;;  %v3499_v33 = vld [vmem:[#allocation14 + $0xdc8] sm:$0xff] }
 0x7d5   : > { %13890 = vmatprep.subr.bf16.mxu0 %v15099_v49  ;;  %v15243_v49 = vcombine.high %v3379_v44, %v3391_v45  ;;  %v3511_v34 = vld [vmem:[#allocation14 + $0xe28] sm:$0xff] }
 0x7d7   : > { %13727 = vmatpush1.bf16.msra.mxu1 %v15096_v61  ;;  %v15240_v61 = vcombine.low %v3378_v39, %v3390_v41  ;;  %v3522_v39 = vld [vmem:[#allocation14 + $0xe80] sm:$0xff] }
 0x7d8   : > { %13891 = vmatpush1.bf16.msra.mxu0 %v15098_v62  ;;  %13728 = vmatprep.subr.bf16.mxu1 %v15121_v0  ;;  %v15242_v62 = vcombine.low %v3379_v44, %v3391_v45  ;;  %v15265_v0 = vcombine.high %v3402_v51, %v3414_v55  ;;  %v3534_v41 = vld [vmem:[#allocation14 + $0xee0] sm:$0xff]  ;;  %v3523_v44 = vld [vmem:[#allocation14 + $0xe88] sm:$0xff] }
 0x7d9   : > { %13892 = vmatprep.subr.bf16.mxu0 %v15123_v1  ;;  %v15267_v1 = vcombine.high %v3403_v56, %v3415_v60  ;;  %v3535_v45 = vld [vmem:[#allocation14 + $0xee8] sm:$0xff] }
 0x7db   : > { %13729 = vmatpush1.bf16.msra.mxu1 %v15120_v9  ;;  %v15264_v9 = vcombine.low %v3402_v51, %v3414_v55  ;;  %v3546_v51 = vld [vmem:[#allocation14 + $0xf40] sm:$0xff] }
 0x7dc   : > { %13893 = vmatpush1.bf16.msra.mxu0 %v15122_v10  ;;  %13730 = vmatprep.subr.bf16.mxu1 %v15145_v28  ;;  %v15266_v10 = vcombine.low %v3403_v56, %v3415_v60  ;;  %v15289_v28 = vcombine.high %v3426_v13, %v3438_v3  ;;  %v3558_v55 = vld [vmem:[#allocation14 + $0xfa0] sm:$0xff]  ;;  %v3547_v56 = vld [vmem:[#allocation14 + $0xf48] sm:$0xff] }
 0x7dd   : > { %13894 = vmatprep.subr.bf16.mxu0 %v15147_v11  ;;  %v15291_v11 = vcombine.high %v3427_v4, %v3439_v8  ;;  %v3559_v60 = vld [vmem:[#allocation14 + $0xfa8] sm:$0xff] }
 0x7df   : > { %13731 = vmatpush1.bf16.msra.mxu1 %v15144_v18  ;;  %v15288_v18 = vcombine.low %v3426_v13, %v3438_v3  ;;  %v3570_v13 = vld [vmem:[#allocation14 + $0x1000] sm:$0xff] }
 0x7e0   : > { %13895 = vmatpush1.bf16.msra.mxu0 %v15146_v22  ;;  %13732 = vmatprep.subr.bf16.mxu1 %v15169_v19  ;;  %v15290_v22 = vcombine.low %v3427_v4, %v3439_v8  ;;  %v15313_v19 = vcombine.high %v3450_v15, %v3462_v14  ;;  %v3582_v3 = vld [vmem:[#allocation14 + $0x1060] sm:$0xff]  ;;  %v3571_v4 = vld [vmem:[#allocation14 + $0x1008] sm:$0xff] }
 0x7e1   : > { %13896 = vmatprep.subr.bf16.mxu0 %v15171_v20  ;;  %v15315_v20 = vcombine.high %v3451_v16, %v3463_v17  ;;  %v3583_v8 = vld [vmem:[#allocation14 + $0x1068] sm:$0xff]  ;;  %v3594_v15 = vld [vmem:[#allocation14 + $0x10c0] sm:$0xff] }
 0x7e2   : > { %v3606_v14 = vld [vmem:[#allocation14 + $0x1120] sm:$0xff] }
 0x7e3   : > { %13733 = vmatpush1.bf16.msra.mxu1 %v15168_v26  ;;  %v3487_v26 = vld [vmem:[#allocation14 + $0xd68] sm:$0xff] }
 0x7e4   : > { %13897 = vmatpush1.bf16.msra.mxu0 %v15170_v27  ;;  %13734 = vmatprep.subr.bf16.mxu1 %v15193_v58  ;;  %v15314_v27 = vcombine.low %v3451_v16, %v3463_v17  ;;  %v15337_v58 = vcombine.high %v3474_v21, %v3486_v23  ;;  %v15339_v32 = vcombine.high %v3475_v40, %v3487_v26  ;;  %v3595_v16 = vld [vmem:[#allocation14 + $0x10c8] sm:$0xff] }
 0x7e5   : > { %13898 = vmatprep.subr.bf16.mxu0 %v15195_v30  ;;  %v3498_v30 = vld [vmem:[#allocation14 + $0xdc0] sm:$0xff]  ;;  %v3607_v17 = vld [vmem:[#allocation14 + $0x1128] sm:$0xff] }
 0x7e7   : > { %13735 = vmatpush1.bf16.msra.mxu1 %v15192_v12  ;;  %v15336_v12 = vcombine.low %v3474_v21, %v3486_v23  ;;  %v3618_v21 = vld [vmem:[#allocation14 + $0x1180] sm:$0xff] }
 0x7e8   : > { %13899 = vmatpush1.bf16.msra.mxu0 %v15194_v35  ;;  %13736 = vmatprep.subr.bf16.mxu1 %v15217_v36  ;;  %v15338_v35 = vcombine.low %v3475_v40, %v3487_v26  ;;  %v15361_v36 = vcombine.high %v3498_v30, %v3510_v25  ;;  %v3630_v23 = vld [vmem:[#allocation14 + $0x11e0] sm:$0xff]  ;;  %v3631_v40 = vld [vmem:[#allocation14 + $0x11e8] sm:$0xff]  ;;  %v15456_v26 = vcombine.low %v3594_v15, %v3606_v14 }
 0x7e9   : > { %13900 = vmatprep.subr.bf16.mxu0 %v15219_v37  ;;  %v15363_v37 = vcombine.high %v3499_v33, %v3511_v34 }
 0x7eb   : > { %13737 = vmatpush1.bf16.msra.mxu1 %v15216_v46  ;;  %v15360_v46 = vcombine.low %v3498_v30, %v3510_v25  ;;  %v3642_v25 = vld [vmem:[#allocation14 + $0x1240] sm:$0xff] }
 0x7ec   : > { %13901 = vmatpush1.bf16.msra.mxu0 %v15218_v47  ;;  %13738 = vmatprep.subr.bf16.mxu1 %v15241_v48  ;;  %v15362_v47 = vcombine.low %v3499_v33, %v3511_v34  ;;  %v15385_v48 = vcombine.high %v3522_v39, %v3534_v41  ;;  %v3643_v33 = vld [vmem:[#allocation14 + $0x1248] sm:$0xff] }
 0x7ed   : > { %13902 = vmatprep.subr.bf16.mxu0 %v15243_v49  ;;  %v15387_v49 = vcombine.high %v3523_v44, %v3535_v45  ;;  %v3655_v34 = vld [vmem:[#allocation14 + $0x12a8] sm:$0xff] }
 0x7ef   : > { %13739 = vmatpush1.bf16.msra.mxu1 %v15240_v61  ;;  %v15384_v61 = vcombine.low %v3522_v39, %v3534_v41  ;;  %v3666_v39 = vld [vmem:[#allocation14 + $0x1300] sm:$0xff] }
 0x7f0   : > { %13903 = vmatpush1.bf16.msra.mxu0 %v15242_v62  ;;  %13740 = vmatprep.subr.bf16.mxu1 %v15265_v0  ;;  %v15386_v62 = vcombine.low %v3523_v44, %v3535_v45  ;;  %v15409_v0 = vcombine.high %v3546_v51, %v3558_v55  ;;  %v3678_v41 = vld [vmem:[#allocation14 + $0x1360] sm:$0xff]  ;;  %v3667_v44 = vld [vmem:[#allocation14 + $0x1308] sm:$0xff] }
 0x7f1   : > { %13904 = vmatprep.subr.bf16.mxu0 %v15267_v1  ;;  %v15411_v1 = vcombine.high %v3547_v56, %v3559_v60  ;;  %v3679_v45 = vld [vmem:[#allocation14 + $0x1368] sm:$0xff] }
 0x7f3   : > { %13741 = vmatpush1.bf16.msra.mxu1 %v15264_v9  ;;  %v15408_v9 = vcombine.low %v3546_v51, %v3558_v55  ;;  %v3690_v51 = vld [vmem:[#allocation14 + $0x13c0] sm:$0xff] }
 0x7f4   : > { %13905 = vmatpush1.bf16.msra.mxu0 %v15266_v10  ;;  %13742 = vmatprep.subr.bf16.mxu1 %v15289_v28  ;;  %v15410_v10 = vcombine.low %v3547_v56, %v3559_v60  ;;  %v15433_v28 = vcombine.high %v3570_v13, %v3582_v3  ;;  %v3702_v55 = vld [vmem:[#allocation14 + $0x1420] sm:$0xff]  ;;  %v3691_v56 = vld [vmem:[#allocation14 + $0x13c8] sm:$0xff] }
 0x7f5   : > { %13906 = vmatprep.subr.bf16.mxu0 %v15291_v11  ;;  %v15435_v11 = vcombine.high %v3571_v4, %v3583_v8  ;;  %v3703_v60 = vld [vmem:[#allocation14 + $0x1428] sm:$0xff] }
 0x7f7   : > { %13743 = vmatpush1.bf16.msra.mxu1 %v15288_v18  ;;  %v15432_v18 = vcombine.low %v3570_v13, %v3582_v3  ;;  %v3714_v13 = vld [vmem:[#allocation14 + $0x1480] sm:$0xff] }
 0x7f8   : > { %13907 = vmatpush1.bf16.msra.mxu0 %v15290_v22  ;;  %13753 = vmatprep.subr.bf16.mxu1 %v15313_v19  ;;  %v15434_v22 = vcombine.low %v3571_v4, %v3583_v8  ;;  %v15457_v19 = vcombine.high %v3594_v15, %v3606_v14  ;;  %v3726_v3 = vld [vmem:[#allocation14 + $0x14e0] sm:$0xff]  ;;  %v3715_v4 = vld [vmem:[#allocation14 + $0x1488] sm:$0xff] }
 0x7f9   : > { %13917 = vmatprep.subr.bf16.mxu0 %v15315_v20  ;;  %v15459_v20 = vcombine.high %v3595_v16, %v3607_v17  ;;  %v3727_v8 = vld [vmem:[#allocation14 + $0x14e8] sm:$0xff]  ;;  %v3738_v15 = vld [vmem:[#allocation14 + $0x1540] sm:$0xff] }
 0x7fa   : > { %13745 = vmatmul.mubr.bf16.vlgmr.msra.gmra.mrb[28].mxu1 %v17701_v43  ;;  %v3750_v14 = vld [vmem:[#allocation14 + $0x15a0] sm:$0xff] }
 0x7fb   : > { %13909 = vmatmul.mubr.bf16.vlgmr.msra.gmra.mrb[32].mxu0 %v17701_v43  ;;  %13754 = vmatpush1.bf16.msra.mxu1 %v15312_v24  ;;  %v3619_v24 = vld [vmem:[#allocation14 + $0x1188] sm:$0xff] }
 0x7fc   : > { %13785 = vmatprep.mubr.bf16.mxu1 %v17705_v50  ;;  %13918 = vmatpush1.bf16.msra.mxu0 %v15314_v27  ;;  %v15458_v27 = vcombine.low %v3595_v16, %v3607_v17  ;;  %v15483_v30 = vcombine.high %v3619_v24, %v3631_v40  ;;  %v3739_v16 = vld [vmem:[#allocation14 + $0x1548] sm:$0xff] }
 0x7fd   : > { %13949 = vmatprep.mubr.bf16.mxu0 %v17705_v50  ;;  %13755 = vmatprep.subr.bf16.mxu1 %v15337_v58  ;;  %v15481_v58 = vcombine.high %v3618_v21, %v3630_v23  ;;  %v3751_v17 = vld [vmem:[#allocation14 + $0x15a8] sm:$0xff] }
 0x7fe   : > { %13919 = vmatprep.subr.bf16.mxu0 %v15339_v32  ;;  %v3654_v32 = vld [vmem:[#allocation14 + $0x12a0] sm:$0xff] }
 0x7ff   : > { %13756 = vmatpush1.bf16.msra.mxu1 %v15336_v12  ;;  %v15480_v12 = vcombine.low %v3618_v21, %v3630_v23  ;;  %v3762_v21 = vld [vmem:[#allocation14 + $0x1600] sm:$0xff] }
 0x800   : > { %13920 = vmatpush1.bf16.msra.mxu0 %v15338_v35  ;;  %13757 = vmatprep.subr.bf16.mxu1 %v15361_v36  ;;  %v15482_v35 = vcombine.low %v3619_v24, %v3631_v40  ;;  %v15505_v36 = vcombine.high %v3642_v25, %v3654_v32  ;;  %v3774_v23 = vld [vmem:[#allocation14 + $0x1660] sm:$0xff]  ;;  %v3763_v24 = vld [vmem:[#allocation14 + $0x1608] sm:$0xff] }
 0x801   : > { %13921 = vmatprep.subr.bf16.mxu0 %v15363_v37  ;;  %v15507_v37 = vcombine.high %v3643_v33, %v3655_v34  ;;  %v3775_v40 = vld [vmem:[#allocation14 + $0x1668] sm:$0xff] }
 0x803   : > { %13758 = vmatpush1.bf16.msra.mxu1 %v15360_v46  ;;  %v15504_v46 = vcombine.low %v3642_v25, %v3654_v32  ;;  %v3786_v25 = vld [vmem:[#allocation14 + $0x16c0] sm:$0xff] }
 0x804   : > { %13922 = vmatpush1.bf16.msra.mxu0 %v15362_v47  ;;  %13759 = vmatprep.subr.bf16.mxu1 %v15385_v48  ;;  %v15506_v47 = vcombine.low %v3643_v33, %v3655_v34  ;;  %v15529_v48 = vcombine.high %v3666_v39, %v3678_v41  ;;  %v3798_v32 = vld [vmem:[#allocation14 + $0x1720] sm:$0xff]  ;;  %v3787_v33 = vld [vmem:[#allocation14 + $0x16c8] sm:$0xff] }
 0x805   : > { %13923 = vmatprep.subr.bf16.mxu0 %v15387_v49  ;;  %v15531_v49 = vcombine.high %v3667_v44, %v3679_v45  ;;  %v3799_v34 = vld [vmem:[#allocation14 + $0x1728] sm:$0xff] }
 0x807   : > { %13760 = vmatpush1.bf16.msra.mxu1 %v15384_v61  ;;  %v15528_v61 = vcombine.low %v3666_v39, %v3678_v41  ;;  %v3810_v39 = vld [vmem:[#allocation14 + $0x1780] sm:$0xff] }
 0x808   : > { %13924 = vmatpush1.bf16.msra.mxu0 %v15386_v62  ;;  %13761 = vmatprep.subr.bf16.mxu1 %v15409_v0  ;;  %v15530_v62 = vcombine.low %v3667_v44, %v3679_v45  ;;  %v15553_v0 = vcombine.high %v3690_v51, %v3702_v55  ;;  %v3822_v41 = vld [vmem:[#allocation14 + $0x17e0] sm:$0xff]  ;;  %v3811_v44 = vld [vmem:[#allocation14 + $0x1788] sm:$0xff] }
 0x809   : > { %13925 = vmatprep.subr.bf16.mxu0 %v15411_v1  ;;  %v15555_v1 = vcombine.high %v3691_v56, %v3703_v60  ;;  %v3823_v45 = vld [vmem:[#allocation14 + $0x17e8] sm:$0xff] }
 0x80b   : > { %13762 = vmatpush1.bf16.msra.mxu1 %v15408_v9  ;;  %v15552_v9 = vcombine.low %v3690_v51, %v3702_v55  ;;  %v3834_v51 = vld [vmem:[#allocation14 + $0x1840] sm:$0xff] }
 0x80c   : > { %13926 = vmatpush1.bf16.msra.mxu0 %v15410_v10  ;;  %13763 = vmatprep.subr.bf16.mxu1 %v15433_v28  ;;  %v15554_v10 = vcombine.low %v3691_v56, %v3703_v60  ;;  %v15577_v28 = vcombine.high %v3714_v13, %v3726_v3  ;;  %v3846_v55 = vld [vmem:[#allocation14 + $0x18a0] sm:$0xff]  ;;  %v3835_v56 = vld [vmem:[#allocation14 + $0x1848] sm:$0xff] }
 0x80d   : > { %13927 = vmatprep.subr.bf16.mxu0 %v15435_v11  ;;  %v15579_v11 = vcombine.high %v3715_v4, %v3727_v8  ;;  %v3847_v60 = vld [vmem:[#allocation14 + $0x18a8] sm:$0xff] }
 0x80f   : > { %13764 = vmatpush1.bf16.msra.mxu1 %v15432_v18  ;;  %v15576_v18 = vcombine.low %v3714_v13, %v3726_v3  ;;  %v3858_v13 = vld [vmem:[#allocation14 + $0x1900] sm:$0xff] }
 0x810   : > { %13928 = vmatpush1.bf16.msra.mxu0 %v15434_v22  ;;  %13765 = vmatprep.subr.bf16.mxu1 %v15457_v19  ;;  %v15578_v22 = vcombine.low %v3715_v4, %v3727_v8  ;;  %v15601_v19 = vcombine.high %v3738_v15, %v3750_v14  ;;  %v3870_v3 = vld [vmem:[#allocation14 + $0x1960] sm:$0xff]  ;;  %v15696_v4 = vcombine.low %v3834_v51, %v3846_v55  ;;  %v3859_v8 = vld [vmem:[#allocation14 + $0x1908] sm:$0xff] }
 0x811   : > { %13929 = vmatprep.subr.bf16.mxu0 %v15459_v20  ;;  %v15603_v20 = vcombine.high %v3739_v16, %v3751_v17 }
 0x813   : > { %13766 = vmatpush1.bf16.msra.mxu1 %v15456_v26  ;;  %v15600_v26 = vcombine.low %v3738_v15, %v3750_v14  ;;  %v3894_v15 = vld [vmem:[#allocation14 + $0x1a20] sm:$0xff] }
 0x814   : > { %13930 = vmatpush1.bf16.msra.mxu0 %v15458_v27  ;;  %13767 = vmatprep.subr.bf16.mxu1 %v15481_v58  ;;  %v15602_v27 = vcombine.low %v3739_v16, %v3751_v17  ;;  %v15625_v58 = vcombine.high %v3762_v21, %v3774_v23  ;;  %v3883_v16 = vld [vmem:[#allocation14 + $0x19c8] sm:$0xff] }
 0x815   : > { %13931 = vmatprep.subr.bf16.mxu0 %v15483_v30  ;;  %v15627_v30 = vcombine.high %v3763_v24, %v3775_v40  ;;  %v3895_v17 = vld [vmem:[#allocation14 + $0x1a28] sm:$0xff] }
 0x817   : > { %13768 = vmatpush1.bf16.msra.mxu1 %v15480_v12  ;;  %v15624_v12 = vcombine.low %v3762_v21, %v3774_v23  ;;  %v3906_v21 = vld [vmem:[#allocation14 + $0x1a80] sm:$0xff] }
 0x818   : > { %13932 = vmatpush1.bf16.msra.mxu0 %v15482_v35  ;;  %13769 = vmatprep.subr.bf16.mxu1 %v15505_v36  ;;  %v15626_v35 = vcombine.low %v3763_v24, %v3775_v40  ;;  %v15649_v36 = vcombine.high %v3786_v25, %v3798_v32  ;;  %v3918_v23 = vld [vmem:[#allocation14 + $0x1ae0] sm:$0xff]  ;;  %v3907_v24 = vld [vmem:[#allocation14 + $0x1a88] sm:$0xff] }
 0x819   : > { %13933 = vmatprep.subr.bf16.mxu0 %v15507_v37  ;;  %v15651_v37 = vcombine.high %v3787_v33, %v3799_v34  ;;  %v3919_v40 = vld [vmem:[#allocation14 + $0x1ae8] sm:$0xff] }
 0x81b   : > { %13770 = vmatpush1.bf16.msra.mxu1 %v15504_v46  ;;  %v15648_v46 = vcombine.low %v3786_v25, %v3798_v32  ;;  %v3930_v25 = vld [vmem:[#allocation14 + $0x1b40] sm:$0xff] }
 0x81c   : > { %13934 = vmatpush1.bf16.msra.mxu0 %v15506_v47  ;;  %13771 = vmatprep.subr.bf16.mxu1 %v15529_v48  ;;  %v15650_v47 = vcombine.low %v3787_v33, %v3799_v34  ;;  %v15673_v48 = vcombine.high %v3810_v39, %v3822_v41  ;;  %v3942_v32 = vld [vmem:[#allocation14 + $0x1ba0] sm:$0xff]  ;;  %v3931_v33 = vld [vmem:[#allocation14 + $0x1b48] sm:$0xff] }
 0x81d   : > { %13935 = vmatprep.subr.bf16.mxu0 %v15531_v49  ;;  %v15675_v49 = vcombine.high %v3811_v44, %v3823_v45  ;;  %v3943_v34 = vld [vmem:[#allocation14 + $0x1ba8] sm:$0xff] }
 0x81f   : > { %13772 = vmatpush1.bf16.msra.mxu1 %v15528_v61  ;;  %v15672_v61 = vcombine.low %v3810_v39, %v3822_v41  ;;  %v3954_v39 = vld [vmem:[#allocation14 + $0x1c00] sm:$0xff] }
 0x820   : > { %13936 = vmatpush1.bf16.msra.mxu0 %v15530_v62  ;;  %13773 = vmatprep.subr.bf16.mxu1 %v15553_v0  ;;  %v15674_v62 = vcombine.low %v3811_v44, %v3823_v45  ;;  %v15697_v0 = vcombine.high %v3834_v51, %v3846_v55  ;;  %v3966_v41 = vld [vmem:[#allocation14 + $0x1c60] sm:$0xff]  ;;  %v3955_v44 = vld [vmem:[#allocation14 + $0x1c08] sm:$0xff] }
 0x821   : > { %13937 = vmatprep.subr.bf16.mxu0 %v15555_v1  ;;  %v15699_v1 = vcombine.high %v3835_v56, %v3847_v60  ;;  %v3967_v45 = vld [vmem:[#allocation14 + $0x1c68] sm:$0xff]  ;;  %v3978_v51 = vld [vmem:[#allocation14 + $0x1cc0] sm:$0xff] }
 0x822   : > { %v3990_v55 = vld [vmem:[#allocation14 + $0x1d20] sm:$0xff] }
 0x823   : > { %13774 = vmatpush1.bf16.msra.mxu1 %v15552_v9  ;;  %v3871_v9 = vld [vmem:[#allocation14 + $0x1968] sm:$0xff] }
 0x824   : > { %13938 = vmatpush1.bf16.msra.mxu0 %v15554_v10  ;;  %13775 = vmatprep.subr.bf16.mxu1 %v15577_v28  ;;  %v15698_v10 = vcombine.low %v3835_v56, %v3847_v60  ;;  %v15721_v28 = vcombine.high %v3858_v13, %v3870_v3  ;;  %v15723_v14 = vcombine.high %v3859_v8, %v3871_v9  ;;  %v3979_v56 = vld [vmem:[#allocation14 + $0x1cc8] sm:$0xff] }
 0x825   : > { %13939 = vmatprep.subr.bf16.mxu0 %v15579_v11  ;;  %v3882_v11 = vld [vmem:[#allocation14 + $0x19c0] sm:$0xff]  ;;  %v3991_v60 = vld [vmem:[#allocation14 + $0x1d28] sm:$0xff] }
 0x827   : > { %13776 = vmatpush1.bf16.msra.mxu1 %v15576_v18  ;;  %v15720_v18 = vcombine.low %v3858_v13, %v3870_v3  ;;  %v4002_v13 = vld [vmem:[#allocation14 + $0x1d80] sm:$0xff] }
 0x828   : > { %13940 = vmatpush1.bf16.msra.mxu0 %v15578_v22  ;;  %13777 = vmatprep.subr.bf16.mxu1 %v15601_v19  ;;  %v15722_v22 = vcombine.low %v3859_v8, %v3871_v9  ;;  %v15745_v19 = vcombine.high %v3882_v11, %v3894_v15  ;;  %v4014_v3 = vld [vmem:[#allocation14 + $0x1de0] sm:$0xff]  ;;  %v4015_v8 = vld [vmem:[#allocation14 + $0x1de8] sm:$0xff]  ;;  %v15840_v9 = vcombine.low %v3978_v51, %v3990_v55 }
 0x829   : > { %13941 = vmatprep.subr.bf16.mxu0 %v15603_v20  ;;  %v15747_v20 = vcombine.high %v3883_v16, %v3895_v17 }
 0x82b   : > { %13778 = vmatpush1.bf16.msra.mxu1 %v15600_v26  ;;  %v15744_v26 = vcombine.low %v3882_v11, %v3894_v15  ;;  %v4026_v15 = vld [vmem:[#allocation14 + $0x1e40] sm:$0xff] }
 0x82c   : > { %13942 = vmatpush1.bf16.msra.mxu0 %v15602_v27  ;;  %13779 = vmatprep.subr.bf16.mxu1 %v15625_v58  ;;  %v15746_v27 = vcombine.low %v3883_v16, %v3895_v17  ;;  %v15769_v58 = vcombine.high %v3906_v21, %v3918_v23  ;;  %v4027_v16 = vld [vmem:[#allocation14 + $0x1e48] sm:$0xff] }
 0x82d   : > { %13943 = vmatprep.subr.bf16.mxu0 %v15627_v30  ;;  %v15771_v30 = vcombine.high %v3907_v24, %v3919_v40  ;;  %v4039_v17 = vld [vmem:[#allocation14 + $0x1ea8] sm:$0xff] }
 0x82f   : > { %13780 = vmatpush1.bf16.msra.mxu1 %v15624_v12  ;;  %v15768_v12 = vcombine.low %v3906_v21, %v3918_v23  ;;  %v4050_v21 = vld [vmem:[#allocation14 + $0x1f00] sm:$0xff] }
 0x830   : > { %13944 = vmatpush1.bf16.msra.mxu0 %v15626_v35  ;;  %13781 = vmatprep.subr.bf16.mxu1 %v15649_v36  ;;  %v15770_v35 = vcombine.low %v3907_v24, %v3919_v40  ;;  %v15793_v36 = vcombine.high %v3930_v25, %v3942_v32  ;;  %v4062_v23 = vld [vmem:[#allocation14 + $0x1f60] sm:$0xff]  ;;  %v4051_v24 = vld [vmem:[#allocation14 + $0x1f08] sm:$0xff] }
 0x831   : > { %13945 = vmatprep.subr.bf16.mxu0 %v15651_v37  ;;  %v15795_v37 = vcombine.high %v3931_v33, %v3943_v34  ;;  %v4063_v40 = vld [vmem:[#allocation14 + $0x1f68] sm:$0xff] }
 0x833   : > { %13782 = vmatpush1.bf16.msra.mxu1 %v15648_v46  ;;  %v15792_v46 = vcombine.low %v3930_v25, %v3942_v32  ;;  %v4074_v25 = vld [vmem:[#allocation14 + $0x1fc0] sm:$0xff] }
 0x834   : > { %13946 = vmatpush1.bf16.msra.mxu0 %v15650_v47  ;;  %13783 = vmatprep.subr.bf16.mxu1 %v15673_v48  ;;  %v15794_v47 = vcombine.low %v3931_v33, %v3943_v34  ;;  %v15817_v48 = vcombine.high %v3954_v39, %v3966_v41  ;;  %v4086_v32 = vld [vmem:[#allocation14 + $0x2020] sm:$0xff]  ;;  %v4075_v33 = vld [vmem:[#allocation14 + $0x1fc8] sm:$0xff] }
 0x835   : > { %13947 = vmatprep.subr.bf16.mxu0 %v15675_v49  ;;  %v15819_v49 = vcombine.high %v3955_v44, %v3967_v45  ;;  %v4087_v34 = vld [vmem:[#allocation14 + $0x2028] sm:$0xff] }
 0x837   : > { %13784 = vmatpush1.bf16.msra.mxu1 %v15672_v61  ;;  %v15816_v61 = vcombine.low %v3954_v39, %v3966_v41  ;;  %v4098_v39 = vld [vmem:[#allocation14 + $0x2080] sm:$0xff] }
 0x838   : > { %13948 = vmatpush1.bf16.msra.mxu0 %v15674_v62  ;;  %13794 = vmatprep.subr.bf16.mxu1 %v15697_v0  ;;  %v15818_v62 = vcombine.low %v3955_v44, %v3967_v45  ;;  %v15841_v0 = vcombine.high %v3978_v51, %v3990_v55  ;;  %v4110_v41 = vld [vmem:[#allocation14 + $0x20e0] sm:$0xff]  ;;  %v4099_v44 = vld [vmem:[#allocation14 + $0x2088] sm:$0xff] }
 0x839   : > { %13958 = vmatprep.subr.bf16.mxu0 %v15699_v1  ;;  %v15843_v1 = vcombine.high %v3979_v56, %v3991_v60  ;;  %v4111_v45 = vld [vmem:[#allocation14 + $0x20e8] sm:$0xff]  ;;  %v4122_v51 = vld [vmem:[#allocation14 + $0x2140] sm:$0xff] }
 0x83a   : > { %13786 = vmatmul.mubr.bf16.vlgmr.msra.gmra.mrb[28].mxu1 %v17714_v7  ;;  %v4134_v55 = vld [vmem:[#allocation14 + $0x21a0] sm:$0xff] }
 0x83b   : > { %13950 = vmatmul.mubr.bf16.vlgmr.msra.gmra.mrb[32].mxu0 %v17714_v7  ;;  %13795 = vmatpush1.bf16.msra.mxu1 %v15696_v4  ;;  %v4003_v4 = vld [vmem:[#allocation14 + $0x1d88] sm:$0xff] }
 0x83c   : > { %13826 = vmatprep.mubr.bf16.mxu1 %v17735_v57  ;;  %13959 = vmatpush1.bf16.msra.mxu0 %v15698_v10  ;;  %v15842_v10 = vcombine.low %v3979_v56, %v3991_v60  ;;  %v15867_v11 = vcombine.high %v4003_v4, %v4015_v8  ;;  %v4123_v56 = vld [vmem:[#allocation14 + $0x2148] sm:$0xff] }
 0x83d   : > { %13990 = vmatprep.mubr.bf16.mxu0 %v17735_v57  ;;  %13796 = vmatprep.subr.bf16.mxu1 %v15721_v28  ;;  %v15865_v28 = vcombine.high %v4002_v13, %v4014_v3  ;;  %v4135_v60 = vld [vmem:[#allocation14 + $0x21a8] sm:$0xff] }
 0x83e   : > { %13960 = vmatprep.subr.bf16.mxu0 %v15723_v14  ;;  %v4038_v14 = vld [vmem:[#allocation14 + $0x1ea0] sm:$0xff] }
 0x83f   : > { %13797 = vmatpush1.bf16.msra.mxu1 %v15720_v18  ;;  %v15864_v18 = vcombine.low %v4002_v13, %v4014_v3  ;;  %v4146_v13 = vld [vmem:[#allocation14 + $0x2200] sm:$0xff] }
 0x840   : > { %13961 = vmatpush1.bf16.msra.mxu0 %v15722_v22  ;;  %13798 = vmatprep.subr.bf16.mxu1 %v15745_v19  ;;  %v15866_v22 = vcombine.low %v4003_v4, %v4015_v8  ;;  %v15889_v19 = vcombine.high %v4026_v15, %v4038_v14  ;;  %v4158_v3 = vld [vmem:[#allocation14 + $0x2260] sm:$0xff]  ;;  %v4147_v4 = vld [vmem:[#allocation14 + $0x2208] sm:$0xff] }
 0x841   : > { %13962 = vmatprep.subr.bf16.mxu0 %v15747_v20  ;;  %v15891_v20 = vcombine.high %v4027_v16, %v4039_v17  ;;  %v4159_v8 = vld [vmem:[#allocation14 + $0x2268] sm:$0xff] }
 0x843   : > { %13799 = vmatpush1.bf16.msra.mxu1 %v15744_v26  ;;  %v15888_v26 = vcombine.low %v4026_v15, %v4038_v14  ;;  %v4170_v15 = vld [vmem:[#allocation14 + $0x22c0] sm:$0xff] }
 0x844   : > { %13963 = vmatpush1.bf16.msra.mxu0 %v15746_v27  ;;  %13800 = vmatprep.subr.bf16.mxu1 %v15769_v58  ;;  %v15890_v27 = vcombine.low %v4027_v16, %v4039_v17  ;;  %v15913_v58 = vcombine.high %v4050_v21, %v4062_v23  ;;  %v4182_v14 = vld [vmem:[#allocation14 + $0x2320] sm:$0xff]  ;;  %v4171_v16 = vld [vmem:[#allocation14 + $0x22c8] sm:$0xff] }
 0x845   : > { %13964 = vmatprep.subr.bf16.mxu0 %v15771_v30  ;;  %v15915_v30 = vcombine.high %v4051_v24, %v4063_v40  ;;  %v4183_v17 = vld [vmem:[#allocation14 + $0x2328] sm:$0xff] }
 0x847   : > { %13801 = vmatpush1.bf16.msra.mxu1 %v15768_v12  ;;  %v15912_v12 = vcombine.low %v4050_v21, %v4062_v23  ;;  %v4194_v21 = vld [vmem:[#allocation14 + $0x2380] sm:$0xff] }
 0x848   : > { %13965 = vmatpush1.bf16.msra.mxu0 %v15770_v35  ;;  %13802 = vmatprep.subr.bf16.mxu1 %v15793_v36  ;;  %v15914_v35 = vcombine.low %v4051_v24, %v4063_v40  ;;  %v15937_v36 = vcombine.high %v4074_v25, %v4086_v32  ;;  %v4206_v23 = vld [vmem:[#allocation14 + $0x23e0] sm:$0xff]  ;;  %v4195_v24 = vld [vmem:[#allocation14 + $0x2388] sm:$0xff] }
 0x849   : > { %13966 = vmatprep.subr.bf16.mxu0 %v15795_v37  ;;  %v15939_v37 = vcombine.high %v4075_v33, %v4087_v34  ;;  %v4207_v40 = vld [vmem:[#allocation14 + $0x23e8] sm:$0xff] }
 0x84b   : > { %13803 = vmatpush1.bf16.msra.mxu1 %v15792_v46  ;;  %v15936_v46 = vcombine.low %v4074_v25, %v4086_v32  ;;  %v4218_v25 = vld [vmem:[#allocation14 + $0x2440] sm:$0xff] }
 0x84c   : > { %13967 = vmatpush1.bf16.msra.mxu0 %v15794_v47  ;;  %13804 = vmatprep.subr.bf16.mxu1 %v15817_v48  ;;  %v15938_v47 = vcombine.low %v4075_v33, %v4087_v34  ;;  %v15961_v48 = vcombine.high %v4098_v39, %v4110_v41  ;;  %v4230_v32 = vld [vmem:[#allocation14 + $0x24a0] sm:$0xff]  ;;  %v4219_v33 = vld [vmem:[#allocation14 + $0x2448] sm:$0xff] }
 0x84d   : > { %13968 = vmatprep.subr.bf16.mxu0 %v15819_v49  ;;  %v15963_v49 = vcombine.high %v4099_v44, %v4111_v45  ;;  %v4231_v34 = vld [vmem:[#allocation14 + $0x24a8] sm:$0xff] }
 0x84f   : > { %13805 = vmatpush1.bf16.msra.mxu1 %v15816_v61  ;;  %v15960_v61 = vcombine.low %v4098_v39, %v4110_v41  ;;  %v4242_v39 = vld [vmem:[#allocation14 + $0x2500] sm:$0xff] }
 0x850   : > { %13969 = vmatpush1.bf16.msra.mxu0 %v15818_v62  ;;  %13806 = vmatprep.subr.bf16.mxu1 %v15841_v0  ;;  %v15962_v62 = vcombine.low %v4099_v44, %v4111_v45  ;;  %v15985_v0 = vcombine.high %v4122_v51, %v4134_v55  ;;  %v4254_v41 = vld [vmem:[#allocation14 + $0x2560] sm:$0xff]  ;;  %v16080_v44 = vcombine.low %v4218_v25, %v4230_v32  ;;  %v4243_v45 = vld [vmem:[#allocation14 + $0x2508] sm:$0xff] }
 0x851   : > { %13970 = vmatprep.subr.bf16.mxu0 %v15843_v1  ;;  %v15987_v1 = vcombine.high %v4123_v56, %v4135_v60 }
 0x853   : > { %13807 = vmatpush1.bf16.msra.mxu1 %v15840_v9  ;;  %v15984_v9 = vcombine.low %v4122_v51, %v4134_v55  ;;  %v4278_v51 = vld [vmem:[#allocation14 + $0x2620] sm:$0xff] }
 0x854   : > { %13971 = vmatpush1.bf16.msra.mxu0 %v15842_v10  ;;  %13808 = vmatprep.subr.bf16.mxu1 %v15865_v28  ;;  %v15986_v10 = vcombine.low %v4123_v56, %v4135_v60  ;;  %v16009_v28 = vcombine.high %v4146_v13, %v4158_v3  ;;  %v4267_v56 = vld [vmem:[#allocation14 + $0x25c8] sm:$0xff] }
 0x855   : > { %13972 = vmatprep.subr.bf16.mxu0 %v15867_v11  ;;  %v16011_v11 = vcombine.high %v4147_v4, %v4159_v8  ;;  %v4279_v60 = vld [vmem:[#allocation14 + $0x2628] sm:$0xff] }
 0x857   : > { %13809 = vmatpush1.bf16.msra.mxu1 %v15864_v18  ;;  %v16008_v18 = vcombine.low %v4146_v13, %v4158_v3  ;;  %v4290_v13 = vld [vmem:[#allocation14 + $0x2680] sm:$0xff] }
 0x858   : > { %13973 = vmatpush1.bf16.msra.mxu0 %v15866_v22  ;;  %13810 = vmatprep.subr.bf16.mxu1 %v15889_v19  ;;  %v16010_v22 = vcombine.low %v4147_v4, %v4159_v8  ;;  %v16033_v19 = vcombine.high %v4170_v15, %v4182_v14  ;;  %v4302_v3 = vld [vmem:[#allocation14 + $0x26e0] sm:$0xff]  ;;  %v4291_v4 = vld [vmem:[#allocation14 + $0x2688] sm:$0xff] }
 0x859   : > { %13974 = vmatprep.subr.bf16.mxu0 %v15891_v20  ;;  %v16035_v20 = vcombine.high %v4171_v16, %v4183_v17  ;;  %v4303_v8 = vld [vmem:[#allocation14 + $0x26e8] sm:$0xff] }
 0x85b   : > { %13811 = vmatpush1.bf16.msra.mxu1 %v15888_v26  ;;  %v16032_v26 = vcombine.low %v4170_v15, %v4182_v14  ;;  %v4314_v15 = vld [vmem:[#allocation14 + $0x2740] sm:$0xff] }
 0x85c   : > { %13975 = vmatpush1.bf16.msra.mxu0 %v15890_v27  ;;  %13812 = vmatprep.subr.bf16.mxu1 %v15913_v58  ;;  %v16034_v27 = vcombine.low %v4171_v16, %v4183_v17  ;;  %v16057_v58 = vcombine.high %v4194_v21, %v4206_v23  ;;  %v4326_v14 = vld [vmem:[#allocation14 + $0x27a0] sm:$0xff]  ;;  %v4315_v16 = vld [vmem:[#allocation14 + $0x2748] sm:$0xff] }
 0x85d   : > { %13976 = vmatprep.subr.bf16.mxu0 %v15915_v30  ;;  %v16059_v30 = vcombine.high %v4195_v24, %v4207_v40  ;;  %v4327_v17 = vld [vmem:[#allocation14 + $0x27a8] sm:$0xff] }
 0x85f   : > { %13813 = vmatpush1.bf16.msra.mxu1 %v15912_v12  ;;  %v16056_v12 = vcombine.low %v4194_v21, %v4206_v23  ;;  %v4338_v21 = vld [vmem:[#allocation14 + $0x2800] sm:$0xff] }
 0x860   : > { %13977 = vmatpush1.bf16.msra.mxu0 %v15914_v35  ;;  %13814 = vmatprep.subr.bf16.mxu1 %v15937_v36  ;;  %v16058_v35 = vcombine.low %v4195_v24, %v4207_v40  ;;  %v16081_v36 = vcombine.high %v4218_v25, %v4230_v32  ;;  %v4350_v23 = vld [vmem:[#allocation14 + $0x2860] sm:$0xff]  ;;  %v4339_v24 = vld [vmem:[#allocation14 + $0x2808] sm:$0xff] }
 0x861   : > { %13978 = vmatprep.subr.bf16.mxu0 %v15939_v37  ;;  %v16083_v37 = vcombine.high %v4219_v33, %v4231_v34  ;;  %v4351_v40 = vld [vmem:[#allocation14 + $0x2868] sm:$0xff]  ;;  %v4362_v25 = vld [vmem:[#allocation14 + $0x28c0] sm:$0xff] }
 0x862   : > { %v4374_v32 = vld [vmem:[#allocation14 + $0x2920] sm:$0xff] }
 0x863   : > { %13815 = vmatpush1.bf16.msra.mxu1 %v15936_v46  ;;  %v4255_v46 = vld [vmem:[#allocation14 + $0x2568] sm:$0xff] }
 0x864   : > { %13979 = vmatpush1.bf16.msra.mxu0 %v15938_v47  ;;  %13816 = vmatprep.subr.bf16.mxu1 %v15961_v48  ;;  %v16082_v47 = vcombine.low %v4219_v33, %v4231_v34  ;;  %v16105_v48 = vcombine.high %v4242_v39, %v4254_v41  ;;  %v16107_v55 = vcombine.high %v4243_v45, %v4255_v46  ;;  %v16903_v33 = vld [vmem:[#allocation16 + $0x8] sm:$0xff] }
 0x865   : > { %13980 = vmatprep.subr.bf16.mxu0 %v15963_v49  ;;  %v4266_v49 = vld [vmem:[#allocation14 + $0x25c0] sm:$0xff]  ;;  %v4651_v34 = vrot.slane %v16903_v33, %v17719_v63 }
 0x867   : > { %13817 = vmatpush1.bf16.msra.mxu1 %v15960_v61  ;;  %v16104_v61 = vcombine.low %v4242_v39, %v4254_v41  ;;  %v16200_v39 = vcombine.low %v4338_v21, %v4350_v23  ;;  %v4663_v41 = vrot.slane %v16903_v33, %v17725_v5 }
 0x868   : > { %13981 = vmatpush1.bf16.msra.mxu0 %v15962_v62  ;;  %13818 = vmatprep.subr.bf16.mxu1 %v15985_v0  ;;  %v16106_v62 = vcombine.low %v4243_v45, %v4255_v46  ;;  %v16129_v0 = vcombine.high %v4266_v49, %v4278_v51  ;;  %v16225_v45 = vcombine.high %v4362_v25, %v4374_v32 }
 0x869   : > { %13982 = vmatprep.subr.bf16.mxu0 %v15987_v1  ;;  %v16131_v1 = vcombine.high %v4267_v56, %v4279_v60 }
 0x86b   : > { %13819 = vmatpush1.bf16.msra.mxu1 %v15984_v9  ;;  %v16128_v9 = vcombine.low %v4266_v49, %v4278_v51  ;;  %v4398_v49 = vld [vmem:[#allocation14 + $0x29e0] sm:$0xff] }
 0x86c   : > { %13983 = vmatpush1.bf16.msra.mxu0 %v15986_v10  ;;  %13820 = vmatprep.subr.bf16.mxu1 %v16009_v28  ;;  %v16130_v10 = vcombine.low %v4267_v56, %v4279_v60  ;;  %v16153_v28 = vcombine.high %v4290_v13, %v4302_v3  ;;  %v4387_v60 = vld [vmem:[#allocation14 + $0x2988] sm:$0xff] }
 0x86d   : > { %13984 = vmatprep.subr.bf16.mxu0 %v16011_v11  ;;  %v16155_v11 = vcombine.high %v4291_v4, %v4303_v8 }
 0x86f   : > { %13821 = vmatpush1.bf16.msra.mxu1 %v16008_v18  ;;  %v16152_v18 = vcombine.low %v4290_v13, %v4302_v3  ;;  %v16224_v3 = vcombine.low %v4362_v25, %v4374_v32  ;;  %v4458_v32 = vld [vmem:[#allocation14 + $0x2bc0] sm:$0xff] }
 0x870   : > { %13985 = vmatpush1.bf16.msra.mxu0 %v16010_v22  ;;  %13822 = vmatprep.subr.bf16.mxu1 %v16033_v19  ;;  %v16154_v22 = vcombine.low %v4291_v4, %v4303_v8  ;;  %v16177_v19 = vcombine.high %v4314_v15, %v4326_v14 }
 0x871   : > { %13986 = vmatprep.subr.bf16.mxu0 %v16035_v20  ;;  %v16179_v20 = vcombine.high %v4315_v16, %v4327_v17 }
 0x873   : > { %13823 = vmatpush1.bf16.msra.mxu1 %v16032_v26  ;;  %v16176_v26 = vcombine.low %v4314_v15, %v4326_v14  ;;  %v4410_v14 = vld [vmem:[#allocation14 + $0x2a40] sm:$0xff] }
 0x874   : > { %13987 = vmatpush1.bf16.msra.mxu0 %v16034_v27  ;;  %13824 = vmatprep.subr.bf16.mxu1 %v16057_v58  ;;  %v16178_v27 = vcombine.low %v4315_v16, %v4327_v17  ;;  %v16201_v58 = vcombine.high %v4338_v21, %v4350_v23  ;;  %v4422_v16 = vld [vmem:[#allocation14 + $0x2aa0] sm:$0xff]  ;;  %v4411_v17 = vld [vmem:[#allocation14 + $0x2a48] sm:$0xff] }
 0x875   : > { %13988 = vmatprep.subr.bf16.mxu0 %v16059_v30  ;;  %v16203_v30 = vcombine.high %v4339_v24, %v4351_v40  ;;  %v4434_v23 = vld [vmem:[#allocation14 + $0x2b00] sm:$0xff] }
 0x877   : > { %13825 = vmatpush1.bf16.msra.mxu1 %v16056_v12  ;;  %v4363_v12 = vld [vmem:[#allocation14 + $0x28c8] sm:$0xff] }
 0x878   : > { %13989 = vmatpush1.bf16.msra.mxu0 %v16058_v35  ;;  %13835 = vmatprep.subr.bf16.mxu1 %v16081_v36  ;;  %v4375_v35 = vld [vmem:[#allocation14 + $0x2928] sm:$0xff]  ;;  %v4659_v36 = vrot.slane %v16903_v33, %v17748_v54 }
 0x879   : > { %13999 = vmatprep.subr.bf16.mxu0 %v16083_v37  ;;  %v4655_v37 = vrot.slane %v16903_v33, %v17722_v2  ;;  %v4470_v33 = vld [vmem:[#allocation14 + $0x2c20] sm:$0xff] }
 0x87a   : > { %13827 = vmatmul.mubr.bf16.vlgmr.msra.gmra.mrb[28].mxu1 %v17737_v52 }
 0x87b   : > { %13991 = vmatmul.mubr.bf16.vlgmr.msra.gmra.mrb[32].mxu0 %v17737_v52  ;;  %13836 = vmatpush1.bf16.msra.mxu1 %v16080_v44  ;;  %v16202_v44 = vcombine.low %v4339_v24, %v4351_v40  ;;  %v4446_v24 = vld [vmem:[#allocation14 + $0x2b60] sm:$0xff]  ;;  %v4435_v40 = vld [vmem:[#allocation14 + $0x2b08] sm:$0xff] }
 0x87c   : > { %13867 = vmatprep.mubr.bf16.mxu1 %v17741_v6  ;;  %14000 = vmatpush1.bf16.msra.mxu0 %v16082_v47  ;;  %v16227_v47 = vcombine.high %v4363_v12, %v4375_v35 }
 0x87d   : > { %14031 = vmatprep.mubr.bf16.mxu0 %v17741_v6  ;;  %13837 = vmatprep.subr.bf16.mxu1 %v16105_v48  ;;  %v4386_v48 = vld [vmem:[#allocation14 + $0x2980] sm:$0xff] }
 0x87e   : > { %14001 = vmatprep.subr.bf16.mxu0 %v16107_v55 }
 0x87f   : > { %13838 = vmatpush1.bf16.msra.mxu1 %v16104_v61  ;;  %v4399_v61 = vld [vmem:[#allocation14 + $0x29e8] sm:$0xff] }
 0x880   : > { %14002 = vmatpush1.bf16.msra.mxu0 %v16106_v62  ;;  %13839 = vmatprep.subr.bf16.mxu1 %v16129_v0  ;;  %v16251_v15 = vcombine.high %v4387_v60, %v4399_v61 }
 0x881   : > { %14003 = vmatprep.subr.bf16.mxu0 %v16131_v1 }
 0x883   : > { %13840 = vmatpush1.bf16.msra.mxu1 %v16128_v9 }
 0x884   : > { %14004 = vmatpush1.bf16.msra.mxu0 %v16130_v10  ;;  %13841 = vmatprep.subr.bf16.mxu1 %v16153_v28  ;;  %v16226_v10 = vcombine.low %v4363_v12, %v4375_v35  ;;  %v16249_v28 = vcombine.high %v4386_v48, %v4398_v49  ;;  %v4471_v12 = vld [vmem:[#allocation14 + $0x2c28] sm:$0xff]  ;;  %v16296_v35 = vcombine.low %v4434_v23, %v4446_v24 }
 0x885   : > { %14005 = vmatprep.subr.bf16.mxu0 %v16155_v11 }
 0x887   : > { %13842 = vmatpush1.bf16.msra.mxu1 %v16152_v18  ;;  %v4423_v18 = vld [vmem:[#allocation14 + $0x2aa8] sm:$0xff] }
 0x888   : > { %14006 = vmatpush1.bf16.msra.mxu0 %v16154_v22  ;;  %13843 = vmatprep.subr.bf16.mxu1 %v16177_v19  ;;  %v16248_v22 = vcombine.low %v4386_v48, %v4398_v49  ;;  %v16250_v19 = vcombine.low %v4387_v60, %v4399_v61  ;;  %v16275_v21 = vcombine.high %v4411_v17, %v4423_v18  ;;  %v4507_v60 = vld [vmem:[#allocation14 + $0x2d48] sm:$0xff] }
 0x889   : > { %14007 = vmatprep.subr.bf16.mxu0 %v16179_v20  ;;  %v16273_v20 = vcombine.high %v4410_v14, %v4422_v16  ;;  %v4519_v61 = vld [vmem:[#allocation14 + $0x2da8] sm:$0xff] }
 0x88b   : > { %13844 = vmatpush1.bf16.msra.mxu1 %v16176_v26  ;;  %v4447_v26 = vld [vmem:[#allocation14 + $0x2b68] sm:$0xff] }
 0x88c   : > { %14008 = vmatpush1.bf16.msra.mxu0 %v16178_v27  ;;  %13845 = vmatprep.subr.bf16.mxu1 %v16201_v58  ;;  %v16272_v27 = vcombine.low %v4410_v14, %v4422_v16  ;;  %v16274_v58 = vcombine.low %v4411_v17, %v4423_v18  ;;  %v16299_v25 = vcombine.high %v4435_v40, %v4447_v26  ;;  %v4554_v14 = vld [vmem:[#allocation14 + $0x2ec0] sm:$0xff]  ;;  %v4555_v17 = vld [vmem:[#allocation14 + $0x2ec8] sm:$0xff] }
 0x88d   : > { %v13541_v46 = vpop.f32.mrb[24].mxu1  ;;  %14009 = vmatprep.subr.bf16.mxu0 %v16203_v30  ;;  %v16297_v30 = vcombine.high %v4434_v23, %v4446_v24  ;;  %v4566_v16 = vld [vmem:[#allocation14 + $0x2f20] sm:$0xff]  ;;  %v4567_v18 = vld [vmem:[#allocation14 + $0x2f28] sm:$0xff] }
 0x88e   : > { %v16471_v51 = vadd.f32 %v13541_v46, %v4651_v34  ;;  %v13705_v55 = vpop.f32.mrb[28].mxu0  ;;  %v13543_v56 = vpop.f32.mrb[25].mxu1  ;;  %v4459_v34 = vld [vmem:[#allocation14 + $0x2bc8] sm:$0xff]  ;;  %v4578_v23 = vld [vmem:[#allocation14 + $0x2f80] sm:$0xff] }
 0x88f   : > { %v16473_v62 = vadd.f32 %v13705_v55, %v4659_v36  ;;  %v16472_v0 = vadd.f32 %v13543_v56, %v4655_v37  ;;  %v13707_v1 = vpop.f32.mrb[29].mxu0  ;;  %v13545_v13 = vpop.f32.mrb[26].mxu1  ;;  %13846 = vmatpush1.bf16.msra.mxu1 %v16200_v39  ;;  %v16298_v36 = vcombine.low %v4435_v40, %v4447_v26  ;;  %v16321_v37 = vcombine.high %v4458_v32, %v4470_v33  ;;  %v4495_v46 = vld [vmem:[#allocation14 + $0x2ce8] sm:$0xff]  ;;  %v4506_v55 = vld [vmem:[#allocation14 + $0x2d40] sm:$0xff] }
 0x890   : > { %14380 = vst [vmem:[%s17777_s22 + $0x60] sm:$0xff] %v16471_v51  ;;  %v16474_v4 = vadd.f32 %v13707_v1, %v4663_v41  ;;  %v13709_v8 = vpop.f32.mrb[30].mxu0  ;;  %14010 = vmatpush1.bf16.msra.mxu0 %v16202_v44  ;;  %v13546_v9 = vpop.f32.mrb[27].mxu1  ;;  %13847 = vmatprep.subr.bf16.mxu1 %v16225_v45  ;;  %v16323_v39 = vcombine.high %v4459_v34, %v4471_v12  ;;  %v4482_v41 = vld [vmem:[#allocation14 + $0x2c80] sm:$0xff]  ;;  %v4483_v45 = vld [vmem:[#allocation14 + $0x2c88] sm:$0xff] }
 0x891   : > { %14382 = vst [vmem:[%s17777_s22 + $0x70] sm:$0xff] %v16473_v62  ;;  %14381 = vst [vmem:[%s17777_s22 + $0x68] sm:$0xff] %v16472_v0  ;;  %v13710_v11 = vpop.f32.mrb[31].mxu0  ;;  %14011 = vmatprep.subr.bf16.mxu0 %v16227_v47  ;;  %v4494_v44 = vld [vmem:[#allocation14 + $0x2ce0] sm:$0xff]  ;;  %v16320_v47 = vcombine.low %v4458_v32, %v4470_v33  ;;  %v16322_v48 = vcombine.low %v4459_v34, %v4471_v12  ;;  %v16347_v51 = vcombine.high %v4483_v45, %v4495_v46  ;;  %v4531_v8 = vld [vmem:[#allocation14 + $0x2e08] sm:$0xff] }
 0x892   : > { %14383 = vst [vmem:[%s17777_s22 + $0x78] sm:$0xff] %v16474_v4  ;;  %v16345_v49 = vcombine.high %v4482_v41, %v4494_v44  ;;  %v4518_v56 = vld [vmem:[#allocation14 + $0x2da0] sm:$0xff]  ;;  %v16344_v62 = vcombine.low %v4482_v41, %v4494_v44  ;;  %v16346_v0 = vcombine.low %v4483_v45, %v4495_v46  ;;  %v16371_v13 = vcombine.high %v4507_v60, %v4519_v61  ;;  %v4543_v9 = vld [vmem:[#allocation14 + $0x2e68] sm:$0xff]  ;;  %v3068_v32 = vld [vmem:[#allocation14 + $0x50] sm:$0xff] }
 0x893   : > { %13848 = vmatpush1.bf16.msra.mxu1 %v16224_v3  ;;  %v16369_v1 = vcombine.high %v4506_v55, %v4518_v56  ;;  %v4530_v3 = vld [vmem:[#allocation14 + $0x2e00] sm:$0xff]  ;;  %v4579_v40 = vld [vmem:[#allocation14 + $0x2f88] sm:$0xff]  ;;  %v3080_v33 = vld [vmem:[#allocation14 + $0xb0] sm:$0xff] }
 0x894   : > { %14012 = vmatpush1.bf16.msra.mxu0 %v16226_v10  ;;  %13849 = vmatprep.subr.bf16.mxu1 %v16249_v28  ;;  %v4542_v4 = vld [vmem:[#allocation14 + $0x2e60] sm:$0xff]  ;;  %v16368_v10 = vcombine.low %v4506_v55, %v4518_v56  ;;  %v16370_v28 = vcombine.low %v4507_v60, %v4519_v61  ;;  %v4591_v26 = vld [vmem:[#allocation14 + $0x2fe8] sm:$0xff]  ;;  %v3069_v34 = vld [vmem:[#allocation14 + $0x58] sm:$0xff]  ;;  %v14932_v45 = vcombine.low %v3068_v32, %v3080_v33 }
 0x895   : > { %14013 = vmatprep.subr.bf16.mxu0 %v16251_v15  ;;  %v16393_v11 = vcombine.high %v4530_v3, %v4542_v4  ;;  %v16395_v15 = vcombine.high %v4531_v8, %v4543_v9  ;;  %v4590_v24 = vld [vmem:[#allocation14 + $0x2fe0] sm:$0xff]  ;;  %v3081_v12 = vld [vmem:[#allocation14 + $0xb8] sm:$0xff]  ;;  %v3092_v41 = vld [vmem:[#allocation14 + $0x110] sm:$0xff] }
 0x896   : > { %v3104_v44 = vld [vmem:[#allocation14 + $0x170] sm:$0xff]  ;;  %v3093_v46 = vld [vmem:[#allocation14 + $0x118] sm:$0xff] }
 0x897   : > { %13850 = vmatpush1.bf16.msra.mxu1 %v16248_v22  ;;  %v16392_v22 = vcombine.low %v4530_v3, %v4542_v4  ;;  %v3128_v55 = vld [vmem:[#allocation14 + $0x230] sm:$0xff]  ;;  %v3117_v60 = vld [vmem:[#allocation14 + $0x1d8] sm:$0xff] }
 0x898   : > { %14014 = vmatpush1.bf16.msra.mxu0 %v16250_v19  ;;  %13851 = vmatprep.subr.bf16.mxu1 %v16273_v20  ;;  %v16394_v19 = vcombine.low %v4531_v8, %v4543_v9  ;;  %v16417_v20 = vcombine.high %v4554_v14, %v4566_v16  ;;  %v3129_v61 = vld [vmem:[#allocation14 + $0x238] sm:$0xff]  ;;  %v3140_v3 = vld [vmem:[#allocation14 + $0x290] sm:$0xff] }
 0x899   : > { %14015 = vmatprep.subr.bf16.mxu0 %v16275_v21  ;;  %v16419_v21 = vcombine.high %v4555_v17, %v4567_v18  ;;  %v3152_v4 = vld [vmem:[#allocation14 + $0x2f0] sm:$0xff]  ;;  %v3141_v8 = vld [vmem:[#allocation14 + $0x298] sm:$0xff] }
 0x89a   : > { %v3153_v9 = vld [vmem:[#allocation14 + $0x2f8] sm:$0xff] }
 0x89b   : > { %13852 = vmatpush1.bf16.msra.mxu1 %v16272_v27  ;;  %v16416_v27 = vcombine.low %v4554_v14, %v4566_v16  ;;  %v3164_v14 = vld [vmem:[#allocation14 + $0x350] sm:$0xff] }
 0x89c   : > { %14016 = vmatpush1.bf16.msra.mxu0 %v16274_v58  ;;  %13853 = vmatprep.subr.bf16.mxu1 %v16297_v30  ;;  %v16418_v58 = vcombine.low %v4555_v17, %v4567_v18  ;;  %v16441_v30 = vcombine.high %v4578_v23, %v4590_v24  ;;  %v3176_v16 = vld [vmem:[#allocation14 + $0x3b0] sm:$0xff]  ;;  %v3165_v17 = vld [vmem:[#allocation14 + $0x358] sm:$0xff] }
 0x89d   : > { %14017 = vmatprep.subr.bf16.mxu0 %v16299_v25  ;;  %v16443_v25 = vcombine.high %v4579_v40, %v4591_v26  ;;  %v3177_v18 = vld [vmem:[#allocation14 + $0x3b8] sm:$0xff] }
 0x89f   : > { %13854 = vmatpush1.bf16.msra.mxu1 %v16296_v35  ;;  %v16440_v35 = vcombine.low %v4578_v23, %v4590_v24  ;;  %v3200_v23 = vld [vmem:[#allocation14 + $0x470] sm:$0xff]  ;;  %v3189_v24 = vld [vmem:[#allocation14 + $0x418] sm:$0xff] }
 0x8a0   : > { %14018 = vmatpush1.bf16.msra.mxu0 %v16298_v36  ;;  %13855 = vmatprep.subr.bf16.mxu1 %v16321_v37  ;;  %v16442_v36 = vcombine.low %v4579_v40, %v4591_v26  ;;  %v14933_v37 = vcombine.high %v3068_v32, %v3080_v33  ;;  %v3201_v40 = vld [vmem:[#allocation14 + $0x478] sm:$0xff]  ;;  %v15028_v26 = vcombine.low %v3164_v14, %v3176_v16  ;;  %v3224_v32 = vld [vmem:[#allocation14 + $0x530] sm:$0xff] }
 0x8a1   : > { %14019 = vmatprep.subr.bf16.mxu0 %v16323_v39  ;;  %v14935_v39 = vcombine.high %v3069_v34, %v3081_v12  ;;  %v3213_v33 = vld [vmem:[#allocation14 + $0x4d8] sm:$0xff] }
 0x8a3   : > { %13856 = vmatpush1.bf16.msra.mxu1 %v16320_v47  ;;  %v3105_v47 = vld [vmem:[#allocation14 + $0x178] sm:$0xff] }
 0x8a4   : > { %14020 = vmatpush1.bf16.msra.mxu0 %v16322_v48  ;;  %13857 = vmatprep.subr.bf16.mxu1 %v16345_v49  ;;  %v14934_v48 = vcombine.low %v3069_v34, %v3081_v12  ;;  %v14957_v49 = vcombine.high %v3092_v41, %v3104_v44  ;;  %v14959_v56 = vcombine.high %v3093_v46, %v3105_v47  ;;  %v3225_v34 = vld [vmem:[#allocation14 + $0x538] sm:$0xff] }
 0x8a5   : > { %14021 = vmatprep.subr.bf16.mxu0 %v16347_v51  ;;  %v3116_v51 = vld [vmem:[#allocation14 + $0x1d0] sm:$0xff] }
 0x8a7   : > { %13858 = vmatpush1.bf16.msra.mxu1 %v16344_v62  ;;  %v14956_v62 = vcombine.low %v3092_v41, %v3104_v44  ;;  %v3248_v41 = vld [vmem:[#allocation14 + $0x5f0] sm:$0xff]  ;;  %v3237_v44 = vld [vmem:[#allocation14 + $0x598] sm:$0xff] }
 0x8a8   : > { %14022 = vmatpush1.bf16.msra.mxu0 %v16346_v0  ;;  %13859 = vmatprep.subr.bf16.mxu1 %v16369_v1  ;;  %v14958_v0 = vcombine.low %v3093_v46, %v3105_v47  ;;  %v14981_v1 = vcombine.high %v3116_v51, %v3128_v55  ;;  %v15078_v47 = vcombine.low %v3213_v33, %v3225_v34 }
 0x8a9   : > { %14023 = vmatprep.subr.bf16.mxu0 %v16371_v13  ;;  %v14983_v13 = vcombine.high %v3117_v60, %v3129_v61 }
 0x8ab   : > { %13860 = vmatpush1.bf16.msra.mxu1 %v16368_v10  ;;  %v14980_v10 = vcombine.low %v3116_v51, %v3128_v55  ;;  %v3260_v51 = vld [vmem:[#allocation14 + $0x650] sm:$0xff] }
 0x8ac   : > { %14024 = vmatpush1.bf16.msra.mxu0 %v16370_v28  ;;  %13861 = vmatprep.subr.bf16.mxu1 %v16393_v11  ;;  %v14982_v28 = vcombine.low %v3117_v60, %v3129_v61  ;;  %v15005_v11 = vcombine.high %v3140_v3, %v3152_v4  ;;  %v3272_v55 = vld [vmem:[#allocation14 + $0x6b0] sm:$0xff]  ;;  %v3273_v60 = vld [vmem:[#allocation14 + $0x6b8] sm:$0xff] }
 0x8ad   : > { %14025 = vmatprep.subr.bf16.mxu0 %v16395_v15  ;;  %v15007_v15 = vcombine.high %v3141_v8, %v3153_v9 }
 0x8af   : > { %13862 = vmatpush1.bf16.msra.mxu1 %v16392_v22  ;;  %v15006_v22 = vcombine.low %v3141_v8, %v3153_v9  ;;  %v3297_v8 = vld [vmem:[#allocation14 + $0x778] sm:$0xff]  ;;  %v15124_v9 = vcombine.low %v3260_v51, %v3272_v55 }
 0x8b0   : > { %14026 = vmatpush1.bf16.msra.mxu0 %v16394_v19  ;;  %13863 = vmatprep.subr.bf16.mxu1 %v16417_v20  ;;  %v15029_v19 = vcombine.high %v3164_v14, %v3176_v16  ;;  %v15031_v20 = vcombine.high %v3165_v17, %v3177_v18  ;;  %v3320_v14 = vld [vmem:[#allocation14 + $0x830] sm:$0xff]  ;;  %v3309_v16 = vld [vmem:[#allocation14 + $0x7d8] sm:$0xff] }
 0x8b1   : > { %14027 = vmatprep.subr.bf16.mxu0 %v16419_v21  ;;  %v3188_v21 = vld [vmem:[#allocation14 + $0x410] sm:$0xff] }
 0x8b2   : > { %v15052_v12 = vcombine.low %v3188_v21, %v3200_v23 }
 0x8b3   : > { %13864 = vmatpush1.bf16.msra.mxu1 %v16416_v27  ;;  %v15030_v27 = vcombine.low %v3165_v17, %v3177_v18  ;;  %v3321_v17 = vld [vmem:[#allocation14 + $0x838] sm:$0xff] }
 0x8b4   : > { %14028 = vmatpush1.bf16.msra.mxu0 %v16418_v58  ;;  %13865 = vmatprep.subr.bf16.mxu1 %v16441_v30  ;;  %v15053_v58 = vcombine.high %v3188_v21, %v3200_v23  ;;  %v15055_v30 = vcombine.high %v3189_v24, %v3201_v40  ;;  %v3344_v21 = vld [vmem:[#allocation14 + $0x8f0] sm:$0xff]  ;;  %v3333_v23 = vld [vmem:[#allocation14 + $0x898] sm:$0xff] }
 0x8b5   : > { %14029 = vmatprep.subr.bf16.mxu0 %v16443_v25  ;;  %v3212_v25 = vld [vmem:[#allocation14 + $0x4d0] sm:$0xff] }
 0x8b6   : > { %v15076_v46 = vcombine.low %v3212_v25, %v3224_v32 }
 0x8b7   : > { %13866 = vmatpush1.bf16.msra.mxu1 %v16440_v35  ;;  %v15054_v35 = vcombine.low %v3189_v24, %v3201_v40  ;;  %v3345_v24 = vld [vmem:[#allocation14 + $0x8f8] sm:$0xff] }
 0x8b8   : > { %14030 = vmatpush1.bf16.msra.mxu0 %v16442_v36  ;;  %14040 = vmatprep.subr.bf16.mxu1 %v14933_v37  ;;  %v15077_v36 = vcombine.high %v3212_v25, %v3224_v32  ;;  %v15079_v37 = vcombine.high %v3213_v33, %v3225_v34  ;;  %v3368_v25 = vld [vmem:[#allocation14 + $0x9b0] sm:$0xff]  ;;  %v3357_v32 = vld [vmem:[#allocation14 + $0x958] sm:$0xff] }
 0x8b9   : > { %14204 = vmatprep.subr.bf16.mxu0 %v14935_v39  ;;  %v3236_v39 = vld [vmem:[#allocation14 + $0x590] sm:$0xff]  ;;  %v3369_v33 = vld [vmem:[#allocation14 + $0x9b8] sm:$0xff] }
 0x8ba   : > { %13868 = vmatmul.mubr.bf16.vlgmr.msra.gmra.mrb[28].mxu1 %v17752_v42  ;;  %v15100_v61 = vcombine.low %v3236_v39, %v3248_v41 }
 0x8bb   : > { %14032 = vmatmul.mubr.bf16.vlgmr.msra.gmra.mrb[32].mxu0 %v17752_v42  ;;  %14041 = vmatpush1.bf16.msra.mxu1 %v14932_v45  ;;  %v3249_v45 = vld [vmem:[#allocation14 + $0x5f8] sm:$0xff] }
 0x8bc   : > { %14072 = vmatprep.mubr.bf16.mxu1 %v17699_v38  ;;  %14205 = vmatpush1.bf16.msra.mxu0 %v14934_v48  ;;  %v15101_v48 = vcombine.high %v3236_v39, %v3248_v41  ;;  %v3392_v39 = vld [vmem:[#allocation14 + $0xa70] sm:$0xff]  ;;  %v3381_v41 = vld [vmem:[#allocation14 + $0xa18] sm:$0xff] }
 0x8bd   : > { %14236 = vmatprep.mubr.bf16.mxu0 %v17699_v38  ;;  %14042 = vmatprep.subr.bf16.mxu1 %v14957_v49  ;;  %v15004_v38 = vcombine.low %v3140_v3, %v3152_v4  ;;  %v15103_v49 = vcombine.high %v3237_v44, %v3249_v45  ;;  %v3296_v3 = vld [vmem:[#allocation14 + $0x770] sm:$0xff]  ;;  %v3285_v4 = vld [vmem:[#allocation14 + $0x718] sm:$0xff] }
 0x8be   : > { %14206 = vmatprep.subr.bf16.mxu0 %v14959_v56  ;;  %v3261_v56 = vld [vmem:[#allocation14 + $0x658] sm:$0xff] }
 0x8bf   : > { %14043 = vmatpush1.bf16.msra.mxu1 %v14956_v62  ;;  %v15102_v62 = vcombine.low %v3237_v44, %v3249_v45  ;;  %v3393_v44 = vld [vmem:[#allocation14 + $0xa78] sm:$0xff] }
 0x8c0   : > { %14207 = vmatpush1.bf16.msra.mxu0 %v14958_v0  ;;  %14044 = vmatprep.subr.bf16.mxu1 %v14981_v1  ;;  %v15125_v0 = vcombine.high %v3260_v51, %v3272_v55  ;;  %v15127_v1 = vcombine.high %v3261_v56, %v3273_v60  ;;  %v3416_v51 = vld [vmem:[#allocation14 + $0xb30] sm:$0xff]  ;;  %v3405_v55 = vld [vmem:[#allocation14 + $0xad8] sm:$0xff] }
 0x8c1   : > { %14208 = vmatprep.subr.bf16.mxu0 %v14983_v13  ;;  %v3284_v13 = vld [vmem:[#allocation14 + $0x710] sm:$0xff] }
 0x8c2   : > { %v15148_v18 = vcombine.low %v3284_v13, %v3296_v3 }
 0x8c3   : > { %14045 = vmatpush1.bf16.msra.mxu1 %v14980_v10  ;;  %v15126_v10 = vcombine.low %v3261_v56, %v3273_v60  ;;  %v3417_v56 = vld [vmem:[#allocation14 + $0xb38] sm:$0xff] }
 0x8c4   : > { %14209 = vmatpush1.bf16.msra.mxu0 %v14982_v28  ;;  %14046 = vmatprep.subr.bf16.mxu1 %v15005_v11  ;;  %v15149_v28 = vcombine.high %v3284_v13, %v3296_v3  ;;  %v15151_v11 = vcombine.high %v3285_v4, %v3297_v8  ;;  %v3440_v13 = vld [vmem:[#allocation14 + $0xbf0] sm:$0xff]  ;;  %v3429_v3 = vld [vmem:[#allocation14 + $0xb98] sm:$0xff] }
 0x8c5   : > { %14210 = vmatprep.subr.bf16.mxu0 %v15007_v15  ;;  %v3308_v15 = vld [vmem:[#allocation14 + $0x7d0] sm:$0xff] }
 0x8c6   : > { %v15172_v40 = vcombine.low %v3308_v15, %v3320_v14 }
 0x8c7   : > { %14047 = vmatpush1.bf16.msra.mxu1 %v15004_v38  ;;  %v15150_v38 = vcombine.low %v3285_v4, %v3297_v8  ;;  %v3441_v4 = vld [vmem:[#allocation14 + $0xbf8] sm:$0xff] }
 0x8c8   : > { %14211 = vmatpush1.bf16.msra.mxu0 %v15006_v22  ;;  %14048 = vmatprep.subr.bf16.mxu1 %v15029_v19  ;;  %v15173_v22 = vcombine.high %v3308_v15, %v3320_v14  ;;  %v15175_v19 = vcombine.high %v3309_v16, %v3321_v17  ;;  %v3464_v15 = vld [vmem:[#allocation14 + $0xcb0] sm:$0xff]  ;;  %v3453_v14 = vld [vmem:[#allocation14 + $0xc58] sm:$0xff] }
 0x8c9   : > { %14212 = vmatprep.subr.bf16.mxu0 %v15031_v20  ;;  %v3332_v20 = vld [vmem:[#allocation14 + $0x890] sm:$0xff] }
 0x8ca   : > { %v15196_v34 = vcombine.low %v3332_v20, %v3344_v21 }
 0x8cb   : > { %14049 = vmatpush1.bf16.msra.mxu1 %v15028_v26  ;;  %v15174_v26 = vcombine.low %v3309_v16, %v3321_v17  ;;  %v3465_v16 = vld [vmem:[#allocation14 + $0xcb8] sm:$0xff] }
 0x8cc   : > { %14213 = vmatpush1.bf16.msra.mxu0 %v15030_v27  ;;  %14050 = vmatprep.subr.bf16.mxu1 %v15053_v58  ;;  %v15197_v27 = vcombine.high %v3332_v20, %v3344_v21  ;;  %v15199_v58 = vcombine.high %v3333_v23, %v3345_v24  ;;  %v3488_v20 = vld [vmem:[#allocation14 + $0xd70] sm:$0xff] }
 0x8cd   : > { %14214 = vmatprep.subr.bf16.mxu0 %v15055_v30  ;;  %v3356_v30 = vld [vmem:[#allocation14 + $0x950] sm:$0xff] }
 0x8ce   : > { %v15220_v45 = vcombine.low %v3356_v30, %v3368_v25 }
 0x8cf   : > { %14051 = vmatpush1.bf16.msra.mxu1 %v15052_v12  ;;  %v15198_v12 = vcombine.low %v3333_v23, %v3345_v24  ;;  %v3477_v23 = vld [vmem:[#allocation14 + $0xd18] sm:$0xff] }
 0x8d0   : > { %14215 = vmatpush1.bf16.msra.mxu0 %v15054_v35  ;;  %14052 = vmatprep.subr.bf16.mxu1 %v15077_v36  ;;  %v15221_v35 = vcombine.high %v3356_v30, %v3368_v25  ;;  %v15223_v36 = vcombine.high %v3357_v32, %v3369_v33  ;;  %v3489_v24 = vld [vmem:[#allocation14 + $0xd78] sm:$0xff] }
 0x8d1   : > { %14216 = vmatprep.subr.bf16.mxu0 %v15079_v37  ;;  %v3380_v37 = vld [vmem:[#allocation14 + $0xa10] sm:$0xff]  ;;  %v15343_v30 = vcombine.high %v3477_v23, %v3489_v24  ;;  %v3501_v25 = vld [vmem:[#allocation14 + $0xdd8] sm:$0xff] }
 0x8d2   : > { %v15244_v60 = vcombine.low %v3380_v37, %v3392_v39 }
 0x8d3   : > { %14053 = vmatpush1.bf16.msra.mxu1 %v15076_v46  ;;  %v15222_v46 = vcombine.low %v3357_v32, %v3369_v33  ;;  %v3513_v32 = vld [vmem:[#allocation14 + $0xe38] sm:$0xff] }
 0x8d4   : > { %14217 = vmatpush1.bf16.msra.mxu0 %v15078_v47  ;;  %14054 = vmatprep.subr.bf16.mxu1 %v15101_v48  ;;  %v15245_v47 = vcombine.high %v3380_v37, %v3392_v39  ;;  %v15247_v48 = vcombine.high %v3381_v41, %v3393_v44  ;;  %v3536_v37 = vld [vmem:[#allocation14 + $0xef0] sm:$0xff]  ;;  %v3525_v39 = vld [vmem:[#allocation14 + $0xe98] sm:$0xff] }
 0x8d5   : > { %14218 = vmatprep.subr.bf16.mxu0 %v15103_v49  ;;  %v3404_v49 = vld [vmem:[#allocation14 + $0xad0] sm:$0xff] }
 0x8d6   : > { %v15268_v8 = vcombine.low %v3404_v49, %v3416_v51 }
 0x8d7   : > { %14055 = vmatpush1.bf16.msra.mxu1 %v15100_v61  ;;  %v15246_v61 = vcombine.low %v3381_v41, %v3393_v44  ;;  %v3537_v41 = vld [vmem:[#allocation14 + $0xef8] sm:$0xff] }
 0x8d8   : > { %14219 = vmatpush1.bf16.msra.mxu0 %v15102_v62  ;;  %14056 = vmatprep.subr.bf16.mxu1 %v15125_v0  ;;  %v15269_v62 = vcombine.high %v3404_v49, %v3416_v51  ;;  %v15271_v0 = vcombine.high %v3405_v55, %v3417_v56  ;;  %v3549_v49 = vld [vmem:[#allocation14 + $0xf58] sm:$0xff] }
 0x8d9   : > { %14220 = vmatprep.subr.bf16.mxu0 %v15127_v1  ;;  %v3428_v1 = vld [vmem:[#allocation14 + $0xb90] sm:$0xff]  ;;  %v3561_v51 = vld [vmem:[#allocation14 + $0xfb8] sm:$0xff] }
 0x8da   : > { %v15292_v17 = vcombine.low %v3428_v1, %v3440_v13 }
 0x8db   : > { %14057 = vmatpush1.bf16.msra.mxu1 %v15124_v9  ;;  %v15270_v9 = vcombine.low %v3405_v55, %v3417_v56  ;;  %v15390_v55 = vcombine.low %v3525_v39, %v3537_v41 }
 0x8dc   : > { %14221 = vmatpush1.bf16.msra.mxu0 %v15126_v10  ;;  %14058 = vmatprep.subr.bf16.mxu1 %v15149_v28  ;;  %v15293_v10 = vcombine.high %v3428_v1, %v3440_v13  ;;  %v15295_v28 = vcombine.high %v3429_v3, %v3441_v4  ;;  %v3585_v1 = vld [vmem:[#allocation14 + $0x1078] sm:$0xff] }
 0x8dd   : > { %14222 = vmatprep.subr.bf16.mxu0 %v15151_v11  ;;  %v3452_v11 = vld [vmem:[#allocation14 + $0xc50] sm:$0xff] }
 0x8de   : > { %v15316_v21 = vcombine.low %v3452_v11, %v3464_v15 }
 0x8df   : > { %14059 = vmatpush1.bf16.msra.mxu1 %v15148_v18  ;;  %v15294_v18 = vcombine.low %v3429_v3, %v3441_v4  ;;  %v15414_v3 = vcombine.low %v3549_v49, %v3561_v51 }
 0x8e0   : > { %14223 = vmatpush1.bf16.msra.mxu0 %v15150_v38  ;;  %14060 = vmatprep.subr.bf16.mxu1 %v15173_v22  ;;  %v15317_v38 = vcombine.high %v3452_v11, %v3464_v15  ;;  %v15319_v22 = vcombine.high %v3453_v14, %v3465_v16  ;;  %v3609_v11 = vld [vmem:[#allocation14 + $0x1138] sm:$0xff] }
 0x8e1   : > { %14224 = vmatprep.subr.bf16.mxu0 %v15175_v19  ;;  %v3476_v19 = vld [vmem:[#allocation14 + $0xd10] sm:$0xff] }
 0x8e2   : > { %v15340_v33 = vcombine.low %v3476_v19, %v3488_v20 }
 0x8e3   : > { %14061 = vmatpush1.bf16.msra.mxu1 %v15172_v40  ;;  %v15318_v40 = vcombine.low %v3453_v14, %v3465_v16 }
 0x8e4   : > { %14225 = vmatpush1.bf16.msra.mxu0 %v15174_v26  ;;  %14062 = vmatprep.subr.bf16.mxu1 %v15197_v27  ;;  %v15341_v26 = vcombine.high %v3476_v19, %v3488_v20  ;;  %v3500_v27 = vld [vmem:[#allocation14 + $0xdd0] sm:$0xff]  ;;  %v3633_v19 = vld [vmem:[#allocation14 + $0x11f8] sm:$0xff] }
 0x8e5   : > { %14226 = vmatprep.subr.bf16.mxu0 %v15199_v58  ;;  %v3512_v58 = vld [vmem:[#allocation14 + $0xe30] sm:$0xff] }
 0x8e6   : > { %v15364_v44 = vcombine.low %v3500_v27, %v3512_v58 }
 0x8e7   : > { %14063 = vmatpush1.bf16.msra.mxu1 %v15196_v34  ;;  %v15342_v34 = vcombine.low %v3477_v23, %v3489_v24 }
 0x8e8   : > { %14227 = vmatpush1.bf16.msra.mxu0 %v15198_v12  ;;  %14064 = vmatprep.subr.bf16.mxu1 %v15221_v35  ;;  %v15365_v12 = vcombine.high %v3500_v27, %v3512_v58  ;;  %v15367_v35 = vcombine.high %v3501_v25, %v3513_v32  ;;  %v3645_v27 = vld [vmem:[#allocation14 + $0x1258] sm:$0xff] }
 0x8e9   : > { %14228 = vmatprep.subr.bf16.mxu0 %v15223_v36  ;;  %v3524_v36 = vld [vmem:[#allocation14 + $0xe90] sm:$0xff]  ;;  %v3657_v58 = vld [vmem:[#allocation14 + $0x12b8] sm:$0xff] }
 0x8eb   : > { %14065 = vmatpush1.bf16.msra.mxu1 %v15220_v45  ;;  %v15389_v45 = vcombine.high %v3524_v36, %v3536_v37 }
 0x8ec   : > { %14229 = vmatpush1.bf16.msra.mxu0 %v15222_v46  ;;  %14066 = vmatprep.subr.bf16.mxu1 %v15245_v47  ;;  %v15391_v46 = vcombine.high %v3525_v39, %v3537_v41  ;;  %v3548_v47 = vld [vmem:[#allocation14 + $0xf50] sm:$0xff]  ;;  %v15510_v39 = vcombine.low %v3645_v27, %v3657_v58 }
 0x8ed   : > { %14230 = vmatprep.subr.bf16.mxu0 %v15247_v48  ;;  %v3560_v48 = vld [vmem:[#allocation14 + $0xfb0] sm:$0xff] }
 0x8ee   : > { %v15413_v56 = vcombine.high %v3548_v47, %v3560_v48  ;;  %v15412_v13 = vcombine.low %v3548_v47, %v3560_v48  ;;  %v3705_v47 = vld [vmem:[#allocation14 + $0x1438] sm:$0xff] }
 0x8ef   : > { %14067 = vmatpush1.bf16.msra.mxu1 %v15244_v60  ;;  %v15415_v60 = vcombine.high %v3549_v49, %v3561_v51 }
 0x8f0   : > { %14231 = vmatpush1.bf16.msra.mxu0 %v15246_v61  ;;  %14068 = vmatprep.subr.bf16.mxu1 %v15269_v62  ;;  %v3572_v61 = vld [vmem:[#allocation14 + $0x1010] sm:$0xff] }
 0x8f1   : > { %14232 = vmatprep.subr.bf16.mxu0 %v15271_v0  ;;  %v3584_v62 = vld [vmem:[#allocation14 + $0x1070] sm:$0xff]  ;;  %v3573_v0 = vld [vmem:[#allocation14 + $0x1018] sm:$0xff] }
 0x8f2   : > { %v15437_v4 = vcombine.high %v3572_v61, %v3584_v62  ;;  %v15436_v15 = vcombine.low %v3572_v61, %v3584_v62  ;;  %v15438_v14 = vcombine.low %v3573_v0, %v3585_v1  ;;  %v3729_v61 = vld [vmem:[#allocation14 + $0x14f8] sm:$0xff] }
 0x8f3   : > { %14069 = vmatpush1.bf16.msra.mxu1 %v15268_v8  ;;  %v15439_v8 = vcombine.high %v3573_v0, %v3585_v1 }
 0x8f4   : > { %14233 = vmatpush1.bf16.msra.mxu0 %v15270_v9  ;;  %14070 = vmatprep.subr.bf16.mxu1 %v15293_v10  ;;  %v3596_v9 = vld [vmem:[#allocation14 + $0x10d0] sm:$0xff] }
 0x8f5   : > { %14234 = vmatprep.subr.bf16.mxu0 %v15295_v28  ;;  %v3608_v10 = vld [vmem:[#allocation14 + $0x1130] sm:$0xff]  ;;  %v3597_v28 = vld [vmem:[#allocation14 + $0x10d8] sm:$0xff] }
 0x8f6   : > { %v15461_v16 = vcombine.high %v3596_v9, %v3608_v10  ;;  %v15460_v20 = vcombine.low %v3596_v9, %v3608_v10  ;;  %v3753_v9 = vld [vmem:[#allocation14 + $0x15b8] sm:$0xff] }
 0x8f7   : > { %14071 = vmatpush1.bf16.msra.mxu1 %v15292_v17  ;;  %v15463_v17 = vcombine.high %v3597_v28, %v3609_v11 }
 0x8f8   : > { %14235 = vmatpush1.bf16.msra.mxu0 %v15294_v18  ;;  %14081 = vmatprep.subr.bf16.mxu1 %v15317_v38  ;;  %v3620_v18 = vld [vmem:[#allocation14 + $0x1190] sm:$0xff] }
 0x8f9   : > { %14245 = vmatprep.subr.bf16.mxu0 %v15319_v22  ;;  %v3632_v38 = vld [vmem:[#allocation14 + $0x11f0] sm:$0xff]  ;;  %v3621_v22 = vld [vmem:[#allocation14 + $0x1198] sm:$0xff] }
 0x8fa   : > { %14073 = vmatmul.mubr.bf16.vlgmr.msra.gmra.mrb[32].mxu1 %v17701_v43  ;;  %v15485_v23 = vcombine.high %v3620_v18, %v3632_v38  ;;  %v15487_v24 = vcombine.high %v3621_v22, %v3633_v19 }
 0x8fb   : > { %14237 = vmatmul.mubr.bf16.vlgmr.msra.gmra.mrb[36].mxu0 %v17701_v43  ;;  %14082 = vmatpush1.bf16.msra.mxu1 %v15316_v21  ;;  %v15366_v43 = vcombine.low %v3501_v25, %v3513_v32  ;;  %v15462_v21 = vcombine.low %v3597_v28, %v3609_v11  ;;  %v15486_v25 = vcombine.low %v3621_v22, %v3633_v19 }
 0x8fc   : > { %14113 = vmatprep.mubr.bf16.mxu1 %v17705_v50  ;;  %14246 = vmatpush1.bf16.msra.mxu0 %v15318_v40  ;;  %v3644_v40 = vld [vmem:[#allocation14 + $0x1250] sm:$0xff] }
 0x8fd   : > { %14277 = vmatprep.mubr.bf16.mxu0 %v17705_v50  ;;  %14083 = vmatprep.subr.bf16.mxu1 %v15341_v26  ;;  %v15388_v50 = vcombine.low %v3524_v36, %v3536_v37  ;;  %v3656_v26 = vld [vmem:[#allocation14 + $0x12b0] sm:$0xff]  ;;  %v3681_v36 = vld [vmem:[#allocation14 + $0x1378] sm:$0xff] }
 0x8fe   : > { %14247 = vmatprep.subr.bf16.mxu0 %v15343_v30  ;;  %v15484_v30 = vcombine.low %v3620_v18, %v3632_v38  ;;  %v15509_v32 = vcombine.high %v3644_v40, %v3656_v26  ;;  %v15508_v37 = vcombine.low %v3644_v40, %v3656_v26  ;;  %v3777_v18 = vld [vmem:[#allocation14 + $0x1678] sm:$0xff] }
 0x8ff   : > { %14084 = vmatpush1.bf16.msra.mxu1 %v15340_v33  ;;  %v15511_v33 = vcombine.high %v3645_v27, %v3657_v58  ;;  %v3801_v40 = vld [vmem:[#allocation14 + $0x1738] sm:$0xff] }
 0x900   : > { %14248 = vmatpush1.bf16.msra.mxu0 %v15342_v34  ;;  %14085 = vmatprep.subr.bf16.mxu1 %v15365_v12  ;;  %v3668_v34 = vld [vmem:[#allocation14 + $0x1310] sm:$0xff] }
 0x901   : > { %14249 = vmatprep.subr.bf16.mxu0 %v15367_v35  ;;  %v3680_v12 = vld [vmem:[#allocation14 + $0x1370] sm:$0xff]  ;;  %v3669_v35 = vld [vmem:[#allocation14 + $0x1318] sm:$0xff] }
 0x902   : > { %v15533_v41 = vcombine.high %v3668_v34, %v3680_v12  ;;  %v15532_v48 = vcombine.low %v3668_v34, %v3680_v12  ;;  %v15534_v49 = vcombine.low %v3669_v35, %v3681_v36  ;;  %v3825_v34 = vld [vmem:[#allocation14 + $0x17f8] sm:$0xff] }
 0x903   : > { %14086 = vmatpush1.bf16.msra.mxu1 %v15364_v44  ;;  %v15535_v44 = vcombine.high %v3669_v35, %v3681_v36 }
 0x904   : > { %14250 = vmatpush1.bf16.msra.mxu0 %v15366_v43  ;;  %14087 = vmatprep.subr.bf16.mxu1 %v15389_v45  ;;  %v3692_v43 = vld [vmem:[#allocation14 + $0x13d0] sm:$0xff] }
 0x905   : > { %14251 = vmatprep.subr.bf16.mxu0 %v15391_v46  ;;  %v3704_v45 = vld [vmem:[#allocation14 + $0x1430] sm:$0xff]  ;;  %v3693_v46 = vld [vmem:[#allocation14 + $0x13d8] sm:$0xff] }
 0x906   : > { %v15557_v51 = vcombine.high %v3692_v43, %v3704_v45  ;;  %v15556_v62 = vcombine.low %v3692_v43, %v3704_v45  ;;  %v15558_v0 = vcombine.low %v3693_v46, %v3705_v47  ;;  %v3849_v43 = vld [vmem:[#allocation14 + $0x18b8] sm:$0xff] }
 0x907   : > { %14088 = vmatpush1.bf16.msra.mxu1 %v15388_v50  ;;  %v15559_v50 = vcombine.high %v3693_v46, %v3705_v47 }
 0x908   : > { %14252 = vmatpush1.bf16.msra.mxu0 %v15390_v55  ;;  %14089 = vmatprep.subr.bf16.mxu1 %v15413_v56  ;;  %v3716_v55 = vld [vmem:[#allocation14 + $0x1490] sm:$0xff] }
 0x909   : > { %14253 = vmatprep.subr.bf16.mxu0 %v15415_v60  ;;  %v3728_v56 = vld [vmem:[#allocation14 + $0x14f0] sm:$0xff]  ;;  %v3717_v60 = vld [vmem:[#allocation14 + $0x1498] sm:$0xff] }
 0x90a   : > { %v15581_v1 = vcombine.high %v3716_v55, %v3728_v56  ;;  %v15580_v10 = vcombine.low %v3716_v55, %v3728_v56  ;;  %v15582_v28 = vcombine.low %v3717_v60, %v3729_v61  ;;  %v3861_v55 = vld [vmem:[#allocation14 + $0x1918] sm:$0xff] }
 0x90b   : > { %14090 = vmatpush1.bf16.msra.mxu1 %v15412_v13  ;;  %v15583_v13 = vcombine.high %v3717_v60, %v3729_v61  ;;  %v3873_v56 = vld [vmem:[#allocation14 + $0x1978] sm:$0xff] }
 0x90c   : > { %14254 = vmatpush1.bf16.msra.mxu0 %v15414_v3  ;;  %14091 = vmatprep.subr.bf16.mxu1 %v15437_v4  ;;  %v3740_v3 = vld [vmem:[#allocation14 + $0x1550] sm:$0xff] }
 0x90d   : > { %14255 = vmatprep.subr.bf16.mxu0 %v15439_v8  ;;  %v3752_v4 = vld [vmem:[#allocation14 + $0x15b0] sm:$0xff]  ;;  %v3741_v8 = vld [vmem:[#allocation14 + $0x1558] sm:$0xff] }
 0x90e   : > { %v15605_v11 = vcombine.high %v3740_v3, %v3752_v4  ;;  %v15604_v38 = vcombine.low %v3740_v3, %v3752_v4  ;;  %v15606_v22 = vcombine.low %v3741_v8, %v3753_v9  ;;  %v3897_v3 = vld [vmem:[#allocation14 + $0x1a38] sm:$0xff] }
 0x90f   : > { %14092 = vmatpush1.bf16.msra.mxu1 %v15436_v15  ;;  %v15607_v15 = vcombine.high %v3741_v8, %v3753_v9  ;;  %v15726_v8 = vcombine.low %v3861_v55, %v3873_v56 }
 0x910   : > { %14256 = vmatpush1.bf16.msra.mxu0 %v15438_v14  ;;  %14093 = vmatprep.subr.bf16.mxu1 %v15461_v16  ;;  %v3764_v14 = vld [vmem:[#allocation14 + $0x1610] sm:$0xff] }
 0x911   : > { %14257 = vmatprep.subr.bf16.mxu0 %v15463_v17  ;;  %v3776_v16 = vld [vmem:[#allocation14 + $0x1670] sm:$0xff]  ;;  %v3765_v17 = vld [vmem:[#allocation14 + $0x1618] sm:$0xff] }
 0x912   : > { %v15629_v19 = vcombine.high %v3764_v14, %v3776_v16  ;;  %v15628_v26 = vcombine.low %v3764_v14, %v3776_v16  ;;  %v15630_v27 = vcombine.low %v3765_v17, %v3777_v18  ;;  %v3921_v14 = vld [vmem:[#allocation14 + $0x1af8] sm:$0xff] }
 0x913   : > { %14094 = vmatpush1.bf16.msra.mxu1 %v15460_v20  ;;  %v15631_v20 = vcombine.high %v3765_v17, %v3777_v18 }
 0x914   : > { %14258 = vmatpush1.bf16.msra.mxu0 %v15462_v21  ;;  %14095 = vmatprep.subr.bf16.mxu1 %v15485_v23  ;;  %v3788_v21 = vld [vmem:[#allocation14 + $0x16d0] sm:$0xff] }
 0x915   : > { %14259 = vmatprep.subr.bf16.mxu0 %v15487_v24  ;;  %v3800_v23 = vld [vmem:[#allocation14 + $0x1730] sm:$0xff]  ;;  %v3789_v24 = vld [vmem:[#allocation14 + $0x16d8] sm:$0xff] }
 0x916   : > { %v15653_v58 = vcombine.high %v3788_v21, %v3800_v23  ;;  %v15652_v12 = vcombine.low %v3788_v21, %v3800_v23  ;;  %v15654_v35 = vcombine.low %v3789_v24, %v3801_v40 }
 0x917   : > { %14096 = vmatpush1.bf16.msra.mxu1 %v15484_v30  ;;  %v15655_v30 = vcombine.high %v3789_v24, %v3801_v40  ;;  %v3956_v40 = vld [vmem:[#allocation14 + $0x1c10] sm:$0xff] }
 0x918   : > { %14260 = vmatpush1.bf16.msra.mxu0 %v15486_v25  ;;  %14097 = vmatprep.subr.bf16.mxu1 %v15509_v32  ;;  %v3812_v25 = vld [vmem:[#allocation14 + $0x1790] sm:$0xff] }
 0x919   : > { %14261 = vmatprep.subr.bf16.mxu0 %v15511_v33  ;;  %v3824_v32 = vld [vmem:[#allocation14 + $0x17f0] sm:$0xff]  ;;  %v3813_v33 = vld [vmem:[#allocation14 + $0x1798] sm:$0xff] }
 0x91a   : > { %v15677_v36 = vcombine.high %v3812_v25, %v3824_v32  ;;  %v15676_v45 = vcombine.low %v3812_v25, %v3824_v32  ;;  %v15678_v46 = vcombine.low %v3813_v33, %v3825_v34 }
 0x91b   : > { %14098 = vmatpush1.bf16.msra.mxu1 %v15508_v37  ;;  %v15679_v37 = vcombine.high %v3813_v33, %v3825_v34  ;;  %v3980_v34 = vld [vmem:[#allocation14 + $0x1cd0] sm:$0xff] }
 0x91c   : > { %14262 = vmatpush1.bf16.msra.mxu0 %v15510_v39  ;;  %14099 = vmatprep.subr.bf16.mxu1 %v15533_v41  ;;  %v3836_v39 = vld [vmem:[#allocation14 + $0x1850] sm:$0xff] }
 0x91d   : > { %14263 = vmatprep.subr.bf16.mxu0 %v15535_v44  ;;  %v3848_v41 = vld [vmem:[#allocation14 + $0x18b0] sm:$0xff]  ;;  %v3837_v44 = vld [vmem:[#allocation14 + $0x1858] sm:$0xff] }
 0x91e   : > { %v15701_v47 = vcombine.high %v3836_v39, %v3848_v41  ;;  %v15702_v60 = vcombine.low %v3837_v44, %v3849_v43 }
 0x91f   : > { %14100 = vmatpush1.bf16.msra.mxu1 %v15532_v48  ;;  %v15703_v48 = vcombine.high %v3837_v44, %v3849_v43  ;;  %v4004_v43 = vld [vmem:[#allocation14 + $0x1d90] sm:$0xff] }
 0x920   : > { %14264 = vmatpush1.bf16.msra.mxu0 %v15534_v49  ;;  %14101 = vmatprep.subr.bf16.mxu1 %v15557_v51  ;;  %v3860_v49 = vld [vmem:[#allocation14 + $0x1910] sm:$0xff] }
 0x921   : > { %14265 = vmatprep.subr.bf16.mxu0 %v15559_v50  ;;  %v3872_v51 = vld [vmem:[#allocation14 + $0x1970] sm:$0xff]  ;;  %v15700_v50 = vcombine.low %v3836_v39, %v3848_v41 }
 0x922   : > { %v15725_v61 = vcombine.high %v3860_v49, %v3872_v51  ;;  %v15724_v4 = vcombine.low %v3860_v49, %v3872_v51 }
 0x923   : > { %14102 = vmatpush1.bf16.msra.mxu1 %v15556_v62  ;;  %v3884_v62 = vld [vmem:[#allocation14 + $0x19d0] sm:$0xff] }
 0x924   : > { %14266 = vmatpush1.bf16.msra.mxu0 %v15558_v0  ;;  %14103 = vmatprep.subr.bf16.mxu1 %v15581_v1  ;;  %v3896_v0 = vld [vmem:[#allocation14 + $0x1a30] sm:$0xff]  ;;  %v15727_v1 = vcombine.high %v3861_v55, %v3873_v56 }
 0x925   : > { %14267 = vmatprep.subr.bf16.mxu0 %v15583_v13  ;;  %v3885_v13 = vld [vmem:[#allocation14 + $0x19d8] sm:$0xff]  ;;  %v15749_v9 = vcombine.high %v3884_v62, %v3896_v0  ;;  %v15748_v16 = vcombine.low %v3884_v62, %v3896_v0  ;;  %v4028_v55 = vld [vmem:[#allocation14 + $0x1e50] sm:$0xff] }
 0x926   : > { %v4040_v56 = vld [vmem:[#allocation14 + $0x1eb0] sm:$0xff] }
 0x927   : > { %14104 = vmatpush1.bf16.msra.mxu1 %v15580_v10  ;;  %v15751_v10 = vcombine.high %v3885_v13, %v3897_v3 }
 0x928   : > { %14268 = vmatpush1.bf16.msra.mxu0 %v15582_v28  ;;  %14105 = vmatprep.subr.bf16.mxu1 %v15605_v11  ;;  %v3908_v28 = vld [vmem:[#allocation14 + $0x1a90] sm:$0xff] }
 0x929   : > { %14269 = vmatprep.subr.bf16.mxu0 %v15607_v15  ;;  %v3920_v11 = vld [vmem:[#allocation14 + $0x1af0] sm:$0xff]  ;;  %v3909_v15 = vld [vmem:[#allocation14 + $0x1a98] sm:$0xff] }
 0x92a   : > { %v15773_v17 = vcombine.high %v3908_v28, %v3920_v11  ;;  %v15775_v18 = vcombine.high %v3909_v15, %v3921_v14  ;;  %v15774_v21 = vcombine.low %v3909_v15, %v3921_v14  ;;  %v4076_v14 = vld [vmem:[#allocation14 + $0x1fd0] sm:$0xff] }
 0x92b   : > { %14106 = vmatpush1.bf16.msra.mxu1 %v15604_v38  ;;  %v3932_v38 = vld [vmem:[#allocation14 + $0x1b50] sm:$0xff] }
 0x92c   : > { %14270 = vmatpush1.bf16.msra.mxu0 %v15606_v22  ;;  %14107 = vmatprep.subr.bf16.mxu1 %v15629_v19  ;;  %v3944_v22 = vld [vmem:[#allocation14 + $0x1bb0] sm:$0xff]  ;;  %v3933_v19 = vld [vmem:[#allocation14 + $0x1b58] sm:$0xff] }
 0x92d   : > { %14271 = vmatprep.subr.bf16.mxu0 %v15631_v20  ;;  %v3945_v20 = vld [vmem:[#allocation14 + $0x1bb8] sm:$0xff]  ;;  %v15797_v23 = vcombine.high %v3932_v38, %v3944_v22 }
 0x92e   : > { %v15799_v24 = vcombine.high %v3933_v19, %v3945_v20  ;;  %v15798_v25 = vcombine.low %v3933_v19, %v3945_v20  ;;  %v4100_v20 = vld [vmem:[#allocation14 + $0x2090] sm:$0xff] }
 0x92f   : > { %14108 = vmatpush1.bf16.msra.mxu1 %v15628_v26  ;;  %v3968_v26 = vld [vmem:[#allocation14 + $0x1c70] sm:$0xff] }
 0x930   : > { %14272 = vmatpush1.bf16.msra.mxu0 %v15630_v27  ;;  %14109 = vmatprep.subr.bf16.mxu1 %v15653_v58  ;;  %v3957_v27 = vld [vmem:[#allocation14 + $0x1c18] sm:$0xff]  ;;  %v15821_v32 = vcombine.high %v3956_v40, %v3968_v26 }
 0x931   : > { %14273 = vmatprep.subr.bf16.mxu0 %v15655_v30  ;;  %v3969_v58 = vld [vmem:[#allocation14 + $0x1c78] sm:$0xff]  ;;  %v15796_v30 = vcombine.low %v3932_v38, %v3944_v22 }
 0x932   : > { %v15823_v33 = vcombine.high %v3957_v27, %v3969_v58  ;;  %v15822_v39 = vcombine.low %v3957_v27, %v3969_v58  ;;  %v4124_v58 = vld [vmem:[#allocation14 + $0x2150] sm:$0xff] }
 0x933   : > { %14110 = vmatpush1.bf16.msra.mxu1 %v15652_v12  ;;  %v3992_v12 = vld [vmem:[#allocation14 + $0x1d30] sm:$0xff] }
 0x934   : > { %14274 = vmatpush1.bf16.msra.mxu0 %v15654_v35  ;;  %14111 = vmatprep.subr.bf16.mxu1 %v15677_v36  ;;  %v3981_v35 = vld [vmem:[#allocation14 + $0x1cd8] sm:$0xff]  ;;  %v15845_v41 = vcombine.high %v3980_v34, %v3992_v12 }
 0x935   : > { %14275 = vmatprep.subr.bf16.mxu0 %v15679_v37  ;;  %v3993_v36 = vld [vmem:[#allocation14 + $0x1d38] sm:$0xff]  ;;  %v15820_v37 = vcombine.low %v3956_v40, %v3968_v26 }
 0x936   : > { %v15847_v44 = vcombine.high %v3981_v35, %v3993_v36  ;;  %v15846_v49 = vcombine.low %v3981_v35, %v3993_v36  ;;  %v4148_v36 = vld [vmem:[#allocation14 + $0x2210] sm:$0xff] }
 0x937   : > { %14112 = vmatpush1.bf16.msra.mxu1 %v15676_v45  ;;  %v4016_v45 = vld [vmem:[#allocation14 + $0x1df0] sm:$0xff] }
 0x938   : > { %14276 = vmatpush1.bf16.msra.mxu0 %v15678_v46  ;;  %14122 = vmatprep.subr.bf16.mxu1 %v15701_v47  ;;  %v4005_v46 = vld [vmem:[#allocation14 + $0x1d98] sm:$0xff]  ;;  %v15869_v51 = vcombine.high %v4004_v43, %v4016_v45  ;;  %v15868_v62 = vcombine.low %v4004_v43, %v4016_v45 }
 0x939   : > { %14286 = vmatprep.subr.bf16.mxu0 %v15703_v48  ;;  %v4017_v47 = vld [vmem:[#allocation14 + $0x1df8] sm:$0xff]  ;;  %v15844_v48 = vcombine.low %v3980_v34, %v3992_v12 }
 0x93a   : > { %14114 = vmatmul.mubr.bf16.vlgmr.msra.gmra.mrb[32].mxu1 %v17714_v7  ;;  %v15870_v0 = vcombine.low %v4005_v46, %v4017_v47 }
 0x93b   : > { %14278 = vmatmul.mubr.bf16.vlgmr.msra.gmra.mrb[36].mxu0 %v17714_v7  ;;  %14123 = vmatpush1.bf16.msra.mxu1 %v15700_v50  ;;  %v15750_v7 = vcombine.low %v3885_v13, %v3897_v3  ;;  %v15871_v50 = vcombine.high %v4005_v46, %v4017_v47  ;;  %v4052_v3 = vld [vmem:[#allocation14 + $0x1f10] sm:$0xff] }
 0x93c   : > { %14154 = vmatprep.mubr.bf16.mxu1 %v17735_v57  ;;  %14287 = vmatpush1.bf16.msra.mxu0 %v15702_v60  ;;  %v4029_v60 = vld [vmem:[#allocation14 + $0x1e58] sm:$0xff]  ;;  %v4172_v47 = vld [vmem:[#allocation14 + $0x22d0] sm:$0xff] }
 0x93d   : > { %14318 = vmatprep.mubr.bf16.mxu0 %v17735_v57  ;;  %14124 = vmatprep.subr.bf16.mxu1 %v15725_v61  ;;  %v15772_v57 = vcombine.low %v3908_v28, %v3920_v11  ;;  %v4041_v61 = vld [vmem:[#allocation14 + $0x1eb8] sm:$0xff] }
 0x93e   : > { %14288 = vmatprep.subr.bf16.mxu0 %v15727_v1  ;;  %v15893_v1 = vcombine.high %v4028_v55, %v4040_v56  ;;  %v15895_v13 = vcombine.high %v4029_v60, %v4041_v61  ;;  %v15894_v28 = vcombine.low %v4029_v60, %v4041_v61  ;;  %v4196_v61 = vld [vmem:[#allocation14 + $0x2390] sm:$0xff] }
 0x93f   : > { %14125 = vmatpush1.bf16.msra.mxu1 %v15724_v4  ;;  %v4064_v4 = vld [vmem:[#allocation14 + $0x1f70] sm:$0xff] }
 0x940   : > { %14289 = vmatpush1.bf16.msra.mxu0 %v15726_v8  ;;  %14126 = vmatprep.subr.bf16.mxu1 %v15749_v9  ;;  %v4053_v8 = vld [vmem:[#allocation14 + $0x1f18] sm:$0xff]  ;;  %v15917_v11 = vcombine.high %v4052_v3, %v4064_v4 }
 0x941   : > { %14290 = vmatprep.subr.bf16.mxu0 %v15751_v10  ;;  %v4065_v9 = vld [vmem:[#allocation14 + $0x1f78] sm:$0xff]  ;;  %v15892_v10 = vcombine.low %v4028_v55, %v4040_v56 }
 0x942   : > { %v15919_v15 = vcombine.high %v4053_v8, %v4065_v9  ;;  %v15918_v38 = vcombine.low %v4053_v8, %v4065_v9  ;;  %v4220_v9 = vld [vmem:[#allocation14 + $0x2450] sm:$0xff] }
 0x943   : > { %14127 = vmatpush1.bf16.msra.mxu1 %v15748_v16  ;;  %v4088_v16 = vld [vmem:[#allocation14 + $0x2030] sm:$0xff] }
 0x944   : > { %14291 = vmatpush1.bf16.msra.mxu0 %v15750_v7  ;;  %14128 = vmatprep.subr.bf16.mxu1 %v15773_v17  ;;  %v4077_v7 = vld [vmem:[#allocation14 + $0x1fd8] sm:$0xff]  ;;  %v15941_v22 = vcombine.high %v4076_v14, %v4088_v16 }
 0x945   : > { %14292 = vmatprep.subr.bf16.mxu0 %v15775_v18  ;;  %v4089_v17 = vld [vmem:[#allocation14 + $0x2038] sm:$0xff]  ;;  %v15916_v18 = vcombine.low %v4052_v3, %v4064_v4 }
 0x946   : > { %v15943_v19 = vcombine.high %v4077_v7, %v4089_v17  ;;  %v15942_v40 = vcombine.low %v4077_v7, %v4089_v17  ;;  %v4244_v17 = vld [vmem:[#allocation14 + $0x2510] sm:$0xff] }
 0x947   : > { %14129 = vmatpush1.bf16.msra.mxu1 %v15772_v57  ;;  %v4112_v57 = vld [vmem:[#allocation14 + $0x20f0] sm:$0xff] }
 0x948   : > { %14293 = vmatpush1.bf16.msra.mxu0 %v15774_v21  ;;  %14130 = vmatprep.subr.bf16.mxu1 %v15797_v23  ;;  %v4101_v21 = vld [vmem:[#allocation14 + $0x2098] sm:$0xff]  ;;  %v15965_v26 = vcombine.high %v4100_v20, %v4112_v57 }
 0x949   : > { %14294 = vmatprep.subr.bf16.mxu0 %v15799_v24  ;;  %v4113_v23 = vld [vmem:[#allocation14 + $0x20f8] sm:$0xff]  ;;  %v15940_v24 = vcombine.low %v4076_v14, %v4088_v16 }
 0x94a   : > { %v15967_v27 = vcombine.high %v4101_v21, %v4113_v23  ;;  %v15966_v34 = vcombine.low %v4101_v21, %v4113_v23  ;;  %v4268_v21 = vld [vmem:[#allocation14 + $0x25d0] sm:$0xff] }
 0x94b   : > { %14131 = vmatpush1.bf16.msra.mxu1 %v15796_v30  ;;  %v4136_v30 = vld [vmem:[#allocation14 + $0x21b0] sm:$0xff] }
 0x94c   : > { %14295 = vmatpush1.bf16.msra.mxu0 %v15798_v25  ;;  %14132 = vmatprep.subr.bf16.mxu1 %v15821_v32  ;;  %v4125_v25 = vld [vmem:[#allocation14 + $0x2158] sm:$0xff]  ;;  %v15989_v12 = vcombine.high %v4124_v58, %v4136_v30  ;;  %v4280_v23 = vld [vmem:[#allocation14 + $0x2630] sm:$0xff] }
 0x94d   : > { %14296 = vmatprep.subr.bf16.mxu0 %v15823_v33  ;;  %v4137_v32 = vld [vmem:[#allocation14 + $0x21b8] sm:$0xff]  ;;  %v15964_v33 = vcombine.low %v4100_v20, %v4112_v57 }
 0x94e   : > { %v15991_v35 = vcombine.high %v4125_v25, %v4137_v32  ;;  %v15990_v43 = vcombine.low %v4125_v25, %v4137_v32  ;;  %v4292_v32 = vld [vmem:[#allocation14 + $0x2690] sm:$0xff] }
 0x94f   : > { %14133 = vmatpush1.bf16.msra.mxu1 %v15820_v37  ;;  %v4160_v37 = vld [vmem:[#allocation14 + $0x2270] sm:$0xff] }
 0x950   : > { %14297 = vmatpush1.bf16.msra.mxu0 %v15822_v39  ;;  %14134 = vmatprep.subr.bf16.mxu1 %v15845_v41  ;;  %v4149_v39 = vld [vmem:[#allocation14 + $0x2218] sm:$0xff]  ;;  %v16013_v45 = vcombine.high %v4148_v36, %v4160_v37 }
 0x951   : > { %14298 = vmatprep.subr.bf16.mxu0 %v15847_v44  ;;  %v4161_v41 = vld [vmem:[#allocation14 + $0x2278] sm:$0xff]  ;;  %v15988_v44 = vcombine.low %v4124_v58, %v4136_v30  ;;  %v16133_v30 = vcombine.high %v4268_v21, %v4280_v23 }
 0x952   : > { %v16015_v46 = vcombine.high %v4149_v39, %v4161_v41  ;;  %v16014_v55 = vcombine.low %v4149_v39, %v4161_v41  ;;  %v4316_v39 = vld [vmem:[#allocation14 + $0x2750] sm:$0xff] }
 0x953   : > { %14135 = vmatpush1.bf16.msra.mxu1 %v15844_v48  ;;  %v4184_v48 = vld [vmem:[#allocation14 + $0x2330] sm:$0xff] }
 0x954   : > { %14299 = vmatpush1.bf16.msra.mxu0 %v15846_v49  ;;  %14136 = vmatprep.subr.bf16.mxu1 %v15869_v51  ;;  %v4173_v49 = vld [vmem:[#allocation14 + $0x22d8] sm:$0xff]  ;;  %v16037_v56 = vcombine.high %v4172_v47, %v4184_v48  ;;  %v4328_v41 = vld [vmem:[#allocation14 + $0x27b0] sm:$0xff] }
 0x955   : > { %14300 = vmatprep.subr.bf16.mxu0 %v15871_v50  ;;  %v4185_v51 = vld [vmem:[#allocation14 + $0x2338] sm:$0xff]  ;;  %v16012_v50 = vcombine.low %v4148_v36, %v4160_v37 }
 0x956   : > { %v16039_v60 = vcombine.high %v4173_v49, %v4185_v51  ;;  %v16038_v3 = vcombine.low %v4173_v49, %v4185_v51  ;;  %v4352_v49 = vld [vmem:[#allocation14 + $0x2870] sm:$0xff]  ;;  %v4341_v51 = vld [vmem:[#allocation14 + $0x2818] sm:$0xff] }
 0x957   : > { %14137 = vmatpush1.bf16.msra.mxu1 %v15868_v62  ;;  %v4208_v62 = vld [vmem:[#allocation14 + $0x23f0] sm:$0xff] }
 0x958   : > { %14301 = vmatpush1.bf16.msra.mxu0 %v15870_v0  ;;  %14138 = vmatprep.subr.bf16.mxu1 %v15893_v1  ;;  %v4197_v0 = vld [vmem:[#allocation14 + $0x2398] sm:$0xff]  ;;  %v16061_v4 = vcombine.high %v4196_v61, %v4208_v62 }
 0x959   : > { %14302 = vmatprep.subr.bf16.mxu0 %v15895_v13  ;;  %v4209_v1 = vld [vmem:[#allocation14 + $0x23f8] sm:$0xff]  ;;  %v16036_v13 = vcombine.low %v4172_v47, %v4184_v48  ;;  %v4340_v48 = vld [vmem:[#allocation14 + $0x2810] sm:$0xff] }
 0x95a   : > { %v16063_v8 = vcombine.high %v4197_v0, %v4209_v1  ;;  %v16062_v14 = vcombine.low %v4197_v0, %v4209_v1  ;;  %v4364_v0 = vld [vmem:[#allocation14 + $0x28d0] sm:$0xff] }
 0x95b   : > { %14139 = vmatpush1.bf16.msra.mxu1 %v15892_v10  ;;  %v4232_v10 = vld [vmem:[#allocation14 + $0x24b0] sm:$0xff] }
 0x95c   : > { %14303 = vmatpush1.bf16.msra.mxu0 %v15894_v28  ;;  %14140 = vmatprep.subr.bf16.mxu1 %v15917_v11  ;;  %v4221_v28 = vld [vmem:[#allocation14 + $0x2458] sm:$0xff]  ;;  %v16085_v16 = vcombine.high %v4220_v9, %v4232_v10  ;;  %v4376_v1 = vld [vmem:[#allocation14 + $0x2930] sm:$0xff] }
 0x95d   : > { %14304 = vmatprep.subr.bf16.mxu0 %v15919_v15  ;;  %v4233_v11 = vld [vmem:[#allocation14 + $0x24b8] sm:$0xff]  ;;  %v16060_v15 = vcombine.low %v4196_v61, %v4208_v62  ;;  %v16205_v61 = vcombine.high %v4340_v48, %v4352_v49 }
 0x95e   : > { %v16087_v7 = vcombine.high %v4221_v28, %v4233_v11  ;;  %v16086_v20 = vcombine.low %v4221_v28, %v4233_v11 }
 0x95f   : > { %14141 = vmatpush1.bf16.msra.mxu1 %v15916_v18  ;;  %v4256_v18 = vld [vmem:[#allocation14 + $0x2570] sm:$0xff] }
 0x960   : > { %14305 = vmatpush1.bf16.msra.mxu0 %v15918_v38  ;;  %14142 = vmatprep.subr.bf16.mxu1 %v15941_v22  ;;  %v16084_v38 = vcombine.low %v4220_v9, %v4232_v10  ;;  %v4245_v22 = vld [vmem:[#allocation14 + $0x2518] sm:$0xff]  ;;  %v16109_v57 = vcombine.high %v4244_v17, %v4256_v18  ;;  %v16204_v10 = vcombine.low %v4340_v48, %v4352_v49 }
 0x961   : > { %14306 = vmatprep.subr.bf16.mxu0 %v15943_v19  ;;  %v4257_v19 = vld [vmem:[#allocation14 + $0x2578] sm:$0xff] }
 0x962   : > { %v16110_v58 = vcombine.low %v4245_v22, %v4257_v19  ;;  %v4461_v48 = vld [vmem:[#allocation14 + $0x2bd8] sm:$0xff] }
 0x963   : > { %14143 = vmatpush1.bf16.msra.mxu1 %v15940_v24  ;;  %v16111_v24 = vcombine.high %v4245_v22, %v4257_v19  ;;  %v4473_v49 = vld [vmem:[#allocation14 + $0x2c38] sm:$0xff] }
 0x964   : > { %14307 = vmatpush1.bf16.msra.mxu0 %v15942_v40  ;;  %14144 = vmatprep.subr.bf16.mxu1 %v15965_v26  ;;  %v4269_v40 = vld [vmem:[#allocation14 + $0x25d8] sm:$0xff] }
 0x965   : > { %14308 = vmatprep.subr.bf16.mxu0 %v15967_v27  ;;  %v4281_v26 = vld [vmem:[#allocation14 + $0x2638] sm:$0xff]  ;;  %v16108_v27 = vcombine.low %v4244_v17, %v4256_v18 }
 0x966   : > { %v16135_v25 = vcombine.high %v4269_v40, %v4281_v26 }
 0x967   : > { %14145 = vmatpush1.bf16.msra.mxu1 %v15964_v33  ;;  %v4304_v33 = vld [vmem:[#allocation14 + $0x26f0] sm:$0xff] }
 0x968   : > { %14309 = vmatpush1.bf16.msra.mxu0 %v15966_v34  ;;  %14146 = vmatprep.subr.bf16.mxu1 %v15989_v12  ;;  %v4293_v34 = vld [vmem:[#allocation14 + $0x2698] sm:$0xff]  ;;  %v16157_v36 = vcombine.high %v4292_v32, %v4304_v33 }
 0x969   : > { %14310 = vmatprep.subr.bf16.mxu0 %v15991_v35  ;;  %v4305_v12 = vld [vmem:[#allocation14 + $0x26f8] sm:$0xff]  ;;  %v16132_v35 = vcombine.low %v4268_v21, %v4280_v23 }
 0x96a   : > { %v16159_v37 = vcombine.high %v4293_v34, %v4305_v12 }
 0x96b   : > { %14147 = vmatpush1.bf16.msra.mxu1 %v15988_v44  ;;  %v4317_v44 = vld [vmem:[#allocation14 + $0x2758] sm:$0xff] }
 0x96c   : > { %14311 = vmatpush1.bf16.msra.mxu0 %v15990_v43  ;;  %14148 = vmatprep.subr.bf16.mxu1 %v16013_v45  ;;  %v4329_v43 = vld [vmem:[#allocation14 + $0x27b8] sm:$0xff]  ;;  %v16158_v45 = vcombine.low %v4293_v34, %v4305_v12 }
 0x96d   : > { %14312 = vmatprep.subr.bf16.mxu0 %v16015_v46  ;;  %v16181_v46 = vcombine.high %v4316_v39, %v4328_v41  ;;  %v16183_v47 = vcombine.high %v4317_v44, %v4329_v43 }
 0x96f   : > { %14149 = vmatpush1.bf16.msra.mxu1 %v16012_v50  ;;  %v4353_v50 = vld [vmem:[#allocation14 + $0x2878] sm:$0xff] }
 0x970   : > { %14313 = vmatpush1.bf16.msra.mxu0 %v16014_v55  ;;  %14150 = vmatprep.subr.bf16.mxu1 %v16037_v56  ;;  %v16180_v55 = vcombine.low %v4316_v39, %v4328_v41  ;;  %v17871_v56 = vld [vmem:[#allocation16 + $0x10] sm:$0xff]  ;;  %v16207_v62 = vcombine.high %v4341_v51, %v4353_v50  ;;  %v16206_v11 = vcombine.low %v4341_v51, %v4353_v50  ;;  %v4437_v39 = vld [vmem:[#allocation14 + $0x2b18] sm:$0xff] }
 0x971   : > { %14314 = vmatprep.subr.bf16.mxu0 %v16039_v60  ;;  %v16182_v60 = vcombine.low %v4317_v44, %v4329_v43  ;;  %v4671_v9 = vrot.slane %v17871_v56, %v17642_v31  ;;  %v4679_v28 = vrot.slane %v17871_v56, %v17649_v53  ;;  %v4401_v31 = vld [vmem:[#allocation14 + $0x29f8] sm:$0xff] }
 0x972   : > { %v4449_v41 = vld [vmem:[#allocation14 + $0x2b78] sm:$0xff] }
 0x973   : > { %14151 = vmatpush1.bf16.msra.mxu1 %v16036_v13  ;;  %v4667_v13 = vrot.slane %v17871_v56, %v17639_v29  ;;  %v16302_v50 = vcombine.low %v4437_v39, %v4449_v41 }
 0x974   : > { %14315 = vmatpush1.bf16.msra.mxu0 %v16038_v3  ;;  %14152 = vmatprep.subr.bf16.mxu1 %v16061_v4  ;;  %v4365_v3 = vld [vmem:[#allocation14 + $0x28d8] sm:$0xff] }
 0x975   : > { %14316 = vmatprep.subr.bf16.mxu0 %v16063_v8  ;;  %v4377_v4 = vld [vmem:[#allocation14 + $0x2938] sm:$0xff]  ;;  %v4675_v8 = vrot.slane %v17871_v56, %v17672_v59 }
 0x976   : > { %v16231_v29 = vcombine.high %v4365_v3, %v4377_v4 }
 0x977   : > { %14153 = vmatpush1.bf16.msra.mxu1 %v16060_v15  ;;  %v16229_v15 = vcombine.high %v4364_v0, %v4376_v1 }
 0x978   : > { %14317 = vmatpush1.bf16.msra.mxu0 %v16062_v14  ;;  %14163 = vmatprep.subr.bf16.mxu1 %v16085_v16  ;;  %v4388_v16 = vld [vmem:[#allocation14 + $0x2990] sm:$0xff] }
 0x979   : > { %14327 = vmatprep.subr.bf16.mxu0 %v16087_v7  ;;  %v4400_v7 = vld [vmem:[#allocation14 + $0x29f0] sm:$0xff] }
 0x97a   : > { %14155 = vmatmul.mubr.bf16.vlgmr.msra.gmra.mrb[32].mxu1 %v17737_v52  ;;  %v16252_v34 = vcombine.low %v4388_v16, %v4400_v7 }
 0x97b   : > { %14319 = vmatmul.mubr.bf16.vlgmr.msra.gmra.mrb[36].mxu0 %v17737_v52  ;;  %14164 = vmatpush1.bf16.msra.mxu1 %v16084_v38  ;;  %v16134_v52 = vcombine.low %v4269_v40, %v4281_v26  ;;  %v4389_v38 = vld [vmem:[#allocation14 + $0x2998] sm:$0xff]  ;;  %v16230_v40 = vcombine.low %v4365_v3, %v4377_v4  ;;  %v16253_v26 = vcombine.high %v4388_v16, %v4400_v7  ;;  %v4532_v7 = vld [vmem:[#allocation14 + $0x2e10] sm:$0xff] }
 0x97c   : > { %14195 = vmatprep.mubr.bf16.mxu1 %v17741_v6  ;;  %14328 = vmatpush1.bf16.msra.mxu0 %v16086_v20  ;;  %v16254_v12 = vcombine.low %v4389_v38, %v4401_v31  ;;  %v16326_v3 = vcombine.low %v4461_v48, %v4473_v49 }
 0x97d   : > { %14359 = vmatprep.mubr.bf16.mxu0 %v17741_v6  ;;  %14165 = vmatprep.subr.bf16.mxu1 %v16109_v57  ;;  %v16156_v6 = vcombine.low %v4292_v32, %v4304_v33  ;;  %v16228_v57 = vcombine.low %v4364_v0, %v4376_v1  ;;  %v4413_v32 = vld [vmem:[#allocation14 + $0x2a58] sm:$0xff] }
 0x97e   : > { %14329 = vmatprep.subr.bf16.mxu0 %v16111_v24  ;;  %v4425_v33 = vld [vmem:[#allocation14 + $0x2ab8] sm:$0xff] }
 0x97f   : > { %14166 = vmatpush1.bf16.msra.mxu1 %v16108_v27  ;;  %v16278_v43 = vcombine.low %v4413_v32, %v4425_v33  ;;  %v4485_v0 = vld [vmem:[#allocation14 + $0x2c98] sm:$0xff] }
 0x980   : > { %14330 = vmatpush1.bf16.msra.mxu0 %v16110_v58  ;;  %14167 = vmatprep.subr.bf16.mxu1 %v16133_v30  ;;  %v16255_v58 = vcombine.high %v4389_v38, %v4401_v31  ;;  %v4412_v30 = vld [vmem:[#allocation14 + $0x2a50] sm:$0xff]  ;;  %v4497_v1 = vld [vmem:[#allocation14 + $0x2cf8] sm:$0xff] }
 0x981   : > { %14331 = vmatprep.subr.bf16.mxu0 %v16135_v25  ;;  %v4424_v25 = vld [vmem:[#allocation14 + $0x2ab0] sm:$0xff] }
 0x982   : > { %v16276_v44 = vcombine.low %v4412_v30, %v4424_v25 }
 0x983   : > { %14168 = vmatpush1.bf16.msra.mxu1 %v16132_v35  ;;  %v16277_v35 = vcombine.high %v4412_v30, %v4424_v25  ;;  %v4581_v30 = vld [vmem:[#allocation14 + $0x2f98] sm:$0xff] }
 0x984   : > { %14332 = vmatpush1.bf16.msra.mxu0 %v16134_v52  ;;  %14169 = vmatprep.subr.bf16.mxu1 %v16157_v36  ;;  %v16279_v52 = vcombine.high %v4413_v32, %v4425_v33  ;;  %v4436_v36 = vld [vmem:[#allocation14 + $0x2b10] sm:$0xff]  ;;  %v4593_v25 = vld [vmem:[#allocation14 + $0x2ff8] sm:$0xff] }
 0x985   : > { %14333 = vmatprep.subr.bf16.mxu0 %v16159_v37  ;;  %v4448_v37 = vld [vmem:[#allocation14 + $0x2b70] sm:$0xff] }
 0x986   : > { %v16300_v51 = vcombine.low %v4436_v36, %v4448_v37 }
 0x987   : > { %14170 = vmatpush1.bf16.msra.mxu1 %v16156_v6  ;;  %v16301_v6 = vcombine.high %v4436_v36, %v4448_v37  ;;  %v4683_v36 = vrot.slane %v17871_v56, %v17719_v63  ;;  %v4691_v37 = vrot.slane %v17871_v56, %v17748_v54 }
 0x988   : > { %14334 = vmatpush1.bf16.msra.mxu0 %v16158_v45  ;;  %14171 = vmatprep.subr.bf16.mxu1 %v16181_v46  ;;  %v16303_v45 = vcombine.high %v4437_v39, %v4449_v41  ;;  %v4460_v46 = vld [vmem:[#allocation14 + $0x2bd0] sm:$0xff]  ;;  %v4687_v39 = vrot.slane %v17871_v56, %v17722_v2  ;;  %v4695_v41 = vrot.slane %v17871_v56, %v17725_v5 }
 0x989   : > { %14335 = vmatprep.subr.bf16.mxu0 %v16183_v47  ;;  %v4472_v47 = vld [vmem:[#allocation14 + $0x2c30] sm:$0xff] }
 0x98b   : > { %14172 = vmatpush1.bf16.msra.mxu1 %v16180_v55  ;;  %v16325_v55 = vcombine.high %v4460_v46, %v4472_v47 }
 0x98c   : > { %14336 = vmatpush1.bf16.msra.mxu0 %v16182_v60  ;;  %14173 = vmatprep.subr.bf16.mxu1 %v16205_v61  ;;  %v16327_v60 = vcombine.high %v4461_v48, %v4473_v49  ;;  %v4484_v61 = vld [vmem:[#allocation14 + $0x2c90] sm:$0xff] }
 0x98d   : > { %v13869_v14 = vpop.f32.mrb[28].mxu1  ;;  %14337 = vmatprep.subr.bf16.mxu0 %v16207_v62  ;;  %v4496_v62 = vld [vmem:[#allocation14 + $0x2cf0] sm:$0xff] }
 0x98e   : > { %v16475_v17 = vadd.f32 %v13869_v14, %v4667_v13  ;;  %v14033_v18 = vpop.f32.mrb[32].mxu0  ;;  %v13871_v59 = vpop.f32.mrb[29].mxu1  ;;  %v16324_v13 = vcombine.low %v4460_v46, %v4472_v47  ;;  %v16349_v4 = vcombine.high %v4484_v61, %v4496_v62  ;;  %v16350_v14 = vcombine.low %v4485_v0, %v4497_v1 }
 0x98f   : > { %v16477_v22 = vadd.f32 %v14033_v18, %v4675_v8  ;;  %v16476_v19 = vadd.f32 %v13871_v59, %v4671_v9  ;;  %v14035_v20 = vpop.f32.mrb[33].mxu0  ;;  %v13873_v53 = vpop.f32.mrb[30].mxu1  ;;  %14174 = vmatpush1.bf16.msra.mxu1 %v16204_v10  ;;  %v16351_v8 = vcombine.high %v4485_v0, %v4497_v1  ;;  %v4508_v9 = vld [vmem:[#allocation14 + $0x2d50] sm:$0xff]  ;;  %v4533_v18 = vld [vmem:[#allocation14 + $0x2e18] sm:$0xff] }
 0x990   : > { %14384 = vst [vmem:[%s17777_s22 + $0x80] sm:$0xff] %v16475_v17  ;;  %v16478_v21 = vadd.f32 %v14035_v20, %v4679_v28  ;;  %v14037_v23 = vpop.f32.mrb[34].mxu0  ;;  %14338 = vmatpush1.bf16.msra.mxu0 %v16206_v11  ;;  %v13874_v24 = vpop.f32.mrb[31].mxu1  ;;  %14175 = vmatprep.subr.bf16.mxu1 %v16229_v15  ;;  %v4520_v10 = vld [vmem:[#allocation14 + $0x2db0] sm:$0xff]  ;;  %v4509_v28 = vld [vmem:[#allocation14 + $0x2d58] sm:$0xff]  ;;  %v16348_v15 = vcombine.low %v4484_v61, %v4496_v62 }
 0x991   : > { %14386 = vst [vmem:[%s17777_s22 + $0x90] sm:$0xff] %v16477_v22  ;;  %14385 = vst [vmem:[%s17777_s22 + $0x88] sm:$0xff] %v16476_v19  ;;  %v14038_v27 = vpop.f32.mrb[35].mxu0  ;;  %14339 = vmatprep.subr.bf16.mxu0 %v16231_v29  ;;  %v4521_v11 = vld [vmem:[#allocation14 + $0x2db8] sm:$0xff]  ;;  %v16373_v29 = vcombine.high %v4508_v9, %v4520_v10  ;;  %v4544_v17 = vld [vmem:[#allocation14 + $0x2e70] sm:$0xff]  ;;  %v16372_v38 = vcombine.low %v4508_v9, %v4520_v10 }
 0x992   : > { %14387 = vst [vmem:[%s17777_s22 + $0x98] sm:$0xff] %v16478_v21  ;;  %v16375_v16 = vcombine.high %v4509_v28, %v4521_v11  ;;  %v4545_v59 = vld [vmem:[#allocation14 + $0x2e78] sm:$0xff]  ;;  %v16374_v31 = vcombine.low %v4509_v28, %v4521_v11  ;;  %v16397_v22 = vcombine.high %v4532_v7, %v4544_v17  ;;  %v4556_v20 = vld [vmem:[#allocation14 + $0x2ed0] sm:$0xff]  ;;  %v16396_v23 = vcombine.low %v4532_v7, %v4544_v17 }
 0x993   : > { %14176 = vmatpush1.bf16.msra.mxu1 %v16228_v57  ;;  %v16399_v19 = vcombine.high %v4533_v18, %v4545_v59  ;;  %v4568_v53 = vld [vmem:[#allocation14 + $0x2f30] sm:$0xff]  ;;  %v4557_v57 = vld [vmem:[#allocation14 + $0x2ed8] sm:$0xff]  ;;  %v16398_v24 = vcombine.low %v4533_v18, %v4545_v59 }
 0x994   : > { %14340 = vmatpush1.bf16.msra.mxu0 %v16230_v40  ;;  %14177 = vmatprep.subr.bf16.mxu1 %v16253_v26  ;;  %v4569_v21 = vld [vmem:[#allocation14 + $0x2f38] sm:$0xff]  ;;  %v16421_v40 = vcombine.high %v4556_v20, %v4568_v53  ;;  %v4580_v27 = vld [vmem:[#allocation14 + $0x2f90] sm:$0xff]  ;;  %v16420_v32 = vcombine.low %v4556_v20, %v4568_v53 }
 0x995   : > { %14341 = vmatprep.subr.bf16.mxu0 %v16255_v58  ;;  %v16423_v26 = vcombine.high %v4557_v57, %v4569_v21  ;;  %v4592_v58 = vld [vmem:[#allocation14 + $0x2ff0] sm:$0xff]  ;;  %v16422_v33 = vcombine.low %v4557_v57, %v4569_v21 }
 0x997   : > { %14178 = vmatpush1.bf16.msra.mxu1 %v16252_v34  ;;  %v16445_v34 = vcombine.high %v4580_v27, %v4592_v58 }
 0x998   : > { %14342 = vmatpush1.bf16.msra.mxu0 %v16254_v12  ;;  %14179 = vmatprep.subr.bf16.mxu1 %v16277_v35  ;;  %v16447_v12 = vcombine.high %v4581_v30, %v4593_v25  ;;  %v16444_v35 = vcombine.low %v4580_v27, %v4592_v58 }
 0x999   : > { %14343 = vmatprep.subr.bf16.mxu0 %v16279_v52  ;;  %v16446_v52 = vcombine.low %v4581_v30, %v4593_v25 }
 0x99b   : > { %14180 = vmatpush1.bf16.msra.mxu1 %v16276_v44 }
 0x99c   : > { %14344 = vmatpush1.bf16.msra.mxu0 %v16278_v43  ;;  %14181 = vmatprep.subr.bf16.mxu1 %v16301_v6 }
 0x99d   : > { %14345 = vmatprep.subr.bf16.mxu0 %v16303_v45 }
 0x99f   : > { %14182 = vmatpush1.bf16.msra.mxu1 %v16300_v51 }
 0x9a0   : > { %14346 = vmatpush1.bf16.msra.mxu0 %v16302_v50  ;;  %14183 = vmatprep.subr.bf16.mxu1 %v16325_v55 }
 0x9a1   : > { %14347 = vmatprep.subr.bf16.mxu0 %v16327_v60 }
 0x9a3   : > { %14184 = vmatpush1.bf16.msra.mxu1 %v16324_v13 }
 0x9a4   : > { %14348 = vmatpush1.bf16.msra.mxu0 %v16326_v3  ;;  %14185 = vmatprep.subr.bf16.mxu1 %v16349_v4 }
 0x9a5   : > { %14349 = vmatprep.subr.bf16.mxu0 %v16351_v8 }
 0x9a7   : > { %14186 = vmatpush1.bf16.msra.mxu1 %v16348_v15 }
 0x9a8   : > { %14350 = vmatpush1.bf16.msra.mxu0 %v16350_v14  ;;  %14187 = vmatprep.subr.bf16.mxu1 %v16373_v29 }
 0x9a9   : > { %14351 = vmatprep.subr.bf16.mxu0 %v16375_v16 }
 0x9ab   : > { %14188 = vmatpush1.bf16.msra.mxu1 %v16372_v38 }
 0x9ac   : > { %14352 = vmatpush1.bf16.msra.mxu0 %v16374_v31  ;;  %14189 = vmatprep.subr.bf16.mxu1 %v16397_v22 }
 0x9ad   : > { %14353 = vmatprep.subr.bf16.mxu0 %v16399_v19 }
 0x9af   : > { %14190 = vmatpush1.bf16.msra.mxu1 %v16396_v23 }
 0x9b0   : > { %14354 = vmatpush1.bf16.msra.mxu0 %v16398_v24  ;;  %14191 = vmatprep.subr.bf16.mxu1 %v16421_v40 }
 0x9b1   : > { %14355 = vmatprep.subr.bf16.mxu0 %v16423_v26 }
 0x9b3   : > { %14192 = vmatpush1.bf16.msra.mxu1 %v16420_v32 }
 0x9b4   : > { %14356 = vmatpush1.bf16.msra.mxu0 %v16422_v33  ;;  %14193 = vmatprep.subr.bf16.mxu1 %v16445_v34 }
 0x9b5   : > { %14357 = vmatprep.subr.bf16.mxu0 %v16447_v12 }
 0x9b7   : > { %14194 = vmatpush1.bf16.msra.mxu1 %v16444_v35 }
 0x9b8   : > { %14358 = vmatpush1.bf16.msra.mxu0 %v16446_v52 }
 0x9ba   : > { %14196 = vmatmul.mubr.bf16.vlgmr.msra.gmra.mrb[32].mxu1 %v17752_v42 }
 0x9bb   : > { %14360 = vmatmul.mubr.bf16.vlgmr.msra.gmra.mrb[36].mxu0 %v17752_v42 }
 0xa8d   : > { %v14197_v44 = vpop.f32.mrb[32].mxu1 }
 0xa8e   : > { %v16479_v43 = vadd.f32 %v14197_v44, %v4683_v36  ;;  %v14361_v42 = vpop.f32.mrb[36].mxu0  ;;  %v14199_v6 = vpop.f32.mrb[33].mxu1 }
 0xa8f   : > { %v16481_v63 = vadd.f32 %v14361_v42, %v4691_v37  ;;  %v16480_v45 = vadd.f32 %v14199_v6, %v4687_v39  ;;  %v14363_v54 = vpop.f32.mrb[37].mxu0  ;;  %v14201_v46 = vpop.f32.mrb[34].mxu1 }
 0xa90   : > { %14388 = vst [vmem:[%s17777_s22 + $0xa0] sm:$0xff] %v16479_v43  ;;  %v16482_v2 = vadd.f32 %v14363_v54, %v4695_v41  ;;  %v14365_v47 = vpop.f32.mrb[38].mxu0  ;;  %v14202_v48 = vpop.f32.mrb[35].mxu1 }
 0xa91   : > { %14390 = vst [vmem:[%s17777_s22 + $0xb0] sm:$0xff] %v16481_v63  ;;  %14389 = vst [vmem:[%s17777_s22 + $0xa8] sm:$0xff] %v16480_v45  ;;  %v14366_v5 = vpop.f32.mrb[39].mxu0 }
 0xa92   : > { %14391 = vst [vmem:[%s17777_s22 + $0xb8] sm:$0xff] %v16482_v2 }
 0xa93   : > { %17171 = shalt.err (!%p17168_p9)
}
 0xa94   : > { %s17172_s1 = scalar_lea.hbm %s17901_s20, 3072  ;;  %s17176_s22 = scalar_lea.hbm %s17983_s9, 6144 }
 0xa95   : > { %p17173_p4 = scmp.ne.s32.totalorder %s17901_s20, %s17172_s1  ;;  %p17177_p2 = scmp.lt.u32.totalorder %s17901_s20, %s17983_s9 }
 0xa96   : > { %p17178_p6 = scmp.lt.u32.totalorder %s17176_s22, %s17172_s1  ;;  %p17180_p10 = scmp.lt.u32.totalorder %s17172_s1, %s17901_s20 }
 0xa97   : > { %p17174_p8 = pnand %p17173_p4, %p17984_p1 }
 0xa98   : > { %p17179_p5 = por %p17178_p6, %p17177_p2 }
 0xa99   : > { %p17175_p0 = pneg %p17174_p8 }
 0xa9a   : > { %p17181_p11 = por %p17180_p10, %p17179_p5 }
 0xa9c   : > { %p17182_p12 = pnand %p17181_p11, %p17175_p0 }
 0xa9e   : > { %17185 = shalt.err (!%p17182_p12)
}
 0xa9f   : > { %16679 = dma.vmem_to_hbm [thread:$0]  (%p17984_p1), %s17903_s19, 3072, %s17901_s20, %s14393_s26  }
 0xaa0 PF: > { %s14419_s15 = sand.u32 1, %s17228_s30   ;;  %p17985_p13 = scmp.ne.s32.totalorder %s17972_s28, 0 }
 0xaa1   : > { %p17986_p3 = scmp.ge.s32.totalorder %s17240_s12, 2  ;;  %s14420_s29 = scalar_lea.sflag [#allocation4], %s14419_s15 }
 0xaa3   : > { %p16711_p7 = pnand %p17986_p3, %p17985_p13 }
 0xaa5   : > { %17223 = dma.done.wait (!%p16711_p7), %s14420_s29, 3072  }
 0xaa6   : > { %17225 = vsyncadd (!%p16711_p7), %s14420_s29, 4294964224  ;;  %p26_p9 = scmp.ge.s32.totalorder %s17533_s27, 4   ;;  %s17987_s30 = smov %s17232_s10 }
 0xaa7   : > { %s17988_s10 = smov %s17236_s11  ;;  %s17989_s11 = smov %s17544_s23 }
 0xaa8   : > { %s17990_s12 = smov %s17533_s27  ;;  %28 = sbr.rel (!%p26_p9) target bundleno = 12 (0xc), region = 133 }
 0xaaf   :  { %14425 = vsyncpa [#allocation3], 1 }
 0xab0   :  { %14427 = vsyncpa [#allocation3 + $0x1], 1 }
 0xab1   :  { %14428 = vsyncpa [#allocation6], 1 }
 0xab2   :  { %14429 = vsyncpa [#allocation9], 1 }
 0xab3   :  { %14430 = vsyncpa [#allocation12], 1 }
 0xab4   :  { %14431 = vsyncpa [#allocation15], 1 }
 0xab5   :  { %14432 = vsyncpa [#allocation4], 1 }
 0xab6   :  { %14434 = vsyncpa [#allocation4 + $0x1], 1 }

</bundles_post_ra>
